<compile_context>
chip_gen: v6e
topology: v6e:2x2x1
jax: 0.10.0
libtpu: 0.0.40
codegen_flags: <defaults>
</compile_context>

<pallas_src>
import jax
import jax.numpy as jnp
from jax.experimental import pallas as pl
from jax.experimental.pallas import tpu as pltpu

LANE_PAD = 128     # lane-dense padding for the final 1-wide output
SUBLANE = 8        # batch padding granularity for (8,128) tile alignment
BATCH_TILE = 256   # batch rows per grid step (feeds the 256-wide MXU on v6e/v7x)


# ----------------------------------------------------------------------------
# Pallas kernel: fused 4-layer MLP (3x ReLU). Weights resident in VMEM,
# batch tiles pipelined over the grid. bf16 MXU operands, f32 accumulation.
# ----------------------------------------------------------------------------
def _mlp_kernel(p1_ref, p2_ref,
                w1a_ref, w1b_ref, b1_ref,
                w2_ref, b2_ref,
                w3_ref, b3_ref,
                w4_ref, b4_ref,
                o_ref):
    # Layer 1: fused concat as a split matmul (pose1 @ W1a + pose2 @ W1b).
    h = (jnp.dot(p1_ref[...], w1a_ref[...], preferred_element_type=jnp.float32)
         + jnp.dot(p2_ref[...], w1b_ref[...], preferred_element_type=jnp.float32)
         + b1_ref[...])
    h = jnp.maximum(h, 0.0)                                   # (TB, 1024) f32

    # Layer 2
    h = jnp.dot(h.astype(jnp.bfloat16), w2_ref[...],
                preferred_element_type=jnp.float32) + b2_ref[...]
    h = jnp.maximum(h, 0.0)

    # Layer 3
    h = jnp.dot(h.astype(jnp.bfloat16), w3_ref[...],
                preferred_element_type=jnp.float32) + b3_ref[...]
    h = jnp.maximum(h, 0.0)

    # Layer 4 (1024 -> 1, lane-padded to 128 for a dense store; wrapper slices col 0).
    y = jnp.dot(h.astype(jnp.bfloat16), w4_ref[...],
                preferred_element_type=jnp.float32) + b4_ref[...]
    o_ref[...] = y                                            # (TB, 128) f32


# ----------------------------------------------------------------------------
# Parameter setup (plain JAX glue, runs once — not in the per-call hot path)
# ----------------------------------------------------------------------------
def _spectral_normalize(w, n_iters=50):
    """w: (out, in). Divide by largest singular value (power iteration)."""
    u = jnp.full((w.shape[0],), 1.0 / jnp.sqrt(w.shape[0]), dtype=w.dtype)

    def body(_, u):
        v = w.T @ u
        v = v / (jnp.linalg.norm(v) + 1e-12)
        u = w @ v
        u = u / (jnp.linalg.norm(u) + 1e-12)
        return u

    u = jax.lax.fori_loop(0, n_iters, body, u)
    v = w.T @ u
    v = v / (jnp.linalg.norm(v) + 1e-12)
    sigma = u @ (w @ v)
    return w / sigma


def init_params(key):
    """Deterministic init matching the PyTorch layer shapes (out, in)."""
    dims = [(1024, 256), (1024, 1024), (1024, 1024), (1, 1024)]
    params = []
    for (out_d, in_d) in dims:
        kw, kb, key = jax.random.split(key, 3)
        bound = 1.0 / jnp.sqrt(in_d)
        w = jax.random.uniform(kw, (out_d, in_d), jnp.float32, -bound, bound)
        b = jax.random.uniform(kb, (out_d,), jnp.float32, -bound, bound)
        w = _spectral_normalize(w)
        params.append((w, b))
    return params


def prepare_params(params, d1):
    """One-time prep: transpose to (in, out), split W1 at the concat boundary,
    lane-pad the final projection, cast matmul operands to bf16."""
    (w1, b1), (w2, b2), (w3, b3), (w4, b4) = params

    w1t = w1.T                                              # (256, 1024)
    w1a = w1t[:d1].astype(jnp.bfloat16)                     # (d1, 1024)
    w1b = w1t[d1:].astype(jnp.bfloat16)                     # (d2, 1024)
    w2t = w2.T.astype(jnp.bfloat16)                         # (1024, 1024)
    w3t = w3.T.astype(jnp.bfloat16)                         # (1024, 1024)
    w4t = (jnp.zeros((w4.shape[1], LANE_PAD), jnp.float32)
           .at[:, :1].set(w4.T)).astype(jnp.bfloat16)       # (1024, 128)

    b1r = b1.reshape(1, -1).astype(jnp.float32)             # (1, 1024)
    b2r = b2.reshape(1, -1).astype(jnp.float32)
    b3r = b3.reshape(1, -1).astype(jnp.float32)
    b4r = (jnp.zeros((1, LANE_PAD), jnp.float32)
           .at[:, :1].set(b4.reshape(1, -1)))               # (1, 128)

    return (w1a, w1b, b1r, w2t, b2r, w3t, b3r, w4t, b4r)


# ----------------------------------------------------------------------------
# Wrapper
# ----------------------------------------------------------------------------
@jax.jit
def pose_forward(pose1, pose2, prepared):
    B, d1 = pose1.shape
    d2 = pose2.shape[1]
    (w1a, w1b, b1r, w2t, b2r, w3t, b3r, w4t, b4r) = prepared

    # Batch tile: whole (sublane-padded) batch if small, else BATCH_TILE rows/step.
    if B <= BATCH_TILE:
        tb = ((B + SUBLANE - 1) // SUBLANE) * SUBLANE
    else:
        tb = BATCH_TILE
    Bp = ((B + tb - 1) // tb) * tb
    grid = (Bp // tb,)

    p1 = jnp.pad(pose1.astype(jnp.bfloat16), ((0, Bp - B), (0, 0)))
    p2 = jnp.pad(pose2.astype(jnp.bfloat16), ((0, Bp - B), (0, 0)))

    def resident(arr):
        return pl.BlockSpec(arr.shape, lambda i: (0, 0))

    out = pl.pallas_call(
        _mlp_kernel,
        out_shape=jax.ShapeDtypeStruct((Bp, LANE_PAD), jnp.float32),
        grid=grid,
        in_specs=[
            pl.BlockSpec((tb, d1), lambda i: (i, 0)),        # pose1 tile
            pl.BlockSpec((tb, d2), lambda i: (i, 0)),        # pose2 tile
            resident(w1a), resident(w1b), resident(b1r),
            resident(w2t), resident(b2r),
            resident(w3t), resident(b3r),
            resident(w4t), resident(b4r),
        ],
        out_specs=pl.BlockSpec((tb, LANE_PAD), lambda i: (i, 0)),
        compiler_params=pltpu.CompilerParams(
            dimension_semantics=("parallel",),               # v7x dual-TC batch split
            vmem_limit_bytes=32 << 20,                       # fits v7x's 64 MiB/TC VMEM
        ),
    )(p1, p2, w1a, w1b, b1r, w2t, b2r, w3t, b3r, w4t, b4r)

    return out[:B, :1]                                       # (B, 1)


# ----------------------------------------------------------------------------
# Reference (plain JAX, bf16 operands / f32 accumulation — mirrors the kernel)
# ----------------------------------------------------------------------------
def reference_bf16(pose1, pose2, params):
    (w1, b1), (w2, b2), (w3, b3), (w4, b4) = params

    def mm(x, w):
        return jnp.dot(x.astype(jnp.bfloat16), w.T.astype(jnp.bfloat16),
                       preferred_element_type=jnp.float32)

    x = jnp.concatenate([pose1, pose2], axis=1)
    x = jnp.maximum(mm(x, w1) + b1, 0.0)
    x = jnp.maximum(mm(x, w2) + b2, 0.0)
    x = jnp.maximum(mm(x, w3) + b3, 0.0)
    return mm(x, w4) + b4


if __name__ == "__main__":
    key = jax.random.PRNGKey(0)
    kp, k1, k2 = jax.random.split(key, 3)

    params = init_params(kp)
    prepared = prepare_params(params, d1=128)   # one-time weight prep (outside hot path)

    B = 2
    pose1 = jax.random.normal(k1, (B, 128), jnp.float32)
    pose2 = jax.random.normal(k2, (B, 128), jnp.float32)

    out = pose_forward(pose1, pose2, prepared)
    out = jax.block_until_ready(out)

    ref = reference_bf16(pose1, pose2, params)
    assert out.shape == (B, 1), out.shape
    assert jnp.allclose(out, ref, atol=1e-2, rtol=1e-2), (out, ref)

    print("KERNEL_OK")
</pallas_src>

<mosaic_0001>
module attributes {stable_mosaic.version = 11 : i64} {
  func.func @_mlp_kernel(%arg0: i32, %arg1: memref<8x128xbf16, #tpu.memory_space<vmem>>, %arg2: memref<8x128xbf16, #tpu.memory_space<vmem>>, %arg3: memref<128x1024xbf16, #tpu.memory_space<vmem>>, %arg4: memref<128x1024xbf16, #tpu.memory_space<vmem>>, %arg5: memref<1x1024xf32, #tpu.memory_space<vmem>>, %arg6: memref<1024x1024xbf16, #tpu.memory_space<vmem>>, %arg7: memref<1x1024xf32, #tpu.memory_space<vmem>>, %arg8: memref<1024x1024xbf16, #tpu.memory_space<vmem>>, %arg9: memref<1x1024xf32, #tpu.memory_space<vmem>>, %arg10: memref<1024x128xbf16, #tpu.memory_space<vmem>>, %arg11: memref<1x128xf32, #tpu.memory_space<vmem>>, %arg12: memref<8x128xf32, #tpu.memory_space<vmem>>) attributes {dimension_semantics = [#tpu.dimension_semantics<parallel>], iteration_bounds = array<i64: 1>, scalar_prefetch = 0 : i64, scratch_operands = 0 : i64, tpu.core_type = #tpu.core_type<tc>, window_params = [{transform_indices = @transform_0, window_bounds = array<i64: 8, 128>}, {transform_indices = @transform_1, window_bounds = array<i64: 8, 128>}, {pipeline_mode = #tpu.pipeline_mode<synchronous>, transform_indices = @transform_2, window_bounds = array<i64: 128, 1024>}, {pipeline_mode = #tpu.pipeline_mode<synchronous>, transform_indices = @transform_3, window_bounds = array<i64: 128, 1024>}, {pipeline_mode = #tpu.pipeline_mode<synchronous>, transform_indices = @transform_4, window_bounds = array<i64: 1, 1024>}, {pipeline_mode = #tpu.pipeline_mode<synchronous>, transform_indices = @transform_5, window_bounds = array<i64: 1024, 1024>}, {pipeline_mode = #tpu.pipeline_mode<synchronous>, transform_indices = @transform_6, window_bounds = array<i64: 1, 1024>}, {pipeline_mode = #tpu.pipeline_mode<synchronous>, transform_indices = @transform_7, window_bounds = array<i64: 1024, 1024>}, {pipeline_mode = #tpu.pipeline_mode<synchronous>, transform_indices = @transform_8, window_bounds = array<i64: 1, 1024>}, {pipeline_mode = #tpu.pipeline_mode<synchronous>, transform_indices = @transform_9, window_bounds = array<i64: 1024, 128>}, {pipeline_mode = #tpu.pipeline_mode<synchronous>, transform_indices = @transform_10, window_bounds = array<i64: 1, 128>}, {transform_indices = @transform_11, window_bounds = array<i64: 8, 128>}]} {
    %c0 = arith.constant 0 : index
    %c0_0 = arith.constant 0 : index
    %0 = vector.load %arg1[%c0, %c0_0] : memref<8x128xbf16, #tpu.memory_space<vmem>>, vector<8x128xbf16>
    %c0_1 = arith.constant 0 : index
    %c0_2 = arith.constant 0 : index
    %1 = vector.load %arg3[%c0_1, %c0_2] : memref<128x1024xbf16, #tpu.memory_space<vmem>>, vector<128x1024xbf16>
    %cst = arith.constant dense<0.000000e+00> : vector<8x1024xf32>
    %2 = tpu.matmul %0, %1, %cst {dimension_numbers = #tpu.dot_dimension_numbers<[1], [0], [0], [1], [0, 0, 1, 1], [], []>} : vector<8x128xbf16>, vector<128x1024xbf16>, vector<8x1024xf32> -> vector<8x1024xf32>
    %c0_3 = arith.constant 0 : index
    %c0_4 = arith.constant 0 : index
    %3 = vector.load %arg2[%c0_3, %c0_4] : memref<8x128xbf16, #tpu.memory_space<vmem>>, vector<8x128xbf16>
    %c0_5 = arith.constant 0 : index
    %c0_6 = arith.constant 0 : index
    %4 = vector.load %arg4[%c0_5, %c0_6] : memref<128x1024xbf16, #tpu.memory_space<vmem>>, vector<128x1024xbf16>
    %cst_7 = arith.constant dense<0.000000e+00> : vector<8x1024xf32>
    %5 = tpu.matmul %3, %4, %cst_7 {dimension_numbers = #tpu.dot_dimension_numbers<[1], [0], [0], [1], [0, 0, 1, 1], [], []>} : vector<8x128xbf16>, vector<128x1024xbf16>, vector<8x1024xf32> -> vector<8x1024xf32>
    %6 = arith.addf %2, %5 : vector<8x1024xf32>
    %c0_8 = arith.constant 0 : index
    %c0_9 = arith.constant 0 : index
    %7 = vector.load %arg5[%c0_8, %c0_9] : memref<1x1024xf32, #tpu.memory_space<vmem>>, vector<1x1024xf32>
    %8 = vector.broadcast %7 : vector<1x1024xf32> to vector<8x1024xf32>
    %9 = arith.addf %6, %8 : vector<8x1024xf32>
    %cst_10 = arith.constant 0.000000e+00 : f32
    %10 = vector.broadcast %cst_10 : f32 to vector<8x1024xf32>
    %11 = arith.maximumf %9, %10 : vector<8x1024xf32>
    %12 = arith.truncf %11 : vector<8x1024xf32> to vector<8x1024xbf16>
    %c0_11 = arith.constant 0 : index
    %c0_12 = arith.constant 0 : index
    %13 = vector.load %arg6[%c0_11, %c0_12] : memref<1024x1024xbf16, #tpu.memory_space<vmem>>, vector<1024x1024xbf16>
    %cst_13 = arith.constant dense<0.000000e+00> : vector<8x1024xf32>
    %14 = tpu.matmul %12, %13, %cst_13 {dimension_numbers = #tpu.dot_dimension_numbers<[1], [0], [0], [1], [0, 0, 1, 1], [], []>} : vector<8x1024xbf16>, vector<1024x1024xbf16>, vector<8x1024xf32> -> vector<8x1024xf32>
    %c0_14 = arith.constant 0 : index
    %c0_15 = arith.constant 0 : index
    %15 = vector.load %arg7[%c0_14, %c0_15] : memref<1x1024xf32, #tpu.memory_space<vmem>>, vector<1x1024xf32>
    %16 = vector.broadcast %15 : vector<1x1024xf32> to vector<8x1024xf32>
    %17 = arith.addf %14, %16 : vector<8x1024xf32>
    %cst_16 = arith.constant 0.000000e+00 : f32
    %18 = vector.broadcast %cst_16 : f32 to vector<8x1024xf32>
    %19 = arith.maximumf %17, %18 : vector<8x1024xf32>
    %20 = arith.truncf %19 : vector<8x1024xf32> to vector<8x1024xbf16>
    %c0_17 = arith.constant 0 : index
    %c0_18 = arith.constant 0 : index
    %21 = vector.load %arg8[%c0_17, %c0_18] : memref<1024x1024xbf16, #tpu.memory_space<vmem>>, vector<1024x1024xbf16>
    %cst_19 = arith.constant dense<0.000000e+00> : vector<8x1024xf32>
    %22 = tpu.matmul %20, %21, %cst_19 {dimension_numbers = #tpu.dot_dimension_numbers<[1], [0], [0], [1], [0, 0, 1, 1], [], []>} : vector<8x1024xbf16>, vector<1024x1024xbf16>, vector<8x1024xf32> -> vector<8x1024xf32>
    %c0_20 = arith.constant 0 : index
    %c0_21 = arith.constant 0 : index
    %23 = vector.load %arg9[%c0_20, %c0_21] : memref<1x1024xf32, #tpu.memory_space<vmem>>, vector<1x1024xf32>
    %24 = vector.broadcast %23 : vector<1x1024xf32> to vector<8x1024xf32>
    %25 = arith.addf %22, %24 : vector<8x1024xf32>
    %cst_22 = arith.constant 0.000000e+00 : f32
    %26 = vector.broadcast %cst_22 : f32 to vector<8x1024xf32>
    %27 = arith.maximumf %25, %26 : vector<8x1024xf32>
    %28 = arith.truncf %27 : vector<8x1024xf32> to vector<8x1024xbf16>
    %c0_23 = arith.constant 0 : index
    %c0_24 = arith.constant 0 : index
    %29 = vector.load %arg10[%c0_23, %c0_24] : memref<1024x128xbf16, #tpu.memory_space<vmem>>, vector<1024x128xbf16>
    %cst_25 = arith.constant dense<0.000000e+00> : vector<8x128xf32>
    %30 = tpu.matmul %28, %29, %cst_25 {dimension_numbers = #tpu.dot_dimension_numbers<[1], [0], [0], [1], [0, 0, 1, 1], [], []>} : vector<8x1024xbf16>, vector<1024x128xbf16>, vector<8x128xf32> -> vector<8x128xf32>
    %c0_26 = arith.constant 0 : index
    %c0_27 = arith.constant 0 : index
    %31 = vector.load %arg11[%c0_26, %c0_27] : memref<1x128xf32, #tpu.memory_space<vmem>>, vector<1x128xf32>
    %32 = vector.broadcast %31 : vector<1x128xf32> to vector<8x128xf32>
    %33 = arith.addf %30, %32 : vector<8x128xf32>
    %c0_28 = arith.constant 0 : index
    %c0_29 = arith.constant 0 : index
    %34 = vector.load %arg12[%c0_28, %c0_29] : memref<8x128xf32, #tpu.memory_space<vmem>>, vector<8x128xf32>
    tpu.vector_store %arg12[%c0_28, %c0_29], %33 {strides = array<i32>} : memref<8x128xf32, #tpu.memory_space<vmem>>, vector<8x128xf32>,
    return
  }
  func.func @transform_0(%arg0: i32) -> (i32, i32) {
    %c0_i32 = arith.constant 0 : i32
    %c0_i32_0 = arith.constant 0 : i32
    return %arg0, %c0_i32 : i32, i32
  }
  func.func @transform_1(%arg0: i32) -> (i32, i32) {
    %c0_i32 = arith.constant 0 : i32
    %c0_i32_0 = arith.constant 0 : i32
    return %arg0, %c0_i32 : i32, i32
  }
  func.func @transform_2(%arg0: i32) -> (i32, i32) {
    %c0_i32 = arith.constant 0 : i32
    %c0_i32_0 = arith.constant 0 : i32
    %c0_i32_1 = arith.constant 0 : i32
    return %c0_i32, %c0_i32_0 : i32, i32
  }
  func.func @transform_3(%arg0: i32) -> (i32, i32) {
    %c0_i32 = arith.constant 0 : i32
    %c0_i32_0 = arith.constant 0 : i32
    %c0_i32_1 = arith.constant 0 : i32
    return %c0_i32, %c0_i32_0 : i32, i32
  }
  func.func @transform_4(%arg0: i32) -> (i32, i32) {
    %c0_i32 = arith.constant 0 : i32
    %c0_i32_0 = arith.constant 0 : i32
    %c0_i32_1 = arith.constant 0 : i32
    return %c0_i32, %c0_i32_0 : i32, i32
  }
  func.func @transform_5(%arg0: i32) -> (i32, i32) {
    %c0_i32 = arith.constant 0 : i32
    %c0_i32_0 = arith.constant 0 : i32
    %c0_i32_1 = arith.constant 0 : i32
    return %c0_i32, %c0_i32_0 : i32, i32
  }
  func.func @transform_6(%arg0: i32) -> (i32, i32) {
    %c0_i32 = arith.constant 0 : i32
    %c0_i32_0 = arith.constant 0 : i32
    %c0_i32_1 = arith.constant 0 : i32
    return %c0_i32, %c0_i32_0 : i32, i32
  }
  func.func @transform_7(%arg0: i32) -> (i32, i32) {
    %c0_i32 = arith.constant 0 : i32
    %c0_i32_0 = arith.constant 0 : i32
    %c0_i32_1 = arith.constant 0 : i32
    return %c0_i32, %c0_i32_0 : i32, i32
  }
  func.func @transform_8(%arg0: i32) -> (i32, i32) {
    %c0_i32 = arith.constant 0 : i32
    %c0_i32_0 = arith.constant 0 : i32
    %c0_i32_1 = arith.constant 0 : i32
    return %c0_i32, %c0_i32_0 : i32, i32
  }
  func.func @transform_9(%arg0: i32) -> (i32, i32) {
    %c0_i32 = arith.constant 0 : i32
    %c0_i32_0 = arith.constant 0 : i32
    %c0_i32_1 = arith.constant 0 : i32
    return %c0_i32, %c0_i32_0 : i32, i32
  }
  func.func @transform_10(%arg0: i32) -> (i32, i32) {
    %c0_i32 = arith.constant 0 : i32
    %c0_i32_0 = arith.constant 0 : i32
    %c0_i32_1 = arith.constant 0 : i32
    return %c0_i32, %c0_i32_0 : i32, i32
  }
  func.func @transform_11(%arg0: i32) -> (i32, i32) {
    %c0_i32 = arith.constant 0 : i32
    %c0_i32_0 = arith.constant 0 : i32
    return %arg0, %c0_i32 : i32, i32
  }
}

</mosaic_0001>

<bundles_post_ra>
// kernel: pose_forward.1
= control target key start
LH: loop header
LB: loop body
LE: loop exit
PB: predicated region body
PF: predicated region fallthrough
CT: control target
= control target key end

     0   :  { %16 = vsyncpa [#allocation3], 0  ;;  %s11620_s0 = inlined_call_operand.vmem [shape: bf16[8,128], index: 0, kind: input, shape index: {}]   ;;  %s11621_s1 = inlined_call_operand.vmem [shape: bf16[8,128], index: 1, kind: input, shape index: {}]   ;;  %s11622_s2 = inlined_call_operand.hbm [shape: bf16[128,1024], index: 2, kind: input, shape index: {}]   ;;  %s11623_s3 = inlined_call_operand.hbm [shape: bf16[128,1024], index: 3, kind: input, shape index: {}]   ;;  %s11624_s4 = inlined_call_operand.hbm [shape: f32[1,1024], index: 4, kind: input, shape index: {}]   ;;  %s11625_s5 = inlined_call_operand.hbm [shape: bf16[1024,1024], index: 5, kind: input, shape index: {}]   ;;  %s11626_s6 = inlined_call_operand.hbm [shape: f32[1,1024], index: 6, kind: input, shape index: {}]   ;;  %s11627_s7 = inlined_call_operand.hbm [shape: bf16[1024,1024], index: 7, kind: input, shape index: {}]   ;;  %s11628_s8 = inlined_call_operand.hbm [shape: f32[1,1024], index: 8, kind: input, shape index: {}]   ;;  %s11629_s9 = inlined_call_operand.hbm [shape: bf16[1024,128], index: 9, kind: input, shape index: {}]   ;;  %s11630_s10 = inlined_call_operand.hbm [shape: f32[1,128], index: 10, kind: input, shape index: {}]   ;;  %s11631_s11 = inlined_call_operand.vmem [shape: f32[8,128], index: 11, kind: output, shape index: {}]  }
   0x1   :  { %17 = vsyncpa [#allocation5], 0 }
   0x2   :  { %18 = vsyncpa [#allocation8], 0 }
   0x3   :  { %19 = vsyncpa [#allocation11], 0 }
   0x4   :  { %20 = vsyncpa [#allocation14], 0  ;;  %s11154_s17 = smov [#allocation4]   ;;  %s11155_s19 = smov [#allocation7]  }
   0x5   :  { %s42_s18 = sshll.u32 %s11154_s17, 4  ;;  %s64_s20 = sshll.u32 %s11155_s19, 4  ;;  %s43_s18 = int_to_ptr.vmem [resolvable:$true] %s42_s18  ;;  %s65_s20 = int_to_ptr.vmem [resolvable:$true] %s64_s20 }
   0x6   :  { %s10972_s21 = scalar_lea.vmem %s43_s18, 8192  ;;  %p10977_p1 = scmp.lt.s32.totalorder %s43_s18, %s43_s18 }
   0x7   :  { %p10973_p0 = scmp.ne.s32.totalorder %s43_s18, %s10972_s21  ;;  %p10978_p2 = scmp.lt.s32.totalorder %s10972_s21, %s10972_s21 }
   0x9   :  { %p10979_p3 = por %p10978_p2, %p10977_p1 }
   0xb   :  { %p10980_p4 = pnand %p10979_p3, %p10973_p0 }
   0xd   :  { %10983 = shalt.err (!%p10980_p4)
}
   0xe   :  { %s11156_s22 = smov 512   ;;  %s11157_s23 = smov 32  }
   0xf   :  { %48 = dma.hbm_to_vmem [thread:$0]  %s11623_s3, 8192, %s43_s18, [#allocation5], %s11156_s22, %s11156_s22, %s11157_s23  }
  0x10   :  { %s10992_s26 = scalar_lea.vmem %s65_s20, 65536  ;;  %p10997_p6 = scmp.lt.s32.totalorder %s65_s20, %s65_s20 }
  0x11   :  { %p10993_p5 = scmp.ne.s32.totalorder %s65_s20, %s10992_s26  ;;  %p10998_p7 = scmp.lt.s32.totalorder %s10992_s26, %s10992_s26 }
  0x13   :  { %p10999_p8 = por %p10998_p7, %p10997_p6 }
  0x15   :  { %p11000_p9 = pnand %p10999_p8, %p10993_p5 }
  0x17   :  { %11003 = shalt.err (!%p11000_p9)
}
  0x18   :  { %70 = dma.hbm_to_vmem [thread:$0]  %s11625_s5, 65536, %s65_s20, [#allocation8], %s11156_s22, %s11156_s22, %s11157_s23  }
  0x19   :  { %s11158_s29 = smov [#allocation10]   ;;  %s11159_s12 = smov [#allocation13]  }
  0x1a   :  { %s86_s30 = sshll.u32 %s11158_s29, 4  ;;  %s108_s13 = sshll.u32 %s11159_s12, 4  ;;  %s87_s30 = int_to_ptr.vmem [resolvable:$true] %s86_s30  ;;  %s109_s13 = int_to_ptr.vmem [resolvable:$true] %s108_s13 }
  0x1b   :  { %s11012_s3 = scalar_lea.vmem %s87_s30, 65536  ;;  %p11017_p11 = scmp.lt.s32.totalorder %s87_s30, %s87_s30 }
  0x1c   :  { %p11013_p10 = scmp.ne.s32.totalorder %s87_s30, %s11012_s3  ;;  %p11018_p12 = scmp.lt.s32.totalorder %s11012_s3, %s11012_s3 }
  0x1e   :  { %p11019_p13 = por %p11018_p12, %p11017_p11 }
  0x20   :  { %p11020_p0 = pnand %p11019_p13, %p11013_p10 }
  0x22   :  { %11023 = shalt.err (!%p11020_p0)
}
  0x23   :  { %92 = dma.hbm_to_vmem [thread:$0]  %s11627_s7, 65536, %s87_s30, [#allocation11], %s11156_s22, %s11156_s22, %s11157_s23  }
  0x24   :  { %s11032_s5 = scalar_lea.vmem %s109_s13, 8192  ;;  %p11037_p2 = scmp.lt.s32.totalorder %s109_s13, %s109_s13 }
  0x25   :  { %p11033_p1 = scmp.ne.s32.totalorder %s109_s13, %s11032_s5  ;;  %p11038_p3 = scmp.lt.s32.totalorder %s11032_s5, %s11032_s5 }
  0x27   :  { %p11039_p4 = por %p11038_p3, %p11037_p2 }
  0x29   :  { %p11040_p5 = pnand %p11039_p4, %p11033_p1 }
  0x2b   :  { %11043 = shalt.err (!%p11040_p5)
}
  0x2c   :  { %s11160_s16 = smov 64   ;;  %s11161_s17 = smov 4  }
  0x2d   :  { %114 = dma.hbm_to_vmem [thread:$0]  %s11629_s9, 8192, %s109_s13, [#allocation14], %s11160_s16, %s11160_s16, %s11161_s17  }
  0x2e   :  { %s11162_s20 = smov [#allocation2]   ;;  %s11163_s24 = smov [#allocation6]  }
  0x2f   :  { %s30_s21 = sshll.u32 %s11162_s20, 4  ;;  %s55_s25 = sshll.u32 %s11163_s24, 4  ;;  %s31_s21 = int_to_ptr.vmem [resolvable:$true] %s30_s21  ;;  %s56_s25 = int_to_ptr.vmem [resolvable:$true] %s55_s25 }
  0x30   :  { %s11052_s7 = scalar_lea.vmem %s31_s21, 8192  ;;  %p11057_p7 = scmp.lt.s32.totalorder %s31_s21, %s31_s21 }
  0x31   :  { %p11053_p6 = scmp.ne.s32.totalorder %s31_s21, %s11052_s7  ;;  %p11058_p8 = scmp.lt.s32.totalorder %s11052_s7, %s11052_s7 }
  0x33   :  { %p11059_p9 = por %p11058_p8, %p11057_p7 }
  0x35   :  { %p11060_p10 = pnand %p11059_p9, %p11053_p6 }
  0x37   :  { %11063 = shalt.err (!%p11060_p10)
}
  0x38   :  { %36 = dma.hbm_to_vmem [thread:$0]  %s11622_s2, 8192, %s31_s21, [#allocation3], %s11156_s22, %s11156_s22, %s11157_s23  }
  0x39   :  { %s11072_s9 = scalar_lea.vmem %s56_s25, 128  ;;  %p11077_p12 = scmp.lt.s32.totalorder %s56_s25, %s56_s25 }
  0x3a   :  { %p11073_p11 = scmp.ne.s32.totalorder %s56_s25, %s11072_s9  ;;  %p11078_p13 = scmp.lt.s32.totalorder %s11072_s9, %s11072_s9 }
  0x3c   :  { %p11079_p0 = por %p11078_p13, %p11077_p12 }
  0x3e   :  { %p11080_p1 = pnand %p11079_p0, %p11073_p11 }
  0x40   :  { %11083 = shalt.err (!%p11080_p1)
}
  0x41   :  { %58 = dma.hbm_to_vmem [thread:$0]  %s11624_s4, 128, %s56_s25, [#allocation5]  }
  0x42   :  { %s11164_s30 = smov [#allocation9]   ;;  %s11165_s13 = smov [#allocation12]  }
  0x43   :  { %s77_s12 = sshll.u32 %s11164_s30, 4  ;;  %s99_s3 = sshll.u32 %s11165_s13, 4  ;;  %s78_s12 = int_to_ptr.vmem [resolvable:$true] %s77_s12  ;;  %s100_s3 = int_to_ptr.vmem [resolvable:$true] %s99_s3 }
  0x44   :  { %s11092_s14 = scalar_lea.vmem %s78_s12, 128  ;;  %p11097_p3 = scmp.lt.s32.totalorder %s78_s12, %s78_s12 }
  0x45   :  { %p11093_p2 = scmp.ne.s32.totalorder %s78_s12, %s11092_s14  ;;  %p11098_p4 = scmp.lt.s32.totalorder %s11092_s14, %s11092_s14 }
  0x47   :  { %p11099_p5 = por %p11098_p4, %p11097_p3 }
  0x49   :  { %p11100_p6 = pnand %p11099_p5, %p11093_p2 }
  0x4b   :  { %11103 = shalt.err (!%p11100_p6)
}
  0x4c   :  { %80 = dma.hbm_to_vmem [thread:$0]  %s11626_s6, 128, %s78_s12, [#allocation8]  }
  0x4d   :  { %s11112_s23 = scalar_lea.vmem %s100_s3, 128  ;;  %p11117_p8 = scmp.lt.s32.totalorder %s100_s3, %s100_s3 }
  0x4e   :  { %p11113_p7 = scmp.ne.s32.totalorder %s100_s3, %s11112_s23  ;;  %p11118_p9 = scmp.lt.s32.totalorder %s11112_s23, %s11112_s23 }
  0x50   :  { %p11119_p10 = por %p11118_p9, %p11117_p8 }
  0x52   :  { %p11120_p11 = pnand %p11119_p10, %p11113_p7 }
  0x54   :  { %11123 = shalt.err (!%p11120_p11)
}
  0x55   :  { %102 = dma.hbm_to_vmem [thread:$0]  %s11628_s8, 128, %s100_s3, [#allocation11]  }
  0x56   :  { %s11166_s5 = smov [#allocation15]  }
  0x57   :  { %s121_s16 = sshll.u32 %s11166_s5, 4  ;;  %s122_s16 = int_to_ptr.vmem [resolvable:$true] %s121_s16 }
  0x58   :  { %s11132_s17 = scalar_lea.vmem %s122_s16, 16  ;;  %s11136_s18 = scalar_lea.vmem %s122_s16, 32 }
  0x59   :  { %p11133_p12 = scmp.ne.s32.totalorder %s122_s16, %s11132_s17  ;;  %p11137_p13 = scmp.lt.s32.totalorder %s122_s16, %s122_s16 }
  0x5a   :  { %p11138_p0 = scmp.lt.s32.totalorder %s11136_s18, %s11132_s17 }
  0x5c   :  { %p11139_p1 = por %p11138_p0, %p11137_p13 }
  0x5e   :  { %p11140_p2 = pnand %p11139_p1, %p11133_p12 }
  0x60   :  { %11143 = shalt.err (!%p11140_p2)
}
  0x61   :  { %124 = dma.hbm_to_vmem [thread:$0]  %s11630_s10, 16, %s122_s16, [#allocation14]  }
  0x62   :  { %11144 = dma.done.wait [#allocation3], 8192  }
  0x63   :  { %11145 = vsyncadd [#allocation3], 4294959104 }
  0x64   :  { %11146 = dma.done.wait [#allocation5], 8320  }
  0x65   :  { %11147 = vsyncadd [#allocation5], 4294958976 }
  0x66   :  { %11148 = dma.done.wait [#allocation8], 65664  }
  0x67   :  { %11149 = vsyncadd [#allocation8], 4294901632 }
  0x68   :  { %11150 = dma.done.wait [#allocation11], 65664  }
  0x69   :  { %11151 = vsyncadd [#allocation11], 4294901632 }
  0x6a   :  { %11152 = dma.done.wait [#allocation14], 8208  }
  0x6b   :  { %11153 = vsyncadd [#allocation14], 4294959088  ;;  %v11167_v0 = vmov 0   ;;  %v275_v1 = vld [vmem:[#allocation4 + $0x1c0] sm:$0xff]  ;;  %v276_v3 = vld [vmem:[#allocation4 + $0x1c8] sm:$0xff] }
  0x6c   :  { %635 = vmatprep.mubr.bf16.mxu0 %v11167_v0  ;;  %676 = vmatprep.mubr.bf16.mxu1 %v11167_v0  ;;  %v279_v2 = vld [vmem:[#allocation4 + $0x1e0] sm:$0xff]  ;;  %v280_v5 = vld [vmem:[#allocation4 + $0x1e8] sm:$0xff]  ;;  %v277_v63 = vld [vmem:[#allocation4 + $0x1d0] sm:$0xff] }
  0x6d   :  { %v9635_v4 = vcombine.high %v275_v1, %v279_v2  ;;  %v9634_v6 = vcombine.low %v275_v1, %v279_v2  ;;  %v267_v7 = vld [vmem:[#allocation4 + $0x180] sm:$0xff]  ;;  %v9637_v9 = vcombine.high %v276_v3, %v280_v5  ;;  %v9636_v10 = vcombine.low %v276_v3, %v280_v5  ;;  %v268_v12 = vld [vmem:[#allocation4 + $0x188] sm:$0xff]  ;;  %v281_v1 = vld [vmem:[#allocation4 + $0x1f0] sm:$0xff] }
  0x6e   :  { %v271_v8 = vld [vmem:[#allocation4 + $0x1a0] sm:$0xff]  ;;  %v272_v13 = vld [vmem:[#allocation4 + $0x1a8] sm:$0xff]  ;;  %v278_v2 = vld [vmem:[#allocation4 + $0x1d8] sm:$0xff] }
  0x6f   :  { %v9627_v11 = vcombine.high %v267_v7, %v271_v8  ;;  %v259_v14 = vld [vmem:[#allocation4 + $0x140] sm:$0xff]  ;;  %603 = vmatprep.subr.bf16.mxu0 %v9635_v4  ;;  %v9629_v15 = vcombine.high %v268_v12, %v272_v13  ;;  %v260_v17 = vld [vmem:[#allocation4 + $0x148] sm:$0xff]  ;;  %644 = vmatprep.subr.bf16.mxu1 %v9637_v9  ;;  %v9626_v19 = vcombine.low %v267_v7, %v271_v8  ;;  %v282_v3 = vld [vmem:[#allocation4 + $0x1f8] sm:$0xff] }
  0x70   :  { %v263_v16 = vld [vmem:[#allocation4 + $0x160] sm:$0xff]  ;;  %v264_v18 = vld [vmem:[#allocation4 + $0x168] sm:$0xff]  ;;  %604 = vmatpush1.bf16.msra.mxu0 %v9634_v6  ;;  %645 = vmatpush1.bf16.msra.mxu1 %v9636_v10  ;;  %v9628_v20 = vcombine.low %v268_v12, %v272_v13  ;;  %v9639_v6 = vcombine.high %v277_v63, %v281_v1  ;;  %v9641_v7 = vcombine.high %v278_v2, %v282_v3  ;;  %v269_v8 = vld [vmem:[#allocation4 + $0x190] sm:$0xff] }
  0x71   :  { %605 = vmatprep.subr.bf16.mxu0 %v9627_v11  ;;  %v9619_v21 = vcombine.high %v259_v14, %v263_v16  ;;  %646 = vmatprep.subr.bf16.mxu1 %v9629_v15  ;;  %v9621_v22 = vcombine.high %v260_v17, %v264_v18  ;;  %v251_v23 = vld [vmem:[#allocation4 + $0x100] sm:$0xff]  ;;  %v252_v25 = vld [vmem:[#allocation4 + $0x108] sm:$0xff]  ;;  %v9618_v27 = vcombine.low %v259_v14, %v263_v16  ;;  %v273_v9 = vld [vmem:[#allocation4 + $0x1b0] sm:$0xff] }
  0x72   :  { %v255_v24 = vld [vmem:[#allocation4 + $0x120] sm:$0xff]  ;;  %v256_v26 = vld [vmem:[#allocation4 + $0x128] sm:$0xff]  ;;  %v9620_v28 = vcombine.low %v260_v17, %v264_v18  ;;  %v270_v10 = vld [vmem:[#allocation4 + $0x198] sm:$0xff]  ;;  %v9638_v13 = vcombine.low %v277_v63, %v281_v1  ;;  %v9640_v14 = vcombine.low %v278_v2, %v282_v3  ;;  %v9631_v15 = vcombine.high %v269_v8, %v273_v9 }
  0x73   :  { %v9611_v29 = vcombine.high %v251_v23, %v255_v24  ;;  %v9613_v30 = vcombine.high %v252_v25, %v256_v26  ;;  %v243_v31 = vld [vmem:[#allocation4 + $0xc0] sm:$0xff]  ;;  %v244_v33 = vld [vmem:[#allocation4 + $0xc8] sm:$0xff]  ;;  %v9610_v35 = vcombine.low %v251_v23, %v255_v24  ;;  %v9612_v36 = vcombine.low %v252_v25, %v256_v26  ;;  %v274_v11 = vld [vmem:[#allocation4 + $0x1b8] sm:$0xff] }
  0x74   :  { %606 = vmatpush1.bf16.msra.mxu0 %v9626_v19  ;;  %647 = vmatpush1.bf16.msra.mxu1 %v9628_v20  ;;  %v247_v32 = vld [vmem:[#allocation4 + $0xe0] sm:$0xff]  ;;  %v248_v34 = vld [vmem:[#allocation4 + $0xe8] sm:$0xff]  ;;  %v9633_v16 = vcombine.high %v270_v10, %v274_v11  ;;  %v261_v17 = vld [vmem:[#allocation4 + $0x150] sm:$0xff] }
  0x75   :  { %607 = vmatprep.subr.bf16.mxu0 %v9619_v21  ;;  %648 = vmatprep.subr.bf16.mxu1 %v9621_v22  ;;  %v9603_v37 = vcombine.high %v243_v31, %v247_v32  ;;  %v9605_v38 = vcombine.high %v244_v33, %v248_v34  ;;  %v235_v39 = vld [vmem:[#allocation4 + $0x80] sm:$0xff]  ;;  %v236_v41 = vld [vmem:[#allocation4 + $0x88] sm:$0xff]  ;;  %v9602_v43 = vcombine.low %v243_v31, %v247_v32  ;;  %v265_v18 = vld [vmem:[#allocation4 + $0x170] sm:$0xff] }
  0x76   :  { %v239_v40 = vld [vmem:[#allocation4 + $0xa0] sm:$0xff]  ;;  %v240_v42 = vld [vmem:[#allocation4 + $0xa8] sm:$0xff]  ;;  %v9604_v44 = vcombine.low %v244_v33, %v248_v34  ;;  %v262_v19 = vld [vmem:[#allocation4 + $0x158] sm:$0xff]  ;;  %v9630_v21 = vcombine.low %v269_v8, %v273_v9  ;;  %v9632_v22 = vcombine.low %v270_v10, %v274_v11  ;;  %v9623_v23 = vcombine.high %v261_v17, %v265_v18 }
  0x77   :  { %v9595_v45 = vcombine.high %v235_v39, %v239_v40  ;;  %v9597_v46 = vcombine.high %v236_v41, %v240_v42  ;;  %v227_v47 = vld [vmem:[#allocation4 + $0x40] sm:$0xff]  ;;  %v228_v49 = vld [vmem:[#allocation4 + $0x48] sm:$0xff]  ;;  %v9594_v51 = vcombine.low %v235_v39, %v239_v40  ;;  %v9596_v52 = vcombine.low %v236_v41, %v240_v42  ;;  %v266_v20 = vld [vmem:[#allocation4 + $0x178] sm:$0xff] }
  0x78   :  { %608 = vmatpush1.bf16.msra.mxu0 %v9618_v27  ;;  %649 = vmatpush1.bf16.msra.mxu1 %v9620_v28  ;;  %v231_v48 = vld [vmem:[#allocation4 + $0x60] sm:$0xff]  ;;  %v232_v50 = vld [vmem:[#allocation4 + $0x68] sm:$0xff]  ;;  %v9625_v24 = vcombine.high %v262_v19, %v266_v20  ;;  %v253_v25 = vld [vmem:[#allocation4 + $0x110] sm:$0xff] }
  0x79   :  { %609 = vmatprep.subr.bf16.mxu0 %v9611_v29  ;;  %650 = vmatprep.subr.bf16.mxu1 %v9613_v30  ;;  %v9587_v53 = vcombine.high %v227_v47, %v231_v48  ;;  %v9589_v54 = vcombine.high %v228_v49, %v232_v50  ;;  %v219_v55 = vld [vmem:[#allocation4] sm:$0xff]  ;;  %v220_v57 = vld [vmem:[#allocation4 + $0x8] sm:$0xff]  ;;  %v9586_v59 = vcombine.low %v227_v47, %v231_v48  ;;  %v257_v26 = vld [vmem:[#allocation4 + $0x130] sm:$0xff] }
  0x7a   :  { %v223_v56 = vld [vmem:[#allocation4 + $0x20] sm:$0xff]  ;;  %v224_v58 = vld [vmem:[#allocation4 + $0x28] sm:$0xff]  ;;  %v9588_v60 = vcombine.low %v228_v49, %v232_v50  ;;  %v254_v27 = vld [vmem:[#allocation4 + $0x118] sm:$0xff]  ;;  %v9622_v29 = vcombine.low %v261_v17, %v265_v18  ;;  %v9624_v30 = vcombine.low %v262_v19, %v266_v20  ;;  %v9615_v31 = vcombine.high %v253_v25, %v257_v26 }
  0x7b   :  { %v9579_v61 = vcombine.high %v219_v55, %v223_v56  ;;  %v9581_v62 = vcombine.high %v220_v57, %v224_v58  ;;  %v9578_v4 = vcombine.low %v219_v55, %v223_v56  ;;  %v9580_v5 = vcombine.low %v220_v57, %v224_v58  ;;  %v11272_v12 = vld [vmem:[%s11621_s1] sm:$0xf]  ;;  %v258_v28 = vld [vmem:[#allocation4 + $0x138] sm:$0xff]  ;;  %v245_v33 = vld [vmem:[#allocation4 + $0xd0] sm:$0xff] }
  0x7c   :  { %610 = vmatpush1.bf16.msra.mxu0 %v9610_v35  ;;  %651 = vmatpush1.bf16.msra.mxu1 %v9612_v36  ;;  %v9617_v32 = vcombine.high %v254_v27, %v258_v28  ;;  %v249_v34 = vld [vmem:[#allocation4 + $0xf0] sm:$0xff]  ;;  %v246_v35 = vld [vmem:[#allocation4 + $0xd8] sm:$0xff]  ;;  %v9616_v40 = vcombine.low %v254_v27, %v258_v28  ;;  %v214_v63 = vld [vmem:[#allocation2 + $0x1e0] sm:$0xff] }
  0x7d   :  { %611 = vmatprep.subr.bf16.mxu0 %v9603_v37  ;;  %652 = vmatprep.subr.bf16.mxu1 %v9605_v38  ;;  %v250_v36 = vld [vmem:[#allocation4 + $0xf8] sm:$0xff]  ;;  %v9614_v37 = vcombine.low %v253_v25, %v257_v26  ;;  %v237_v38 = vld [vmem:[#allocation4 + $0x90] sm:$0xff]  ;;  %v9607_v41 = vcombine.high %v245_v33, %v249_v34  ;;  %v211_v3 = vld [vmem:[#allocation2 + $0x1c8] sm:$0xff] }
  0x7e   :  { %v241_v39 = vld [vmem:[#allocation4 + $0xb0] sm:$0xff]  ;;  %v238_v42 = vld [vmem:[#allocation4 + $0x98] sm:$0xff]  ;;  %v9608_v48 = vcombine.low %v246_v35, %v250_v36  ;;  %v206_v8 = vld [vmem:[#allocation2 + $0x1a0] sm:$0xff] }
  0x7f   :  { %v233_v47 = vld [vmem:[#allocation4 + $0x70] sm:$0xff]  ;;  %v9599_v49 = vcombine.high %v237_v38, %v241_v39  ;;  %v230_v50 = vld [vmem:[#allocation4 + $0x58] sm:$0xff]  ;;  %v203_v11 = vld [vmem:[#allocation2 + $0x188] sm:$0xff] }
  0x80   :  { %612 = vmatpush1.bf16.msra.mxu0 %v9602_v43  ;;  %653 = vmatpush1.bf16.msra.mxu1 %v9604_v44  ;;  %v242_v43 = vld [vmem:[#allocation4 + $0xb8] sm:$0xff]  ;;  %v9609_v44 = vcombine.high %v246_v35, %v250_v36  ;;  %v225_v55 = vld [vmem:[#allocation4 + $0x30] sm:$0xff]  ;;  %v198_v17 = vld [vmem:[#allocation2 + $0x160] sm:$0xff] }
  0x81   :  { %613 = vmatprep.subr.bf16.mxu0 %v9595_v45  ;;  %654 = vmatprep.subr.bf16.mxu1 %v9597_v46  ;;  %v9606_v45 = vcombine.low %v245_v33, %v249_v34  ;;  %v229_v46 = vld [vmem:[#allocation4 + $0x50] sm:$0xff]  ;;  %v9600_v56 = vcombine.low %v238_v42, %v242_v43  ;;  %v222_v58 = vld [vmem:[#allocation4 + $0x18] sm:$0xff]  ;;  %v195_v20 = vld [vmem:[#allocation2 + $0x148] sm:$0xff] }
  0x82   :  { %v9591_v57 = vcombine.high %v229_v46, %v233_v47  ;;  %v190_v25 = vld [vmem:[#allocation2 + $0x120] sm:$0xff]  ;;  %v187_v28 = vld [vmem:[#allocation2 + $0x108] sm:$0xff] }
  0x83   :  { %v179_v35 = vld [vmem:[#allocation2 + $0xc8] sm:$0xff] }
  0x84   :  { %614 = vmatpush1.bf16.msra.mxu0 %v9594_v51  ;;  %655 = vmatpush1.bf16.msra.mxu1 %v9596_v52  ;;  %v234_v51 = vld [vmem:[#allocation4 + $0x78] sm:$0xff]  ;;  %v9601_v52 = vcombine.high %v238_v42, %v242_v43  ;;  %v183_v36 = vld [vmem:[#allocation2 + $0xe8] sm:$0xff] }
  0x85   :  { %615 = vmatprep.subr.bf16.mxu0 %v9587_v53  ;;  %656 = vmatprep.subr.bf16.mxu1 %v9589_v54  ;;  %v9598_v53 = vcombine.low %v237_v38, %v241_v39  ;;  %v221_v54 = vld [vmem:[#allocation4 + $0x10] sm:$0xff]  ;;  %v9592_v1 = vcombine.low %v230_v50, %v234_v51  ;;  %v170_v39 = vld [vmem:[#allocation2 + $0x80] sm:$0xff]  ;;  %v171_v43 = vld [vmem:[#allocation2 + $0x88] sm:$0xff] }
  0x86   :  { %v9583_v2 = vcombine.high %v221_v54, %v225_v55 }
  0x88   :  { %616 = vmatpush1.bf16.msra.mxu0 %v9586_v59  ;;  %657 = vmatpush1.bf16.msra.mxu1 %v9588_v60  ;;  %v226_v59 = vld [vmem:[#allocation4 + $0x38] sm:$0xff]  ;;  %v9593_v60 = vcombine.high %v230_v50, %v234_v51  ;;  %v163_v51 = vld [vmem:[#allocation2 + $0x48] sm:$0xff] }
  0x89   :  { %617 = vmatprep.subr.bf16.mxu0 %v9579_v61  ;;  %658 = vmatprep.subr.bf16.mxu1 %v9581_v62  ;;  %v9590_v61 = vcombine.low %v229_v46, %v233_v47  ;;  %v210_v62 = vld [vmem:[#allocation2 + $0x1c0] sm:$0xff]  ;;  %v9584_v9 = vcombine.low %v222_v58, %v226_v59 }
  0x8a   :  { %v9699_v10 = vcombine.high %v210_v62, %v214_v63  ;;  %v162_v47 = vld [vmem:[#allocation2 + $0x40] sm:$0xff] }
  0x8c   :  { %618 = vmatpush1.bf16.msra.mxu0 %v9578_v4  ;;  %659 = vmatpush1.bf16.msra.mxu1 %v9580_v5  ;;  %v215_v4 = vld [vmem:[#allocation2 + $0x1e8] sm:$0xff]  ;;  %v9585_v5 = vcombine.high %v222_v58, %v226_v59  ;;  %v154_v58 = vld [vmem:[#allocation2] sm:$0xff] }
  0x8d   :  { %685 = vmatprep.subr.bf16.mxu0 %v9639_v6  ;;  %726 = vmatprep.subr.bf16.mxu1 %v9641_v7  ;;  %v9582_v6 = vcombine.low %v221_v54, %v225_v55  ;;  %v202_v7 = vld [vmem:[#allocation2 + $0x180] sm:$0xff]  ;;  %v9700_v18 = vcombine.low %v211_v3, %v215_v4 }
  0x8e   :  { %v9691_v19 = vcombine.high %v202_v7, %v206_v8  ;;  %v158_v59 = vld [vmem:[#allocation2 + $0x20] sm:$0xff] }
  0x8f   :  { %636 = vmatmul.mubr.bf16.vlgmr.msra.gmra.mxu0 %v11272_v12  ;;  %677 = vmatmul.mubr.bf16.vlgmr.msra.gmra.mxu1 %v11272_v12 }
  0x90   :  { %686 = vmatpush1.bf16.msra.mxu0 %v9638_v13  ;;  %727 = vmatpush1.bf16.msra.mxu1 %v9640_v14  ;;  %v207_v13 = vld [vmem:[#allocation2 + $0x1a8] sm:$0xff]  ;;  %v9701_v14 = vcombine.high %v211_v3, %v215_v4  ;;  %v212_v3 = vld [vmem:[#allocation2 + $0x1d0] sm:$0xff] }
  0x91   :  { %687 = vmatprep.subr.bf16.mxu0 %v9631_v15  ;;  %728 = vmatprep.subr.bf16.mxu1 %v9633_v16  ;;  %v9698_v15 = vcombine.low %v210_v62, %v214_v63  ;;  %v194_v16 = vld [vmem:[#allocation2 + $0x140] sm:$0xff]  ;;  %v9692_v26 = vcombine.low %v203_v11, %v207_v13  ;;  %v216_v4 = vld [vmem:[#allocation2 + $0x1f0] sm:$0xff] }
  0x92   :  { %717 = vmatprep.mubr.bf16.mxu0 %v11167_v0  ;;  %758 = vmatprep.mubr.bf16.mxu1 %v11167_v0  ;;  %v9683_v27 = vcombine.high %v194_v16, %v198_v17 }
  0x94   :  { %688 = vmatpush1.bf16.msra.mxu0 %v9630_v21  ;;  %729 = vmatpush1.bf16.msra.mxu1 %v9632_v22  ;;  %v199_v21 = vld [vmem:[#allocation2 + $0x168] sm:$0xff]  ;;  %v9693_v22 = vcombine.high %v203_v11, %v207_v13  ;;  %v204_v11 = vld [vmem:[#allocation2 + $0x190] sm:$0xff] }
  0x95   :  { %689 = vmatprep.subr.bf16.mxu0 %v9623_v23  ;;  %730 = vmatprep.subr.bf16.mxu1 %v9625_v24  ;;  %v9690_v23 = vcombine.low %v202_v7, %v206_v8  ;;  %v186_v24 = vld [vmem:[#allocation2 + $0x100] sm:$0xff]  ;;  %v9684_v33 = vcombine.low %v195_v20, %v199_v21  ;;  %v9642_v7 = vcombine.low %v154_v58, %v158_v59  ;;  %v208_v13 = vld [vmem:[#allocation2 + $0x1b0] sm:$0xff] }
  0x96   :  { %v9675_v34 = vcombine.high %v186_v24, %v190_v25  ;;  %v9674_v38 = vcombine.low %v186_v24, %v190_v25  ;;  %v201_v24 = vld [vmem:[#allocation2 + $0x178] sm:$0xff]  ;;  %v9694_v25 = vcombine.low %v204_v11, %v208_v13 }
  0x98   :  { %690 = vmatpush1.bf16.msra.mxu0 %v9622_v29  ;;  %731 = vmatpush1.bf16.msra.mxu1 %v9624_v30  ;;  %v191_v29 = vld [vmem:[#allocation2 + $0x128] sm:$0xff]  ;;  %v9685_v30 = vcombine.high %v195_v20, %v199_v21  ;;  %v196_v21 = vld [vmem:[#allocation2 + $0x150] sm:$0xff] }
  0x99   :  { %691 = vmatprep.subr.bf16.mxu0 %v9615_v31  ;;  %732 = vmatprep.subr.bf16.mxu1 %v9617_v32  ;;  %v9682_v31 = vcombine.low %v194_v16, %v198_v17  ;;  %v178_v32 = vld [vmem:[#allocation2 + $0xc0] sm:$0xff]  ;;  %v9702_v17 = vcombine.low %v212_v3, %v216_v4 }
  0x9a   :  { %v11285_v16 = vld [vmem:[%s11620_s0] sm:$0xf] }
  0x9c   :  { %692 = vmatpush1.bf16.msra.mxu0 %v9614_v37  ;;  %733 = vmatpush1.bf16.msra.mxu1 %v9616_v40  ;;  %v9677_v37 = vcombine.high %v187_v28, %v191_v29  ;;  %v174_v40 = vld [vmem:[#allocation2 + $0xa0] sm:$0xff] }
  0x9d   :  { %693 = vmatprep.subr.bf16.mxu0 %v9607_v41  ;;  %734 = vmatprep.subr.bf16.mxu1 %v9609_v44  ;;  %v9676_v41 = vcombine.low %v187_v28, %v191_v29  ;;  %v175_v44 = vld [vmem:[#allocation2 + $0xa8] sm:$0xff]  ;;  %v9659_v50 = vcombine.high %v170_v39, %v174_v40  ;;  %v9658_v54 = vcombine.low %v170_v39, %v174_v40  ;;  %v188_v29 = vld [vmem:[#allocation2 + $0x110] sm:$0xff]  ;;  %v185_v39 = vld [vmem:[#allocation2 + $0xf8] sm:$0xff] }
  0x9e   :  { %v9660_v55 = vcombine.low %v171_v43, %v175_v44 }
  0xa0   :  { %694 = vmatpush1.bf16.msra.mxu0 %v9606_v45  ;;  %735 = vmatpush1.bf16.msra.mxu1 %v9608_v48  ;;  %v9669_v45 = vcombine.high %v179_v35, %v183_v36  ;;  %v166_v48 = vld [vmem:[#allocation2 + $0x60] sm:$0xff] }
  0xa1   :  { %695 = vmatprep.subr.bf16.mxu0 %v9599_v49  ;;  %736 = vmatprep.subr.bf16.mxu1 %v9601_v52  ;;  %v9668_v49 = vcombine.low %v179_v35, %v183_v36  ;;  %v167_v52 = vld [vmem:[#allocation2 + $0x68] sm:$0xff]  ;;  %v9650_v62 = vcombine.low %v162_v47, %v166_v48  ;;  %v180_v36 = vld [vmem:[#allocation2 + $0xd0] sm:$0xff] }
  0xa2   :  { %v9652_v63 = vcombine.low %v163_v51, %v167_v52 }
  0xa4   :  { %696 = vmatpush1.bf16.msra.mxu0 %v9598_v53  ;;  %737 = vmatpush1.bf16.msra.mxu1 %v9600_v56  ;;  %v9661_v53 = vcombine.high %v171_v43, %v175_v44  ;;  %v9651_v56 = vcombine.high %v162_v47, %v166_v48  ;;  %v172_v43 = vld [vmem:[#allocation2 + $0x90] sm:$0xff] }
  0xa5   :  { %697 = vmatprep.subr.bf16.mxu0 %v9591_v57  ;;  %738 = vmatprep.subr.bf16.mxu1 %v9593_v60  ;;  %v9653_v57 = vcombine.high %v163_v51, %v167_v52  ;;  %v155_v60 = vld [vmem:[#allocation2 + $0x8] sm:$0xff]  ;;  %v176_v44 = vld [vmem:[#allocation2 + $0xb0] sm:$0xff] }
  0xa6   :  { %v164_v51 = vld [vmem:[#allocation2 + $0x50] sm:$0xff] }
  0xa7   :  { %v168_v52 = vld [vmem:[#allocation2 + $0x70] sm:$0xff] }
  0xa8   :  { %698 = vmatpush1.bf16.msra.mxu0 %v9590_v61  ;;  %739 = vmatpush1.bf16.msra.mxu1 %v9592_v1  ;;  %v159_v61 = vld [vmem:[#allocation2 + $0x28] sm:$0xff]  ;;  %v9643_v1 = vcombine.high %v154_v58, %v158_v59  ;;  %v156_v59 = vld [vmem:[#allocation2 + $0x10] sm:$0xff] }
  0xa9   :  { %699 = vmatprep.subr.bf16.mxu0 %v9583_v2  ;;  %740 = vmatprep.subr.bf16.mxu1 %v9585_v5  ;;  %v9645_v2 = vcombine.high %v155_v60, %v159_v61  ;;  %v213_v5 = vld [vmem:[#allocation2 + $0x1d8] sm:$0xff]  ;;  %v9644_v8 = vcombine.low %v155_v60, %v159_v61  ;;  %v160_v60 = vld [vmem:[#allocation2 + $0x30] sm:$0xff] }
  0xaa   :  { %v157_v61 = vld [vmem:[#allocation2 + $0x18] sm:$0xff] }
  0xac   :  { %700 = vmatpush1.bf16.msra.mxu0 %v9582_v6  ;;  %741 = vmatpush1.bf16.msra.mxu1 %v9584_v9  ;;  %v217_v6 = vld [vmem:[#allocation2 + $0x1f8] sm:$0xff]  ;;  %v9703_v9 = vcombine.high %v212_v3, %v216_v4  ;;  %v1373_v4 = vld [vmem:[#allocation7 + $0x1c0] sm:$0xff] }
  0xad   :  { %1087 = vmatprep.subr.bf16.mxu0 %v9699_v10  ;;  %1128 = vmatprep.subr.bf16.mxu1 %v9701_v14  ;;  %v9705_v10 = vcombine.high %v213_v5, %v217_v6  ;;  %v205_v14 = vld [vmem:[#allocation2 + $0x198] sm:$0xff] }
  0xaf   :  { %718 = vmatmul.mubr.bf16.vlgmr.msra.gmra.mxu0 %v11272_v12  ;;  %759 = vmatmul.mubr.bf16.vlgmr.msra.gmra.mxu1 %v11272_v12  ;;  %v182_v12 = vld [vmem:[#allocation2 + $0xe0] sm:$0xff] }
  0xb0   :  { %1088 = vmatpush1.bf16.msra.mxu0 %v9698_v15  ;;  %1129 = vmatpush1.bf16.msra.mxu1 %v9700_v18  ;;  %v9667_v42 = vcombine.high %v178_v32, %v182_v12  ;;  %v9666_v46 = vcombine.low %v178_v32, %v182_v12  ;;  %v209_v15 = vld [vmem:[#allocation2 + $0x1b8] sm:$0xff]  ;;  %v9704_v18 = vcombine.low %v213_v5, %v217_v6  ;;  %v1377_v5 = vld [vmem:[#allocation7 + $0x1e0] sm:$0xff] }
  0xb1   :  { %1089 = vmatprep.subr.bf16.mxu0 %v9691_v19  ;;  %1130 = vmatprep.subr.bf16.mxu1 %v9693_v22  ;;  %v9695_v19 = vcombine.high %v204_v11, %v208_v13  ;;  %v9697_v20 = vcombine.high %v205_v14, %v209_v15  ;;  %v200_v22 = vld [vmem:[#allocation2 + $0x170] sm:$0xff]  ;;  %v193_v32 = vld [vmem:[#allocation2 + $0x138] sm:$0xff]  ;;  %v1501_v6 = vld [vmem:[#allocation7 + $0x5c0] sm:$0xff] }
  0xb2   :  { %1119 = vmatprep.mubr.bf16.mxu0 %v11167_v0  ;;  %1160 = vmatprep.mubr.bf16.mxu1 %v11167_v0  ;;  %v9686_v12 = vcombine.low %v196_v21, %v200_v22  ;;  %v1365_v13 = vld [vmem:[#allocation7 + $0x180] sm:$0xff] }
  0xb4   :  { %1090 = vmatpush1.bf16.msra.mxu0 %v9690_v23  ;;  %1131 = vmatpush1.bf16.msra.mxu1 %v9692_v26  ;;  %v197_v23 = vld [vmem:[#allocation2 + $0x158] sm:$0xff]  ;;  %v9696_v26 = vcombine.low %v205_v14, %v209_v15  ;;  %v1369_v14 = vld [vmem:[#allocation7 + $0x1a0] sm:$0xff] }
  0xb5   :  { %1091 = vmatprep.subr.bf16.mxu0 %v9683_v27  ;;  %1132 = vmatprep.subr.bf16.mxu1 %v9685_v30  ;;  %v9687_v27 = vcombine.high %v196_v21, %v200_v22  ;;  %v9689_v28 = vcombine.high %v197_v23, %v201_v24  ;;  %v192_v30 = vld [vmem:[#allocation2 + $0x130] sm:$0xff]  ;;  %v1493_v15 = vld [vmem:[#allocation7 + $0x580] sm:$0xff] }
  0xb6   :  { %v9678_v40 = vcombine.low %v188_v29, %v192_v30  ;;  %v1357_v22 = vld [vmem:[#allocation7 + $0x140] sm:$0xff] }
  0xb8   :  { %1092 = vmatpush1.bf16.msra.mxu0 %v9682_v31  ;;  %1133 = vmatpush1.bf16.msra.mxu1 %v9684_v33  ;;  %v189_v31 = vld [vmem:[#allocation2 + $0x118] sm:$0xff]  ;;  %v9688_v33 = vcombine.low %v197_v23, %v201_v24  ;;  %v1361_v23 = vld [vmem:[#allocation7 + $0x160] sm:$0xff] }
  0xb9   :  { %1093 = vmatprep.subr.bf16.mxu0 %v9675_v34  ;;  %1134 = vmatprep.subr.bf16.mxu1 %v9677_v37  ;;  %v9679_v34 = vcombine.high %v188_v29, %v192_v30  ;;  %v9681_v35 = vcombine.high %v189_v31, %v193_v32  ;;  %v184_v37 = vld [vmem:[#allocation2 + $0xf0] sm:$0xff]  ;;  %v1485_v24 = vld [vmem:[#allocation7 + $0x540] sm:$0xff] }
  0xba   :  { %v9670_v47 = vcombine.low %v180_v36, %v184_v37  ;;  %v1349_v30 = vld [vmem:[#allocation7 + $0x100] sm:$0xff] }
  0xbc   :  { %1094 = vmatpush1.bf16.msra.mxu0 %v9674_v38  ;;  %1135 = vmatpush1.bf16.msra.mxu1 %v9676_v41  ;;  %v181_v38 = vld [vmem:[#allocation2 + $0xd8] sm:$0xff]  ;;  %v9680_v41 = vcombine.low %v189_v31, %v193_v32  ;;  %v1353_v31 = vld [vmem:[#allocation7 + $0x120] sm:$0xff] }
  0xbd   :  { %1095 = vmatprep.subr.bf16.mxu0 %v9667_v42  ;;  %1136 = vmatprep.subr.bf16.mxu1 %v9669_v45  ;;  %v9671_v42 = vcombine.high %v180_v36, %v184_v37  ;;  %v173_v45 = vld [vmem:[#allocation2 + $0x98] sm:$0xff]  ;;  %v9672_v48 = vcombine.low %v181_v38, %v185_v39  ;;  %v1477_v32 = vld [vmem:[#allocation7 + $0x500] sm:$0xff] }
  0xbe   :  { %v1341_v36 = vld [vmem:[#allocation7 + $0xc0] sm:$0xff] }
  0xbf   :  { %v1345_v37 = vld [vmem:[#allocation7 + $0xe0] sm:$0xff] }
  0xc0   :  { %1096 = vmatpush1.bf16.msra.mxu0 %v9666_v46  ;;  %1137 = vmatpush1.bf16.msra.mxu1 %v9668_v49  ;;  %v177_v46 = vld [vmem:[#allocation2 + $0xb8] sm:$0xff]  ;;  %v9663_v49 = vcombine.high %v172_v43, %v176_v44 }
  0xc1   :  { %1097 = vmatprep.subr.bf16.mxu0 %v9659_v50  ;;  %1138 = vmatprep.subr.bf16.mxu1 %v9661_v53  ;;  %v9665_v50 = vcombine.high %v173_v45, %v177_v46  ;;  %v165_v53 = vld [vmem:[#allocation2 + $0x58] sm:$0xff] }
  0xc4   :  { %1098 = vmatpush1.bf16.msra.mxu0 %v9658_v54  ;;  %1139 = vmatpush1.bf16.msra.mxu1 %v9660_v55  ;;  %v169_v54 = vld [vmem:[#allocation2 + $0x78] sm:$0xff]  ;;  %v9662_v55 = vcombine.low %v172_v43, %v176_v44  ;;  %v1333_v43 = vld [vmem:[#allocation7 + $0x80] sm:$0xff] }
  0xc5   :  { %1099 = vmatprep.subr.bf16.mxu0 %v9651_v56  ;;  %1140 = vmatprep.subr.bf16.mxu1 %v9653_v57  ;;  %v9664_v56 = vcombine.low %v173_v45, %v177_v46  ;;  %v9655_v57 = vcombine.high %v164_v51, %v168_v52  ;;  %v9657_v58 = vcombine.high %v165_v53, %v169_v54  ;;  %v1337_v44 = vld [vmem:[#allocation7 + $0xa0] sm:$0xff] }
  0xc6   :  { %v1461_v45 = vld [vmem:[#allocation7 + $0x480] sm:$0xff] }
  0xc7   :  { %v1465_v46 = vld [vmem:[#allocation7 + $0x4a0] sm:$0xff] }
  0xc8   :  { %1100 = vmatpush1.bf16.msra.mxu0 %v9650_v62  ;;  %1141 = vmatpush1.bf16.msra.mxu1 %v9652_v63  ;;  %v161_v62 = vld [vmem:[#allocation2 + $0x38] sm:$0xff]  ;;  %v9654_v63 = vcombine.low %v164_v51, %v168_v52  ;;  %v1325_v51 = vld [vmem:[#allocation7 + $0x40] sm:$0xff] }
  0xc9   :  { %1101 = vmatprep.subr.bf16.mxu0 %v9643_v1  ;;  %1142 = vmatprep.subr.bf16.mxu1 %v9645_v2  ;;  %v9656_v1 = vcombine.low %v165_v53, %v169_v54  ;;  %v9647_v2 = vcombine.high %v156_v59, %v160_v60  ;;  %v9649_v3 = vcombine.high %v157_v61, %v161_v62  ;;  %v1329_v52 = vld [vmem:[#allocation7 + $0x60] sm:$0xff] }
  0xca   :  { %v1453_v53 = vld [vmem:[#allocation7 + $0x440] sm:$0xff] }
  0xcb   :  { %v1457_v54 = vld [vmem:[#allocation7 + $0x460] sm:$0xff] }
  0xcc   :  { %1102 = vmatpush1.bf16.msra.mxu0 %v9642_v7  ;;  %1143 = vmatpush1.bf16.msra.mxu1 %v9644_v8  ;;  %v1505_v7 = vld [vmem:[#allocation7 + $0x5e0] sm:$0xff]  ;;  %v9646_v8 = vcombine.low %v156_v59, %v160_v60 }
  0xcd   :  { %1169 = vmatprep.subr.bf16.mxu0 %v9703_v9  ;;  %1210 = vmatprep.subr.bf16.mxu1 %v9705_v10  ;;  %v9648_v9 = vcombine.low %v157_v61, %v161_v62  ;;  %v9763_v10 = vcombine.high %v1373_v4, %v1377_v5  ;;  %v9891_v11 = vcombine.high %v1501_v6, %v1505_v7  ;;  %v1317_v59 = vld [vmem:[#allocation7] sm:$0xff] }
  0xce   :  { %v1321_v60 = vld [vmem:[#allocation7 + $0x20] sm:$0xff] }
  0xcf   :  { %1120 = vmatmul.mubr.bf16.vlgmr.msra.gmra.mxu0 %v11285_v16  ;;  %1161 = vmatmul.mubr.bf16.vlgmr.msra.gmra.mxu1 %v11285_v16  ;;  %v1445_v61 = vld [vmem:[#allocation7 + $0x400] sm:$0xff] }
  0xd0   :  { %1170 = vmatpush1.bf16.msra.mxu0 %v9702_v17  ;;  %1211 = vmatpush1.bf16.msra.mxu1 %v9704_v18  ;;  %v1497_v17 = vld [vmem:[#allocation7 + $0x5a0] sm:$0xff]  ;;  %v9762_v18 = vcombine.low %v1373_v4, %v1377_v5 }
  0xd1   :  { %1171 = vmatprep.subr.bf16.mxu0 %v9695_v19  ;;  %1212 = vmatprep.subr.bf16.mxu1 %v9697_v20  ;;  %v9890_v19 = vcombine.low %v1501_v6, %v1505_v7  ;;  %v9755_v20 = vcombine.high %v1365_v13, %v1369_v14  ;;  %v9883_v21 = vcombine.high %v1493_v15, %v1497_v17  ;;  %v1449_v62 = vld [vmem:[#allocation7 + $0x420] sm:$0xff] }
  0xd2   :  { %1201 = vmatprep.mubr.bf16.mxu0 %v11167_v0  ;;  %1242 = vmatprep.mubr.bf16.mxu1 %v11167_v0  ;;  %v9673_v0 = vcombine.high %v181_v38, %v185_v39  ;;  %v1469_v38 = vld [vmem:[#allocation7 + $0x4c0] sm:$0xff] }
  0xd3   :  { %v1473_v39 = vld [vmem:[#allocation7 + $0x4e0] sm:$0xff] }
  0xd4   :  { %1172 = vmatpush1.bf16.msra.mxu0 %v9694_v25  ;;  %1213 = vmatpush1.bf16.msra.mxu1 %v9696_v26  ;;  %v1489_v25 = vld [vmem:[#allocation7 + $0x560] sm:$0xff]  ;;  %v9754_v26 = vcombine.low %v1365_v13, %v1369_v14 }
  0xd5   :  { %1173 = vmatprep.subr.bf16.mxu0 %v9687_v27  ;;  %1214 = vmatprep.subr.bf16.mxu1 %v9689_v28  ;;  %v9882_v27 = vcombine.low %v1493_v15, %v1497_v17  ;;  %v9747_v28 = vcombine.high %v1357_v22, %v1361_v23  ;;  %v9875_v29 = vcombine.high %v1485_v24, %v1489_v25  ;;  %v1437_v4 = vld [vmem:[#allocation7 + $0x3c0] sm:$0xff] }
  0xd6   :  { %v1441_v5 = vld [vmem:[#allocation7 + $0x3e0] sm:$0xff] }
  0xd7   :  { %v1565_v6 = vld [vmem:[#allocation7 + $0x7c0] sm:$0xff] }
  0xd8   :  { %1174 = vmatpush1.bf16.msra.mxu0 %v9686_v12  ;;  %1215 = vmatpush1.bf16.msra.mxu1 %v9688_v33  ;;  %v1481_v12 = vld [vmem:[#allocation7 + $0x520] sm:$0xff]  ;;  %v9746_v33 = vcombine.low %v1357_v22, %v1361_v23 }
  0xd9   :  { %1175 = vmatprep.subr.bf16.mxu0 %v9679_v34  ;;  %1216 = vmatprep.subr.bf16.mxu1 %v9681_v35  ;;  %v9874_v34 = vcombine.low %v1485_v24, %v1489_v25  ;;  %v9739_v35 = vcombine.high %v1349_v30, %v1353_v31  ;;  %v1569_v7 = vld [vmem:[#allocation7 + $0x7e0] sm:$0xff] }
  0xda   :  { %v1429_v13 = vld [vmem:[#allocation7 + $0x380] sm:$0xff] }
  0xdb   :  { %v1433_v14 = vld [vmem:[#allocation7 + $0x3a0] sm:$0xff] }
  0xdc   :  { %1176 = vmatpush1.bf16.msra.mxu0 %v9678_v40  ;;  %1217 = vmatpush1.bf16.msra.mxu1 %v9680_v41  ;;  %v9738_v40 = vcombine.low %v1349_v30, %v1353_v31  ;;  %v9866_v41 = vcombine.low %v1477_v32, %v1481_v12  ;;  %v1557_v15 = vld [vmem:[#allocation7 + $0x780] sm:$0xff] }
  0xdd   :  { %1177 = vmatprep.subr.bf16.mxu0 %v9671_v42  ;;  %1218 = vmatprep.subr.bf16.mxu1 %v9673_v0  ;;  %v9731_v42 = vcombine.high %v1341_v36, %v1345_v37  ;;  %v9859_v0 = vcombine.high %v1469_v38, %v1473_v39  ;;  %v1561_v17 = vld [vmem:[#allocation7 + $0x7a0] sm:$0xff] }
  0xde   :  { %v1421_v22 = vld [vmem:[#allocation7 + $0x340] sm:$0xff] }
  0xdf   :  { %v1425_v23 = vld [vmem:[#allocation7 + $0x360] sm:$0xff] }
  0xe0   :  { %1178 = vmatpush1.bf16.msra.mxu0 %v9670_v47  ;;  %1219 = vmatpush1.bf16.msra.mxu1 %v9672_v48  ;;  %v9730_v47 = vcombine.low %v1341_v36, %v1345_v37  ;;  %v9858_v48 = vcombine.low %v1469_v38, %v1473_v39  ;;  %v1549_v24 = vld [vmem:[#allocation7 + $0x740] sm:$0xff] }
  0xe1   :  { %1179 = vmatprep.subr.bf16.mxu0 %v9663_v49  ;;  %1220 = vmatprep.subr.bf16.mxu1 %v9665_v50  ;;  %v9723_v49 = vcombine.high %v1333_v43, %v1337_v44  ;;  %v9851_v50 = vcombine.high %v1461_v45, %v1465_v46  ;;  %v1553_v25 = vld [vmem:[#allocation7 + $0x760] sm:$0xff] }
  0xe2   :  { %v1413_v30 = vld [vmem:[#allocation7 + $0x300] sm:$0xff] }
  0xe3   :  { %v1417_v31 = vld [vmem:[#allocation7 + $0x320] sm:$0xff] }
  0xe4   :  { %1180 = vmatpush1.bf16.msra.mxu0 %v9662_v55  ;;  %1221 = vmatpush1.bf16.msra.mxu1 %v9664_v56  ;;  %v9722_v55 = vcombine.low %v1333_v43, %v1337_v44  ;;  %v9850_v56 = vcombine.low %v1461_v45, %v1465_v46  ;;  %v1405_v36 = vld [vmem:[#allocation7 + $0x2c0] sm:$0xff] }
  0xe5   :  { %1181 = vmatprep.subr.bf16.mxu0 %v9655_v57  ;;  %1222 = vmatprep.subr.bf16.mxu1 %v9657_v58  ;;  %v9715_v57 = vcombine.high %v1325_v51, %v1329_v52  ;;  %v9843_v58 = vcombine.high %v1453_v53, %v1457_v54  ;;  %v1409_v37 = vld [vmem:[#allocation7 + $0x2e0] sm:$0xff] }
  0xe6   :  { %v1533_v38 = vld [vmem:[#allocation7 + $0x6c0] sm:$0xff]  ;;  %v9795_v44 = vcombine.high %v1405_v36, %v1409_v37 }
  0xe7   :  { %v1537_v39 = vld [vmem:[#allocation7 + $0x6e0] sm:$0xff] }
  0xe8   :  { %1182 = vmatpush1.bf16.msra.mxu0 %v9654_v63  ;;  %1223 = vmatpush1.bf16.msra.mxu1 %v9656_v1  ;;  %v9714_v63 = vcombine.low %v1325_v51, %v1329_v52  ;;  %v9842_v1 = vcombine.low %v1453_v53, %v1457_v54  ;;  %v11299_v45 = vld [vmem:[#allocation7 + $0xde0] sm:$0xff]  ;;  %v9923_v46 = vcombine.high %v1533_v38, %v1537_v39 }
  0xe9   :  { %1183 = vmatprep.subr.bf16.mxu0 %v9647_v2  ;;  %1224 = vmatprep.subr.bf16.mxu1 %v9649_v3  ;;  %v9707_v2 = vcombine.high %v1317_v59, %v1321_v60  ;;  %v9835_v3 = vcombine.high %v1445_v61, %v1449_v62  ;;  %v1525_v51 = vld [vmem:[#allocation7 + $0x680] sm:$0xff]  ;;  %v9794_v53 = vcombine.low %v1405_v36, %v1409_v37 }
  0xea   :  { %v1529_v52 = vld [vmem:[#allocation7 + $0x6a0] sm:$0xff]  ;;  %v9922_v54 = vcombine.low %v1533_v38, %v1537_v39 }
  0xec   :  { %1184 = vmatpush1.bf16.msra.mxu0 %v9646_v8  ;;  %1225 = vmatpush1.bf16.msra.mxu1 %v9648_v9  ;;  %v9706_v8 = vcombine.low %v1317_v59, %v1321_v60  ;;  %v9834_v9 = vcombine.low %v1445_v61, %v1449_v62  ;;  %v1517_v59 = vld [vmem:[#allocation7 + $0x640] sm:$0xff]  ;;  %v9914_v62 = vcombine.low %v1525_v51, %v1529_v52 }
  0xed   :  { %4431 = vmatprep.subr.bf16.mxu0 %v9763_v10  ;;  %4472 = vmatprep.subr.bf16.mxu1 %v9891_v11  ;;  %v9827_v10 = vcombine.high %v1437_v4, %v1441_v5  ;;  %v9955_v11 = vcombine.high %v1565_v6, %v1569_v7  ;;  %v1521_v60 = vld [vmem:[#allocation7 + $0x660] sm:$0xff] }
  0xef   :  { %1202 = vmatmul.mubr.bf16.vlgmr.msra.gmra.mxu0 %v11285_v16  ;;  %1243 = vmatmul.mubr.bf16.vlgmr.msra.gmra.mxu1 %v11285_v16  ;;  %v9867_v16 = vcombine.high %v1477_v32, %v1481_v12  ;;  %v1541_v32 = vld [vmem:[#allocation7 + $0x700] sm:$0xff] }
  0xf0   :  { %4432 = vmatpush1.bf16.msra.mxu0 %v9762_v18  ;;  %4473 = vmatpush1.bf16.msra.mxu1 %v9890_v19  ;;  %v9826_v18 = vcombine.low %v1437_v4, %v1441_v5  ;;  %v9954_v19 = vcombine.low %v1565_v6, %v1569_v7  ;;  %v1545_v12 = vld [vmem:[#allocation7 + $0x720] sm:$0xff]  ;;  %v9906_v7 = vcombine.low %v1517_v59, %v1521_v60 }
  0xf1   :  { %4433 = vmatprep.subr.bf16.mxu0 %v9755_v20  ;;  %4474 = vmatprep.subr.bf16.mxu1 %v9883_v21  ;;  %v9819_v20 = vcombine.high %v1429_v13, %v1433_v14  ;;  %v9947_v21 = vcombine.high %v1557_v15, %v1561_v17  ;;  %v9930_v43 = vcombine.low %v1541_v32, %v1545_v12  ;;  %v1509_v4 = vld [vmem:[#allocation7 + $0x600] sm:$0xff] }
  0xf2   :  { %v1513_v5 = vld [vmem:[#allocation7 + $0x620] sm:$0xff] }
  0xf4   :  { %4434 = vmatpush1.bf16.msra.mxu0 %v9754_v26  ;;  %4475 = vmatpush1.bf16.msra.mxu1 %v9882_v27  ;;  %v9818_v26 = vcombine.low %v1429_v13, %v1433_v14  ;;  %v9946_v27 = vcombine.low %v1557_v15, %v1561_v17 }
  0xf5   :  { %4435 = vmatprep.subr.bf16.mxu0 %v9747_v28  ;;  %4476 = vmatprep.subr.bf16.mxu1 %v9875_v29  ;;  %v9811_v28 = vcombine.high %v1421_v22, %v1425_v23  ;;  %v9939_v29 = vcombine.high %v1549_v24, %v1553_v25 }
  0xf8   :  { %4436 = vmatpush1.bf16.msra.mxu0 %v9746_v33  ;;  %4477 = vmatpush1.bf16.msra.mxu1 %v9874_v34  ;;  %v9810_v33 = vcombine.low %v1421_v22, %v1425_v23  ;;  %v9938_v34 = vcombine.low %v1549_v24, %v1553_v25 }
  0xf9   :  { %4437 = vmatprep.subr.bf16.mxu0 %v9739_v35  ;;  %4478 = vmatprep.subr.bf16.mxu1 %v9867_v16  ;;  %v9803_v35 = vcombine.high %v1413_v30, %v1417_v31  ;;  %v9931_v16 = vcombine.high %v1541_v32, %v1545_v12  ;;  %v1253_v32 = vlaneseq }
  0xfb   :  { %v11317_v12 = vshrl.u32 %v1253_v32, 7  ;;  %v1597_v32 = vld [vmem:[#allocation7 + $0x8c0] sm:$0xff] }
  0xfc   :  { %4438 = vmatpush1.bf16.msra.mxu0 %v9738_v40  ;;  %4479 = vmatpush1.bf16.msra.mxu1 %v9866_v41  ;;  %v9802_v40 = vcombine.low %v1413_v30, %v1417_v31  ;;  %v11293_v41 = vld [vmem:[#allocation7 + $0x9c0] sm:$0xff] }
  0xfd   :  { %4439 = vmatprep.subr.bf16.mxu0 %v9731_v42  ;;  %4480 = vmatprep.subr.bf16.mxu1 %v9859_v0  ;;  %v11295_v42 = vld [vmem:[#allocation7 + $0x9e0] sm:$0xff]  ;;  %v11331_v36 = vsub.s32 3, %v11317_v12 }
  0xfe   :  { %v11297_v0 = vld [vmem:[#allocation7 + $0xdc0] sm:$0xff]  ;;  %v10019_v13 = vcombine.high %v11293_v41, %v11295_v42 }
  0xff   :  { %v10147_v14 = vcombine.high %v11297_v0, %v11299_v45 }
 0x100   :  { %4440 = vmatpush1.bf16.msra.mxu0 %v9730_v47  ;;  %4481 = vmatpush1.bf16.msra.mxu1 %v9858_v48  ;;  %v1397_v47 = vld [vmem:[#allocation7 + $0x280] sm:$0xff] }
 0x101   :  { %4441 = vmatprep.subr.bf16.mxu0 %v9723_v49  ;;  %4482 = vmatprep.subr.bf16.mxu1 %v9851_v50  ;;  %v1401_v48 = vld [vmem:[#allocation7 + $0x2a0] sm:$0xff]  ;;  %v10018_v49 = vcombine.low %v11293_v41, %v11295_v42  ;;  %v10146_v50 = vcombine.low %v11297_v0, %v11299_v45 }
 0x102   :  { %v9786_v61 = vcombine.low %v1397_v47, %v1401_v48  ;;  %v1601_v0 = vld [vmem:[#allocation7 + $0x8e0] sm:$0xff] }
 0x103   :  { %v1725_v45 = vld [vmem:[#allocation7 + $0xcc0] sm:$0xff] }
 0x104   :  { %4442 = vmatpush1.bf16.msra.mxu0 %v9722_v55  ;;  %4483 = vmatpush1.bf16.msra.mxu1 %v9850_v56  ;;  %v9787_v55 = vcombine.high %v1397_v47, %v1401_v48  ;;  %v9915_v56 = vcombine.high %v1525_v51, %v1529_v52 }
 0x105   :  { %4443 = vmatprep.subr.bf16.mxu0 %v9715_v57  ;;  %4484 = vmatprep.subr.bf16.mxu1 %v9843_v58  ;;  %v1389_v57 = vld [vmem:[#allocation7 + $0x240] sm:$0xff] }
 0x106   :  { %v1393_v58 = vld [vmem:[#allocation7 + $0x260] sm:$0xff] }
 0x107   :  { %v9778_v6 = vcombine.low %v1389_v57, %v1393_v58 }
 0x108   :  { %4444 = vmatpush1.bf16.msra.mxu0 %v9714_v63  ;;  %4485 = vmatpush1.bf16.msra.mxu1 %v9842_v1  ;;  %v9779_v63 = vcombine.high %v1389_v57, %v1393_v58  ;;  %v9907_v1 = vcombine.high %v1517_v59, %v1521_v60 }
 0x109   :  { %4445 = vmatprep.subr.bf16.mxu0 %v9707_v2  ;;  %4486 = vmatprep.subr.bf16.mxu1 %v9835_v3  ;;  %v1381_v2 = vld [vmem:[#allocation7 + $0x200] sm:$0xff] }
 0x10a   :  { %v1385_v3 = vld [vmem:[#allocation7 + $0x220] sm:$0xff] }
 0x10c   :  { %4446 = vmatpush1.bf16.msra.mxu0 %v9706_v8  ;;  %4487 = vmatpush1.bf16.msra.mxu1 %v9834_v9  ;;  %v9771_v8 = vcombine.high %v1381_v2, %v1385_v3  ;;  %v9899_v9 = vcombine.high %v1509_v4, %v1513_v5 }
 0x10d   :  { %4447 = vmatprep.subr.bf16.mxu0 %v9827_v10  ;;  %4488 = vmatprep.subr.bf16.mxu1 %v9955_v11  ;;  %v9770_v10 = vcombine.low %v1381_v2, %v1385_v3  ;;  %v9898_v11 = vcombine.low %v1509_v4, %v1513_v5  ;;  %v1621_v2 = vld [vmem:[#allocation7 + $0x980] sm:$0xff] }
 0x10e   :  { %v1625_v3 = vld [vmem:[#allocation7 + $0x9a0] sm:$0xff] }
 0x10f   :  { %v1749_v5 = vld [vmem:[#allocation7 + $0xd80] sm:$0xff] }
 0x110   :  { %4448 = vmatpush2.bf16.msra.mxu0 %v9826_v18  ;;  %4489 = vmatpush2.bf16.msra.mxu1 %v9954_v19 }
 0x111   :  { %4449 = vmatprep.subr.bf16.mxu0 %v9819_v20  ;;  %4490 = vmatprep.subr.bf16.mxu1 %v9947_v21 }
 0x114   :  { %4450 = vmatpush2.bf16.msra.mxu0 %v9818_v26  ;;  %4491 = vmatpush2.bf16.msra.mxu1 %v9946_v27 }
 0x115   :  { %4451 = vmatprep.subr.bf16.mxu0 %v9811_v28  ;;  %4492 = vmatprep.subr.bf16.mxu1 %v9939_v29 }
 0x118   :  { %4452 = vmatpush2.bf16.msra.mxu0 %v9810_v33  ;;  %4493 = vmatpush2.bf16.msra.mxu1 %v9938_v34  ;;  %v11320_v33 = vsub.s32 0, %v11317_v12  ;;  %v11322_v34 = vld [vmem:[#allocation6] sm:$0xff] }
 0x119   :  { %4453 = vmatprep.subr.bf16.mxu0 %v9803_v35  ;;  %4494 = vmatprep.subr.bf16.mxu1 %v9931_v16  ;;  %v11325_v35 = vsub.s32 2, %v11317_v12  ;;  %v11328_v16 = vsub.s32 1, %v11317_v12  ;;  %v1268_v48 = vrot.slane %v11322_v34, %v11331_v36 }
 0x11a   :  { %v1256_v37 = vrot.slane %v11322_v34, %v11320_v33 }
 0x11b   :  { %v1264_v39 = vrot.slane %v11322_v34, %v11325_v35 }
 0x11c   :  { %4454 = vmatpush2.bf16.msra.mxu0 %v9802_v40  ;;  %4495 = vmatpush2.bf16.msra.mxu1 %v9930_v43 }
 0x11d   :  { %4455 = vmatprep.subr.bf16.mxu0 %v9795_v44  ;;  %4496 = vmatprep.subr.bf16.mxu1 %v9923_v46  ;;  %v1260_v44 = vrot.slane %v11322_v34, %v11328_v16 }
 0x120   :  { %4456 = vmatpush2.bf16.msra.mxu0 %v9794_v53  ;;  %4497 = vmatpush2.bf16.msra.mxu1 %v9922_v54 }
 0x121   :  { %4457 = vmatprep.subr.bf16.mxu0 %v9787_v55  ;;  %4498 = vmatprep.subr.bf16.mxu1 %v9915_v56 }
 0x124   :  { %4458 = vmatpush2.bf16.msra.mxu0 %v9786_v61  ;;  %4499 = vmatpush2.bf16.msra.mxu1 %v9914_v62 }
 0x125   :  { %4459 = vmatprep.subr.bf16.mxu0 %v9779_v63  ;;  %4500 = vmatprep.subr.bf16.mxu1 %v9907_v1 }
 0x128   :  { %4460 = vmatpush2.bf16.msra.mxu0 %v9778_v6  ;;  %4501 = vmatpush2.bf16.msra.mxu1 %v9906_v7  ;;  %v1753_v6 = vld [vmem:[#allocation7 + $0xda0] sm:$0xff] }
 0x129   :  { %4461 = vmatprep.subr.bf16.mxu0 %v9771_v8  ;;  %4502 = vmatprep.subr.bf16.mxu1 %v9899_v9 }
 0x12c   :  { %4462 = vmatpush2.bf16.msra.mxu0 %v9770_v10  ;;  %4503 = vmatpush2.bf16.msra.mxu1 %v9898_v11  ;;  %v10011_v10 = vcombine.high %v1621_v2, %v1625_v3 }
 0x12d   :  { %4513 = vmatprep.subr.bf16.mxu0 %v10019_v13  ;;  %4554 = vmatprep.subr.bf16.mxu1 %v10147_v14  ;;  %v10139_v13 = vcombine.high %v1749_v5, %v1753_v6  ;;  %v1613_v14 = vld [vmem:[#allocation7 + $0x940] sm:$0xff] }
 0x14f   :  { %v637_v15 = vpop.f32.mrf.mxu0  ;;  %v678_v17 = vpop.f32.mrf.mxu1 }
 0x151   :  { %v639_v18 = vpop.f32.mrf.mxu0  ;;  %v680_v19 = vpop.f32.mrf.mxu1 }
 0x153   :  { %v641_v20 = vpop.f32.mrf.mxu0  ;;  %v682_v21 = vpop.f32.mrf.mxu1 }
 0x154   :  { %v10138_v20 = vcombine.low %v1749_v5, %v1753_v6  ;;  %v1577_v5 = vld [vmem:[#allocation7 + $0x820] sm:$0xff] }
 0x155   :  { %v642_v22 = vpop.f32.mrf.mxu0  ;;  %v683_v23 = vpop.f32.mrf.mxu1 }
 0x156   :  { %v1605_v23 = vld [vmem:[#allocation7 + $0x900] sm:$0xff] }
 0x16f   :  { %v11309_v24 = vpop.f32.mrf.mxu0  ;;  %v11311_v25 = vpop.f32.mrf.mxu1 }
 0x171   :  { %v11313_v26 = vpop.f32.mrf.mxu0  ;;  %v11315_v27 = vpop.f32.mrf.mxu1 }
 0x173   :  { %v723_v28 = vpop.f32.mrf.mxu0  ;;  %v764_v29 = vpop.f32.mrf.mxu1 }
 0x174   :  { %v1609_v28 = vld [vmem:[#allocation7 + $0x920] sm:$0xff] }
 0x175   :  { %v724_v30 = vpop.f32.mrf.mxu0  ;;  %v765_v31 = vpop.f32.mrf.mxu1  ;;  %v1733_v29 = vld [vmem:[#allocation7 + $0xd00] sm:$0xff]  ;;  %v9995_v42 = vcombine.high %v1605_v23, %v1609_v28 }
 0x176   :  { %v1737_v30 = vld [vmem:[#allocation7 + $0xd20] sm:$0xff] }
 0x18f   :  { %v1121_v38 = vpop.f32.mrf.mxu0  ;;  %v1162_v43 = vpop.f32.mrf.mxu1 }
 0x190   :  { %v1122_v40 = vadd.f32 %v1121_v38, %v637_v15  ;;  %v1163_v46 = vadd.f32 %v1162_v43, %v678_v17  ;;  %v1617_v15 = vld [vmem:[#allocation7 + $0x960] sm:$0xff]  ;;  %v10122_v38 = vcombine.low %v1733_v29, %v1737_v30 }
 0x191   :  { %v1123_v47 = vpop.f32.mrf.mxu0  ;;  %v1164_v53 = vpop.f32.mrf.mxu1  ;;  %v1741_v17 = vld [vmem:[#allocation7 + $0xd40] sm:$0xff]  ;;  %v10003_v21 = vcombine.high %v1613_v14, %v1617_v15  ;;  %v10002_v31 = vcombine.low %v1613_v14, %v1617_v15 }
 0x192   :  { %v1293_v51 = vadd.f32 %v1256_v37, %v1122_v40  ;;  %v1124_v52 = vadd.f32 %v1123_v47, %v639_v18  ;;  %v1295_v54 = vadd.f32 %v1264_v39, %v1163_v46  ;;  %v1165_v55 = vadd.f32 %v1164_v53, %v680_v19  ;;  %v1745_v18 = vld [vmem:[#allocation7 + $0xd60] sm:$0xff] }
 0x193   :  { %v1125_v56 = vpop.f32.mrf.mxu0  ;;  %v1166_v58 = vpop.f32.mrf.mxu1  ;;  %v10010_v19 = vcombine.low %v1621_v2, %v1625_v3  ;;  %v10131_v22 = vcombine.high %v1741_v17, %v1745_v18  ;;  %v10130_v41 = vcombine.low %v1741_v17, %v1745_v18  ;;  %v9994_v37 = vcombine.low %v1605_v23, %v1609_v28  ;;  %v1589_v43 = vld [vmem:[#allocation7 + $0x880] sm:$0xff] }
 0x194   :  { %v1294_v57 = vadd.f32 %v1260_v44, %v1124_v52  ;;  %v1301_v59 = vmax.f32 %v1293_v51, 0.0  ;;  %v1296_v60 = vadd.f32 %v1268_v48, %v1165_v55  ;;  %v1303_v62 = vmax.f32 %v1295_v54, 0.0  ;;  %v1593_v44 = vld [vmem:[#allocation7 + $0x8a0] sm:$0xff] }
 0x195   :  { %v1126_v61 = vpop.f32.mrf.mxu0  ;;  %v1167_v1 = vpop.f32.mrf.mxu1  ;;  %v9987_v39 = vcombine.high %v1597_v32, %v1601_v0  ;;  %v1717_v46 = vld [vmem:[#allocation7 + $0xc80] sm:$0xff]  ;;  %v9986_v48 = vcombine.low %v1597_v32, %v1601_v0  ;;  %v9979_v52 = vcombine.high %v1589_v43, %v1593_v44  ;;  %v11360_v54 = vsub.s32 4, %v11317_v12 }
 0x196   :  { %v1302_v63 = vmax.f32 %v1294_v57, 0.0  ;;  %v1304_v4 = vmax.f32 %v1296_v60, 0.0  ;;  %v11343_v8 = vpack.c.bf16 %v1301_v59, %v1301_v59  ;;  %v11347_v11 = vpack.c.bf16 %v1303_v62, %v1303_v62  ;;  %v1721_v47 = vld [vmem:[#allocation7 + $0xca0] sm:$0xff] }
 0x197   :  { %v10107_v53 = vcombine.high %v1717_v46, %v1721_v47  ;;  %v1581_v55 = vld [vmem:[#allocation7 + $0x840] sm:$0xff]  ;;  %v11363_v57 = vsub.s32 6, %v11317_v12  ;;  %v9978_v60 = vcombine.low %v1589_v43, %v1593_v44  ;;  %v11366_v61 = vsub.s32 5, %v11317_v12 }
 0x198   :  { %v11341_v7 = vpack.c.bf16 %v1302_v63, %v1302_v63  ;;  %v11345_v9 = vpack.c.bf16 %v1304_v4, %v1304_v4  ;;  %v1585_v56 = vld [vmem:[#allocation7 + $0x860] sm:$0xff]  ;;  %v10106_v62 = vcombine.low %v1717_v46, %v1721_v47  ;;  %v11369_v63 = vsub.s32 7, %v11317_v12 }
 0x199   :  { %v1709_v58 = vld [vmem:[#allocation7 + $0xc40] sm:$0xff]  ;;  %v9971_v1 = vcombine.high %v1581_v55, %v1585_v56  ;;  %v1272_v2 = vrot.slane %v11322_v34, %v11360_v54  ;;  %v1276_v12 = vrot.slane %v11322_v34, %v11366_v61  ;;  %v9970_v18 = vcombine.low %v1581_v55, %v1585_v56 }
 0x19a   :  { %4463 = vmatprep.mubr.bf16.mxu0 %v11341_v7  ;;  %4504 = vmatprep.mubr.bf16.mxu1 %v11345_v9  ;;  %v1713_v59 = vld [vmem:[#allocation7 + $0xc60] sm:$0xff] }
 0x19b   :  { %4464 = vmatmul.mubr.bf16.vlgmr.msra.gmra.mxu0 %v11343_v8  ;;  %4505 = vmatmul.mubr.bf16.vlgmr.msra.gmra.mxu1 %v11347_v11  ;;  %v10099_v3 = vcombine.high %v1709_v58, %v1713_v59  ;;  %v1573_v4 = vld [vmem:[#allocation7 + $0x800] sm:$0xff] }
 0x19c   :  { %4514 = vmatpush1.bf16.msra.mxu0 %v10018_v49  ;;  %4555 = vmatpush1.bf16.msra.mxu1 %v10146_v50  ;;  %v10123_v49 = vcombine.high %v1733_v29, %v1737_v30  ;;  %v1729_v50 = vld [vmem:[#allocation7 + $0xce0] sm:$0xff]  ;;  %v9963_v23 = vcombine.high %v1573_v4, %v1577_v5 }
 0x19d   :  { %4515 = vmatprep.subr.bf16.mxu0 %v10011_v10  ;;  %4556 = vmatprep.subr.bf16.mxu1 %v10139_v13  ;;  %v10115_v40 = vcombine.high %v1725_v45, %v1729_v50  ;;  %v10114_v51 = vcombine.low %v1725_v45, %v1729_v50  ;;  %v1280_v10 = vrot.slane %v11322_v34, %v11363_v57  ;;  %v1701_v13 = vld [vmem:[#allocation7 + $0xc00] sm:$0xff] }
 0x19e   :  { %v1705_v14 = vld [vmem:[#allocation7 + $0xc20] sm:$0xff] }
 0x19f   :  { %v10091_v30 = vcombine.high %v1701_v13, %v1705_v14  ;;  %v1825_v32 = vld [vmem:[#allocation7 + $0xfe0] sm:$0xff] }
 0x1a0   :  { %4516 = vmatpush1.bf16.msra.mxu0 %v10010_v19  ;;  %4557 = vmatpush1.bf16.msra.mxu1 %v10138_v20  ;;  %v10098_v19 = vcombine.low %v1709_v58, %v1713_v59  ;;  %v1685_v44 = vld [vmem:[#allocation7 + $0xb80] sm:$0xff] }
 0x1a1   :  { %4517 = vmatprep.subr.bf16.mxu0 %v10003_v21  ;;  %4558 = vmatprep.subr.bf16.mxu1 %v10131_v22  ;;  %v1284_v22 = vrot.slane %v11322_v34, %v11369_v63  ;;  %v9962_v34 = vcombine.low %v1573_v4, %v1577_v5  ;;  %v1689_v46 = vld [vmem:[#allocation7 + $0xba0] sm:$0xff] }
 0x1a2   :  { %v10075_v58 = vcombine.high %v1685_v44, %v1689_v46 }
 0x1a4   :  { %4518 = vmatpush1.bf16.msra.mxu0 %v10002_v31  ;;  %4559 = vmatpush1.bf16.msra.mxu1 %v10130_v41  ;;  %v1693_v31 = vld [vmem:[#allocation7 + $0xbc0] sm:$0xff] }
 0x1a5   :  { %4519 = vmatprep.subr.bf16.mxu0 %v9995_v42  ;;  %4560 = vmatprep.subr.bf16.mxu1 %v10123_v49  ;;  %v1697_v41 = vld [vmem:[#allocation7 + $0xbe0] sm:$0xff] }
 0x1a6   :  { %v1821_v49 = vld [vmem:[#allocation7 + $0xfc0] sm:$0xff] }
 0x1a7   :  { %v10211_v43 = vcombine.high %v1821_v49, %v1825_v32  ;;  %v10210_v56 = vcombine.low %v1821_v49, %v1825_v32  ;;  %v1781_v49 = vld [vmem:[#allocation7 + $0xe80] sm:$0xff] }
 0x1a8   :  { %4520 = vmatpush1.bf16.msra.mxu0 %v9994_v37  ;;  %4561 = vmatpush1.bf16.msra.mxu1 %v10122_v38  ;;  %v10083_v38 = vcombine.high %v1693_v31, %v1697_v41  ;;  %v1785_v32 = vld [vmem:[#allocation7 + $0xea0] sm:$0xff] }
 0x1a9   :  { %4521 = vmatprep.subr.bf16.mxu0 %v9987_v39  ;;  %4562 = vmatprep.subr.bf16.mxu1 %v10115_v40 }
 0x1ac   :  { %4522 = vmatpush1.bf16.msra.mxu0 %v9986_v48  ;;  %4563 = vmatpush1.bf16.msra.mxu1 %v10114_v51  ;;  %v1813_v48 = vld [vmem:[#allocation7 + $0xf80] sm:$0xff] }
 0x1ad   :  { %4523 = vmatprep.subr.bf16.mxu0 %v9979_v52  ;;  %4564 = vmatprep.subr.bf16.mxu1 %v10107_v53  ;;  %v1817_v51 = vld [vmem:[#allocation7 + $0xfa0] sm:$0xff]  ;;  %v10082_v53 = vcombine.low %v1693_v31, %v1697_v41 }
 0x1ae   :  { %v10203_v59 = vcombine.high %v1813_v48, %v1817_v51  ;;  %v10202_v4 = vcombine.low %v1813_v48, %v1817_v51  ;;  %v1653_v41 = vld [vmem:[#allocation7 + $0xa80] sm:$0xff] }
 0x1af   :  { %v1203_v6 = vpop.f32.mrf.mxu0  ;;  %v1244_v17 = vpop.f32.mrf.mxu1  ;;  %v1765_v48 = vld [vmem:[#allocation7 + $0xe00] sm:$0xff] }
 0x1b0   :  { %v1204_v15 = vadd.f32 %v1203_v6, %v11309_v24  ;;  %4524 = vmatpush1.bf16.msra.mxu0 %v9978_v60  ;;  %v1245_v20 = vadd.f32 %v1244_v17, %v11311_v25  ;;  %4565 = vmatpush1.bf16.msra.mxu1 %v10106_v62  ;;  %v1677_v60 = vld [vmem:[#allocation7 + $0xb40] sm:$0xff] }
 0x1b1   :  { %v1205_v21 = vpop.f32.mrf.mxu0  ;;  %4525 = vmatprep.subr.bf16.mxu0 %v9971_v1  ;;  %v1246_v29 = vpop.f32.mrf.mxu1  ;;  %4566 = vmatprep.subr.bf16.mxu1 %v10099_v3  ;;  %v1681_v62 = vld [vmem:[#allocation7 + $0xb60] sm:$0xff]  ;;  %v10074_v3 = vcombine.low %v1685_v44, %v1689_v46 }
 0x1b2   :  { %v11381_v28 = vadd.f32 %v1272_v2, %v1204_v15  ;;  %v1206_v24 = vadd.f32 %v1205_v21, %v11313_v26  ;;  %v11384_v42 = vadd.f32 %v1280_v10, %v1245_v20  ;;  %v1247_v25 = vadd.f32 %v1246_v29, %v11315_v27  ;;  %v1805_v1 = vld [vmem:[#allocation7 + $0xf40] sm:$0xff] }
 0x1b3   :  { %v1207_v0 = vpop.f32.mrf.mxu0  ;;  %v1248_v50 = vpop.f32.mrf.mxu1  ;;  %v10090_v26 = vcombine.low %v1701_v13, %v1705_v14  ;;  %v1809_v2 = vld [vmem:[#allocation7 + $0xf60] sm:$0xff]  ;;  %v10067_v5 = vcombine.high %v1677_v60, %v1681_v62  ;;  %v10066_v17 = vcombine.low %v1677_v60, %v1681_v62  ;;  %v1374_v60 = vld [vmem:[#allocation7 + $0x1c8] sm:$0xff] }
 0x1b4   :  { %v1298_v45 = vadd.f32 %v1276_v12, %v1206_v24  ;;  %4526 = vmatpush1.bf16.msra.mxu0 %v9970_v18  ;;  %v1300_v37 = vadd.f32 %v1284_v22, %v1247_v25  ;;  %4567 = vmatpush1.bf16.msra.mxu1 %v10098_v19  ;;  %v10195_v6 = vcombine.high %v1805_v1, %v1809_v2  ;;  %v1669_v10 = vld [vmem:[#allocation7 + $0xb00] sm:$0xff]  ;;  %v1378_v62 = vld [vmem:[#allocation7 + $0x1e8] sm:$0xff] }
 0x1b5   :  { %4527 = vmatprep.subr.bf16.mxu0 %v9963_v23  ;;  %v1208_v39 = vpop.f32.mrf.mxu0  ;;  %4568 = vmatprep.subr.bf16.mxu1 %v10091_v30  ;;  %v1249_v47 = vpop.f32.mrf.mxu1  ;;  %v1673_v13 = vld [vmem:[#allocation7 + $0xb20] sm:$0xff]  ;;  %v10194_v12 = vcombine.low %v1805_v1, %v1809_v2  ;;  %v10171_v50 = vcombine.high %v1781_v49, %v1785_v32  ;;  %v1502_v1 = vld [vmem:[#allocation7 + $0x5c8] sm:$0xff] }
 0x1b6   :  { %v1306_v40 = vmax.f32 %v1298_v45, 0.0  ;;  %v1308_v27 = vmax.f32 %v1300_v37, 0.0  ;;  %v1797_v14 = vld [vmem:[#allocation7 + $0xf00] sm:$0xff]  ;;  %v10059_v18 = vcombine.high %v1669_v10, %v1673_v13  ;;  %v10058_v24 = vcombine.low %v1669_v10, %v1673_v13  ;;  %v1506_v2 = vld [vmem:[#allocation7 + $0x5e8] sm:$0xff] }
 0x1b7   :  { %v1801_v15 = vld [vmem:[#allocation7 + $0xf20] sm:$0xff]  ;;  %v1307_v10 = vmax.f32 %v11384_v42, 0.0  ;;  %v9893_v13 = vcombine.high %v1502_v1, %v1506_v2 }
 0x1b8   :  { %v11387_v52 = vpack.c.bf16 %v1306_v40, %v1306_v40  ;;  %4528 = vmatpush1.bf16.msra.mxu0 %v9962_v34  ;;  %v11389_v55 = vpack.c.bf16 %v1308_v27, %v1308_v27  ;;  %4569 = vmatpush1.bf16.msra.mxu1 %v10090_v26  ;;  %v10187_v19 = vcombine.high %v1797_v14, %v1801_v15  ;;  %v1661_v20 = vld [vmem:[#allocation7 + $0xac0] sm:$0xff] }
 0x1b9   :  { %4529 = vmatprep.subr.bf16.mxu0 %v10083_v38  ;;  %4570 = vmatprep.subr.bf16.mxu1 %v10211_v43  ;;  %v1665_v21 = vld [vmem:[#allocation7 + $0xae0] sm:$0xff]  ;;  %v10186_v29 = vcombine.low %v1797_v14, %v1801_v15  ;;  %v10170_v43 = vcombine.low %v1781_v49, %v1785_v32  ;;  %v1366_v14 = vld [vmem:[#allocation7 + $0x188] sm:$0xff] }
 0x1ba   :  { %4545 = vmatprep.mubr.bf16.mxu0 %v11387_v52  ;;  %4586 = vmatprep.mubr.bf16.mxu1 %v11389_v55  ;;  %v1789_v22 = vld [vmem:[#allocation7 + $0xec0] sm:$0xff]  ;;  %v10051_v30 = vcombine.high %v1661_v20, %v1665_v21  ;;  %v10050_v0 = vcombine.low %v1661_v20, %v1665_v21  ;;  %v1370_v15 = vld [vmem:[#allocation7 + $0x1a8] sm:$0xff]  ;;  %v9892_v20 = vcombine.low %v1502_v1, %v1506_v2 }
 0x1bb   :  { %v1793_v23 = vld [vmem:[#allocation7 + $0xee0] sm:$0xff]  ;;  %v9757_v21 = vcombine.high %v1366_v14, %v1370_v15  ;;  %v1350_v49 = vld [vmem:[#allocation7 + $0x108] sm:$0xff] }
 0x1bc   :  { %4530 = vmatpush2.bf16.msra.mxu0 %v10082_v53  ;;  %4571 = vmatpush2.bf16.msra.mxu1 %v10210_v56  ;;  %v10179_v31 = vcombine.high %v1789_v22, %v1793_v23  ;;  %v1657_v25 = vld [vmem:[#allocation7 + $0xaa0] sm:$0xff]  ;;  %v10178_v45 = vcombine.low %v1789_v22, %v1793_v23  ;;  %v1358_v22 = vld [vmem:[#allocation7 + $0x148] sm:$0xff] }
 0x1bd   :  { %4531 = vmatprep.subr.bf16.mxu0 %v10075_v58  ;;  %4572 = vmatprep.subr.bf16.mxu1 %v10203_v59  ;;  %v10043_v34 = vcombine.high %v1653_v41, %v1657_v25  ;;  %v1645_v37 = vld [vmem:[#allocation7 + $0xa40] sm:$0xff]  ;;  %v10042_v40 = vcombine.low %v1653_v41, %v1657_v25  ;;  %v1362_v23 = vld [vmem:[#allocation7 + $0x168] sm:$0xff] }
 0x1be   :  { %v1649_v26 = vld [vmem:[#allocation7 + $0xa60] sm:$0xff]  ;;  %v9749_v41 = vcombine.high %v1358_v22, %v1362_v23  ;;  %v1354_v32 = vld [vmem:[#allocation7 + $0x128] sm:$0xff] }
 0x1bf   :  { %v1773_v38 = vld [vmem:[#allocation7 + $0xe40] sm:$0xff]  ;;  %v10035_v44 = vcombine.high %v1645_v37, %v1649_v26  ;;  %v10034_v53 = vcombine.low %v1645_v37, %v1649_v26  ;;  %v9741_v37 = vcombine.high %v1350_v49, %v1354_v32  ;;  %v1326_v1 = vld [vmem:[#allocation7 + $0x48] sm:$0xff] }
 0x1c0   :  { %4532 = vmatpush2.bf16.msra.mxu0 %v10074_v3  ;;  %4573 = vmatpush2.bf16.msra.mxu1 %v10202_v4  ;;  %v1777_v39 = vld [vmem:[#allocation7 + $0xe60] sm:$0xff]  ;;  %v1305_v4 = vmax.f32 %v11381_v28, 0.0  ;;  %v11397_v28 = vpack.c.bf16 %v1307_v10, %v1307_v10  ;;  %v1330_v2 = vld [vmem:[#allocation7 + $0x68] sm:$0xff] }
 0x1c1   :  { %4533 = vmatprep.subr.bf16.mxu0 %v10067_v5  ;;  %4574 = vmatprep.subr.bf16.mxu1 %v10195_v6  ;;  %v10163_v46 = vcombine.high %v1773_v38, %v1777_v39  ;;  %v1637_v47 = vld [vmem:[#allocation7 + $0xa00] sm:$0xff]  ;;  %v10162_v56 = vcombine.low %v1773_v38, %v1777_v39  ;;  %v9765_v6 = vcombine.high %v1374_v60, %v1378_v62  ;;  %v1342_v38 = vld [vmem:[#allocation7 + $0xc8] sm:$0xff] }
 0x1c2   :  { %v1641_v27 = vld [vmem:[#allocation7 + $0xa20] sm:$0xff]  ;;  %v1346_v39 = vld [vmem:[#allocation7 + $0xe8] sm:$0xff]  ;;  %v9717_v10 = vcombine.high %v1326_v1, %v1330_v2 }
 0x1c3   :  { %v1769_v51 = vld [vmem:[#allocation7 + $0xe20] sm:$0xff]  ;;  %v10027_v58 = vcombine.high %v1637_v47, %v1641_v27  ;;  %v10026_v3 = vcombine.low %v1637_v47, %v1641_v27  ;;  %v9733_v47 = vcombine.high %v1342_v38, %v1346_v39 }
 0x1c4   :  { %4534 = vmatpush2.bf16.msra.mxu0 %v10066_v17  ;;  %4575 = vmatpush2.bf16.msra.mxu1 %v10194_v12  ;;  %v10155_v59 = vcombine.high %v1765_v48, %v1769_v51  ;;  %v10154_v5 = vcombine.low %v1765_v48, %v1769_v51  ;;  %v9764_v17 = vcombine.low %v1374_v60, %v1378_v62  ;;  %v1494_v12 = vld [vmem:[#allocation7 + $0x588] sm:$0xff] }
 0x1c5   :  { %4535 = vmatprep.subr.bf16.mxu0 %v10059_v18  ;;  %4576 = vmatprep.subr.bf16.mxu1 %v10187_v19  ;;  %v1498_v18 = vld [vmem:[#allocation7 + $0x5a8] sm:$0xff]  ;;  %v11395_v19 = vpack.c.bf16 %v1305_v4, %v1305_v4 }
 0x1c6   :  { %v9885_v42 = vcombine.high %v1494_v12, %v1498_v18  ;;  %v1334_v48 = vld [vmem:[#allocation7 + $0x88] sm:$0xff] }
 0x1c7   :  { %v1338_v51 = vld [vmem:[#allocation7 + $0xa8] sm:$0xff] }
 0x1c8   :  { %4536 = vmatpush2.bf16.msra.mxu0 %v10058_v24  ;;  %4577 = vmatpush2.bf16.msra.mxu1 %v10186_v29  ;;  %v1486_v24 = vld [vmem:[#allocation7 + $0x548] sm:$0xff]  ;;  %v9725_v60 = vcombine.high %v1334_v48, %v1338_v51 }
 0x1c9   :  { %4537 = vmatprep.subr.bf16.mxu0 %v10051_v30  ;;  %4578 = vmatprep.subr.bf16.mxu1 %v10179_v31  ;;  %v1490_v29 = vld [vmem:[#allocation7 + $0x568] sm:$0xff]  ;;  %v9756_v30 = vcombine.low %v1366_v14, %v1370_v15  ;;  %v9884_v31 = vcombine.low %v1494_v12, %v1498_v18  ;;  %v9716_v18 = vcombine.low %v1326_v1, %v1330_v2 }
 0x1ca   :  { %v9877_v25 = vcombine.high %v1486_v24, %v1490_v29  ;;  %v1458_v4 = vld [vmem:[#allocation7 + $0x468] sm:$0xff] }
 0x1cb   :  { %v1318_v14 = vld [vmem:[#allocation7 + $0x8] sm:$0xff] }
 0x1cc   :  { %4538 = vmatpush2.bf16.msra.mxu0 %v10050_v0  ;;  %4579 = vmatpush2.bf16.msra.mxu1 %v10178_v45  ;;  %v1478_v0 = vld [vmem:[#allocation7 + $0x508] sm:$0xff] }
 0x1cd   :  { %4539 = vmatprep.subr.bf16.mxu0 %v10043_v34  ;;  %4580 = vmatprep.subr.bf16.mxu1 %v10171_v50  ;;  %v1482_v45 = vld [vmem:[#allocation7 + $0x528] sm:$0xff]  ;;  %v9748_v34 = vcombine.low %v1358_v22, %v1362_v23  ;;  %v9876_v50 = vcombine.low %v1486_v24, %v1490_v29 }
 0x1ce   :  { %v9869_v26 = vcombine.high %v1478_v0, %v1482_v45  ;;  %v1322_v15 = vld [vmem:[#allocation7 + $0x28] sm:$0xff] }
 0x1cf   :  { %v1450_v12 = vld [vmem:[#allocation7 + $0x428] sm:$0xff] }
 0x1d0   :  { %4540 = vmatpush2.bf16.msra.mxu0 %v10042_v40  ;;  %4581 = vmatpush2.bf16.msra.mxu1 %v10170_v43  ;;  %v1470_v40 = vld [vmem:[#allocation7 + $0x4c8] sm:$0xff] }
 0x1d1   :  { %4541 = vmatprep.subr.bf16.mxu0 %v10035_v44  ;;  %4582 = vmatprep.subr.bf16.mxu1 %v10163_v46  ;;  %v1474_v43 = vld [vmem:[#allocation7 + $0x4e8] sm:$0xff]  ;;  %v9740_v44 = vcombine.low %v1350_v49, %v1354_v32  ;;  %v9868_v46 = vcombine.low %v1478_v0, %v1482_v45 }
 0x1d2   :  { %v9861_v27 = vcombine.high %v1470_v40, %v1474_v43  ;;  %v1438_v23 = vld [vmem:[#allocation7 + $0x3c8] sm:$0xff] }
 0x1d3   :  { %v1566_v24 = vld [vmem:[#allocation7 + $0x7c8] sm:$0xff] }
 0x1d4   :  { %4542 = vmatpush2.bf16.msra.mxu0 %v10034_v53  ;;  %4583 = vmatpush2.bf16.msra.mxu1 %v10162_v56  ;;  %v1462_v53 = vld [vmem:[#allocation7 + $0x488] sm:$0xff] }
 0x1d5   :  { %4543 = vmatprep.subr.bf16.mxu0 %v10027_v58  ;;  %4584 = vmatprep.subr.bf16.mxu1 %v10155_v59  ;;  %v1466_v56 = vld [vmem:[#allocation7 + $0x4a8] sm:$0xff]  ;;  %v9732_v58 = vcombine.low %v1342_v38, %v1346_v39  ;;  %v9860_v59 = vcombine.low %v1470_v40, %v1474_v43 }
 0x1d6   :  { %v9853_v62 = vcombine.high %v1462_v53, %v1466_v56  ;;  %v1570_v29 = vld [vmem:[#allocation7 + $0x7e8] sm:$0xff] }
 0x1d7   :  { %v1430_v49 = vld [vmem:[#allocation7 + $0x388] sm:$0xff] }
 0x1d8   :  { %4544 = vmatpush2.bf16.msra.mxu0 %v10026_v3  ;;  %4585 = vmatpush2.bf16.msra.mxu1 %v10154_v5  ;;  %v1454_v3 = vld [vmem:[#allocation7 + $0x448] sm:$0xff]  ;;  %v9724_v5 = vcombine.low %v1334_v48, %v1338_v51 }
 0x1d9   :  { %4595 = vmatprep.subr.bf16.mxu0 %v9765_v6  ;;  %4636 = vmatprep.subr.bf16.mxu1 %v9893_v13  ;;  %v9852_v6 = vcombine.low %v1462_v53, %v1466_v56  ;;  %v9845_v13 = vcombine.high %v1454_v3, %v1458_v4  ;;  %v1434_v32 = vld [vmem:[#allocation7 + $0x3a8] sm:$0xff] }
 0x1da   :  { %v1558_v0 = vld [vmem:[#allocation7 + $0x788] sm:$0xff] }
 0x1db   :  { %4546 = vmatmul.mubr.bf16.vlgmr.msra.gmra.mxu0 %v11395_v19  ;;  %4587 = vmatmul.mubr.bf16.vlgmr.msra.gmra.mxu1 %v11397_v28  ;;  %v1562_v45 = vld [vmem:[#allocation7 + $0x7a8] sm:$0xff] }
 0x1dc   :  { %4596 = vmatpush1.bf16.msra.mxu0 %v9764_v17  ;;  %4627 = vmatprep.mubr.bf16.mxu0 %v11341_v7  ;;  %v1446_v17 = vld [vmem:[#allocation7 + $0x408] sm:$0xff] }
 0x1dd   :  { %4637 = vmatpush1.bf16.msra.mxu1 %v9892_v20  ;;  %4668 = vmatprep.mubr.bf16.mxu1 %v11345_v9  ;;  %v9844_v20 = vcombine.low %v1454_v3, %v1458_v4  ;;  %v9837_v22 = vcombine.high %v1446_v17, %v1450_v12  ;;  %v1422_v38 = vld [vmem:[#allocation7 + $0x348] sm:$0xff] }
 0x1de   :  { %4597 = vmatprep.subr.bf16.mxu0 %v9757_v21  ;;  %4638 = vmatprep.subr.bf16.mxu1 %v9885_v42  ;;  %v9709_v21 = vcombine.high %v1318_v14, %v1322_v15  ;;  %v1442_v42 = vld [vmem:[#allocation7 + $0x3e8] sm:$0xff] }
 0x1df   :  { %v1426_v39 = vld [vmem:[#allocation7 + $0x368] sm:$0xff] }
 0x1e0   :  { %4598 = vmatpush1.bf16.msra.mxu0 %v9756_v30  ;;  %v9708_v30 = vcombine.low %v1318_v14, %v1322_v15  ;;  %v1550_v40 = vld [vmem:[#allocation7 + $0x748] sm:$0xff] }
 0x1e1   :  { %4639 = vmatpush1.bf16.msra.mxu1 %v9884_v31  ;;  %4599 = vmatprep.subr.bf16.mxu0 %v9749_v41  ;;  %v9836_v31 = vcombine.low %v1446_v17, %v1450_v12  ;;  %v9829_v41 = vcombine.high %v1438_v23, %v1442_v42  ;;  %v1554_v43 = vld [vmem:[#allocation7 + $0x768] sm:$0xff] }
 0x1e2   :  { %4640 = vmatprep.subr.bf16.mxu1 %v9877_v25  ;;  %v9957_v25 = vcombine.high %v1566_v24, %v1570_v29  ;;  %v1414_v48 = vld [vmem:[#allocation7 + $0x308] sm:$0xff] }
 0x1e3   :  { %v1418_v51 = vld [vmem:[#allocation7 + $0x328] sm:$0xff] }
 0x1e4   :  { %4600 = vmatpush1.bf16.msra.mxu0 %v9748_v34  ;;  %v9828_v34 = vcombine.low %v1438_v23, %v1442_v42  ;;  %v1542_v53 = vld [vmem:[#allocation7 + $0x708] sm:$0xff] }
 0x1e5   :  { %4641 = vmatpush1.bf16.msra.mxu1 %v9876_v50  ;;  %4601 = vmatprep.subr.bf16.mxu0 %v9741_v37  ;;  %v9956_v50 = vcombine.low %v1566_v24, %v1570_v29  ;;  %v9821_v37 = vcombine.high %v1430_v49, %v1434_v32  ;;  %v1546_v56 = vld [vmem:[#allocation7 + $0x728] sm:$0xff] }
 0x1e6   :  { %4642 = vmatprep.subr.bf16.mxu1 %v9869_v26  ;;  %v9949_v26 = vcombine.high %v1558_v0, %v1562_v45  ;;  %v1406_v1 = vld [vmem:[#allocation7 + $0x2c8] sm:$0xff] }
 0x1e7   :  { %v1410_v2 = vld [vmem:[#allocation7 + $0x2e8] sm:$0xff] }
 0x1e8   :  { %4602 = vmatpush1.bf16.msra.mxu0 %v9740_v44  ;;  %v9820_v44 = vcombine.low %v1430_v49, %v1434_v32  ;;  %v1534_v3 = vld [vmem:[#allocation7 + $0x6c8] sm:$0xff] }
 0x1e9   :  { %4643 = vmatpush1.bf16.msra.mxu1 %v9868_v46  ;;  %4603 = vmatprep.subr.bf16.mxu0 %v9733_v47  ;;  %v9948_v46 = vcombine.low %v1558_v0, %v1562_v45  ;;  %v9813_v47 = vcombine.high %v1422_v38, %v1426_v39  ;;  %v1538_v4 = vld [vmem:[#allocation7 + $0x6e8] sm:$0xff] }
 0x1ea   :  { %4644 = vmatprep.subr.bf16.mxu1 %v9861_v27  ;;  %v9941_v27 = vcombine.high %v1550_v40, %v1554_v43  ;;  %v1398_v14 = vld [vmem:[#allocation7 + $0x288] sm:$0xff] }
 0x1eb   :  { %v1402_v15 = vld [vmem:[#allocation7 + $0x2a8] sm:$0xff] }
 0x1ec   :  { %4604 = vmatpush1.bf16.msra.mxu0 %v9732_v58  ;;  %v9812_v58 = vcombine.low %v1422_v38, %v1426_v39  ;;  %v1526_v17 = vld [vmem:[#allocation7 + $0x688] sm:$0xff] }
 0x1ed   :  { %4645 = vmatpush1.bf16.msra.mxu1 %v9860_v59  ;;  %4605 = vmatprep.subr.bf16.mxu0 %v9725_v60  ;;  %v9940_v59 = vcombine.low %v1550_v40, %v1554_v43  ;;  %v9805_v60 = vcombine.high %v1414_v48, %v1418_v51  ;;  %v1530_v12 = vld [vmem:[#allocation7 + $0x6a8] sm:$0xff] }
 0x1ee   :  { %4646 = vmatprep.subr.bf16.mxu1 %v9853_v62  ;;  %v9933_v62 = vcombine.high %v1542_v53, %v1546_v56  ;;  %v1390_v23 = vld [vmem:[#allocation7 + $0x248] sm:$0xff] }
 0x1ef   :  { %v1394_v42 = vld [vmem:[#allocation7 + $0x268] sm:$0xff] }
 0x1f0   :  { %4606 = vmatpush1.bf16.msra.mxu0 %v9724_v5  ;;  %v9804_v5 = vcombine.low %v1414_v48, %v1418_v51  ;;  %v1518_v24 = vld [vmem:[#allocation7 + $0x648] sm:$0xff] }
 0x1f1   :  { %4647 = vmatpush1.bf16.msra.mxu1 %v9852_v6  ;;  %4607 = vmatprep.subr.bf16.mxu0 %v9717_v10  ;;  %v9932_v6 = vcombine.low %v1542_v53, %v1546_v56  ;;  %v9797_v10 = vcombine.high %v1406_v1, %v1410_v2  ;;  %v1522_v29 = vld [vmem:[#allocation7 + $0x668] sm:$0xff] }
 0x1f2   :  { %4648 = vmatprep.subr.bf16.mxu1 %v9845_v13  ;;  %v9925_v13 = vcombine.high %v1534_v3, %v1538_v4  ;;  %v1382_v49 = vld [vmem:[#allocation7 + $0x208] sm:$0xff] }
 0x1f3   :  { %v1386_v32 = vld [vmem:[#allocation7 + $0x228] sm:$0xff] }
 0x1f4   :  { %4608 = vmatpush1.bf16.msra.mxu0 %v9716_v18  ;;  %v9796_v18 = vcombine.low %v1406_v1, %v1410_v2  ;;  %v1510_v0 = vld [vmem:[#allocation7 + $0x608] sm:$0xff] }
 0x1f5   :  { %4649 = vmatpush1.bf16.msra.mxu1 %v9844_v20  ;;  %4609 = vmatprep.subr.bf16.mxu0 %v9709_v21  ;;  %v9924_v20 = vcombine.low %v1534_v3, %v1538_v4  ;;  %v9789_v21 = vcombine.high %v1398_v14, %v1402_v15  ;;  %v1514_v45 = vld [vmem:[#allocation7 + $0x628] sm:$0xff] }
 0x1f6   :  { %4650 = vmatprep.subr.bf16.mxu1 %v9837_v22  ;;  %v9917_v22 = vcombine.high %v1526_v17, %v1530_v12  ;;  %v1630_v38 = vld [vmem:[#allocation7 + $0x9c8] sm:$0xff] }
 0x1f7   :  { %v1634_v39 = vld [vmem:[#allocation7 + $0x9e8] sm:$0xff] }
 0x1f8   :  { %4610 = vmatpush1.bf16.msra.mxu0 %v9708_v30  ;;  %v9788_v30 = vcombine.low %v1398_v14, %v1402_v15  ;;  %v1758_v40 = vld [vmem:[#allocation7 + $0xdc8] sm:$0xff]  ;;  %v10020_v53 = vcombine.low %v1630_v38, %v1634_v39 }
 0x1f9   :  { %4651 = vmatpush1.bf16.msra.mxu1 %v9836_v31  ;;  %4611 = vmatprep.subr.bf16.mxu0 %v9829_v41  ;;  %v9916_v31 = vcombine.low %v1526_v17, %v1530_v12  ;;  %v9781_v41 = vcombine.high %v1390_v23, %v1394_v42  ;;  %v1762_v43 = vld [vmem:[#allocation7 + $0xde8] sm:$0xff] }
 0x1fa   :  { %4652 = vmatprep.subr.bf16.mxu1 %v9957_v25  ;;  %v9909_v25 = vcombine.high %v1518_v24, %v1522_v29  ;;  %v1622_v48 = vld [vmem:[#allocation7 + $0x988] sm:$0xff] }
 0x1fb   :  { %v1626_v51 = vld [vmem:[#allocation7 + $0x9a8] sm:$0xff] }
 0x1fc   :  { %4612 = vmatpush2.bf16.msra.mxu0 %v9828_v34  ;;  %v9780_v34 = vcombine.low %v1390_v23, %v1394_v42  ;;  %v1750_v56 = vld [vmem:[#allocation7 + $0xd88] sm:$0xff] }
 0x1fd   :  { %4653 = vmatpush2.bf16.msra.mxu1 %v9956_v50  ;;  %4613 = vmatprep.subr.bf16.mxu0 %v9821_v37  ;;  %v9908_v50 = vcombine.low %v1518_v24, %v1522_v29  ;;  %v9773_v37 = vcombine.high %v1382_v49, %v1386_v32  ;;  %v1618_v1 = vld [vmem:[#allocation7 + $0x968] sm:$0xff] }
 0x1fe   :  { %4654 = vmatprep.subr.bf16.mxu1 %v9949_v26  ;;  %v9901_v26 = vcombine.high %v1510_v0, %v1514_v45  ;;  %v1742_v3 = vld [vmem:[#allocation7 + $0xd48] sm:$0xff] }
 0x1ff   :  { %v1746_v4 = vld [vmem:[#allocation7 + $0xd68] sm:$0xff] }
 0x200   :  { %4614 = vmatpush2.bf16.msra.mxu0 %v9820_v44  ;;  %v9772_v44 = vcombine.low %v1382_v49, %v1386_v32  ;;  %v1606_v14 = vld [vmem:[#allocation7 + $0x908] sm:$0xff] }
 0x201   :  { %4655 = vmatpush2.bf16.msra.mxu1 %v9948_v46  ;;  %4615 = vmatprep.subr.bf16.mxu0 %v9813_v47  ;;  %v9900_v46 = vcombine.low %v1510_v0, %v1514_v45  ;;  %v10021_v47 = vcombine.high %v1630_v38, %v1634_v39  ;;  %v1610_v15 = vld [vmem:[#allocation7 + $0x928] sm:$0xff] }
 0x202   :  { %4656 = vmatprep.subr.bf16.mxu1 %v9941_v27  ;;  %v10149_v27 = vcombine.high %v1758_v40, %v1762_v43  ;;  %v1734_v17 = vld [vmem:[#allocation7 + $0xd08] sm:$0xff] }
 0x203   :  { %v1738_v12 = vld [vmem:[#allocation7 + $0xd28] sm:$0xff] }
 0x204   :  { %4616 = vmatpush2.bf16.msra.mxu0 %v9812_v58  ;;  %v1754_v58 = vld [vmem:[#allocation7 + $0xda8] sm:$0xff] }
 0x205   :  { %4657 = vmatpush2.bf16.msra.mxu1 %v9940_v59  ;;  %4617 = vmatprep.subr.bf16.mxu0 %v9805_v60  ;;  %v10148_v59 = vcombine.low %v1758_v40, %v1762_v43  ;;  %v10013_v60 = vcombine.high %v1622_v48, %v1626_v51  ;;  %v10141_v2 = vcombine.high %v1750_v56, %v1754_v58  ;;  %v1598_v23 = vld [vmem:[#allocation7 + $0x8c8] sm:$0xff] }
 0x206   :  { %4658 = vmatprep.subr.bf16.mxu1 %v9933_v62  ;;  %v1614_v62 = vld [vmem:[#allocation7 + $0x948] sm:$0xff] }
 0x207   :  { %v1602_v42 = vld [vmem:[#allocation7 + $0x8e8] sm:$0xff] }
 0x208   :  { %4618 = vmatpush2.bf16.msra.mxu0 %v9804_v5  ;;  %v10012_v5 = vcombine.low %v1622_v48, %v1626_v51  ;;  %v1726_v24 = vld [vmem:[#allocation7 + $0xcc8] sm:$0xff] }
 0x209   :  { %4659 = vmatpush2.bf16.msra.mxu1 %v9932_v6  ;;  %4619 = vmatprep.subr.bf16.mxu0 %v9797_v10  ;;  %v10140_v6 = vcombine.low %v1750_v56, %v1754_v58  ;;  %v10005_v10 = vcombine.high %v1614_v62, %v1618_v1  ;;  %v1730_v29 = vld [vmem:[#allocation7 + $0xce8] sm:$0xff] }
 0x20a   :  { %4660 = vmatprep.subr.bf16.mxu1 %v9925_v13  ;;  %v10133_v13 = vcombine.high %v1742_v3, %v1746_v4  ;;  %v1590_v49 = vld [vmem:[#allocation7 + $0x888] sm:$0xff] }
 0x20b   :  { %v1594_v32 = vld [vmem:[#allocation7 + $0x8a8] sm:$0xff] }
 0x20c   :  { %4620 = vmatpush2.bf16.msra.mxu0 %v9796_v18  ;;  %v10004_v18 = vcombine.low %v1614_v62, %v1618_v1  ;;  %v1718_v0 = vld [vmem:[#allocation7 + $0xc88] sm:$0xff] }
 0x20d   :  { %4661 = vmatpush2.bf16.msra.mxu1 %v9924_v20  ;;  %4621 = vmatprep.subr.bf16.mxu0 %v9789_v21  ;;  %v10132_v20 = vcombine.low %v1742_v3, %v1746_v4  ;;  %v9997_v21 = vcombine.high %v1606_v14, %v1610_v15  ;;  %v1722_v45 = vld [vmem:[#allocation7 + $0xca8] sm:$0xff] }
 0x20e   :  { %4662 = vmatprep.subr.bf16.mxu1 %v9917_v22  ;;  %v10125_v22 = vcombine.high %v1734_v17, %v1738_v12  ;;  %v1582_v38 = vld [vmem:[#allocation7 + $0x848] sm:$0xff] }
 0x20f   :  { %v1586_v39 = vld [vmem:[#allocation7 + $0x868] sm:$0xff] }
 0x210   :  { %4622 = vmatpush2.bf16.msra.mxu0 %v9788_v30  ;;  %v9996_v30 = vcombine.low %v1606_v14, %v1610_v15  ;;  %v1710_v40 = vld [vmem:[#allocation7 + $0xc48] sm:$0xff]  ;;  %v9972_v58 = vcombine.low %v1582_v38, %v1586_v39 }
 0x211   :  { %4663 = vmatpush2.bf16.msra.mxu1 %v9916_v31  ;;  %4623 = vmatprep.subr.bf16.mxu0 %v9781_v41  ;;  %v10124_v31 = vcombine.low %v1734_v17, %v1738_v12  ;;  %v9989_v41 = vcombine.high %v1598_v23, %v1602_v42  ;;  %v1714_v43 = vld [vmem:[#allocation7 + $0xc68] sm:$0xff] }
 0x212   :  { %4664 = vmatprep.subr.bf16.mxu1 %v9909_v25  ;;  %v10117_v25 = vcombine.high %v1726_v24, %v1730_v29  ;;  %v1574_v48 = vld [vmem:[#allocation7 + $0x808] sm:$0xff] }
 0x213   :  { %v1578_v51 = vld [vmem:[#allocation7 + $0x828] sm:$0xff] }
 0x214   :  { %4624 = vmatpush2.bf16.msra.mxu0 %v9780_v34  ;;  %v9988_v34 = vcombine.low %v1598_v23, %v1602_v42  ;;  %v1706_v56 = vld [vmem:[#allocation7 + $0xc28] sm:$0xff] }
 0x215   :  { %4665 = vmatpush2.bf16.msra.mxu1 %v9908_v50  ;;  %4625 = vmatprep.subr.bf16.mxu0 %v9773_v37  ;;  %v10116_v50 = vcombine.low %v1726_v24, %v1730_v29  ;;  %v9981_v37 = vcombine.high %v1590_v49, %v1594_v32  ;;  %v1694_v1 = vld [vmem:[#allocation7 + $0xbc8] sm:$0xff] }
 0x216   :  { %4666 = vmatprep.subr.bf16.mxu1 %v9901_v26  ;;  %v10109_v26 = vcombine.high %v1718_v0, %v1722_v45  ;;  %v1822_v3 = vld [vmem:[#allocation7 + $0xfc8] sm:$0xff] }
 0x217   :  { %v1826_v4 = vld [vmem:[#allocation7 + $0xfe8] sm:$0xff] }
 0x218   :  { %4626 = vmatpush2.bf16.msra.mxu0 %v9772_v44  ;;  %v9980_v44 = vcombine.low %v1590_v49, %v1594_v32  ;;  %v1686_v14 = vld [vmem:[#allocation7 + $0xb88] sm:$0xff] }
 0x219   :  { %4667 = vmatpush2.bf16.msra.mxu1 %v9900_v46  ;;  %4677 = vmatprep.subr.bf16.mxu0 %v10021_v47  ;;  %v10108_v46 = vcombine.low %v1718_v0, %v1722_v45  ;;  %v9973_v47 = vcombine.high %v1582_v38, %v1586_v39  ;;  %v1690_v15 = vld [vmem:[#allocation7 + $0xba8] sm:$0xff] }
 0x21a   :  { %4718 = vmatprep.subr.bf16.mxu1 %v10149_v27  ;;  %v10101_v27 = vcombine.high %v1710_v40, %v1714_v43  ;;  %v1814_v17 = vld [vmem:[#allocation7 + $0xf88] sm:$0xff] }
 0x21b   :  { %4628 = vmatmul.mubr.bf16.vlgmr.msra.gmra.mxu0 %v11343_v8  ;;  %v1818_v12 = vld [vmem:[#allocation7 + $0xfa8] sm:$0xff] }
 0x21c   :  { %4669 = vmatmul.mubr.bf16.vlgmr.msra.gmra.mxu1 %v11347_v11  ;;  %4678 = vmatpush1.bf16.msra.mxu0 %v10020_v53  ;;  %v1702_v53 = vld [vmem:[#allocation7 + $0xc08] sm:$0xff] }
 0x21d   :  { %4709 = vmatprep.mubr.bf16.mxu0 %v11387_v52  ;;  %4719 = vmatpush1.bf16.msra.mxu1 %v10148_v59  ;;  %v10100_v59 = vcombine.low %v1710_v40, %v1714_v43  ;;  %v10093_v62 = vcombine.high %v1702_v53, %v1706_v56  ;;  %v1678_v23 = vld [vmem:[#allocation7 + $0xb48] sm:$0xff] }
 0x21e   :  { %4750 = vmatprep.mubr.bf16.mxu1 %v11389_v55  ;;  %4679 = vmatprep.subr.bf16.mxu0 %v10013_v60  ;;  %v9965_v60 = vcombine.high %v1574_v48, %v1578_v51  ;;  %v1682_v42 = vld [vmem:[#allocation7 + $0xb68] sm:$0xff] }
 0x21f   :  { %4720 = vmatprep.subr.bf16.mxu1 %v10141_v2  ;;  %v1698_v2 = vld [vmem:[#allocation7 + $0xbe8] sm:$0xff] }
 0x220   :  { %4680 = vmatpush1.bf16.msra.mxu0 %v10012_v5  ;;  %v9964_v5 = vcombine.low %v1574_v48, %v1578_v51  ;;  %v1806_v24 = vld [vmem:[#allocation7 + $0xf48] sm:$0xff] }
 0x221   :  { %4721 = vmatpush1.bf16.msra.mxu1 %v10140_v6  ;;  %4681 = vmatprep.subr.bf16.mxu0 %v10005_v10  ;;  %v10092_v6 = vcombine.low %v1702_v53, %v1706_v56  ;;  %v10085_v10 = vcombine.high %v1694_v1, %v1698_v2  ;;  %v1810_v29 = vld [vmem:[#allocation7 + $0xf68] sm:$0xff] }
 0x222   :  { %4722 = vmatprep.subr.bf16.mxu1 %v10133_v13  ;;  %v10213_v13 = vcombine.high %v1822_v3, %v1826_v4  ;;  %v1670_v49 = vld [vmem:[#allocation7 + $0xb08] sm:$0xff] }
 0x223   :  { %v1674_v32 = vld [vmem:[#allocation7 + $0xb28] sm:$0xff] }
 0x224   :  { %4682 = vmatpush1.bf16.msra.mxu0 %v10004_v18  ;;  %v10084_v18 = vcombine.low %v1694_v1, %v1698_v2  ;;  %v1798_v0 = vld [vmem:[#allocation7 + $0xf08] sm:$0xff] }
 0x225   :  { %4723 = vmatpush1.bf16.msra.mxu1 %v10132_v20  ;;  %4683 = vmatprep.subr.bf16.mxu0 %v9997_v21  ;;  %v10212_v20 = vcombine.low %v1822_v3, %v1826_v4  ;;  %v10077_v21 = vcombine.high %v1686_v14, %v1690_v15  ;;  %v1802_v45 = vld [vmem:[#allocation7 + $0xf28] sm:$0xff] }
 0x226   :  { %4724 = vmatprep.subr.bf16.mxu1 %v10125_v22  ;;  %v10205_v22 = vcombine.high %v1814_v17, %v1818_v12  ;;  %v1662_v38 = vld [vmem:[#allocation7 + $0xac8] sm:$0xff] }
 0x227   :  { %v1666_v39 = vld [vmem:[#allocation7 + $0xae8] sm:$0xff] }
 0x228   :  { %4684 = vmatpush1.bf16.msra.mxu0 %v9996_v30  ;;  %v10076_v30 = vcombine.low %v1686_v14, %v1690_v15  ;;  %v1790_v40 = vld [vmem:[#allocation7 + $0xec8] sm:$0xff] }
 0x229   :  { %4725 = vmatpush1.bf16.msra.mxu1 %v10124_v31  ;;  %4685 = vmatprep.subr.bf16.mxu0 %v9989_v41  ;;  %v10204_v31 = vcombine.low %v1814_v17, %v1818_v12  ;;  %v10069_v41 = vcombine.high %v1678_v23, %v1682_v42  ;;  %v1794_v43 = vld [vmem:[#allocation7 + $0xee8] sm:$0xff] }
 0x22a   :  { %4726 = vmatprep.subr.bf16.mxu1 %v10117_v25  ;;  %v10197_v25 = vcombine.high %v1806_v24, %v1810_v29  ;;  %v1654_v48 = vld [vmem:[#allocation7 + $0xa88] sm:$0xff] }
 0x22b   :  { %v1658_v51 = vld [vmem:[#allocation7 + $0xaa8] sm:$0xff] }
 0x22c   :  { %4686 = vmatpush1.bf16.msra.mxu0 %v9988_v34  ;;  %v10068_v34 = vcombine.low %v1678_v23, %v1682_v42  ;;  %v1782_v53 = vld [vmem:[#allocation7 + $0xe88] sm:$0xff]  ;;  %v1375_v23 = vld [vmem:[#allocation7 + $0x1d0] sm:$0xff] }
 0x22d   :  { %4727 = vmatpush1.bf16.msra.mxu1 %v10116_v50  ;;  %4687 = vmatprep.subr.bf16.mxu0 %v9981_v37  ;;  %v10196_v50 = vcombine.low %v1806_v24, %v1810_v29  ;;  %v10061_v37 = vcombine.high %v1670_v49, %v1674_v32  ;;  %v1786_v56 = vld [vmem:[#allocation7 + $0xea8] sm:$0xff]  ;;  %v1379_v42 = vld [vmem:[#allocation7 + $0x1f0] sm:$0xff] }
 0x22e   :  { %4728 = vmatprep.subr.bf16.mxu1 %v10109_v26  ;;  %v10189_v26 = vcombine.high %v1798_v0, %v1802_v45  ;;  %v1646_v1 = vld [vmem:[#allocation7 + $0xa48] sm:$0xff]  ;;  %v1503_v24 = vld [vmem:[#allocation7 + $0x5d0] sm:$0xff] }
 0x22f   :  { %v1650_v2 = vld [vmem:[#allocation7 + $0xa68] sm:$0xff]  ;;  %v1507_v29 = vld [vmem:[#allocation7 + $0x5f0] sm:$0xff] }
 0x230   :  { %4688 = vmatpush1.bf16.msra.mxu0 %v9980_v44  ;;  %v10060_v44 = vcombine.low %v1670_v49, %v1674_v32  ;;  %v1774_v3 = vld [vmem:[#allocation7 + $0xe48] sm:$0xff]  ;;  %v9895_v49 = vcombine.high %v1503_v24, %v1507_v29  ;;  %v1367_v32 = vld [vmem:[#allocation7 + $0x190] sm:$0xff] }
 0x231   :  { %4729 = vmatpush1.bf16.msra.mxu1 %v10108_v46  ;;  %4689 = vmatprep.subr.bf16.mxu0 %v9973_v47  ;;  %v10188_v46 = vcombine.low %v1798_v0, %v1802_v45  ;;  %v10053_v47 = vcombine.high %v1662_v38, %v1666_v39  ;;  %v1778_v4 = vld [vmem:[#allocation7 + $0xe68] sm:$0xff]  ;;  %v1371_v0 = vld [vmem:[#allocation7 + $0x1b0] sm:$0xff]  ;;  %v9766_v45 = vcombine.low %v1375_v23, %v1379_v42 }
 0x232   :  { %4730 = vmatprep.subr.bf16.mxu1 %v10101_v27  ;;  %v10181_v27 = vcombine.high %v1790_v40, %v1794_v43  ;;  %v1638_v14 = vld [vmem:[#allocation7 + $0xa08] sm:$0xff] }
 0x233   :  { %v1642_v15 = vld [vmem:[#allocation7 + $0xa28] sm:$0xff] }
 0x234   :  { %4690 = vmatpush1.bf16.msra.mxu0 %v9972_v58  ;;  %v10052_v58 = vcombine.low %v1662_v38, %v1666_v39  ;;  %v1766_v17 = vld [vmem:[#allocation7 + $0xe08] sm:$0xff]  ;;  %v9759_v39 = vcombine.high %v1367_v32, %v1371_v0 }
 0x235   :  { %4731 = vmatpush1.bf16.msra.mxu1 %v10100_v59  ;;  %4691 = vmatprep.subr.bf16.mxu0 %v9965_v60  ;;  %v10180_v59 = vcombine.low %v1790_v40, %v1794_v43  ;;  %v10045_v60 = vcombine.high %v1654_v48, %v1658_v51  ;;  %v1770_v12 = vld [vmem:[#allocation7 + $0xe28] sm:$0xff]  ;;  %v1359_v40 = vld [vmem:[#allocation7 + $0x150] sm:$0xff] }
 0x236   :  { %4732 = vmatprep.subr.bf16.mxu1 %v10093_v62  ;;  %v10173_v62 = vcombine.high %v1782_v53, %v1786_v56  ;;  %v1363_v43 = vld [vmem:[#allocation7 + $0x170] sm:$0xff] }
 0x238   :  { %4692 = vmatpush1.bf16.msra.mxu0 %v9964_v5  ;;  %v10044_v5 = vcombine.low %v1654_v48, %v1658_v51 }
 0x239   :  { %4733 = vmatpush1.bf16.msra.mxu1 %v10092_v6  ;;  %4693 = vmatprep.subr.bf16.mxu0 %v10085_v10  ;;  %v10172_v6 = vcombine.low %v1782_v53, %v1786_v56  ;;  %v10037_v10 = vcombine.high %v1646_v1, %v1650_v2  ;;  %v9758_v53 = vcombine.low %v1367_v32, %v1371_v0  ;;  %v1339_v32 = vld [vmem:[#allocation7 + $0xb0] sm:$0xff] }
 0x23a   :  { %4734 = vmatprep.subr.bf16.mxu1 %v10213_v13  ;;  %v10165_v13 = vcombine.high %v1774_v3, %v1778_v4  ;;  %v1463_v0 = vld [vmem:[#allocation7 + $0x490] sm:$0xff] }
 0x23c   :  { %4694 = vmatpush2.bf16.msra.mxu0 %v10084_v18  ;;  %v10036_v18 = vcombine.low %v1646_v1, %v1650_v2 }
 0x23d   :  { %4735 = vmatpush2.bf16.msra.mxu1 %v10212_v20  ;;  %4695 = vmatprep.subr.bf16.mxu0 %v10077_v21  ;;  %v10164_v20 = vcombine.low %v1774_v3, %v1778_v4  ;;  %v10029_v21 = vcombine.high %v1638_v14, %v1642_v15  ;;  %v1351_v3 = vld [vmem:[#allocation7 + $0x110] sm:$0xff] }
 0x23e   :  { %4736 = vmatprep.subr.bf16.mxu1 %v10205_v22  ;;  %v10157_v22 = vcombine.high %v1766_v17, %v1770_v12  ;;  %v1355_v4 = vld [vmem:[#allocation7 + $0x130] sm:$0xff] }
 0x240   :  { %4696 = vmatpush2.bf16.msra.mxu0 %v10076_v30  ;;  %v10028_v30 = vcombine.low %v1638_v14, %v1642_v15  ;;  %v9750_v15 = vcombine.low %v1359_v40, %v1363_v43 }
 0x241   :  { %4737 = vmatpush2.bf16.msra.mxu1 %v10204_v31  ;;  %4697 = vmatprep.subr.bf16.mxu0 %v10069_v41  ;;  %v10156_v31 = vcombine.low %v1766_v17, %v1770_v12  ;;  %v9767_v41 = vcombine.high %v1375_v23, %v1379_v42  ;;  %v1347_v23 = vld [vmem:[#allocation7 + $0xf0] sm:$0xff] }
 0x242   :  { %4738 = vmatprep.subr.bf16.mxu1 %v10197_v25  ;;  %v11407_v25 = vld [vmem:[#allocation9] sm:$0xff]  ;;  %v1471_v42 = vld [vmem:[#allocation7 + $0x4d0] sm:$0xff] }
 0x243   :  { %v1838_v38 = vrot.slane %v11407_v25, %v11328_v16 }
 0x244   :  { %4698 = vmatpush2.bf16.msra.mxu0 %v10068_v34  ;;  %v1834_v34 = vrot.slane %v11407_v25, %v11320_v33 }
 0x245   :  { %4739 = vmatpush2.bf16.msra.mxu1 %v10196_v50  ;;  %4699 = vmatprep.subr.bf16.mxu0 %v10061_v37  ;;  %v1495_v50 = vld [vmem:[#allocation7 + $0x590] sm:$0xff] }
 0x246   :  { %4740 = vmatprep.subr.bf16.mxu1 %v10189_v26  ;;  %v1499_v37 = vld [vmem:[#allocation7 + $0x5b0] sm:$0xff]  ;;  %v9894_v26 = vcombine.low %v1503_v24, %v1507_v29  ;;  %v9742_v29 = vcombine.low %v1351_v3, %v1355_v4 }
 0x247   :  { %v1475_v24 = vld [vmem:[#allocation7 + $0x4f0] sm:$0xff] }
 0x248   :  { %4700 = vmatpush2.bf16.msra.mxu0 %v10060_v44 }
 0x249   :  { %4741 = vmatpush2.bf16.msra.mxu1 %v10188_v46  ;;  %4701 = vmatprep.subr.bf16.mxu0 %v10053_v47  ;;  %v9887_v46 = vcombine.high %v1495_v50, %v1499_v37  ;;  %v1487_v47 = vld [vmem:[#allocation7 + $0x550] sm:$0xff] }
 0x24a   :  { %4742 = vmatprep.subr.bf16.mxu1 %v10181_v27  ;;  %v1491_v27 = vld [vmem:[#allocation7 + $0x570] sm:$0xff] }
 0x24b   :  { %v9879_v2 = vcombine.high %v1487_v47, %v1491_v27  ;;  %v9878_v12 = vcombine.low %v1487_v47, %v1491_v27 }
 0x24c   :  { %4702 = vmatpush2.bf16.msra.mxu0 %v10052_v58  ;;  %v9886_v58 = vcombine.low %v1495_v50, %v1499_v37  ;;  %v9862_v50 = vcombine.low %v1471_v42, %v1475_v24 }
 0x24d   :  { %4743 = vmatpush2.bf16.msra.mxu1 %v10180_v59  ;;  %4703 = vmatprep.subr.bf16.mxu0 %v10045_v60  ;;  %v9751_v59 = vcombine.high %v1359_v40, %v1363_v43  ;;  %v1455_v40 = vld [vmem:[#allocation7 + $0x450] sm:$0xff] }
 0x24e   :  { %4744 = vmatprep.subr.bf16.mxu1 %v10173_v62  ;;  %v1459_v43 = vld [vmem:[#allocation7 + $0x470] sm:$0xff] }
 0x24f   :  { %v9847_v27 = vcombine.high %v1455_v40, %v1459_v43 }
 0x250   :  { %4704 = vmatpush2.bf16.msra.mxu0 %v10044_v5 }
 0x251   :  { %4745 = vmatpush2.bf16.msra.mxu1 %v10172_v6  ;;  %4705 = vmatprep.subr.bf16.mxu0 %v10037_v10  ;;  %v1479_v6 = vld [vmem:[#allocation7 + $0x510] sm:$0xff] }
 0x252   :  { %4746 = vmatprep.subr.bf16.mxu1 %v10165_v13  ;;  %v1483_v10 = vld [vmem:[#allocation7 + $0x530] sm:$0xff] }
 0x254   :  { %4706 = vmatpush2.bf16.msra.mxu0 %v10036_v18  ;;  %v9743_v18 = vcombine.high %v1351_v3, %v1355_v4  ;;  %v1443_v3 = vld [vmem:[#allocation7 + $0x3f0] sm:$0xff] }
 0x255   :  { %4747 = vmatpush2.bf16.msra.mxu1 %v10164_v20  ;;  %4707 = vmatprep.subr.bf16.mxu0 %v10029_v21  ;;  %v9871_v21 = vcombine.high %v1479_v6, %v1483_v10  ;;  %v1567_v4 = vld [vmem:[#allocation7 + $0x7d0] sm:$0xff] }
 0x256   :  { %4748 = vmatprep.subr.bf16.mxu1 %v10157_v22  ;;  %v1343_v22 = vld [vmem:[#allocation7 + $0xd0] sm:$0xff] }
 0x258   :  { %4708 = vmatpush2.bf16.msra.mxu0 %v10028_v30  ;;  %v9870_v30 = vcombine.low %v1479_v6, %v1483_v10 }
 0x259   :  { %4749 = vmatpush2.bf16.msra.mxu1 %v10156_v31  ;;  %4759 = vmatprep.subr.bf16.mxu0 %v9767_v41  ;;  %v9735_v31 = vcombine.high %v1343_v22, %v1347_v23  ;;  %v9863_v41 = vcombine.high %v1471_v42, %v1475_v24  ;;  %v1423_v24 = vld [vmem:[#allocation7 + $0x350] sm:$0xff] }
 0x25a   :  { %4800 = vmatprep.subr.bf16.mxu1 %v9895_v49  ;;  %v1335_v49 = vld [vmem:[#allocation7 + $0x90] sm:$0xff] }
 0x25b   :  { %4710 = vmatmul.mubr.bf16.vlgmr.msra.gmra.mxu0 %v11395_v19  ;;  %v4465_v44 = vpop.f32.mrf.mxu0  ;;  %v4506_v51 = vpop.f32.mrf.mxu1  ;;  %v9727_v37 = vcombine.high %v1335_v49, %v1339_v32 }
 0x25c   :  { %4751 = vmatmul.mubr.bf16.vlgmr.msra.gmra.mxu1 %v11397_v28  ;;  %v4466_v48 = vadd.f32 %v4465_v44, %v1834_v34  ;;  %4760 = vmatpush1.bf16.msra.mxu0 %v9766_v45  ;;  %v1467_v45 = vld [vmem:[#allocation7 + $0x4b0] sm:$0xff]  ;;  %v9734_v34 = vcombine.low %v1343_v22, %v1347_v23  ;;  %v9726_v44 = vcombine.low %v1335_v49, %v1339_v32 }
 0x25d   :  { %4791 = vmatprep.mubr.bf16.mxu0 %v11341_v7  ;;  %4801 = vmatpush1.bf16.msra.mxu1 %v9894_v26  ;;  %v4467_v56 = vpop.f32.mrf.mxu0  ;;  %v4508_v1 = vpop.f32.mrf.mxu1  ;;  %v9855_v26 = vcombine.high %v1463_v0, %v1467_v45 }
 0x25e   :  { %v11416_v60 = vadd.f32 %v4506_v51, %v4466_v48  ;;  %4832 = vmatprep.mubr.bf16.mxu1 %v11345_v9  ;;  %v4468_v62 = vadd.f32 %v4467_v56, %v1838_v38  ;;  %4761 = vmatprep.subr.bf16.mxu0 %v9759_v39  ;;  %v1327_v38 = vld [vmem:[#allocation7 + $0x50] sm:$0xff] }
 0x25f   :  { %4802 = vmatprep.subr.bf16.mxu1 %v9887_v46  ;;  %v4469_v5 = vpop.f32.mrf.mxu0  ;;  %v4510_v14 = vpop.f32.mrf.mxu1  ;;  %v1331_v39 = vld [vmem:[#allocation7 + $0x70] sm:$0xff]  ;;  %v9854_v46 = vcombine.low %v1463_v0, %v1467_v45 }
 0x260   :  { %v11419_v13 = vadd.f32 %v4508_v1, %v4468_v62  ;;  %4762 = vmatpush1.bf16.msra.mxu0 %v9758_v53  ;;  %v9719_v47 = vcombine.high %v1327_v38, %v1331_v39  ;;  %v1319_v48 = vld [vmem:[#allocation7 + $0x10] sm:$0xff] }
 0x261   :  { %4803 = vmatpush1.bf16.msra.mxu1 %v9886_v58  ;;  %v4470_v17 = vpop.f32.mrf.mxu0  ;;  %4763 = vmatprep.subr.bf16.mxu0 %v9751_v59  ;;  %v4511_v20 = vpop.f32.mrf.mxu1  ;;  %v1323_v51 = vld [vmem:[#allocation7 + $0x30] sm:$0xff]  ;;  %v9718_v58 = vcombine.low %v1327_v38, %v1331_v39  ;;  %v9846_v59 = vcombine.low %v1455_v40, %v1459_v43 }
 0x262   :  { %4804 = vmatprep.subr.bf16.mxu1 %v9879_v2  ;;  %v1447_v53 = vld [vmem:[#allocation7 + $0x410] sm:$0xff]  ;;  %v9711_v62 = vcombine.high %v1319_v48, %v1323_v51  ;;  %v9710_v6 = vcombine.low %v1319_v48, %v1323_v51 }
 0x263   :  { %v1451_v56 = vld [vmem:[#allocation7 + $0x430] sm:$0xff] }
 0x264   :  { %4764 = vmatpush1.bf16.msra.mxu0 %v9750_v15  ;;  %v9839_v1 = vcombine.high %v1447_v53, %v1451_v56  ;;  %v1439_v2 = vld [vmem:[#allocation7 + $0x3d0] sm:$0xff]  ;;  %v9838_v10 = vcombine.low %v1447_v53, %v1451_v56 }
 0x265   :  { %4805 = vmatpush1.bf16.msra.mxu1 %v9878_v12  ;;  %4765 = vmatprep.subr.bf16.mxu0 %v9743_v18  ;;  %v1571_v5 = vld [vmem:[#allocation7 + $0x7f0] sm:$0xff]  ;;  %v9831_v14 = vcombine.high %v1439_v2, %v1443_v3 }
 0x266   :  { %4806 = vmatprep.subr.bf16.mxu1 %v9871_v21  ;;  %v9959_v15 = vcombine.high %v1567_v4, %v1571_v5  ;;  %v1431_v17 = vld [vmem:[#allocation7 + $0x390] sm:$0xff]  ;;  %v9830_v21 = vcombine.low %v1439_v2, %v1443_v3  ;;  %v9958_v22 = vcombine.low %v1567_v4, %v1571_v5 }
 0x267   :  { %v1435_v12 = vld [vmem:[#allocation7 + $0x3b0] sm:$0xff] }
 0x268   :  { %4766 = vmatpush1.bf16.msra.mxu0 %v9742_v29  ;;  %v1559_v18 = vld [vmem:[#allocation7 + $0x790] sm:$0xff]  ;;  %v9823_v23 = vcombine.high %v1431_v17, %v1435_v12 }
 0x269   :  { %4807 = vmatpush1.bf16.msra.mxu1 %v9870_v30  ;;  %4767 = vmatprep.subr.bf16.mxu0 %v9735_v31  ;;  %v1563_v20 = vld [vmem:[#allocation7 + $0x7b0] sm:$0xff] }
 0x26a   :  { %4808 = vmatprep.subr.bf16.mxu1 %v9863_v41  ;;  %v9951_v42 = vcombine.high %v1559_v18, %v1563_v20  ;;  %v1427_v29 = vld [vmem:[#allocation7 + $0x370] sm:$0xff]  ;;  %v9822_v41 = vcombine.low %v1431_v17, %v1435_v12  ;;  %v9950_v49 = vcombine.low %v1559_v18, %v1563_v20 }
 0x26b   :  { %v1551_v30 = vld [vmem:[#allocation7 + $0x750] sm:$0xff]  ;;  %v9815_v32 = vcombine.high %v1423_v24, %v1427_v29 }
 0x26c   :  { %4768 = vmatpush1.bf16.msra.mxu0 %v9734_v34  ;;  %v1555_v31 = vld [vmem:[#allocation7 + $0x770] sm:$0xff] }
 0x26d   :  { %4809 = vmatpush1.bf16.msra.mxu1 %v9862_v50  ;;  %4769 = vmatprep.subr.bf16.mxu0 %v9727_v37  ;;  %v9943_v0 = vcombine.high %v1551_v30, %v1555_v31  ;;  %v1415_v45 = vld [vmem:[#allocation7 + $0x310] sm:$0xff]  ;;  %v9942_v38 = vcombine.low %v1551_v30, %v1555_v31 }
 0x26e   :  { %4810 = vmatprep.subr.bf16.mxu1 %v9855_v26  ;;  %v1419_v34 = vld [vmem:[#allocation7 + $0x330] sm:$0xff]  ;;  %v9814_v26 = vcombine.low %v1423_v24, %v1427_v29 }
 0x26f   :  { %v1543_v50 = vld [vmem:[#allocation7 + $0x710] sm:$0xff]  ;;  %v9807_v39 = vcombine.high %v1415_v45, %v1419_v34 }
 0x270   :  { %4770 = vmatpush1.bf16.msra.mxu0 %v9726_v44  ;;  %v1547_v37 = vld [vmem:[#allocation7 + $0x730] sm:$0xff] }
 0x271   :  { %4811 = vmatpush1.bf16.msra.mxu1 %v9854_v46  ;;  %4771 = vmatprep.subr.bf16.mxu0 %v9719_v47  ;;  %v9935_v40 = vcombine.high %v1543_v50, %v1547_v37  ;;  %v1407_v43 = vld [vmem:[#allocation7 + $0x2d0] sm:$0xff]  ;;  %v9934_v48 = vcombine.low %v1543_v50, %v1547_v37 }
 0x272   :  { %4812 = vmatprep.subr.bf16.mxu1 %v9847_v27  ;;  %v1411_v44 = vld [vmem:[#allocation7 + $0x2f0] sm:$0xff]  ;;  %v9806_v27 = vcombine.low %v1415_v45, %v1419_v34 }
 0x273   :  { %v1535_v46 = vld [vmem:[#allocation7 + $0x6d0] sm:$0xff]  ;;  %v9799_v51 = vcombine.high %v1407_v43, %v1411_v44 }
 0x274   :  { %4772 = vmatpush1.bf16.msra.mxu0 %v9718_v58  ;;  %v1539_v47 = vld [vmem:[#allocation7 + $0x6f0] sm:$0xff] }
 0x275   :  { %4813 = vmatpush1.bf16.msra.mxu1 %v9846_v59  ;;  %4773 = vmatprep.subr.bf16.mxu0 %v9711_v62  ;;  %v9927_v53 = vcombine.high %v1535_v46, %v1539_v47  ;;  %v1399_v56 = vld [vmem:[#allocation7 + $0x290] sm:$0xff]  ;;  %v9926_v2 = vcombine.low %v1535_v46, %v1539_v47 }
 0x276   :  { %4814 = vmatprep.subr.bf16.mxu1 %v9839_v1  ;;  %v1403_v58 = vld [vmem:[#allocation7 + $0x2b0] sm:$0xff]  ;;  %v9798_v1 = vcombine.low %v1407_v43, %v1411_v44 }
 0x277   :  { %v1527_v59 = vld [vmem:[#allocation7 + $0x690] sm:$0xff]  ;;  %v9791_v3 = vcombine.high %v1399_v56, %v1403_v58 }
 0x278   :  { %4774 = vmatpush1.bf16.msra.mxu0 %v9710_v6  ;;  %v1531_v62 = vld [vmem:[#allocation7 + $0x6b0] sm:$0xff] }
 0x279   :  { %4815 = vmatpush1.bf16.msra.mxu1 %v9838_v10  ;;  %4775 = vmatprep.subr.bf16.mxu0 %v9831_v14  ;;  %v9919_v4 = vcombine.high %v1527_v59, %v1531_v62  ;;  %v1391_v5 = vld [vmem:[#allocation7 + $0x250] sm:$0xff]  ;;  %v9918_v17 = vcombine.low %v1527_v59, %v1531_v62 }
 0x27a   :  { %4816 = vmatprep.subr.bf16.mxu1 %v9959_v15  ;;  %v1395_v6 = vld [vmem:[#allocation7 + $0x270] sm:$0xff]  ;;  %v9790_v15 = vcombine.low %v1399_v56, %v1403_v58 }
 0x27b   :  { %v1519_v10 = vld [vmem:[#allocation7 + $0x650] sm:$0xff]  ;;  %v9783_v12 = vcombine.high %v1391_v5, %v1395_v6 }
 0x27c   :  { %4776 = vmatpush2.bf16.msra.mxu0 %v9830_v21  ;;  %v1523_v14 = vld [vmem:[#allocation7 + $0x670] sm:$0xff] }
 0x27d   :  { %4817 = vmatpush2.bf16.msra.mxu1 %v9958_v22  ;;  %4777 = vmatprep.subr.bf16.mxu0 %v9823_v23  ;;  %v9911_v18 = vcombine.high %v1519_v10, %v1523_v14  ;;  %v1383_v20 = vld [vmem:[#allocation7 + $0x210] sm:$0xff]  ;;  %v9910_v24 = vcombine.low %v1519_v10, %v1523_v14 }
 0x27e   :  { %4818 = vmatprep.subr.bf16.mxu1 %v9951_v42  ;;  %v1387_v21 = vld [vmem:[#allocation7 + $0x230] sm:$0xff]  ;;  %v9782_v42 = vcombine.low %v1391_v5, %v1395_v6 }
 0x27f   :  { %v1511_v22 = vld [vmem:[#allocation7 + $0x610] sm:$0xff]  ;;  %v9775_v29 = vcombine.high %v1383_v20, %v1387_v21 }
 0x280   :  { %4778 = vmatpush2.bf16.msra.mxu0 %v9822_v41  ;;  %v1515_v23 = vld [vmem:[#allocation7 + $0x630] sm:$0xff] }
 0x281   :  { %4819 = vmatpush2.bf16.msra.mxu1 %v9950_v49  ;;  %4779 = vmatprep.subr.bf16.mxu0 %v9815_v32  ;;  %v9903_v30 = vcombine.high %v1511_v22, %v1515_v23  ;;  %v1631_v31 = vld [vmem:[#allocation7 + $0x9d0] sm:$0xff]  ;;  %v9902_v45 = vcombine.low %v1511_v22, %v1515_v23 }
 0x282   :  { %4820 = vmatprep.subr.bf16.mxu1 %v9943_v0  ;;  %v1635_v41 = vld [vmem:[#allocation7 + $0x9f0] sm:$0xff]  ;;  %v9774_v0 = vcombine.low %v1383_v20, %v1387_v21 }
 0x283   :  { %v1759_v49 = vld [vmem:[#allocation7 + $0xdd0] sm:$0xff]  ;;  %v10023_v34 = vcombine.high %v1631_v31, %v1635_v41 }
 0x284   :  { %4780 = vmatpush2.bf16.msra.mxu0 %v9814_v26  ;;  %v1763_v32 = vld [vmem:[#allocation7 + $0xdf0] sm:$0xff] }
 0x285   :  { %4821 = vmatpush2.bf16.msra.mxu1 %v9942_v38  ;;  %4781 = vmatprep.subr.bf16.mxu0 %v9807_v39  ;;  %v10151_v50 = vcombine.high %v1759_v49, %v1763_v32  ;;  %v1623_v37 = vld [vmem:[#allocation7 + $0x990] sm:$0xff]  ;;  %v10022_v38 = vcombine.low %v1631_v31, %v1635_v41  ;;  %v10150_v43 = vcombine.low %v1759_v49, %v1763_v32 }
 0x286   :  { %4822 = vmatprep.subr.bf16.mxu1 %v9935_v40  ;;  %v1627_v26 = vld [vmem:[#allocation7 + $0x9b0] sm:$0xff] }
 0x287   :  { %v1751_v39 = vld [vmem:[#allocation7 + $0xd90] sm:$0xff]  ;;  %v10015_v44 = vcombine.high %v1623_v37, %v1627_v26  ;;  %v10014_v59 = vcombine.low %v1623_v37, %v1627_v26 }
 0x288   :  { %4782 = vmatpush2.bf16.msra.mxu0 %v9806_v27  ;;  %v1755_v40 = vld [vmem:[#allocation7 + $0xdb0] sm:$0xff] }
 0x289   :  { %4823 = vmatpush2.bf16.msra.mxu1 %v9934_v48  ;;  %4783 = vmatprep.subr.bf16.mxu0 %v9799_v51  ;;  %v1615_v46 = vld [vmem:[#allocation7 + $0x950] sm:$0xff]  ;;  %v10143_v48 = vcombine.high %v1751_v39, %v1755_v40 }
 0x28a   :  { %4824 = vmatprep.subr.bf16.mxu1 %v9927_v53  ;;  %v1619_v47 = vld [vmem:[#allocation7 + $0x970] sm:$0xff] }
 0x28b   :  { %v1743_v51 = vld [vmem:[#allocation7 + $0xd50] sm:$0xff]  ;;  %v10006_v20 = vcombine.low %v1615_v46, %v1619_v47 }
 0x28c   :  { %4784 = vmatpush2.bf16.msra.mxu0 %v9798_v1  ;;  %v1747_v53 = vld [vmem:[#allocation7 + $0xd70] sm:$0xff]  ;;  %v10142_v1 = vcombine.low %v1751_v39, %v1755_v40 }
 0x28d   :  { %4825 = vmatpush2.bf16.msra.mxu1 %v9926_v2  ;;  %4785 = vmatprep.subr.bf16.mxu0 %v9791_v3  ;;  %v10007_v2 = vcombine.high %v1615_v46, %v1619_v47  ;;  %v1607_v6 = vld [vmem:[#allocation7 + $0x910] sm:$0xff]  ;;  %v10134_v22 = vcombine.low %v1743_v51, %v1747_v53 }
 0x28e   :  { %4826 = vmatprep.subr.bf16.mxu1 %v9919_v4  ;;  %v1611_v10 = vld [vmem:[#allocation7 + $0x930] sm:$0xff] }
 0x28f   :  { %v9999_v23 = vcombine.high %v1607_v6, %v1611_v10  ;;  %v1731_v31 = vld [vmem:[#allocation7 + $0xcf0] sm:$0xff]  ;;  %v9998_v41 = vcombine.low %v1607_v6, %v1611_v10 }
 0x290   :  { %4786 = vmatpush2.bf16.msra.mxu0 %v9790_v15  ;;  %v1735_v15 = vld [vmem:[#allocation7 + $0xd10] sm:$0xff] }
 0x291   :  { %4827 = vmatpush2.bf16.msra.mxu1 %v9918_v17  ;;  %4787 = vmatprep.subr.bf16.mxu0 %v9783_v12  ;;  %v1739_v17 = vld [vmem:[#allocation7 + $0xd30] sm:$0xff] }
 0x292   :  { %4828 = vmatprep.subr.bf16.mxu1 %v9911_v18  ;;  %v10126_v49 = vcombine.low %v1735_v15, %v1739_v17  ;;  %v1723_v37 = vld [vmem:[#allocation7 + $0xcb0] sm:$0xff] }
 0x293   :  { %v1711_v46 = vld [vmem:[#allocation7 + $0xc50] sm:$0xff] }
 0x294   :  { %4788 = vmatpush2.bf16.msra.mxu0 %v9782_v42  ;;  %v10127_v42 = vcombine.high %v1735_v15, %v1739_v17  ;;  %v1715_v47 = vld [vmem:[#allocation7 + $0xc70] sm:$0xff] }
 0x295   :  { %4829 = vmatpush2.bf16.msra.mxu1 %v9910_v24  ;;  %4789 = vmatprep.subr.bf16.mxu0 %v9775_v29  ;;  %v1599_v24 = vld [vmem:[#allocation7 + $0x8d0] sm:$0xff] }
 0x296   :  { %4830 = vmatprep.subr.bf16.mxu1 %v9903_v30  ;;  %v1603_v29 = vld [vmem:[#allocation7 + $0x8f0] sm:$0xff] }
 0x297   :  { %v1727_v30 = vld [vmem:[#allocation7 + $0xcd0] sm:$0xff]  ;;  %v9991_v32 = vcombine.high %v1599_v24, %v1603_v29  ;;  %v9990_v26 = vcombine.low %v1599_v24, %v1603_v29 }
 0x298   :  { %4790 = vmatpush2.bf16.msra.mxu0 %v9774_v0  ;;  %v10119_v0 = vcombine.high %v1727_v30, %v1731_v31  ;;  %v1699_v6 = vld [vmem:[#allocation7 + $0xbf0] sm:$0xff] }
 0x299   :  { %4831 = vmatpush2.bf16.msra.mxu1 %v9902_v45  ;;  %4841 = vmatprep.subr.bf16.mxu0 %v10023_v34  ;;  %v1591_v45 = vld [vmem:[#allocation7 + $0x890] sm:$0xff] }
 0x29a   :  { %4882 = vmatprep.subr.bf16.mxu1 %v10151_v50  ;;  %v1595_v34 = vld [vmem:[#allocation7 + $0x8b0] sm:$0xff] }
 0x29b   :  { %v4547_v27 = vpop.f32.mrf.mxu0  ;;  %4792 = vmatmul.mubr.bf16.vlgmr.msra.gmra.mxu0 %v11343_v8  ;;  %v4588_v58 = vpop.f32.mrf.mxu1  ;;  %v1719_v50 = vld [vmem:[#allocation7 + $0xc90] sm:$0xff]  ;;  %v9983_v39 = vcombine.high %v1591_v45, %v1595_v34 }
 0x29c   :  { %v4548_v56 = vadd.f32 %v4547_v27, %v11416_v60  ;;  %4833 = vmatmul.mubr.bf16.vlgmr.msra.gmra.mxu1 %v11347_v11  ;;  %4842 = vmatpush1.bf16.msra.mxu0 %v10022_v38  ;;  %v10135_v60 = vcombine.high %v1743_v51, %v1747_v53  ;;  %v10118_v38 = vcombine.low %v1727_v30, %v1731_v31  ;;  %v1823_v10 = vld [vmem:[#allocation7 + $0xfd0] sm:$0xff] }
 0x29d   :  { %4873 = vmatprep.mubr.bf16.mxu0 %v11387_v52  ;;  %4883 = vmatpush1.bf16.msra.mxu1 %v10150_v43  ;;  %v4549_v62 = vpop.f32.mrf.mxu0  ;;  %v4590_v5 = vpop.f32.mrf.mxu1  ;;  %v10111_v40 = vcombine.high %v1719_v50, %v1723_v37  ;;  %v1583_v43 = vld [vmem:[#allocation7 + $0x850] sm:$0xff]  ;;  %v9982_v27 = vcombine.low %v1591_v45, %v1595_v34  ;;  %v10103_v53 = vcombine.high %v1711_v46, %v1715_v47 }
 0x29e   :  { %v11425_v3 = vadd.f32 %v4588_v58, %v4548_v56  ;;  %4914 = vmatprep.mubr.bf16.mxu1 %v11389_v55  ;;  %v4550_v4 = vadd.f32 %v4549_v62, %v11419_v13  ;;  %4843 = vmatprep.subr.bf16.mxu0 %v10015_v44  ;;  %v1587_v44 = vld [vmem:[#allocation7 + $0x870] sm:$0xff] }
 0x29f   :  { %v4551_v14 = vpop.f32.mrf.mxu0  ;;  %4884 = vmatprep.subr.bf16.mxu1 %v10143_v48  ;;  %v4592_v18 = vpop.f32.mrf.mxu1  ;;  %v10110_v48 = vcombine.low %v1719_v50, %v1723_v37  ;;  %v9975_v51 = vcombine.high %v1583_v43, %v1587_v44  ;;  %v1575_v56 = vld [vmem:[#allocation7 + $0x810] sm:$0xff] }
 0x2a0   :  { %v11429_v12 = vadd.f32 %v4590_v5, %v4550_v4  ;;  %4844 = vmatpush1.bf16.msra.mxu0 %v10014_v59  ;;  %v1579_v58 = vld [vmem:[#allocation7 + $0x830] sm:$0xff] }
 0x2a1   :  { %4885 = vmatpush1.bf16.msra.mxu1 %v10142_v1  ;;  %v4552_v21 = vpop.f32.mrf.mxu0  ;;  %4845 = vmatprep.subr.bf16.mxu0 %v10007_v2  ;;  %v4593_v13 = vpop.f32.mrf.mxu1  ;;  %v1703_v59 = vld [vmem:[#allocation7 + $0xc10] sm:$0xff]  ;;  %v9974_v1 = vcombine.low %v1583_v43, %v1587_v44  ;;  %v10102_v2 = vcombine.low %v1711_v46, %v1715_v47  ;;  %v9967_v4 = vcombine.high %v1575_v56, %v1579_v58 }
 0x2a2   :  { %4886 = vmatprep.subr.bf16.mxu1 %v10135_v60  ;;  %v1707_v62 = vld [vmem:[#allocation7 + $0xc30] sm:$0xff]  ;;  %v9966_v15 = vcombine.low %v1575_v56, %v1579_v58 }
 0x2a3   :  { %v10095_v5 = vcombine.high %v1703_v59, %v1707_v62  ;;  %v1695_v60 = vld [vmem:[#allocation7 + $0xbd0] sm:$0xff]  ;;  %v10094_v17 = vcombine.low %v1703_v59, %v1707_v62 }
 0x2a4   :  { %4846 = vmatpush1.bf16.msra.mxu0 %v10006_v20  ;;  %v1827_v14 = vld [vmem:[#allocation7 + $0xff0] sm:$0xff]  ;;  %v10087_v18 = vcombine.high %v1695_v60, %v1699_v6 }
 0x2a5   :  { %4887 = vmatpush1.bf16.msra.mxu1 %v10134_v22  ;;  %4847 = vmatprep.subr.bf16.mxu0 %v9999_v23  ;;  %v10215_v20 = vcombine.high %v1823_v10, %v1827_v14  ;;  %v1687_v21 = vld [vmem:[#allocation7 + $0xb90] sm:$0xff]  ;;  %v10214_v24 = vcombine.low %v1823_v10, %v1827_v14 }
 0x2a6   :  { %4888 = vmatprep.subr.bf16.mxu1 %v10127_v42  ;;  %v1691_v22 = vld [vmem:[#allocation7 + $0xbb0] sm:$0xff]  ;;  %v10086_v42 = vcombine.low %v1695_v60, %v1699_v6 }
 0x2a7   :  { %v1815_v23 = vld [vmem:[#allocation7 + $0xf90] sm:$0xff]  ;;  %v10079_v29 = vcombine.high %v1687_v21, %v1691_v22 }
 0x2a8   :  { %4848 = vmatpush1.bf16.msra.mxu0 %v9998_v41  ;;  %v1819_v13 = vld [vmem:[#allocation7 + $0xfb0] sm:$0xff] }
 0x2a9   :  { %4889 = vmatpush1.bf16.msra.mxu1 %v10126_v49  ;;  %4849 = vmatprep.subr.bf16.mxu0 %v9991_v32  ;;  %v10207_v30 = vcombine.high %v1815_v23, %v1819_v13  ;;  %v1679_v31 = vld [vmem:[#allocation7 + $0xb50] sm:$0xff]  ;;  %v10206_v45 = vcombine.low %v1815_v23, %v1819_v13 }
 0x2aa   :  { %4890 = vmatprep.subr.bf16.mxu1 %v10119_v0  ;;  %v1683_v41 = vld [vmem:[#allocation7 + $0xb70] sm:$0xff]  ;;  %v10078_v0 = vcombine.low %v1687_v21, %v1691_v22 }
 0x2ab   :  { %v1807_v49 = vld [vmem:[#allocation7 + $0xf50] sm:$0xff]  ;;  %v10071_v34 = vcombine.high %v1679_v31, %v1683_v41 }
 0x2ac   :  { %4850 = vmatpush1.bf16.msra.mxu0 %v9990_v26  ;;  %v1811_v32 = vld [vmem:[#allocation7 + $0xf70] sm:$0xff] }
 0x2ad   :  { %4891 = vmatpush1.bf16.msra.mxu1 %v10118_v38  ;;  %4851 = vmatprep.subr.bf16.mxu0 %v9983_v39  ;;  %v10199_v50 = vcombine.high %v1807_v49, %v1811_v32  ;;  %v1671_v37 = vld [vmem:[#allocation7 + $0xb10] sm:$0xff]  ;;  %v10198_v43 = vcombine.low %v1807_v49, %v1811_v32  ;;  %v1376_v32 = vld [vmem:[#allocation7 + $0x1d8] sm:$0xff] }
 0x2ae   :  { %4892 = vmatprep.subr.bf16.mxu1 %v10111_v40  ;;  %v1675_v26 = vld [vmem:[#allocation7 + $0xb30] sm:$0xff]  ;;  %v10070_v40 = vcombine.low %v1679_v31, %v1683_v41 }
 0x2af   :  { %v1799_v38 = vld [vmem:[#allocation7 + $0xf10] sm:$0xff]  ;;  %v10063_v44 = vcombine.high %v1671_v37, %v1675_v26 }
 0x2b0   :  { %4852 = vmatpush1.bf16.msra.mxu0 %v9982_v27  ;;  %v1803_v39 = vld [vmem:[#allocation7 + $0xf30] sm:$0xff] }
 0x2b1   :  { %4893 = vmatpush1.bf16.msra.mxu1 %v10110_v48  ;;  %4853 = vmatprep.subr.bf16.mxu0 %v9975_v51  ;;  %v10191_v46 = vcombine.high %v1799_v38, %v1803_v39  ;;  %v1663_v47 = vld [vmem:[#allocation7 + $0xad0] sm:$0xff]  ;;  %v10190_v56 = vcombine.low %v1799_v38, %v1803_v39  ;;  %v1368_v39 = vld [vmem:[#allocation7 + $0x198] sm:$0xff] }
 0x2b2   :  { %4894 = vmatprep.subr.bf16.mxu1 %v10103_v53  ;;  %v1667_v27 = vld [vmem:[#allocation7 + $0xaf0] sm:$0xff]  ;;  %v10062_v53 = vcombine.low %v1671_v37, %v1675_v26 }
 0x2b3   :  { %v1791_v48 = vld [vmem:[#allocation7 + $0xed0] sm:$0xff]  ;;  %v10055_v58 = vcombine.high %v1663_v47, %v1667_v27 }
 0x2b4   :  { %4854 = vmatpush1.bf16.msra.mxu0 %v9974_v1  ;;  %v1795_v51 = vld [vmem:[#allocation7 + $0xef0] sm:$0xff] }
 0x2b5   :  { %4895 = vmatpush1.bf16.msra.mxu1 %v10102_v2  ;;  %4855 = vmatprep.subr.bf16.mxu0 %v9967_v4  ;;  %v10183_v59 = vcombine.high %v1791_v48, %v1795_v51  ;;  %v1655_v62 = vld [vmem:[#allocation7 + $0xa90] sm:$0xff]  ;;  %v10182_v60 = vcombine.low %v1791_v48, %v1795_v51  ;;  %v1846_v48 = vrot.slane %v11407_v25, %v11331_v36 }
 0x2b6   :  { %4896 = vmatprep.subr.bf16.mxu1 %v10095_v5  ;;  %v1659_v1 = vld [vmem:[#allocation7 + $0xab0] sm:$0xff]  ;;  %v10054_v5 = vcombine.low %v1663_v47, %v1667_v27  ;;  %v1500_v47 = vld [vmem:[#allocation7 + $0x5b8] sm:$0xff] }
 0x2b7   :  { %v1783_v2 = vld [vmem:[#allocation7 + $0xe90] sm:$0xff]  ;;  %v10047_v6 = vcombine.high %v1655_v62, %v1659_v1 }
 0x2b8   :  { %4856 = vmatpush1.bf16.msra.mxu0 %v9966_v15  ;;  %v1787_v4 = vld [vmem:[#allocation7 + $0xeb0] sm:$0xff] }
 0x2b9   :  { %4897 = vmatpush1.bf16.msra.mxu1 %v10094_v17  ;;  %4857 = vmatprep.subr.bf16.mxu0 %v10087_v18  ;;  %v10175_v10 = vcombine.high %v1783_v2, %v1787_v4  ;;  %v1647_v14 = vld [vmem:[#allocation7 + $0xa50] sm:$0xff]  ;;  %v10174_v21 = vcombine.low %v1783_v2, %v1787_v4 }
 0x2ba   :  { %4898 = vmatprep.subr.bf16.mxu1 %v10215_v20  ;;  %v1651_v15 = vld [vmem:[#allocation7 + $0xa70] sm:$0xff]  ;;  %v10046_v20 = vcombine.low %v1655_v62, %v1659_v1  ;;  %v1488_v62 = vld [vmem:[#allocation7 + $0x558] sm:$0xff] }
 0x2bb   :  { %v1775_v17 = vld [vmem:[#allocation7 + $0xe50] sm:$0xff]  ;;  %v10039_v22 = vcombine.high %v1647_v14, %v1651_v15  ;;  %v1492_v1 = vld [vmem:[#allocation7 + $0x578] sm:$0xff] }
 0x2bc   :  { %4858 = vmatpush2.bf16.msra.mxu0 %v10086_v42  ;;  %v1779_v18 = vld [vmem:[#allocation7 + $0xe70] sm:$0xff] }
 0x2bd   :  { %4899 = vmatpush2.bf16.msra.mxu1 %v10214_v24  ;;  %4859 = vmatprep.subr.bf16.mxu0 %v10079_v29  ;;  %v10167_v23 = vcombine.high %v1775_v17, %v1779_v18  ;;  %v1639_v13 = vld [vmem:[#allocation7 + $0xa10] sm:$0xff]  ;;  %v10166_v31 = vcombine.low %v1775_v17, %v1779_v18  ;;  %v9881_v17 = vcombine.high %v1488_v62, %v1492_v1  ;;  %v1352_v18 = vld [vmem:[#allocation7 + $0x118] sm:$0xff] }
 0x2be   :  { %4900 = vmatprep.subr.bf16.mxu1 %v10207_v30  ;;  %v1643_v42 = vld [vmem:[#allocation7 + $0xa30] sm:$0xff]  ;;  %v10038_v30 = vcombine.low %v1647_v14, %v1651_v15 }
 0x2bf   :  { %v1767_v24 = vld [vmem:[#allocation7 + $0xe10] sm:$0xff]  ;;  %v10031_v41 = vcombine.high %v1639_v13, %v1643_v42 }
 0x2c0   :  { %4860 = vmatpush2.bf16.msra.mxu0 %v10078_v0  ;;  %v1771_v29 = vld [vmem:[#allocation7 + $0xe30] sm:$0xff]  ;;  %v1380_v0 = vld [vmem:[#allocation7 + $0x1f8] sm:$0xff] }
 0x2c1   :  { %4901 = vmatpush2.bf16.msra.mxu1 %v10206_v45  ;;  %4861 = vmatprep.subr.bf16.mxu0 %v10071_v34  ;;  %v10159_v49 = vcombine.high %v1767_v24, %v1771_v29  ;;  %v1504_v45 = vld [vmem:[#allocation7 + $0x5d8] sm:$0xff]  ;;  %v10158_v37 = vcombine.low %v1767_v24, %v1771_v29  ;;  %v9769_v26 = vcombine.high %v1376_v32, %v1380_v0 }
 0x2c2   :  { %4902 = vmatprep.subr.bf16.mxu1 %v10199_v50  ;;  %v1508_v34 = vld [vmem:[#allocation7 + $0x5f8] sm:$0xff]  ;;  %v10030_v50 = vcombine.low %v1639_v13, %v1643_v42  ;;  %v9880_v29 = vcombine.low %v1488_v62, %v1492_v1 }
 0x2c3   :  { %v9897_v38 = vcombine.high %v1504_v45, %v1508_v34  ;;  %v9896_v27 = vcombine.low %v1504_v45, %v1508_v34  ;;  %v1320_v1 = vld [vmem:[#allocation7 + $0x18] sm:$0xff] }
 0x2c4   :  { %4862 = vmatpush2.bf16.msra.mxu0 %v10070_v40  ;;  %v1372_v40 = vld [vmem:[#allocation7 + $0x1b8] sm:$0xff] }
 0x2c5   :  { %4903 = vmatpush2.bf16.msra.mxu1 %v10198_v43  ;;  %4863 = vmatprep.subr.bf16.mxu0 %v10063_v44  ;;  %v1842_v43 = vrot.slane %v11407_v25, %v11325_v35  ;;  %v9768_v44 = vcombine.low %v1376_v32, %v1380_v0  ;;  %v9761_v51 = vcombine.high %v1368_v39, %v1372_v40  ;;  %v1472_v32 = vld [vmem:[#allocation7 + $0x4d8] sm:$0xff] }
 0x2c6   :  { %4904 = vmatprep.subr.bf16.mxu1 %v10191_v46  ;;  %v1496_v46 = vld [vmem:[#allocation7 + $0x598] sm:$0xff] }
 0x2c7   :  { %v9888_v25 = vcombine.low %v1496_v46, %v1500_v47  ;;  %v1476_v0 = vld [vmem:[#allocation7 + $0x4f8] sm:$0xff] }
 0x2c8   :  { %4864 = vmatpush2.bf16.msra.mxu0 %v10062_v53  ;;  %v1360_v53 = vld [vmem:[#allocation7 + $0x158] sm:$0xff] }
 0x2c9   :  { %4905 = vmatpush2.bf16.msra.mxu1 %v10190_v56  ;;  %4865 = vmatprep.subr.bf16.mxu0 %v10055_v58  ;;  %v1364_v56 = vld [vmem:[#allocation7 + $0x178] sm:$0xff] }
 0x2ca   :  { %4906 = vmatprep.subr.bf16.mxu1 %v10183_v59  ;;  %v9889_v59 = vcombine.high %v1496_v46, %v1500_v47  ;;  %v9752_v42 = vcombine.low %v1360_v53, %v1364_v56 }
 0x2cc   :  { %4866 = vmatpush2.bf16.msra.mxu0 %v10054_v5  ;;  %v9760_v5 = vcombine.low %v1368_v39, %v1372_v40  ;;  %v1464_v39 = vld [vmem:[#allocation7 + $0x498] sm:$0xff] }
 0x2cd   :  { %4907 = vmatpush2.bf16.msra.mxu1 %v10182_v60  ;;  %4867 = vmatprep.subr.bf16.mxu0 %v10047_v6  ;;  %v9753_v6 = vcombine.high %v1360_v53, %v1364_v56  ;;  %v1468_v40 = vld [vmem:[#allocation7 + $0x4b8] sm:$0xff] }
 0x2ce   :  { %4908 = vmatprep.subr.bf16.mxu1 %v10175_v10  ;;  %v9857_v47 = vcombine.high %v1464_v39, %v1468_v40  ;;  %v1460_v53 = vld [vmem:[#allocation7 + $0x478] sm:$0xff] }
 0x2d0   :  { %4868 = vmatpush2.bf16.msra.mxu0 %v10046_v20  ;;  %v1356_v20 = vld [vmem:[#allocation7 + $0x138] sm:$0xff] }
 0x2d1   :  { %4909 = vmatpush2.bf16.msra.mxu1 %v10174_v21  ;;  %4869 = vmatprep.subr.bf16.mxu0 %v10039_v22  ;;  %v1480_v22 = vld [vmem:[#allocation7 + $0x518] sm:$0xff]  ;;  %v9744_v45 = vcombine.low %v1352_v18, %v1356_v20 }
 0x2d2   :  { %4910 = vmatprep.subr.bf16.mxu1 %v10167_v23  ;;  %v1484_v23 = vld [vmem:[#allocation7 + $0x538] sm:$0xff] }
 0x2d3   :  { %v9872_v34 = vcombine.low %v1480_v22, %v1484_v23 }
 0x2d4   :  { %4870 = vmatpush2.bf16.msra.mxu0 %v10038_v30 }
 0x2d5   :  { %4911 = vmatpush2.bf16.msra.mxu1 %v10166_v31  ;;  %4871 = vmatprep.subr.bf16.mxu0 %v10031_v41  ;;  %v9873_v31 = vcombine.high %v1480_v22, %v1484_v23  ;;  %v1344_v41 = vld [vmem:[#allocation7 + $0xd8] sm:$0xff] }
 0x2d6   :  { %4912 = vmatprep.subr.bf16.mxu1 %v10159_v49  ;;  %v1348_v49 = vld [vmem:[#allocation7 + $0xf8] sm:$0xff] }
 0x2d8   :  { %4872 = vmatpush2.bf16.msra.mxu0 %v10030_v50  ;;  %v9737_v50 = vcombine.high %v1344_v41, %v1348_v49 }
 0x2d9   :  { %4913 = vmatpush2.bf16.msra.mxu1 %v10158_v37  ;;  %4923 = vmatprep.subr.bf16.mxu0 %v9769_v26  ;;  %v9865_v37 = vcombine.high %v1472_v32, %v1476_v0  ;;  %v1336_v26 = vld [vmem:[#allocation7 + $0x98] sm:$0xff] }
 0x2da   :  { %4964 = vmatprep.subr.bf16.mxu1 %v9897_v38  ;;  %v1340_v38 = vld [vmem:[#allocation7 + $0xb8] sm:$0xff] }
 0x2db   :  { %v4629_v58 = vpop.f32.mrf.mxu0  ;;  %4874 = vmatmul.mubr.bf16.vlgmr.msra.gmra.mxu0 %v11395_v19  ;;  %v9729_v46 = vcombine.high %v1336_v26, %v1340_v38  ;;  %v9728_v56 = vcombine.low %v1336_v26, %v1340_v38 }
 0x2dc   :  { %v4630_v2 = vadd.f32 %v4629_v58, %v1842_v43  ;;  %v4670_v4 = vpop.f32.mrf.mxu1  ;;  %4915 = vmatmul.mubr.bf16.vlgmr.msra.gmra.mxu1 %v11397_v28  ;;  %4924 = vmatpush1.bf16.msra.mxu0 %v9768_v44  ;;  %v9736_v43 = vcombine.low %v1344_v41, %v1348_v49  ;;  %v9864_v44 = vcombine.low %v1472_v32, %v1476_v0  ;;  %v1424_v32 = vld [vmem:[#allocation7 + $0x358] sm:$0xff] }
 0x2dd   :  { %4955 = vmatprep.mubr.bf16.mxu0 %v11341_v7  ;;  %4965 = vmatpush1.bf16.msra.mxu1 %v9896_v27  ;;  %v4631_v60 = vpop.f32.mrf.mxu0  ;;  %v1328_v27 = vld [vmem:[#allocation7 + $0x58] sm:$0xff]  ;;  %v9856_v58 = vcombine.low %v1464_v39, %v1468_v40 }
 0x2de   :  { %v11438_v10 = vadd.f32 %v4670_v4, %v4630_v2  ;;  %4996 = vmatprep.mubr.bf16.mxu1 %v11345_v9  ;;  %v4632_v14 = vadd.f32 %v4631_v60, %v1846_v48  ;;  %v4672_v15 = vpop.f32.mrf.mxu1  ;;  %4925 = vmatprep.subr.bf16.mxu0 %v9761_v51  ;;  %v9745_v9 = vcombine.high %v1352_v18, %v1356_v20  ;;  %v1332_v48 = vld [vmem:[#allocation7 + $0x78] sm:$0xff] }
 0x2df   :  { %v4633_v21 = vpop.f32.mrf.mxu0  ;;  %4966 = vmatprep.subr.bf16.mxu1 %v9889_v59  ;;  %v1456_v51 = vld [vmem:[#allocation7 + $0x458] sm:$0xff]  ;;  %v9721_v59 = vcombine.high %v1328_v27, %v1332_v48  ;;  %v9720_v60 = vcombine.low %v1328_v27, %v1332_v48 }
 0x2e0   :  { %v11441_v13 = vadd.f32 %v4672_v15, %v4632_v14  ;;  %v4674_v7 = vpop.f32.mrf.mxu1  ;;  %4926 = vmatpush1.bf16.msra.mxu0 %v9760_v5  ;;  %v9849_v62 = vcombine.high %v1456_v51, %v1460_v53  ;;  %v1324_v2 = vld [vmem:[#allocation7 + $0x38] sm:$0xff] }
 0x2e1   :  { %4967 = vmatpush1.bf16.msra.mxu1 %v9888_v25  ;;  %v4634_v24 = vpop.f32.mrf.mxu0  ;;  %4927 = vmatprep.subr.bf16.mxu0 %v9753_v6  ;;  %v1448_v4 = vld [vmem:[#allocation7 + $0x418] sm:$0xff]  ;;  %v9848_v25 = vcombine.low %v1456_v51, %v1460_v53  ;;  %v9713_v6 = vcombine.high %v1320_v1, %v1324_v2  ;;  %v9712_v21 = vcombine.low %v1320_v1, %v1324_v2 }
 0x2e2   :  { %v4675_v30 = vpop.f32.mrf.mxu1  ;;  %4968 = vmatprep.subr.bf16.mxu1 %v9881_v17  ;;  %v1452_v5 = vld [vmem:[#allocation7 + $0x438] sm:$0xff] }
 0x2e3   :  { %v9841_v14 = vcombine.high %v1448_v4, %v1452_v5  ;;  %v1440_v15 = vld [vmem:[#allocation7 + $0x3d8] sm:$0xff]  ;;  %v9840_v22 = vcombine.low %v1448_v4, %v1452_v5 }
 0x2e4   :  { %4928 = vmatpush1.bf16.msra.mxu0 %v9752_v42  ;;  %v1444_v17 = vld [vmem:[#allocation7 + $0x3f8] sm:$0xff] }
 0x2e5   :  { %4969 = vmatpush1.bf16.msra.mxu1 %v9880_v29  ;;  %4929 = vmatprep.subr.bf16.mxu0 %v9745_v9  ;;  %v1568_v18 = vld [vmem:[#allocation7 + $0x7d8] sm:$0xff]  ;;  %v9833_v23 = vcombine.high %v1440_v15, %v1444_v17  ;;  %v9832_v30 = vcombine.low %v1440_v15, %v1444_v17 }
 0x2e6   :  { %4970 = vmatprep.subr.bf16.mxu1 %v9873_v31  ;;  %v1572_v20 = vld [vmem:[#allocation7 + $0x7f8] sm:$0xff] }
 0x2e7   :  { %v9961_v7 = vcombine.high %v1568_v18, %v1572_v20  ;;  %v1432_v42 = vld [vmem:[#allocation7 + $0x398] sm:$0xff]  ;;  %v9960_v31 = vcombine.low %v1568_v18, %v1572_v20 }
 0x2e8   :  { %4930 = vmatpush1.bf16.msra.mxu0 %v9744_v45  ;;  %v1436_v24 = vld [vmem:[#allocation7 + $0x3b8] sm:$0xff] }
 0x2e9   :  { %4971 = vmatpush1.bf16.msra.mxu1 %v9872_v34  ;;  %4931 = vmatprep.subr.bf16.mxu0 %v9737_v50  ;;  %v1560_v29 = vld [vmem:[#allocation7 + $0x798] sm:$0xff]  ;;  %v9825_v41 = vcombine.high %v1432_v42, %v1436_v24  ;;  %v9824_v50 = vcombine.low %v1432_v42, %v1436_v24 }
 0x2ea   :  { %4972 = vmatprep.subr.bf16.mxu1 %v9865_v37  ;;  %v1564_v9 = vld [vmem:[#allocation7 + $0x7b8] sm:$0xff] }
 0x2eb   :  { %v9953_v49 = vcombine.high %v1560_v29, %v1564_v9  ;;  %v1428_v0 = vld [vmem:[#allocation7 + $0x378] sm:$0xff]  ;;  %v9952_v37 = vcombine.low %v1560_v29, %v1564_v9 }
 0x2ec   :  { %4932 = vmatpush1.bf16.msra.mxu0 %v9736_v43  ;;  %v1552_v45 = vld [vmem:[#allocation7 + $0x758] sm:$0xff]  ;;  %v9817_v26 = vcombine.high %v1424_v32, %v1428_v0 }
 0x2ed   :  { %4973 = vmatpush1.bf16.msra.mxu1 %v9864_v44  ;;  %4933 = vmatprep.subr.bf16.mxu0 %v9729_v46  ;;  %v1556_v34 = vld [vmem:[#allocation7 + $0x778] sm:$0xff]  ;;  %v9816_v46 = vcombine.low %v1424_v32, %v1428_v0 }
 0x2ee   :  { %4974 = vmatprep.subr.bf16.mxu1 %v9857_v47  ;;  %v9945_v38 = vcombine.high %v1552_v45, %v1556_v34  ;;  %v1416_v39 = vld [vmem:[#allocation7 + $0x318] sm:$0xff]  ;;  %v9944_v47 = vcombine.low %v1552_v45, %v1556_v34 }
 0x2ef   :  { %v1420_v40 = vld [vmem:[#allocation7 + $0x338] sm:$0xff] }
 0x2f0   :  { %4934 = vmatpush1.bf16.msra.mxu0 %v9728_v56  ;;  %v1544_v43 = vld [vmem:[#allocation7 + $0x718] sm:$0xff]  ;;  %v9809_v27 = vcombine.high %v1416_v39, %v1420_v40 }
 0x2f1   :  { %4975 = vmatpush1.bf16.msra.mxu1 %v9856_v58  ;;  %4935 = vmatprep.subr.bf16.mxu0 %v9721_v59  ;;  %v1548_v44 = vld [vmem:[#allocation7 + $0x738] sm:$0xff]  ;;  %v9808_v59 = vcombine.low %v1416_v39, %v1420_v40 }
 0x2f2   :  { %4976 = vmatprep.subr.bf16.mxu1 %v9849_v62  ;;  %v9937_v48 = vcombine.high %v1544_v43, %v1548_v44  ;;  %v1408_v51 = vld [vmem:[#allocation7 + $0x2d8] sm:$0xff]  ;;  %v9936_v62 = vcombine.low %v1544_v43, %v1548_v44 }
 0x2f3   :  { %v1412_v53 = vld [vmem:[#allocation7 + $0x2f8] sm:$0xff] }
 0x2f4   :  { %4936 = vmatpush1.bf16.msra.mxu0 %v9720_v60  ;;  %v1536_v56 = vld [vmem:[#allocation7 + $0x6d8] sm:$0xff]  ;;  %v9801_v1 = vcombine.high %v1408_v51, %v1412_v53 }
 0x2f5   :  { %4977 = vmatpush1.bf16.msra.mxu1 %v9848_v25  ;;  %4937 = vmatprep.subr.bf16.mxu0 %v9713_v6  ;;  %v1540_v58 = vld [vmem:[#allocation7 + $0x6f8] sm:$0xff]  ;;  %v9800_v6 = vcombine.low %v1408_v51, %v1412_v53 }
 0x2f6   :  { %4978 = vmatprep.subr.bf16.mxu1 %v9841_v14  ;;  %v9929_v2 = vcombine.high %v1536_v56, %v1540_v58  ;;  %v1400_v4 = vld [vmem:[#allocation7 + $0x298] sm:$0xff]  ;;  %v9928_v14 = vcombine.low %v1536_v56, %v1540_v58 }
 0x2f7   :  { %v1404_v5 = vld [vmem:[#allocation7 + $0x2b8] sm:$0xff] }
 0x2f8   :  { %4938 = vmatpush1.bf16.msra.mxu0 %v9712_v21  ;;  %v1528_v60 = vld [vmem:[#allocation7 + $0x698] sm:$0xff]  ;;  %v9793_v15 = vcombine.high %v1400_v4, %v1404_v5 }
 0x2f9   :  { %4979 = vmatpush1.bf16.msra.mxu1 %v9840_v22  ;;  %4939 = vmatprep.subr.bf16.mxu0 %v9833_v23  ;;  %v1532_v25 = vld [vmem:[#allocation7 + $0x6b8] sm:$0xff]  ;;  %v9792_v23 = vcombine.low %v1400_v4, %v1404_v5 }
 0x2fa   :  { %4980 = vmatprep.subr.bf16.mxu1 %v9961_v7  ;;  %v9921_v17 = vcombine.high %v1528_v60, %v1532_v25  ;;  %v1392_v18 = vld [vmem:[#allocation7 + $0x258] sm:$0xff]  ;;  %v9920_v7 = vcombine.low %v1528_v60, %v1532_v25 }
 0x2fb   :  { %v1396_v20 = vld [vmem:[#allocation7 + $0x278] sm:$0xff] }
 0x2fc   :  { %4940 = vmatpush2.bf16.msra.mxu0 %v9832_v30  ;;  %v1520_v21 = vld [vmem:[#allocation7 + $0x658] sm:$0xff]  ;;  %v9785_v42 = vcombine.high %v1392_v18, %v1396_v20 }
 0x2fd   :  { %4981 = vmatpush2.bf16.msra.mxu1 %v9960_v31  ;;  %4941 = vmatprep.subr.bf16.mxu0 %v9825_v41  ;;  %v1524_v22 = vld [vmem:[#allocation7 + $0x678] sm:$0xff]  ;;  %v9784_v41 = vcombine.low %v1392_v18, %v1396_v20 }
 0x2fe   :  { %4982 = vmatprep.subr.bf16.mxu1 %v9953_v49  ;;  %v9913_v24 = vcombine.high %v1520_v21, %v1524_v22  ;;  %v1384_v29 = vld [vmem:[#allocation7 + $0x218] sm:$0xff]  ;;  %v9912_v49 = vcombine.low %v1520_v21, %v1524_v22 }
 0x2ff   :  { %v1388_v9 = vld [vmem:[#allocation7 + $0x238] sm:$0xff] }
 0x300   :  { %4942 = vmatpush2.bf16.msra.mxu0 %v9824_v50  ;;  %v1512_v30 = vld [vmem:[#allocation7 + $0x618] sm:$0xff]  ;;  %v9777_v32 = vcombine.high %v1384_v29, %v1388_v9 }
 0x301   :  { %4983 = vmatpush2.bf16.msra.mxu1 %v9952_v37  ;;  %4943 = vmatprep.subr.bf16.mxu0 %v9817_v26  ;;  %v1516_v31 = vld [vmem:[#allocation7 + $0x638] sm:$0xff]  ;;  %v9776_v26 = vcombine.low %v1384_v29, %v1388_v9 }
 0x302   :  { %4984 = vmatprep.subr.bf16.mxu1 %v9945_v38  ;;  %v9905_v0 = vcombine.high %v1512_v30, %v1516_v31  ;;  %v1632_v45 = vld [vmem:[#allocation7 + $0x9d8] sm:$0xff]  ;;  %v9904_v38 = vcombine.low %v1512_v30, %v1516_v31 }
 0x303   :  { %v1636_v34 = vld [vmem:[#allocation7 + $0x9f8] sm:$0xff] }
 0x304   :  { %4944 = vmatpush2.bf16.msra.mxu0 %v9816_v46  ;;  %v1760_v50 = vld [vmem:[#allocation7 + $0xdd8] sm:$0xff]  ;;  %v10025_v39 = vcombine.high %v1632_v45, %v1636_v34  ;;  %v10024_v46 = vcombine.low %v1632_v45, %v1636_v34 }
 0x305   :  { %4985 = vmatpush2.bf16.msra.mxu1 %v9944_v47  ;;  %4945 = vmatprep.subr.bf16.mxu0 %v9809_v27  ;;  %v1764_v37 = vld [vmem:[#allocation7 + $0xdf8] sm:$0xff] }
 0x306   :  { %4986 = vmatprep.subr.bf16.mxu1 %v9937_v48  ;;  %v10153_v40 = vcombine.high %v1760_v50, %v1764_v37  ;;  %v1624_v43 = vld [vmem:[#allocation7 + $0x998] sm:$0xff]  ;;  %v10152_v48 = vcombine.low %v1760_v50, %v1764_v37 }
 0x307   :  { %v1628_v44 = vld [vmem:[#allocation7 + $0x9b8] sm:$0xff] }
 0x308   :  { %4946 = vmatpush2.bf16.msra.mxu0 %v9808_v59  ;;  %v1752_v47 = vld [vmem:[#allocation7 + $0xd98] sm:$0xff]  ;;  %v10017_v51 = vcombine.high %v1624_v43, %v1628_v44  ;;  %v10016_v5 = vcombine.low %v1624_v43, %v1628_v44 }
 0x309   :  { %4987 = vmatpush2.bf16.msra.mxu1 %v9936_v62  ;;  %4947 = vmatprep.subr.bf16.mxu0 %v9801_v1  ;;  %v1756_v27 = vld [vmem:[#allocation7 + $0xdb8] sm:$0xff] }
 0x30a   :  { %4988 = vmatprep.subr.bf16.mxu1 %v9929_v2  ;;  %v1616_v53 = vld [vmem:[#allocation7 + $0x958] sm:$0xff]  ;;  %v10145_v59 = vcombine.high %v1752_v47, %v1756_v27  ;;  %v10144_v25 = vcombine.low %v1752_v47, %v1756_v27 }
 0x30b   :  { %v1620_v56 = vld [vmem:[#allocation7 + $0x978] sm:$0xff] }
 0x30c   :  { %4948 = vmatpush2.bf16.msra.mxu0 %v9800_v6  ;;  %v1744_v62 = vld [vmem:[#allocation7 + $0xd58] sm:$0xff]  ;;  %v10009_v6 = vcombine.high %v1616_v53, %v1620_v56  ;;  %v10008_v21 = vcombine.low %v1616_v53, %v1620_v56 }
 0x30d   :  { %4989 = vmatpush2.bf16.msra.mxu1 %v9928_v14  ;;  %4949 = vmatprep.subr.bf16.mxu0 %v9793_v15  ;;  %v1748_v1 = vld [vmem:[#allocation7 + $0xd78] sm:$0xff] }
 0x30e   :  { %4990 = vmatprep.subr.bf16.mxu1 %v9921_v17  ;;  %v1608_v15 = vld [vmem:[#allocation7 + $0x918] sm:$0xff] }
 0x30f   :  { %v1612_v17 = vld [vmem:[#allocation7 + $0x938] sm:$0xff] }
 0x310   :  { %4950 = vmatpush2.bf16.msra.mxu0 %v9792_v23  ;;  %v1736_v18 = vld [vmem:[#allocation7 + $0xd18] sm:$0xff]  ;;  %v10136_v23 = vcombine.low %v1744_v62, %v1748_v1  ;;  %v10000_v31 = vcombine.low %v1608_v15, %v1612_v17 }
 0x311   :  { %4991 = vmatpush2.bf16.msra.mxu1 %v9920_v7  ;;  %4951 = vmatprep.subr.bf16.mxu0 %v9785_v42  ;;  %v1740_v20 = vld [vmem:[#allocation7 + $0xd38] sm:$0xff]  ;;  %v10001_v7 = vcombine.high %v1608_v15, %v1612_v17 }
 0x312   :  { %4992 = vmatprep.subr.bf16.mxu1 %v9913_v24  ;;  %v1600_v24 = vld [vmem:[#allocation7 + $0x8d8] sm:$0xff] }
 0x313   :  { %v1604_v29 = vld [vmem:[#allocation7 + $0x8f8] sm:$0xff] }
 0x314   :  { %4952 = vmatpush2.bf16.msra.mxu0 %v9784_v41  ;;  %v1728_v9 = vld [vmem:[#allocation7 + $0xcd8] sm:$0xff]  ;;  %v10128_v41 = vcombine.low %v1736_v18, %v1740_v20  ;;  %v9992_v37 = vcombine.low %v1600_v24, %v1604_v29 }
 0x315   :  { %4993 = vmatpush2.bf16.msra.mxu1 %v9912_v49  ;;  %4953 = vmatprep.subr.bf16.mxu0 %v9777_v32  ;;  %v1732_v30 = vld [vmem:[#allocation7 + $0xcf8] sm:$0xff]  ;;  %v9993_v49 = vcombine.high %v1600_v24, %v1604_v29 }
 0x316   :  { %4994 = vmatprep.subr.bf16.mxu1 %v9905_v0  ;;  %v10121_v32 = vcombine.high %v1728_v9, %v1732_v30  ;;  %v1592_v0 = vld [vmem:[#allocation7 + $0x898] sm:$0xff] }
 0x317   :  { %v1596_v45 = vld [vmem:[#allocation7 + $0x8b8] sm:$0xff] }
 0x318   :  { %4954 = vmatpush2.bf16.msra.mxu0 %v9776_v26  ;;  %v1720_v34 = vld [vmem:[#allocation7 + $0xc98] sm:$0xff]  ;;  %v10120_v26 = vcombine.low %v1728_v9, %v1732_v30  ;;  %v9984_v47 = vcombine.low %v1592_v0, %v1596_v45 }
 0x319   :  { %4995 = vmatpush2.bf16.msra.mxu1 %v9904_v38  ;;  %5005 = vmatprep.subr.bf16.mxu0 %v10025_v39  ;;  %v1724_v50 = vld [vmem:[#allocation7 + $0xcb8] sm:$0xff]  ;;  %v9985_v38 = vcombine.high %v1592_v0, %v1596_v45 }
 0x31a   :  { %5046 = vmatprep.subr.bf16.mxu1 %v10153_v40  ;;  %v10113_v39 = vcombine.high %v1720_v34, %v1724_v50  ;;  %v1584_v40 = vld [vmem:[#allocation7 + $0x858] sm:$0xff]  ;;  %v10112_v27 = vcombine.low %v1720_v34, %v1724_v50 }
 0x31b   :  { %v4711_v58 = vpop.f32.mrf.mxu0  ;;  %4956 = vmatmul.mubr.bf16.vlgmr.msra.gmra.mxu0 %v11343_v8  ;;  %v1588_v43 = vld [vmem:[#allocation7 + $0x878] sm:$0xff] }
 0x31c   :  { %v4712_v2 = vadd.f32 %v4711_v58, %v11438_v10  ;;  %v4752_v4 = vpop.f32.mrf.mxu1  ;;  %4997 = vmatmul.mubr.bf16.vlgmr.msra.gmra.mxu1 %v11347_v11  ;;  %5006 = vmatpush1.bf16.msra.mxu0 %v10024_v46  ;;  %v10137_v10 = vcombine.high %v1744_v62, %v1748_v1  ;;  %v1712_v44 = vld [vmem:[#allocation7 + $0xc58] sm:$0xff]  ;;  %v9976_v62 = vcombine.low %v1584_v40, %v1588_v43 }
 0x31d   :  { %5037 = vmatprep.mubr.bf16.mxu0 %v11387_v52  ;;  %5047 = vmatpush1.bf16.msra.mxu1 %v10152_v48  ;;  %v11447_v60 = vpop.f32.mrf.mxu0  ;;  %v1716_v46 = vld [vmem:[#allocation7 + $0xc78] sm:$0xff]  ;;  %v9977_v48 = vcombine.high %v1584_v40, %v1588_v43 }
 0x31e   :  { %v11449_v14 = vadd.f32 %v4752_v4, %v4712_v2  ;;  %5078 = vmatprep.mubr.bf16.mxu1 %v11389_v55  ;;  %v11452_v8 = vpop.f32.mrf.mxu1  ;;  %5007 = vmatprep.subr.bf16.mxu0 %v10017_v51  ;;  %v10129_v55 = vcombine.high %v1736_v18, %v1740_v20  ;;  %v10105_v51 = vcombine.high %v1712_v44, %v1716_v46  ;;  %v1576_v53 = vld [vmem:[#allocation7 + $0x818] sm:$0xff] }
 0x31f   :  { %v4715_v11 = vpop.f32.mrf.mxu0  ;;  %5048 = vmatprep.subr.bf16.mxu1 %v10145_v59  ;;  %v1580_v56 = vld [vmem:[#allocation7 + $0x838] sm:$0xff]  ;;  %v10104_v1 = vcombine.low %v1712_v44, %v1716_v46 }
 0x320   :  { %v4756_v52 = vpop.f32.mrf.mxu1  ;;  %5008 = vmatpush1.bf16.msra.mxu0 %v10016_v5  ;;  %v1704_v58 = vld [vmem:[#allocation7 + $0xc18] sm:$0xff]  ;;  %v9969_v2 = vcombine.high %v1576_v53, %v1580_v56  ;;  %v9968_v15 = vcombine.low %v1576_v53, %v1580_v56 }
 0x321   :  { %5049 = vmatpush1.bf16.msra.mxu1 %v10144_v25  ;;  %v4716_v22 = vpop.f32.mrf.mxu0  ;;  %5009 = vmatprep.subr.bf16.mxu0 %v10009_v6  ;;  %v1708_v59 = vld [vmem:[#allocation7 + $0xc38] sm:$0xff] }
 0x322   :  { %v4757_v42 = vpop.f32.mrf.mxu1  ;;  %5050 = vmatprep.subr.bf16.mxu1 %v10137_v10  ;;  %v10097_v4 = vcombine.high %v1704_v58, %v1708_v59  ;;  %v1696_v5 = vld [vmem:[#allocation7 + $0xbd8] sm:$0xff]  ;;  %v10096_v17 = vcombine.low %v1704_v58, %v1708_v59 }
 0x323   :  { %v1700_v25 = vld [vmem:[#allocation7 + $0xbf8] sm:$0xff] }
 0x324   :  { %5010 = vmatpush1.bf16.msra.mxu0 %v10008_v21  ;;  %v1824_v6 = vld [vmem:[#allocation7 + $0xfd8] sm:$0xff]  ;;  %v10089_v11 = vcombine.high %v1696_v5, %v1700_v25 }
 0x325   :  { %5051 = vmatpush1.bf16.msra.mxu1 %v10136_v23  ;;  %5011 = vmatprep.subr.bf16.mxu0 %v10001_v7  ;;  %v1828_v10 = vld [vmem:[#allocation7 + $0xff8] sm:$0xff]  ;;  %v10088_v23 = vcombine.low %v1696_v5, %v1700_v25 }
 0x326   :  { %5052 = vmatprep.subr.bf16.mxu1 %v10129_v55  ;;  %v10217_v18 = vcombine.high %v1824_v6, %v1828_v10  ;;  %v1688_v20 = vld [vmem:[#allocation7 + $0xb98] sm:$0xff]  ;;  %v10216_v7 = vcombine.low %v1824_v6, %v1828_v10 }
 0x327   :  { %v1692_v52 = vld [vmem:[#allocation7 + $0xbb8] sm:$0xff] }
 0x328   :  { %5012 = vmatpush1.bf16.msra.mxu0 %v10000_v31  ;;  %v1816_v21 = vld [vmem:[#allocation7 + $0xf98] sm:$0xff]  ;;  %v10081_v42 = vcombine.high %v1688_v20, %v1692_v52  ;;  %v10080_v31 = vcombine.low %v1688_v20, %v1692_v52 }
 0x329   :  { %5053 = vmatpush1.bf16.msra.mxu1 %v10128_v41  ;;  %5013 = vmatprep.subr.bf16.mxu0 %v9993_v49  ;;  %v1820_v22 = vld [vmem:[#allocation7 + $0xfb8] sm:$0xff] }
 0x32a   :  { %5054 = vmatprep.subr.bf16.mxu1 %v10121_v32  ;;  %v10209_v55 = vcombine.high %v1816_v21, %v1820_v22  ;;  %v1680_v24 = vld [vmem:[#allocation7 + $0xb58] sm:$0xff]  ;;  %v10208_v41 = vcombine.low %v1816_v21, %v1820_v22 }
 0x32b   :  { %v1684_v29 = vld [vmem:[#allocation7 + $0xb78] sm:$0xff] }
 0x32c   :  { %5014 = vmatpush1.bf16.msra.mxu0 %v9992_v37  ;;  %v1808_v9 = vld [vmem:[#allocation7 + $0xf58] sm:$0xff]  ;;  %v10073_v49 = vcombine.high %v1680_v24, %v1684_v29  ;;  %v10072_v37 = vcombine.low %v1680_v24, %v1684_v29  ;;  %v5159_v29 = vld [vmem:[#allocation10 + $0x1c0] sm:$0xff] }
 0x32d   :  { %5055 = vmatpush1.bf16.msra.mxu1 %v10120_v26  ;;  %5015 = vmatprep.subr.bf16.mxu0 %v9985_v38  ;;  %v1812_v30 = vld [vmem:[#allocation7 + $0xf78] sm:$0xff] }
 0x32e   :  { %5056 = vmatprep.subr.bf16.mxu1 %v10113_v39  ;;  %v10201_v32 = vcombine.high %v1808_v9, %v1812_v30  ;;  %v1672_v0 = vld [vmem:[#allocation7 + $0xb18] sm:$0xff]  ;;  %v10200_v26 = vcombine.low %v1808_v9, %v1812_v30  ;;  %v5163_v9 = vld [vmem:[#allocation10 + $0x1e0] sm:$0xff] }
 0x32f   :  { %v1676_v45 = vld [vmem:[#allocation7 + $0xb38] sm:$0xff]  ;;  %v5287_v30 = vld [vmem:[#allocation10 + $0x5c0] sm:$0xff] }
 0x330   :  { %5016 = vmatpush1.bf16.msra.mxu0 %v9984_v47  ;;  %v1800_v34 = vld [vmem:[#allocation7 + $0xf18] sm:$0xff]  ;;  %v10065_v38 = vcombine.high %v1672_v0, %v1676_v45  ;;  %v10064_v47 = vcombine.low %v1672_v0, %v1676_v45  ;;  %v5088_v0 = vmax.f32 %v11429_v12, 0.0  ;;  %v5151_v45 = vld [vmem:[#allocation10 + $0x180] sm:$0xff] }
 0x331   :  { %5057 = vmatpush1.bf16.msra.mxu1 %v10112_v27  ;;  %5017 = vmatprep.subr.bf16.mxu0 %v9977_v48  ;;  %v1804_v50 = vld [vmem:[#allocation7 + $0xf38] sm:$0xff] }
 0x332   :  { %5058 = vmatprep.subr.bf16.mxu1 %v10105_v51  ;;  %v10193_v39 = vcombine.high %v1800_v34, %v1804_v50  ;;  %v1664_v40 = vld [vmem:[#allocation7 + $0xad8] sm:$0xff]  ;;  %v10192_v27 = vcombine.low %v1800_v34, %v1804_v50  ;;  %v5155_v34 = vld [vmem:[#allocation10 + $0x1a0] sm:$0xff]  ;;  %v11462_v12 = vpack.c.bf16 %v5088_v0, %v5088_v0 }
 0x333   :  { %v1668_v43 = vld [vmem:[#allocation7 + $0xaf8] sm:$0xff] }
 0x334   :  { %5018 = vmatpush1.bf16.msra.mxu0 %v9976_v62  ;;  %v1792_v44 = vld [vmem:[#allocation7 + $0xed8] sm:$0xff]  ;;  %v10057_v48 = vcombine.high %v1664_v40, %v1668_v43  ;;  %v10056_v62 = vcombine.low %v1664_v40, %v1668_v43  ;;  %v10267_v43 = vcombine.high %v5151_v45, %v5155_v34 }
 0x335   :  { %5059 = vmatpush1.bf16.msra.mxu1 %v10104_v1  ;;  %5019 = vmatprep.subr.bf16.mxu0 %v9969_v2  ;;  %v1796_v46 = vld [vmem:[#allocation7 + $0xef8] sm:$0xff] }
 0x336   :  { %5060 = vmatprep.subr.bf16.mxu1 %v10097_v4  ;;  %v10185_v51 = vcombine.high %v1792_v44, %v1796_v46  ;;  %v1656_v53 = vld [vmem:[#allocation7 + $0xa98] sm:$0xff]  ;;  %v10184_v1 = vcombine.low %v1792_v44, %v1796_v46  ;;  %v5143_v44 = vld [vmem:[#allocation10 + $0x140] sm:$0xff] }
 0x337   :  { %v1660_v56 = vld [vmem:[#allocation7 + $0xab8] sm:$0xff]  ;;  %v5147_v46 = vld [vmem:[#allocation10 + $0x160] sm:$0xff] }
 0x338   :  { %5020 = vmatpush1.bf16.msra.mxu0 %v9968_v15  ;;  %v1784_v58 = vld [vmem:[#allocation7 + $0xe98] sm:$0xff]  ;;  %v10049_v2 = vcombine.high %v1656_v53, %v1660_v56  ;;  %v10048_v15 = vcombine.low %v1656_v53, %v1660_v56 }
 0x339   :  { %5061 = vmatpush1.bf16.msra.mxu1 %v10096_v17  ;;  %5021 = vmatprep.subr.bf16.mxu0 %v10089_v11  ;;  %v1788_v59 = vld [vmem:[#allocation7 + $0xeb8] sm:$0xff] }
 0x33a   :  { %5062 = vmatprep.subr.bf16.mxu1 %v10217_v18  ;;  %v10177_v4 = vcombine.high %v1784_v58, %v1788_v59  ;;  %v1648_v5 = vld [vmem:[#allocation7 + $0xa58] sm:$0xff]  ;;  %v10176_v17 = vcombine.low %v1784_v58, %v1788_v59  ;;  %v10266_v59 = vcombine.low %v5151_v45, %v5155_v34  ;;  %v5111_v34 = vld [vmem:[#allocation10 + $0x40] sm:$0xff] }
 0x33b   :  { %v1652_v25 = vld [vmem:[#allocation7 + $0xa78] sm:$0xff] }
 0x33c   :  { %5022 = vmatpush2.bf16.msra.mxu0 %v10088_v23  ;;  %v1776_v6 = vld [vmem:[#allocation7 + $0xe58] sm:$0xff]  ;;  %v10041_v11 = vcombine.high %v1648_v5, %v1652_v25  ;;  %v4714_v23 = vadd.f32 %v11447_v60, %v11441_v13  ;;  %v10275_v13 = vcombine.high %v5159_v29, %v5163_v9 }
 0x33d   :  { %5063 = vmatpush2.bf16.msra.mxu1 %v10216_v7  ;;  %5023 = vmatprep.subr.bf16.mxu0 %v10081_v42  ;;  %v1780_v10 = vld [vmem:[#allocation7 + $0xe78] sm:$0xff]  ;;  %v10040_v7 = vcombine.low %v1648_v5, %v1652_v25  ;;  %v5135_v25 = vld [vmem:[#allocation10 + $0x100] sm:$0xff] }
 0x33e   :  { %5064 = vmatprep.subr.bf16.mxu1 %v10209_v55  ;;  %v10169_v18 = vcombine.high %v1776_v6, %v1780_v10  ;;  %v1640_v20 = vld [vmem:[#allocation7 + $0xa18] sm:$0xff]  ;;  %v10168_v42 = vcombine.low %v1776_v6, %v1780_v10  ;;  %v5139_v6 = vld [vmem:[#allocation10 + $0x120] sm:$0xff] }
 0x33f   :  { %v1644_v52 = vld [vmem:[#allocation7 + $0xa38] sm:$0xff]  ;;  %v5263_v10 = vld [vmem:[#allocation10 + $0x500] sm:$0xff] }
 0x340   :  { %5024 = vmatpush2.bf16.msra.mxu0 %v10080_v31  ;;  %v1768_v21 = vld [vmem:[#allocation7 + $0xe18] sm:$0xff]  ;;  %v10033_v55 = vcombine.high %v1640_v20, %v1644_v52  ;;  %v5291_v31 = vld [vmem:[#allocation10 + $0x5e0] sm:$0xff] }
 0x341   :  { %5065 = vmatpush2.bf16.msra.mxu1 %v10208_v41  ;;  %5025 = vmatprep.subr.bf16.mxu0 %v10073_v49  ;;  %v1772_v22 = vld [vmem:[#allocation7 + $0xe38] sm:$0xff]  ;;  %v4755_v41 = vadd.f32 %v11452_v8, %v4714_v23  ;;  %v10032_v49 = vcombine.low %v1640_v20, %v1644_v52  ;;  %v10403_v60 = vcombine.high %v5287_v30, %v5291_v31  ;;  %v5127_v23 = vld [vmem:[#allocation10 + $0xc0] sm:$0xff] }
 0x342   :  { %5066 = vmatprep.subr.bf16.mxu1 %v10201_v32  ;;  %v10161_v24 = vcombine.high %v1768_v21, %v1772_v22  ;;  %v10160_v32 = vcombine.low %v1768_v21, %v1772_v22  ;;  %v10274_v8 = vcombine.low %v5159_v29, %v5163_v9  ;;  %v10402_v40 = vcombine.low %v5287_v30, %v5291_v31  ;;  %v5119_v31 = vld [vmem:[#allocation10 + $0x80] sm:$0xff] }
 0x343   :  { %v5090_v50 = vmax.f32 %v4755_v41, 0.0  ;;  %v10251_v52 = vcombine.high %v5135_v25, %v5139_v6  ;;  %v5123_v41 = vld [vmem:[#allocation10 + $0xa0] sm:$0xff] }
 0x344   :  { %5026 = vmatpush2.bf16.msra.mxu0 %v10072_v37  ;;  %v11458_v37 = vld [vmem:[#allocation9] sm:$0xff]  ;;  %v10235_v0 = vcombine.high %v5119_v31, %v5123_v41 }
 0x345   :  { %5067 = vmatpush2.bf16.msra.mxu1 %v10200_v26  ;;  %5027 = vmatprep.subr.bf16.mxu0 %v10065_v38  ;;  %v1850_v26 = vrot.slane %v11458_v37, %v11360_v54  ;;  %v5279_v38 = vld [vmem:[#allocation10 + $0x580] sm:$0xff]  ;;  %v11465_v53 = vpack.c.bf16 %v5090_v50, %v5090_v50 }
 0x346   :  { %5068 = vmatprep.subr.bf16.mxu1 %v10193_v39  ;;  %v5283_v39 = vld [vmem:[#allocation10 + $0x5a0] sm:$0xff] }
 0x347   :  { %v5115_v50 = vld [vmem:[#allocation10 + $0x60] sm:$0xff] }
 0x348   :  { %5028 = vmatpush2.bf16.msra.mxu0 %v10064_v47 }
 0x349   :  { %5069 = vmatpush2.bf16.msra.mxu1 %v10192_v27  ;;  %5029 = vmatprep.subr.bf16.mxu0 %v10057_v48  ;;  %v10395_v27 = vcombine.high %v5279_v38, %v5283_v39  ;;  %v5271_v48 = vld [vmem:[#allocation10 + $0x540] sm:$0xff] }
 0x34a   :  { %5070 = vmatprep.subr.bf16.mxu1 %v10185_v51  ;;  %v5275_v51 = vld [vmem:[#allocation10 + $0x560] sm:$0xff] }
 0x34b   :  { %v10387_v5 = vcombine.high %v5271_v48, %v5275_v51  ;;  %v10386_v20 = vcombine.low %v5271_v48, %v5275_v51  ;;  %v10226_v48 = vcombine.low %v5111_v34, %v5115_v50 }
 0x34c   :  { %5030 = vmatpush2.bf16.msra.mxu0 %v10056_v62 }
 0x34d   :  { %5071 = vmatpush2.bf16.msra.mxu1 %v10184_v1  ;;  %5031 = vmatprep.subr.bf16.mxu0 %v10049_v2  ;;  %v10394_v1 = vcombine.low %v5279_v38, %v5283_v39  ;;  %v10259_v2 = vcombine.high %v5143_v44, %v5147_v46  ;;  %v10234_v38 = vcombine.low %v5119_v31, %v5123_v41  ;;  %v5199_v31 = vld [vmem:[#allocation10 + $0x300] sm:$0xff] }
 0x34e   :  { %5072 = vmatprep.subr.bf16.mxu1 %v10177_v4  ;;  %v5203_v41 = vld [vmem:[#allocation10 + $0x320] sm:$0xff] }
 0x350   :  { %5032 = vmatpush2.bf16.msra.mxu0 %v10048_v15  ;;  %v5267_v15 = vld [vmem:[#allocation10 + $0x520] sm:$0xff] }
 0x351   :  { %5073 = vmatpush2.bf16.msra.mxu1 %v10176_v17  ;;  %5033 = vmatprep.subr.bf16.mxu0 %v10041_v11  ;;  %v10258_v11 = vcombine.low %v5143_v44, %v5147_v46  ;;  %v10379_v22 = vcombine.high %v5263_v10, %v5267_v15  ;;  %v10378_v29 = vcombine.low %v5263_v10, %v5267_v15  ;;  %v5103_v44 = vld [vmem:[#allocation10] sm:$0xff] }
 0x352   :  { %5074 = vmatprep.subr.bf16.mxu1 %v10169_v18  ;;  %v5107_v46 = vld [vmem:[#allocation10 + $0x20] sm:$0xff] }
 0x353   :  { %v5215_v15 = vld [vmem:[#allocation10 + $0x380] sm:$0xff] }
 0x354   :  { %5034 = vmatpush2.bf16.msra.mxu0 %v10040_v7  ;;  %v5131_v7 = vld [vmem:[#allocation10 + $0xe0] sm:$0xff] }
 0x355   :  { %5075 = vmatpush2.bf16.msra.mxu1 %v10168_v42  ;;  %5035 = vmatprep.subr.bf16.mxu0 %v10033_v55  ;;  %v5255_v42 = vld [vmem:[#allocation10 + $0x4c0] sm:$0xff]  ;;  %v10243_v9 = vcombine.high %v5127_v23, %v5131_v7 }
 0x356   :  { %5076 = vmatprep.subr.bf16.mxu1 %v10161_v24  ;;  %v5259_v55 = vld [vmem:[#allocation10 + $0x4e0] sm:$0xff]  ;;  %v10250_v24 = vcombine.low %v5135_v25, %v5139_v6  ;;  %v10218_v25 = vcombine.low %v5103_v44, %v5107_v46 }
 0x357   :  { %v10371_v30 = vcombine.high %v5255_v42, %v5259_v55 }
 0x358   :  { %5036 = vmatpush2.bf16.msra.mxu0 %v10032_v49  ;;  %v5247_v49 = vld [vmem:[#allocation10 + $0x480] sm:$0xff] }
 0x359   :  { %5077 = vmatpush2.bf16.msra.mxu1 %v10160_v32  ;;  %8217 = vmatprep.subr.bf16.mxu0 %v10275_v13  ;;  %v5251_v32 = vld [vmem:[#allocation10 + $0x4a0] sm:$0xff]  ;;  %v10242_v13 = vcombine.low %v5127_v23, %v5131_v7 }
 0x35a   :  { %8258 = vmatprep.subr.bf16.mxu1 %v10403_v60  ;;  %v10370_v60 = vcombine.low %v5255_v42, %v5259_v55  ;;  %v10363_v45 = vcombine.high %v5247_v49, %v5251_v32  ;;  %v10362_v39 = vcombine.low %v5247_v49, %v5251_v32  ;;  %v5207_v23 = vld [vmem:[#allocation10 + $0x340] sm:$0xff] }
 0x35b   :  { %v4793_v47 = vpop.f32.mrf.mxu0  ;;  %5038 = vmatmul.mubr.bf16.vlgmr.msra.gmra.mxu0 %v11395_v19  ;;  %v5211_v7 = vld [vmem:[#allocation10 + $0x360] sm:$0xff] }
 0x35c   :  { %v4794_v56 = vadd.f32 %v4793_v47, %v1850_v26  ;;  %v4834_v58 = vpop.f32.mrf.mxu1  ;;  %5079 = vmatmul.mubr.bf16.vlgmr.msra.gmra.mxu1 %v11397_v28  ;;  %8218 = vmatpush1.bf16.msra.mxu0 %v10274_v8  ;;  %v5239_v26 = vld [vmem:[#allocation10 + $0x440] sm:$0xff] }
 0x35d   :  { %8249 = vmatprep.mubr.bf16.mxu0 %v11462_v12  ;;  %8259 = vmatpush1.bf16.msra.mxu1 %v10402_v40  ;;  %v11469_v62 = vpop.f32.mrf.mxu0  ;;  %v5243_v8 = vld [vmem:[#allocation10 + $0x460] sm:$0xff]  ;;  %v10227_v40 = vcombine.high %v5111_v34, %v5115_v50 }
 0x35e   :  { %v11471_v4 = vadd.f32 %v4834_v58, %v4794_v56  ;;  %8290 = vmatprep.mubr.bf16.mxu1 %v11465_v53  ;;  %v11474_v19 = vpop.f32.mrf.mxu1  ;;  %8219 = vmatprep.subr.bf16.mxu0 %v10267_v43  ;;  %v10355_v43 = vcombine.high %v5239_v26, %v5243_v8  ;;  %v5231_v47 = vld [vmem:[#allocation10 + $0x400] sm:$0xff]  ;;  %v10354_v51 = vcombine.low %v5239_v26, %v5243_v8 }
 0x35f   :  { %v4797_v28 = vpop.f32.mrf.mxu0  ;;  %8260 = vmatprep.subr.bf16.mxu1 %v10395_v27  ;;  %v5235_v27 = vld [vmem:[#allocation10 + $0x420] sm:$0xff]  ;;  %v10219_v56 = vcombine.high %v5103_v44, %v5107_v46 }
 0x360   :  { %v4838_v17 = vpop.f32.mrf.mxu1  ;;  %8220 = vmatpush1.bf16.msra.mxu0 %v10266_v59  ;;  %v10347_v58 = vcombine.high %v5231_v47, %v5235_v27  ;;  %v5223_v59 = vld [vmem:[#allocation10 + $0x3c0] sm:$0xff]  ;;  %v10346_v6 = vcombine.low %v5231_v47, %v5235_v27 }
 0x361   :  { %8261 = vmatpush1.bf16.msra.mxu1 %v10394_v1  ;;  %v4798_v18 = vpop.f32.mrf.mxu0  ;;  %8221 = vmatprep.subr.bf16.mxu0 %v10259_v2  ;;  %v5227_v1 = vld [vmem:[#allocation10 + $0x3e0] sm:$0xff] }
 0x362   :  { %v4839_v21 = vpop.f32.mrf.mxu1  ;;  %8262 = vmatprep.subr.bf16.mxu1 %v10387_v5  ;;  %v5351_v2 = vld [vmem:[#allocation10 + $0x7c0] sm:$0xff]  ;;  %v10339_v28 = vcombine.high %v5223_v59, %v5227_v1 }
 0x363   :  { %v5355_v5 = vld [vmem:[#allocation10 + $0x7e0] sm:$0xff] }
 0x364   :  { %8222 = vmatpush1.bf16.msra.mxu0 %v10258_v11  ;;  %v10467_v10 = vcombine.high %v5351_v2, %v5355_v5  ;;  %v5219_v17 = vld [vmem:[#allocation10 + $0x3a0] sm:$0xff] }
 0x365   :  { %8263 = vmatpush1.bf16.msra.mxu1 %v10386_v20  ;;  %8223 = vmatprep.subr.bf16.mxu0 %v10251_v52  ;;  %v5343_v11 = vld [vmem:[#allocation10 + $0x780] sm:$0xff]  ;;  %v10338_v20 = vcombine.low %v5223_v59, %v5227_v1  ;;  %v10466_v52 = vcombine.low %v5351_v2, %v5355_v5  ;;  %v10331_v21 = vcombine.high %v5215_v15, %v5219_v17 }
 0x366   :  { %8264 = vmatprep.subr.bf16.mxu1 %v10379_v22  ;;  %v5347_v18 = vld [vmem:[#allocation10 + $0x7a0] sm:$0xff] }
 0x367   :  { %v10459_v22 = vcombine.high %v5343_v11, %v5347_v18  ;;  %v5335_v42 = vld [vmem:[#allocation10 + $0x740] sm:$0xff] }
 0x368   :  { %8224 = vmatpush1.bf16.msra.mxu0 %v10250_v24  ;;  %v5339_v55 = vld [vmem:[#allocation10 + $0x760] sm:$0xff]  ;;  %v10330_v24 = vcombine.low %v5215_v15, %v5219_v17 }
 0x369   :  { %8265 = vmatpush1.bf16.msra.mxu1 %v10378_v29  ;;  %8225 = vmatprep.subr.bf16.mxu0 %v10243_v9  ;;  %v10458_v29 = vcombine.low %v5343_v11, %v5347_v18  ;;  %v10323_v9 = vcombine.high %v5207_v23, %v5211_v7  ;;  %v5327_v49 = vld [vmem:[#allocation10 + $0x700] sm:$0xff] }
 0x36a   :  { %8266 = vmatprep.subr.bf16.mxu1 %v10371_v30  ;;  %v10451_v30 = vcombine.high %v5335_v42, %v5339_v55  ;;  %v5331_v32 = vld [vmem:[#allocation10 + $0x720] sm:$0xff] }
 0x36b   :  { %v5191_v34 = vld [vmem:[#allocation10 + $0x2c0] sm:$0xff] }
 0x36c   :  { %8226 = vmatpush1.bf16.msra.mxu0 %v10242_v13  ;;  %v10322_v13 = vcombine.low %v5207_v23, %v5211_v7  ;;  %v5195_v50 = vld [vmem:[#allocation10 + $0x2e0] sm:$0xff] }
 0x36d   :  { %8267 = vmatpush1.bf16.msra.mxu1 %v10370_v60  ;;  %8227 = vmatprep.subr.bf16.mxu0 %v10235_v0  ;;  %v10450_v60 = vcombine.low %v5335_v42, %v5339_v55  ;;  %v10315_v0 = vcombine.high %v5199_v31, %v5203_v41  ;;  %v5319_v26 = vld [vmem:[#allocation10 + $0x6c0] sm:$0xff] }
 0x36e   :  { %8268 = vmatprep.subr.bf16.mxu1 %v10363_v45  ;;  %v10443_v45 = vcombine.high %v5327_v49, %v5331_v32  ;;  %v5323_v8 = vld [vmem:[#allocation10 + $0x6e0] sm:$0xff] }
 0x36f   :  { %v5183_v44 = vld [vmem:[#allocation10 + $0x280] sm:$0xff] }
 0x370   :  { %8228 = vmatpush1.bf16.msra.mxu0 %v10234_v38  ;;  %v10314_v38 = vcombine.low %v5199_v31, %v5203_v41  ;;  %v5187_v46 = vld [vmem:[#allocation10 + $0x2a0] sm:$0xff]  ;;  %v5089_v41 = vmax.f32 %v11449_v14, 0.0 }
 0x371   :  { %8269 = vmatpush1.bf16.msra.mxu1 %v10362_v39  ;;  %8229 = vmatprep.subr.bf16.mxu0 %v10227_v40  ;;  %v10442_v39 = vcombine.low %v5327_v49, %v5331_v32  ;;  %v10307_v40 = vcombine.high %v5191_v34, %v5195_v50  ;;  %v5311_v47 = vld [vmem:[#allocation10 + $0x680] sm:$0xff] }
 0x372   :  { %8270 = vmatprep.subr.bf16.mxu1 %v10355_v43  ;;  %v10435_v43 = vcombine.high %v5319_v26, %v5323_v8  ;;  %v5315_v27 = vld [vmem:[#allocation10 + $0x6a0] sm:$0xff] }
 0x373   :  { %v5175_v59 = vld [vmem:[#allocation10 + $0x240] sm:$0xff] }
 0x374   :  { %8230 = vmatpush1.bf16.msra.mxu0 %v10226_v48  ;;  %v10306_v48 = vcombine.low %v5191_v34, %v5195_v50  ;;  %v5179_v1 = vld [vmem:[#allocation10 + $0x260] sm:$0xff] }
 0x375   :  { %8271 = vmatpush1.bf16.msra.mxu1 %v10354_v51  ;;  %8231 = vmatprep.subr.bf16.mxu0 %v10219_v56  ;;  %v10434_v51 = vcombine.low %v5319_v26, %v5323_v8  ;;  %v10299_v56 = vcombine.high %v5183_v44, %v5187_v46  ;;  %v5303_v2 = vld [vmem:[#allocation10 + $0x640] sm:$0xff]  ;;  %v11483_v26 = vpack.c.bf16 %v5089_v41, %v5089_v41 }
 0x376   :  { %8272 = vmatprep.subr.bf16.mxu1 %v10347_v58  ;;  %v10427_v58 = vcombine.high %v5311_v47, %v5315_v27  ;;  %v5307_v5 = vld [vmem:[#allocation10 + $0x660] sm:$0xff] }
 0x377   :  { %v5167_v15 = vld [vmem:[#allocation10 + $0x200] sm:$0xff] }
 0x378   :  { %8232 = vmatpush1.bf16.msra.mxu0 %v10218_v25  ;;  %v10298_v25 = vcombine.low %v5183_v44, %v5187_v46  ;;  %v5171_v17 = vld [vmem:[#allocation10 + $0x220] sm:$0xff] }
 0x379   :  { %8273 = vmatpush1.bf16.msra.mxu1 %v10346_v6  ;;  %8233 = vmatprep.subr.bf16.mxu0 %v10339_v28  ;;  %v10426_v6 = vcombine.low %v5311_v47, %v5315_v27  ;;  %v10291_v28 = vcombine.high %v5175_v59, %v5179_v1  ;;  %v5295_v11 = vld [vmem:[#allocation10 + $0x600] sm:$0xff] }
 0x37a   :  { %8274 = vmatprep.subr.bf16.mxu1 %v10467_v10  ;;  %v10419_v10 = vcombine.high %v5303_v2, %v5307_v5  ;;  %v5299_v18 = vld [vmem:[#allocation10 + $0x620] sm:$0xff] }
 0x37b   :  { %v5415_v23 = vld [vmem:[#allocation10 + $0x9c0] sm:$0xff] }
 0x37c   :  { %8234 = vmatpush2.bf16.msra.mxu0 %v10338_v20  ;;  %v10290_v20 = vcombine.low %v5175_v59, %v5179_v1  ;;  %v5419_v7 = vld [vmem:[#allocation10 + $0x9e0] sm:$0xff] }
 0x37d   :  { %8275 = vmatpush2.bf16.msra.mxu1 %v10466_v52  ;;  %8235 = vmatprep.subr.bf16.mxu0 %v10331_v21  ;;  %v10418_v52 = vcombine.low %v5303_v2, %v5307_v5  ;;  %v10283_v21 = vcombine.high %v5167_v15, %v5171_v17  ;;  %v5543_v42 = vld [vmem:[#allocation10 + $0xdc0] sm:$0xff]  ;;  %v10531_v31 = vcombine.high %v5415_v23, %v5419_v7 }
 0x37e   :  { %8276 = vmatprep.subr.bf16.mxu1 %v10459_v22  ;;  %v10411_v22 = vcombine.high %v5295_v11, %v5299_v18  ;;  %v5547_v55 = vld [vmem:[#allocation10 + $0xde0] sm:$0xff] }
 0x37f   :  { %v5407_v49 = vld [vmem:[#allocation10 + $0x980] sm:$0xff]  ;;  %v10658_v50 = vcombine.low %v5543_v42, %v5547_v55 }
 0x380   :  { %8236 = vmatpush2.bf16.msra.mxu0 %v10330_v24  ;;  %v1854_v24 = vrot.slane %v11458_v37, %v11366_v61  ;;  %v5411_v32 = vld [vmem:[#allocation10 + $0x9a0] sm:$0xff]  ;;  %v10530_v37 = vcombine.low %v5415_v23, %v5419_v7 }
 0x381   :  { %8277 = vmatpush2.bf16.msra.mxu1 %v10458_v29  ;;  %8237 = vmatprep.subr.bf16.mxu0 %v10323_v9  ;;  %v10282_v29 = vcombine.low %v5167_v15, %v5171_v17  ;;  %v5087_v9 = vmax.f32 %v11425_v3, 0.0  ;;  %v10523_v3 = vcombine.high %v5407_v49, %v5411_v32  ;;  %v5399_v8 = vld [vmem:[#allocation10 + $0x940] sm:$0xff]  ;;  %v10522_v46 = vcombine.low %v5407_v49, %v5411_v32 }
 0x382   :  { %8278 = vmatprep.subr.bf16.mxu1 %v10451_v30  ;;  %v10410_v30 = vcombine.low %v5295_v11, %v5299_v18  ;;  %v5403_v14 = vld [vmem:[#allocation10 + $0x960] sm:$0xff] }
 0x383   :  { %v11481_v34 = vpack.c.bf16 %v5087_v9, %v5087_v9  ;;  %v10515_v27 = vcombine.high %v5399_v8, %v5403_v14  ;;  %v5395_v59 = vld [vmem:[#allocation10 + $0x920] sm:$0xff]  ;;  %v11496_v9 = vld [vmem:[#allocation10 + $0x5e8] sm:$0xff] }
 0x384   :  { %8238 = vmatpush2.bf16.msra.mxu0 %v10322_v13  ;;  %v10659_v13 = vcombine.high %v5543_v42, %v5547_v55  ;;  %v5519_v5 = vld [vmem:[#allocation10 + $0xd00] sm:$0xff] }
 0x385   :  { %8279 = vmatpush2.bf16.msra.mxu1 %v10450_v60  ;;  %8239 = vmatprep.subr.bf16.mxu0 %v10315_v0  ;;  %v5535_v60 = vld [vmem:[#allocation10 + $0xd80] sm:$0xff] }
 0x386   :  { %8280 = vmatprep.subr.bf16.mxu1 %v10443_v45  ;;  %v5539_v0 = vld [vmem:[#allocation10 + $0xda0] sm:$0xff]  ;;  %v4796_v45 = vadd.f32 %v11469_v62, %v1854_v24 }
 0x387   :  { %v5531_v62 = vld [vmem:[#allocation10 + $0xd60] sm:$0xff] }
 0x388   :  { %8240 = vmatpush2.bf16.msra.mxu0 %v10314_v38  ;;  %v10651_v38 = vcombine.high %v5535_v60, %v5539_v0  ;;  %v5515_v23 = vld [vmem:[#allocation10 + $0xce0] sm:$0xff] }
 0x389   :  { %8281 = vmatpush2.bf16.msra.mxu1 %v10442_v39  ;;  %8241 = vmatprep.subr.bf16.mxu0 %v10307_v40  ;;  %v5527_v40 = vld [vmem:[#allocation10 + $0xd40] sm:$0xff] }
 0x38a   :  { %8282 = vmatprep.subr.bf16.mxu1 %v10435_v43  ;;  %v4837_v43 = vadd.f32 %v11474_v19, %v4796_v45  ;;  %v10643_v1 = vcombine.high %v5527_v40, %v5531_v62  ;;  %v5523_v19 = vld [vmem:[#allocation10 + $0xd20] sm:$0xff]  ;;  %v10642_v17 = vcombine.low %v5527_v40, %v5531_v62 }
 0x38b   :  { %v10634_v24 = vcombine.low %v5519_v5, %v5523_v19  ;;  %v5503_v32 = vld [vmem:[#allocation10 + $0xc80] sm:$0xff] }
 0x38c   :  { %8242 = vmatpush2.bf16.msra.mxu0 %v10306_v48  ;;  %v10650_v48 = vcombine.low %v5535_v60, %v5539_v0 }
 0x38d   :  { %8283 = vmatpush2.bf16.msra.mxu1 %v10434_v51  ;;  %8243 = vmatprep.subr.bf16.mxu0 %v10299_v56 }
 0x38e   :  { %8284 = vmatprep.subr.bf16.mxu1 %v10427_v58  ;;  %v5391_v58 = vld [vmem:[#allocation10 + $0x900] sm:$0xff] }
 0x38f   :  { %v10507_v15 = vcombine.high %v5391_v58, %v5395_v59  ;;  %v10506_v42 = vcombine.low %v5391_v58, %v5395_v59  ;;  %v5479_v59 = vld [vmem:[#allocation10 + $0xbc0] sm:$0xff] }
 0x390   :  { %8244 = vmatpush2.bf16.msra.mxu0 %v10298_v25 }
 0x391   :  { %8285 = vmatpush2.bf16.msra.mxu1 %v10426_v6  ;;  %8245 = vmatprep.subr.bf16.mxu0 %v10291_v28  ;;  %v10514_v28 = vcombine.low %v5399_v8, %v5403_v14  ;;  %v5495_v8 = vld [vmem:[#allocation10 + $0xc40] sm:$0xff] }
 0x392   :  { %8286 = vmatprep.subr.bf16.mxu1 %v10419_v10  ;;  %v5499_v14 = vld [vmem:[#allocation10 + $0xc60] sm:$0xff] }
 0x393   :  { %v10610_v58 = vcombine.low %v5495_v8, %v5499_v14 }
 0x394   :  { %8246 = vmatpush2.bf16.msra.mxu0 %v10290_v20  ;;  %v5383_v20 = vld [vmem:[#allocation10 + $0x8c0] sm:$0xff] }
 0x395   :  { %8287 = vmatpush2.bf16.msra.mxu1 %v10418_v52  ;;  %8247 = vmatprep.subr.bf16.mxu0 %v10283_v21  ;;  %v5387_v52 = vld [vmem:[#allocation10 + $0x8e0] sm:$0xff]  ;;  %v10635_v21 = vcombine.high %v5519_v5, %v5523_v19 }
 0x396   :  { %8288 = vmatprep.subr.bf16.mxu1 %v10411_v22  ;;  %v5511_v22 = vld [vmem:[#allocation10 + $0xcc0] sm:$0xff]  ;;  %v10499_v55 = vcombine.high %v5383_v20, %v5387_v52  ;;  %v10498_v60 = vcombine.low %v5383_v20, %v5387_v52 }
 0x397   :  { %v10627_v41 = vcombine.high %v5511_v22, %v5515_v23  ;;  %v10626_v45 = vcombine.low %v5511_v22, %v5515_v23  ;;  %v5607_v5 = vld [vmem:[#allocation10 + $0xfc0] sm:$0xff] }
 0x398   :  { %8248 = vmatpush2.bf16.msra.mxu0 %v10282_v29  ;;  %v11494_v29 = vld [vmem:[#allocation10 + $0x5c8] sm:$0xff]  ;;  %v5611_v19 = vld [vmem:[#allocation10 + $0xfe0] sm:$0xff] }
 0x399   :  { %8289 = vmatpush2.bf16.msra.mxu1 %v10410_v30  ;;  %8299 = vmatprep.subr.bf16.mxu0 %v10531_v31  ;;  %v5375_v30 = vld [vmem:[#allocation10 + $0x880] sm:$0xff]  ;;  %v10404_v49 = vcombine.low %v11494_v29, %v11496_v9 }
 0x39a   :  { %8340 = vmatprep.subr.bf16.mxu1 %v10659_v13  ;;  %v5379_v31 = vld [vmem:[#allocation10 + $0x8a0] sm:$0xff] }
 0x39b   :  { %v11485_v39 = vpop.f32.mrf.mxu0  ;;  %8250 = vmatmul.mubr.bf16.vlgmr.msra.gmra.mxu0 %v11481_v34  ;;  %v5507_v13 = vld [vmem:[#allocation10 + $0xca0] sm:$0xff]  ;;  %v10491_v0 = vcombine.high %v5375_v30, %v5379_v31 }
 0x39c   :  { %v11489_v44 = vpop.f32.mrf.mxu1  ;;  %8291 = vmatmul.mubr.bf16.vlgmr.msra.gmra.mxu1 %v11483_v26  ;;  %8300 = vmatpush1.bf16.msra.mxu0 %v10530_v37  ;;  %v5367_v37 = vld [vmem:[#allocation10 + $0x840] sm:$0xff]  ;;  %v10618_v62 = vcombine.low %v5503_v32, %v5507_v13 }
 0x39d   :  { %v4877_v47 = vpop.f32.mrf.mxu0  ;;  %8301 = vmatprep.subr.bf16.mxu0 %v10523_v3  ;;  %8341 = vmatpush1.bf16.msra.mxu1 %v10658_v50  ;;  %v5371_v3 = vld [vmem:[#allocation10 + $0x860] sm:$0xff]  ;;  %v10619_v50 = vcombine.high %v5503_v32, %v5507_v13 }
 0x39e   :  { %v4878_v51 = vadd.f32 %v4877_v47, %v4837_v43  ;;  %v4918_v56 = vpop.f32.mrf.mxu1  ;;  %8342 = vmatprep.subr.bf16.mxu1 %v10651_v38  ;;  %v10490_v38 = vcombine.low %v5375_v30, %v5379_v31  ;;  %v10483_v40 = vcombine.high %v5367_v37, %v5371_v3  ;;  %v5359_v43 = vld [vmem:[#allocation10 + $0x800] sm:$0xff]  ;;  %v10611_v47 = vcombine.high %v5495_v8, %v5499_v14 }
 0x39f   :  { %v4879_v2 = vpop.f32.mrf.mxu0  ;;  %v5463_v22 = vld [vmem:[#allocation10 + $0xb40] sm:$0xff] }
 0x3a0   :  { %v4919_v25 = vadd.f32 %v4918_v56, %v4878_v51  ;;  %v4920_v6 = vpop.f32.mrf.mxu1  ;;  %8302 = vmatpush1.bf16.msra.mxu0 %v10522_v46  ;;  %v5363_v46 = vld [vmem:[#allocation10 + $0x820] sm:$0xff]  ;;  %v10482_v51 = vcombine.low %v5367_v37, %v5371_v3 }
 0x3a1   :  { %v4880_v10 = vpop.f32.mrf.mxu0  ;;  %8303 = vmatprep.subr.bf16.mxu0 %v10515_v27  ;;  %8343 = vmatpush1.bf16.msra.mxu1 %v10650_v48  ;;  %v5487_v27 = vld [vmem:[#allocation10 + $0xc00] sm:$0xff]  ;;  %v10475_v56 = vcombine.high %v5359_v43, %v5363_v46 }
 0x3a2   :  { %v5092_v11 = vmax.f32 %v4919_v25, 0.0  ;;  %v4921_v18 = vpop.f32.mrf.mxu1  ;;  %8344 = vmatprep.subr.bf16.mxu1 %v10643_v1  ;;  %v5491_v48 = vld [vmem:[#allocation10 + $0xc20] sm:$0xff]  ;;  %v10474_v25 = vcombine.low %v5359_v43, %v5363_v46 }
 0x3a3   :  { %v5483_v1 = vld [vmem:[#allocation10 + $0xbe0] sm:$0xff]  ;;  %v10603_v2 = vcombine.high %v5487_v27, %v5491_v48 }
 0x3a4   :  { %v11492_v7 = vpack.c.bf16 %v5092_v11, %v5092_v11  ;;  %8304 = vmatpush1.bf16.msra.mxu0 %v10514_v28  ;;  %v10595_v6 = vcombine.high %v5479_v59, %v5483_v1  ;;  %v10602_v28 = vcombine.low %v5487_v27, %v5491_v48  ;;  %v5471_v10 = vld [vmem:[#allocation10 + $0xb80] sm:$0xff]  ;;  %v10594_v20 = vcombine.low %v5479_v59, %v5483_v1 }
 0x3a5   :  { %8305 = vmatprep.subr.bf16.mxu0 %v10507_v15  ;;  %8345 = vmatpush1.bf16.msra.mxu1 %v10642_v17  ;;  %v5475_v15 = vld [vmem:[#allocation10 + $0xba0] sm:$0xff]  ;;  %v10723_v17 = vcombine.high %v5607_v5, %v5611_v19 }
 0x3a6   :  { %8331 = vmatprep.mubr.bf16.mxu0 %v11492_v7  ;;  %8346 = vmatprep.subr.bf16.mxu1 %v10635_v21  ;;  %v5599_v11 = vld [vmem:[#allocation10 + $0xf80] sm:$0xff]  ;;  %v10587_v52 = vcombine.high %v5471_v10, %v5475_v15  ;;  %v10722_v21 = vcombine.low %v5607_v5, %v5611_v19  ;;  %v10586_v30 = vcombine.low %v5471_v10, %v5475_v15 }
 0x3a7   :  { %v5603_v18 = vld [vmem:[#allocation10 + $0xfa0] sm:$0xff]  ;;  %v4876_v15 = vadd.f32 %v11485_v39, %v11471_v4  ;;  %v5164_v4 = vld [vmem:[#allocation10 + $0x1e8] sm:$0xff] }
 0x3a8   :  { %8306 = vmatpush1.bf16.msra.mxu0 %v10506_v42  ;;  %v5467_v23 = vld [vmem:[#allocation10 + $0xb60] sm:$0xff]  ;;  %v10715_v42 = vcombine.high %v5599_v11, %v5603_v18 }
 0x3a9   :  { %8307 = vmatprep.subr.bf16.mxu0 %v10499_v55  ;;  %8347 = vmatpush1.bf16.msra.mxu1 %v10634_v24  ;;  %v5591_v55 = vld [vmem:[#allocation10 + $0xf40] sm:$0xff]  ;;  %v10579_v31 = vcombine.high %v5463_v22, %v5467_v23  ;;  %v10578_v37 = vcombine.low %v5463_v22, %v5467_v23 }
 0x3aa   :  { %8348 = vmatprep.subr.bf16.mxu1 %v10627_v41  ;;  %v5595_v24 = vld [vmem:[#allocation10 + $0xf60] sm:$0xff]  ;;  %v10714_v41 = vcombine.low %v5599_v11, %v5603_v18 }
 0x3ab   :  { %v5455_v32 = vld [vmem:[#allocation10 + $0xb00] sm:$0xff] }
 0x3ac   :  { %8308 = vmatpush1.bf16.msra.mxu0 %v10498_v60  ;;  %v5459_v13 = vld [vmem:[#allocation10 + $0xb20] sm:$0xff]  ;;  %v10707_v60 = vcombine.high %v5591_v55, %v5595_v24 }
 0x3ad   :  { %8309 = vmatprep.subr.bf16.mxu0 %v10491_v0  ;;  %8349 = vmatpush1.bf16.msra.mxu1 %v10626_v45  ;;  %v5583_v0 = vld [vmem:[#allocation10 + $0xf00] sm:$0xff]  ;;  %v10571_v3 = vcombine.high %v5455_v32, %v5459_v13  ;;  %v10570_v43 = vcombine.low %v5455_v32, %v5459_v13 }
 0x3ae   :  { %8350 = vmatprep.subr.bf16.mxu1 %v10619_v50  ;;  %v5587_v45 = vld [vmem:[#allocation10 + $0xf20] sm:$0xff]  ;;  %v10706_v50 = vcombine.low %v5591_v55, %v5595_v24 }
 0x3af   :  { %v5447_v8 = vld [vmem:[#allocation10 + $0xac0] sm:$0xff] }
 0x3b0   :  { %8310 = vmatpush1.bf16.msra.mxu0 %v10490_v38  ;;  %v5451_v14 = vld [vmem:[#allocation10 + $0xae0] sm:$0xff]  ;;  %v10699_v38 = vcombine.high %v5583_v0, %v5587_v45 }
 0x3b1   :  { %8311 = vmatprep.subr.bf16.mxu0 %v10483_v40  ;;  %8351 = vmatpush1.bf16.msra.mxu1 %v10618_v62  ;;  %v5575_v40 = vld [vmem:[#allocation10 + $0xec0] sm:$0xff]  ;;  %v10563_v46 = vcombine.high %v5447_v8, %v5451_v14  ;;  %v10562_v59 = vcombine.low %v5447_v8, %v5451_v14  ;;  %v5148_v8 = vld [vmem:[#allocation10 + $0x168] sm:$0xff] }
 0x3b2   :  { %8352 = vmatprep.subr.bf16.mxu1 %v10611_v47  ;;  %v5579_v62 = vld [vmem:[#allocation10 + $0xee0] sm:$0xff]  ;;  %v10698_v47 = vcombine.low %v5583_v0, %v5587_v45  ;;  %v5156_v0 = vld [vmem:[#allocation10 + $0x1a8] sm:$0xff] }
 0x3b3   :  { %v5439_v27 = vld [vmem:[#allocation10 + $0xa80] sm:$0xff] }
 0x3b4   :  { %8312 = vmatpush1.bf16.msra.mxu0 %v10482_v51  ;;  %v5443_v48 = vld [vmem:[#allocation10 + $0xaa0] sm:$0xff]  ;;  %v10691_v51 = vcombine.high %v5575_v40, %v5579_v62 }
 0x3b5   :  { %8313 = vmatprep.subr.bf16.mxu0 %v10475_v56  ;;  %8353 = vmatpush1.bf16.msra.mxu1 %v10610_v58  ;;  %v5567_v56 = vld [vmem:[#allocation10 + $0xe80] sm:$0xff]  ;;  %v10555_v1 = vcombine.high %v5439_v27, %v5443_v48  ;;  %v10554_v10 = vcombine.low %v5439_v27, %v5443_v48  ;;  %v5140_v27 = vld [vmem:[#allocation10 + $0x128] sm:$0xff] }
 0x3b6   :  { %8354 = vmatprep.subr.bf16.mxu1 %v10603_v2  ;;  %v5571_v58 = vld [vmem:[#allocation10 + $0xea0] sm:$0xff]  ;;  %v10690_v2 = vcombine.low %v5575_v40, %v5579_v62 }
 0x3b7   :  { %v5431_v5 = vld [vmem:[#allocation10 + $0xa40] sm:$0xff]  ;;  %v10682_v11 = vcombine.low %v5567_v56, %v5571_v58 }
 0x3b8   :  { %8314 = vmatpush1.bf16.msra.mxu0 %v10474_v25  ;;  %v5435_v19 = vld [vmem:[#allocation10 + $0xa60] sm:$0xff]  ;;  %v10683_v25 = vcombine.high %v5567_v56, %v5571_v58 }
 0x3b9   :  { %8315 = vmatprep.subr.bf16.mxu0 %v10595_v6  ;;  %8355 = vmatpush1.bf16.msra.mxu1 %v10602_v28  ;;  %v5559_v6 = vld [vmem:[#allocation10 + $0xe40] sm:$0xff]  ;;  %v10546_v23 = vcombine.low %v5431_v5, %v5435_v19 }
 0x3ba   :  { %8356 = vmatprep.subr.bf16.mxu1 %v10723_v17  ;;  %v5563_v28 = vld [vmem:[#allocation10 + $0xe60] sm:$0xff]  ;;  %v10547_v17 = vcombine.high %v5431_v5, %v5435_v19  ;;  %v5132_v5 = vld [vmem:[#allocation10 + $0xe8] sm:$0xff] }
 0x3bb   :  { %v5423_v18 = vld [vmem:[#allocation10 + $0xa00] sm:$0xff]  ;;  %v10674_v24 = vcombine.low %v5559_v6, %v5563_v28 }
 0x3bc   :  { %8316 = vmatpush2.bf16.msra.mxu0 %v10594_v20  ;;  %v5427_v20 = vld [vmem:[#allocation10 + $0xa20] sm:$0xff] }
 0x3bd   :  { %8317 = vmatprep.subr.bf16.mxu0 %v10587_v52  ;;  %8357 = vmatpush2.bf16.msra.mxu1 %v10722_v21  ;;  %v10675_v52 = vcombine.high %v5559_v6, %v5563_v28  ;;  %v5551_v21 = vld [vmem:[#allocation10 + $0xe00] sm:$0xff]  ;;  %v10539_v55 = vcombine.high %v5423_v18, %v5427_v20  ;;  %v5120_v6 = vld [vmem:[#allocation10 + $0x88] sm:$0xff] }
 0x3be   :  { %8358 = vmatprep.subr.bf16.mxu1 %v10715_v42  ;;  %v5555_v22 = vld [vmem:[#allocation10 + $0xe20] sm:$0xff]  ;;  %v4917_v42 = vadd.f32 %v11489_v44, %v4876_v15  ;;  %v10405_v44 = vcombine.high %v11494_v29, %v11496_v9  ;;  %v5124_v28 = vld [vmem:[#allocation10 + $0xa8] sm:$0xff] }
 0x3bf   :  { %v10667_v39 = vcombine.high %v5551_v21, %v5555_v22  ;;  %v10666_v13 = vcombine.low %v5551_v21, %v5555_v22  ;;  %v10237_v15 = vcombine.high %v5120_v6, %v5124_v28  ;;  %v5108_v21 = vld [vmem:[#allocation10 + $0x28] sm:$0xff] }
 0x3c0   :  { %8318 = vmatpush2.bf16.msra.mxu0 %v10586_v30  ;;  %v5160_v30 = vld [vmem:[#allocation10 + $0x1c8] sm:$0xff] }
 0x3c1   :  { %8319 = vmatprep.subr.bf16.mxu0 %v10579_v31  ;;  %8359 = vmatpush2.bf16.msra.mxu1 %v10714_v41  ;;  %v10538_v31 = vcombine.low %v5423_v18, %v5427_v20  ;;  %v5091_v41 = vmax.f32 %v4917_v42, 0.0  ;;  %v10277_v32 = vcombine.high %v5160_v30, %v5164_v4  ;;  %v10276_v45 = vcombine.low %v5160_v30, %v5164_v4  ;;  %v5224_v42 = vld [vmem:[#allocation10 + $0x3c8] sm:$0xff] }
 0x3c2   :  { %8360 = vmatprep.subr.bf16.mxu1 %v10707_v60  ;;  %v5152_v60 = vld [vmem:[#allocation10 + $0x188] sm:$0xff]  ;;  %v10236_v18 = vcombine.low %v5120_v6, %v5124_v28  ;;  %v10962_v28 = vld [vmem:[#allocation9] sm:$0xff] }
 0x3c3   :  { %v10268_v40 = vcombine.low %v5152_v60, %v5156_v0  ;;  %v5216_v4 = vld [vmem:[#allocation10 + $0x388] sm:$0xff] }
 0x3c4   :  { %8320 = vmatpush2.bf16.msra.mxu0 %v10578_v37  ;;  %v11506_v37 = vpack.c.bf16 %v5091_v41, %v5091_v41 }
 0x3c5   :  { %8321 = vmatprep.subr.bf16.mxu0 %v10571_v3  ;;  %8361 = vmatpush2.bf16.msra.mxu1 %v10706_v50  ;;  %v10269_v3 = vcombine.high %v5152_v60, %v5156_v0  ;;  %v5144_v50 = vld [vmem:[#allocation10 + $0x148] sm:$0xff] }
 0x3c6   :  { %8362 = vmatprep.subr.bf16.mxu1 %v10699_v38  ;;  %v10260_v56 = vcombine.low %v5144_v50, %v5148_v8 }
 0x3c8   :  { %8322 = vmatpush2.bf16.msra.mxu0 %v10570_v43  ;;  %v10261_v43 = vcombine.high %v5144_v50, %v5148_v8  ;;  %v5192_v8 = vld [vmem:[#allocation10 + $0x2c8] sm:$0xff] }
 0x3c9   :  { %8323 = vmatprep.subr.bf16.mxu0 %v10563_v46  ;;  %8363 = vmatpush2.bf16.msra.mxu1 %v10698_v47  ;;  %v5136_v47 = vld [vmem:[#allocation10 + $0x108] sm:$0xff] }
 0x3ca   :  { %8364 = vmatprep.subr.bf16.mxu1 %v10691_v51  ;;  %v10252_v19 = vcombine.low %v5136_v47, %v5140_v27 }
 0x3cc   :  { %8324 = vmatpush2.bf16.msra.mxu0 %v10562_v59  ;;  %v10253_v59 = vcombine.high %v5136_v47, %v5140_v27  ;;  %v5184_v27 = vld [vmem:[#allocation10 + $0x288] sm:$0xff] }
 0x3cd   :  { %8325 = vmatprep.subr.bf16.mxu0 %v10555_v1  ;;  %8365 = vmatpush2.bf16.msra.mxu1 %v10690_v2  ;;  %v5128_v2 = vld [vmem:[#allocation10 + $0xc8] sm:$0xff] }
 0x3ce   :  { %8366 = vmatprep.subr.bf16.mxu1 %v10683_v25  ;;  %v10245_v25 = vcombine.high %v5128_v2, %v5132_v5 }
 0x3d0   :  { %8326 = vmatpush2.bf16.msra.mxu0 %v10554_v10  ;;  %v10244_v10 = vcombine.low %v5128_v2, %v5132_v5  ;;  %v5168_v5 = vld [vmem:[#allocation10 + $0x208] sm:$0xff] }
 0x3d1   :  { %8327 = vmatprep.subr.bf16.mxu0 %v10547_v17  ;;  %8367 = vmatpush2.bf16.msra.mxu1 %v10682_v11  ;;  %v5112_v17 = vld [vmem:[#allocation10 + $0x48] sm:$0xff] }
 0x3d2   :  { %8368 = vmatprep.subr.bf16.mxu1 %v10675_v52  ;;  %v5116_v11 = vld [vmem:[#allocation10 + $0x68] sm:$0xff] }
 0x3d3   :  { %v10229_v20 = vcombine.high %v5112_v17, %v5116_v11  ;;  %v5104_v52 = vld [vmem:[#allocation10 + $0x8] sm:$0xff]  ;;  %v10228_v22 = vcombine.low %v5112_v17, %v5116_v11  ;;  %v1862_v11 = vrot.slane %v10962_v28, %v11369_v63 }
 0x3d4   :  { %8328 = vmatpush2.bf16.msra.mxu0 %v10546_v23  ;;  %v10221_v23 = vcombine.high %v5104_v52, %v5108_v21  ;;  %v5420_v17 = vld [vmem:[#allocation10 + $0x9e8] sm:$0xff] }
 0x3d5   :  { %8329 = vmatprep.subr.bf16.mxu0 %v10539_v55  ;;  %8369 = vmatpush2.bf16.msra.mxu1 %v10674_v24  ;;  %v5228_v55 = vld [vmem:[#allocation10 + $0x3e8] sm:$0xff]  ;;  %v10220_v24 = vcombine.low %v5104_v52, %v5108_v21 }
 0x3d6   :  { %8370 = vmatprep.subr.bf16.mxu1 %v10667_v39  ;;  %v10341_v30 = vcombine.high %v5224_v42, %v5228_v55  ;;  %v5220_v39 = vld [vmem:[#allocation10 + $0x3a8] sm:$0xff] }
 0x3d7   :  { %v10333_v41 = vcombine.high %v5216_v4, %v5220_v39  ;;  %v10332_v60 = vcombine.low %v5216_v4, %v5220_v39  ;;  %v5408_v21 = vld [vmem:[#allocation10 + $0x988] sm:$0xff] }
 0x3d8   :  { %8330 = vmatpush2.bf16.msra.mxu0 %v10538_v31  ;;  %v10340_v31 = vcombine.low %v5224_v42, %v5228_v55  ;;  %v5404_v4 = vld [vmem:[#allocation10 + $0x968] sm:$0xff] }
 0x3d9   :  { %8381 = vmatprep.subr.bf16.mxu0 %v10277_v32  ;;  %8371 = vmatpush2.bf16.msra.mxu1 %v10666_v13  ;;  %v5208_v32 = vld [vmem:[#allocation10 + $0x348] sm:$0xff] }
 0x3da   :  { %8422 = vmatprep.subr.bf16.mxu1 %v10405_v44  ;;  %v5212_v13 = vld [vmem:[#allocation10 + $0x368] sm:$0xff] }
 0x3db   :  { %v11508_v14 = vpop.f32.mrf.mxu0  ;;  %8332 = vmatmul.mubr.bf16.vlgmr.msra.gmra.mxu0 %v11506_v37  ;;  %v10325_v0 = vcombine.high %v5208_v32, %v5212_v13  ;;  %v5200_v44 = vld [vmem:[#allocation10 + $0x308] sm:$0xff] }
 0x3dc   :  { %v11511_v38 = vpop.f32.mrf.mxu1  ;;  %8382 = vmatpush1.bf16.msra.mxu0 %v10276_v45  ;;  %8413 = vmatprep.mubr.bf16.mxu0 %v11462_v12  ;;  %v5204_v45 = vld [vmem:[#allocation10 + $0x328] sm:$0xff] }
 0x3dd   :  { %v11514_v62 = vpop.f32.mrf.mxu0  ;;  %8383 = vmatprep.subr.bf16.mxu0 %v10269_v3  ;;  %v10324_v3 = vcombine.low %v5208_v32, %v5212_v13  ;;  %v10317_v50 = vcombine.high %v5200_v44, %v5204_v45 }
 0x3de   :  { %v11516_v46 = vpop.f32.mrf.mxu1 }
 0x3df   :  { %v4961_v48 = vpop.f32.mrf.mxu0 }
 0x3e0   :  { %v5002_v51 = vpop.f32.mrf.mxu1  ;;  %8384 = vmatpush1.bf16.msra.mxu0 %v10268_v40  ;;  %v5196_v40 = vld [vmem:[#allocation10 + $0x2e8] sm:$0xff] }
 0x3e1   :  { %v4962_v58 = vpop.f32.mrf.mxu0  ;;  %8385 = vmatprep.subr.bf16.mxu0 %v10261_v43  ;;  %v10316_v43 = vcombine.low %v5200_v44, %v5204_v45  ;;  %v10309_v47 = vcombine.high %v5192_v8, %v5196_v40  ;;  %v5188_v48 = vld [vmem:[#allocation10 + $0x2a8] sm:$0xff]  ;;  %v10308_v51 = vcombine.low %v5192_v8, %v5196_v40 }
 0x3e2   :  { %v5003_v1 = vpop.f32.mrf.mxu1  ;;  %v5176_v58 = vld [vmem:[#allocation10 + $0x248] sm:$0xff] }
 0x3e3   :  { %v10300_v1 = vcombine.low %v5184_v27, %v5188_v48  ;;  %v5396_v45 = vld [vmem:[#allocation10 + $0x928] sm:$0xff] }
 0x3e4   :  { %8386 = vmatpush1.bf16.msra.mxu0 %v10260_v56  ;;  %v10301_v56 = vcombine.high %v5184_v27, %v5188_v48 }
 0x3e5   :  { %8387 = vmatprep.subr.bf16.mxu0 %v10253_v59  ;;  %v5180_v59 = vld [vmem:[#allocation10 + $0x268] sm:$0xff] }
 0x3e6   :  { %v10293_v2 = vcombine.high %v5176_v58, %v5180_v59 }
 0x3e8   :  { %8388 = vmatpush1.bf16.msra.mxu0 %v10252_v19  ;;  %v5172_v19 = vld [vmem:[#allocation10 + $0x228] sm:$0xff] }
 0x3e9   :  { %8389 = vmatprep.subr.bf16.mxu0 %v10245_v25  ;;  %v10292_v25 = vcombine.low %v5176_v58, %v5180_v59  ;;  %v10285_v6 = vcombine.high %v5168_v5, %v5172_v19  ;;  %v5384_v58 = vld [vmem:[#allocation10 + $0x8c8] sm:$0xff] }
 0x3ea   :  { %v5388_v59 = vld [vmem:[#allocation10 + $0x8e8] sm:$0xff] }
 0x3ec   :  { %8390 = vmatpush1.bf16.msra.mxu0 %v10244_v10  ;;  %v1858_v10 = vrot.slane %v10962_v28, %v11363_v57  ;;  %v5276_v28 = vld [vmem:[#allocation10 + $0x568] sm:$0xff] }
 0x3ed   :  { %8391 = vmatprep.subr.bf16.mxu0 %v10237_v15  ;;  %v5416_v15 = vld [vmem:[#allocation10 + $0x9c8] sm:$0xff] }
 0x3ee   :  { %v4958_v52 = vadd.f32 %v11508_v14, %v1858_v10  ;;  %v10532_v42 = vcombine.low %v5416_v15, %v5420_v17  ;;  %v5376_v10 = vld [vmem:[#allocation10 + $0x888] sm:$0xff] }
 0x3f0   :  { %8392 = vmatpush1.bf16.msra.mxu0 %v10236_v18  ;;  %v10284_v18 = vcombine.low %v5168_v5, %v5172_v19 }
 0x3f1   :  { %8393 = vmatprep.subr.bf16.mxu0 %v10229_v20  ;;  %v10533_v20 = vcombine.high %v5416_v15, %v5420_v17  ;;  %v5380_v15 = vld [vmem:[#allocation10 + $0x8a8] sm:$0xff] }
 0x3f4   :  { %8394 = vmatpush1.bf16.msra.mxu0 %v10228_v22  ;;  %v5412_v22 = vld [vmem:[#allocation10 + $0x9a8] sm:$0xff] }
 0x3f5   :  { %8395 = vmatprep.subr.bf16.mxu0 %v10221_v23  ;;  %v4960_v23 = vadd.f32 %v11514_v62, %v1862_v11  ;;  %v10525_v55 = vcombine.high %v5408_v21, %v5412_v22  ;;  %v10524_v14 = vcombine.low %v5408_v21, %v5412_v22  ;;  %v10500_v11 = vcombine.low %v5384_v58, %v5388_v59  ;;  %v5268_v21 = vld [vmem:[#allocation10 + $0x528] sm:$0xff] }
 0x3f6   :  { %v5368_v22 = vld [vmem:[#allocation10 + $0x848] sm:$0xff] }
 0x3f8   :  { %8396 = vmatpush1.bf16.msra.mxu0 %v10220_v24  ;;  %v4999_v24 = vadd.f32 %v11511_v38, %v4958_v52  ;;  %v5392_v38 = vld [vmem:[#allocation10 + $0x908] sm:$0xff] }
 0x3f9   :  { %8397 = vmatprep.subr.bf16.mxu0 %v10341_v30  ;;  %v5400_v30 = vld [vmem:[#allocation10 + $0x948] sm:$0xff]  ;;  %v10508_v5 = vcombine.low %v5392_v38, %v5396_v45 }
 0x3fa   :  { %v10517_v13 = vcombine.high %v5400_v30, %v5404_v4  ;;  %v10516_v40 = vcombine.low %v5400_v30, %v5404_v4  ;;  %v5264_v52 = vld [vmem:[#allocation10 + $0x508] sm:$0xff] }
 0x3fb   :  { %v10381_v29 = vcombine.high %v5264_v52, %v5268_v21  ;;  %v5360_v30 = vld [vmem:[#allocation10 + $0x808] sm:$0xff] }
 0x3fc   :  { %8398 = vmatpush2.bf16.msra.mxu0 %v10340_v31  ;;  %v5001_v31 = vadd.f32 %v11516_v46, %v4960_v23  ;;  %v5372_v23 = vld [vmem:[#allocation10 + $0x868] sm:$0xff] }
 0x3fd   :  { %8399 = vmatprep.subr.bf16.mxu0 %v10333_v41  ;;  %v10485_v9 = vcombine.high %v5368_v22, %v5372_v23  ;;  %v5364_v4 = vld [vmem:[#allocation10 + $0x828] sm:$0xff] }
 0x400   :  { %8400 = vmatpush2.bf16.msra.mxu0 %v10332_v60 }
 0x401   :  { %8401 = vmatprep.subr.bf16.mxu0 %v10325_v0 }
 0x404   :  { %8402 = vmatpush2.bf16.msra.mxu0 %v10324_v3 }
 0x405   :  { %8403 = vmatprep.subr.bf16.mxu0 %v10317_v50 }
 0x408   :  { %8404 = vmatpush2.bf16.msra.mxu0 %v10316_v43 }
 0x409   :  { %8405 = vmatprep.subr.bf16.mxu0 %v10309_v47  ;;  %v10509_v47 = vcombine.high %v5392_v38, %v5396_v45 }
 0x40c   :  { %8406 = vmatpush2.bf16.msra.mxu0 %v10308_v51  ;;  %v5280_v51 = vld [vmem:[#allocation10 + $0x588] sm:$0xff] }
 0x40d   :  { %8407 = vmatprep.subr.bf16.mxu0 %v10301_v56  ;;  %v5284_v56 = vld [vmem:[#allocation10 + $0x5a8] sm:$0xff] }
 0x40e   :  { %v10397_v19 = vcombine.high %v5280_v51, %v5284_v56  ;;  %v10396_v17 = vcombine.low %v5280_v51, %v5284_v56  ;;  %v5236_v51 = vld [vmem:[#allocation10 + $0x428] sm:$0xff] }
 0x40f   :  { %v5464_v56 = vld [vmem:[#allocation10 + $0xb48] sm:$0xff] }
 0x410   :  { %8408 = vmatpush2.bf16.msra.mxu0 %v10300_v1 }
 0x411   :  { %8409 = vmatprep.subr.bf16.mxu0 %v10293_v2 }
 0x414   :  { %8410 = vmatpush2.bf16.msra.mxu0 %v10292_v25  ;;  %v10501_v25 = vcombine.high %v5384_v58, %v5388_v59  ;;  %v5468_v58 = vld [vmem:[#allocation10 + $0xb68] sm:$0xff] }
 0x415   :  { %8411 = vmatprep.subr.bf16.mxu0 %v10285_v6  ;;  %v5272_v6 = vld [vmem:[#allocation10 + $0x548] sm:$0xff] }
 0x418   :  { %8412 = vmatpush2.bf16.msra.mxu0 %v10284_v18  ;;  %v10389_v18 = vcombine.high %v5272_v6, %v5276_v28 }
 0x419   :  { %8463 = vmatprep.subr.bf16.mxu0 %v10533_v20  ;;  %v10493_v20 = vcombine.high %v5376_v10, %v5380_v15 }
 0x41b   :  { %v5039_v39 = vpop.f32.mrf.mxu0  ;;  %8414 = vmatmul.mubr.bf16.vlgmr.msra.gmra.mxu0 %v11481_v34 }
 0x41c   :  { %v5040_v41 = vadd.f32 %v5039_v39, %v4999_v24  ;;  %v5080_v32 = vpop.f32.mrf.mxu1  ;;  %8464 = vmatpush1.bf16.msra.mxu0 %v10532_v42  ;;  %8495 = vmatprep.mubr.bf16.mxu0 %v11492_v7  ;;  %v10388_v42 = vcombine.low %v5272_v6, %v5276_v28  ;;  %v5260_v24 = vld [vmem:[#allocation10 + $0x4e8] sm:$0xff]  ;;  %v10380_v39 = vcombine.low %v5264_v52, %v5268_v21 }
 0x41d   :  { %v5041_v62 = vpop.f32.mrf.mxu0  ;;  %8465 = vmatprep.subr.bf16.mxu0 %v10525_v55  ;;  %v10492_v55 = vcombine.low %v5376_v10, %v5380_v15  ;;  %v5352_v6 = vld [vmem:[#allocation10 + $0x7c8] sm:$0xff] }
 0x41e   :  { %v5081_v60 = vadd.f32 %v5080_v32, %v5040_v41  ;;  %v5042_v0 = vadd.f32 %v5041_v62, %v5001_v31  ;;  %v5082_v44 = vpop.f32.mrf.mxu1  ;;  %v10484_v31 = vcombine.low %v5368_v22, %v5372_v23  ;;  %v10477_v32 = vcombine.high %v5360_v30, %v5364_v4  ;;  %v5252_v62 = vld [vmem:[#allocation10 + $0x4a8] sm:$0xff] }
 0x41f   :  { %v5043_v3 = vpop.f32.mrf.mxu0  ;;  %v5356_v28 = vld [vmem:[#allocation10 + $0x7e8] sm:$0xff] }
 0x420   :  { %v5083_v50 = vadd.f32 %v5082_v44, %v5042_v0  ;;  %v5084_v8 = vpop.f32.mrf.mxu1  ;;  %8466 = vmatpush1.bf16.msra.mxu0 %v10524_v14  ;;  %v5093_v46 = vmax.f32 %v5081_v60, 0.0  ;;  %v5248_v14 = vld [vmem:[#allocation10 + $0x488] sm:$0xff]  ;;  %v10476_v44 = vcombine.low %v5360_v30, %v5364_v4 }
 0x421   :  { %v5044_v43 = vpop.f32.mrf.mxu0  ;;  %8467 = vmatprep.subr.bf16.mxu0 %v10517_v13  ;;  %v5480_v13 = vld [vmem:[#allocation10 + $0xbc8] sm:$0xff]  ;;  %v10365_v38 = vcombine.high %v5248_v14, %v5252_v62 }
 0x422   :  { %v5094_v27 = vmax.f32 %v5083_v50, 0.0  ;;  %v5085_v48 = vpop.f32.mrf.mxu1  ;;  %v11528_v2 = vpack.c.bf16 %v5093_v46, %v5093_v46  ;;  %v5484_v60 = vld [vmem:[#allocation10 + $0xbe8] sm:$0xff]  ;;  %v10364_v46 = vcombine.low %v5248_v14, %v5252_v62 }
 0x423   :  { %v10597_v45 = vcombine.high %v5480_v13, %v5484_v60  ;;  %v5240_v3 = vld [vmem:[#allocation10 + $0x448] sm:$0xff]  ;;  %v10596_v43 = vcombine.low %v5480_v13, %v5484_v60 }
 0x424   :  { %v11526_v1 = vpack.c.bf16 %v5094_v27, %v5094_v27  ;;  %8468 = vmatpush1.bf16.msra.mxu0 %v10516_v40  ;;  %v5244_v50 = vld [vmem:[#allocation10 + $0x468] sm:$0xff] }
 0x425   :  { %8469 = vmatprep.subr.bf16.mxu0 %v10509_v47  ;;  %v5472_v8 = vld [vmem:[#allocation10 + $0xb88] sm:$0xff]  ;;  %v10357_v47 = vcombine.high %v5240_v3, %v5244_v50  ;;  %v10356_v59 = vcombine.low %v5240_v3, %v5244_v50 }
 0x426   :  { %8372 = vmatprep.mubr.bf16.mxu1 %v11526_v1  ;;  %v5476_v40 = vld [vmem:[#allocation10 + $0xba8] sm:$0xff] }
 0x427   :  { %8373 = vmatmul.mubr.bf16.vlgmr.msra.gmra.mxu1 %v11528_v2  ;;  %v10589_v27 = vcombine.high %v5472_v8, %v5476_v40  ;;  %v5232_v48 = vld [vmem:[#allocation10 + $0x408] sm:$0xff] }
 0x428   :  { %8423 = vmatpush1.bf16.msra.mxu1 %v10404_v49  ;;  %8454 = vmatprep.mubr.bf16.mxu1 %v11465_v53  ;;  %v5256_v49 = vld [vmem:[#allocation10 + $0x4c8] sm:$0xff] }
 0x429   :  { %8470 = vmatpush1.bf16.msra.mxu0 %v10508_v5  ;;  %8424 = vmatprep.subr.bf16.mxu1 %v10397_v19  ;;  %v10373_v41 = vcombine.high %v5256_v49, %v5260_v24  ;;  %v10372_v0 = vcombine.low %v5256_v49, %v5260_v24  ;;  %v10588_v5 = vcombine.low %v5472_v8, %v5476_v40  ;;  %v5456_v10 = vld [vmem:[#allocation10 + $0xb08] sm:$0xff] }
 0x42a   :  { %8471 = vmatprep.subr.bf16.mxu0 %v10501_v25  ;;  %v10349_v19 = vcombine.high %v5232_v48, %v5236_v51  ;;  %v10581_v25 = vcombine.high %v5464_v56, %v5468_v58  ;;  %v5460_v15 = vld [vmem:[#allocation10 + $0xb28] sm:$0xff] }
 0x42b   :  { %v5344_v52 = vld [vmem:[#allocation10 + $0x788] sm:$0xff] }
 0x42c   :  { %8425 = vmatpush1.bf16.msra.mxu1 %v10396_v17  ;;  %v10348_v17 = vcombine.low %v5232_v48, %v5236_v51  ;;  %v5348_v21 = vld [vmem:[#allocation10 + $0x7a8] sm:$0xff] }
 0x42d   :  { %8472 = vmatpush1.bf16.msra.mxu0 %v10500_v11  ;;  %8426 = vmatprep.subr.bf16.mxu1 %v10389_v18  ;;  %v10580_v11 = vcombine.low %v5464_v56, %v5468_v58  ;;  %v10469_v18 = vcombine.high %v5352_v6, %v5356_v28  ;;  %v5448_v22 = vld [vmem:[#allocation10 + $0xac8] sm:$0xff]  ;;  %v5161_v56 = vld [vmem:[#allocation10 + $0x1d0] sm:$0xff] }
 0x42e   :  { %8473 = vmatprep.subr.bf16.mxu0 %v10493_v20  ;;  %v10573_v20 = vcombine.high %v5456_v10, %v5460_v15  ;;  %v5452_v23 = vld [vmem:[#allocation10 + $0xae8] sm:$0xff]  ;;  %v5165_v58 = vld [vmem:[#allocation10 + $0x1f0] sm:$0xff] }
 0x42f   :  { %v5336_v49 = vld [vmem:[#allocation10 + $0x748] sm:$0xff] }
 0x430   :  { %8427 = vmatpush1.bf16.msra.mxu1 %v10388_v42  ;;  %v10468_v42 = vcombine.low %v5352_v6, %v5356_v28  ;;  %v5340_v24 = vld [vmem:[#allocation10 + $0x768] sm:$0xff]  ;;  %v10279_v6 = vcombine.high %v5161_v56, %v5165_v58 }
 0x431   :  { %8474 = vmatpush1.bf16.msra.mxu0 %v10492_v55  ;;  %8428 = vmatprep.subr.bf16.mxu1 %v10381_v29  ;;  %v10572_v55 = vcombine.low %v5456_v10, %v5460_v15  ;;  %v10461_v29 = vcombine.high %v5344_v52, %v5348_v21  ;;  %v5440_v30 = vld [vmem:[#allocation10 + $0xa88] sm:$0xff]  ;;  %v5153_v15 = vld [vmem:[#allocation10 + $0x190] sm:$0xff] }
 0x432   :  { %8475 = vmatprep.subr.bf16.mxu0 %v10485_v9  ;;  %v10565_v9 = vcombine.high %v5448_v22, %v5452_v23  ;;  %v5444_v4 = vld [vmem:[#allocation10 + $0xaa8] sm:$0xff] }
 0x433   :  { %v5328_v14 = vld [vmem:[#allocation10 + $0x708] sm:$0xff] }
 0x434   :  { %8429 = vmatpush1.bf16.msra.mxu1 %v10380_v39  ;;  %v10460_v39 = vcombine.low %v5344_v52, %v5348_v21  ;;  %v5332_v62 = vld [vmem:[#allocation10 + $0x728] sm:$0xff] }
 0x435   :  { %8476 = vmatpush1.bf16.msra.mxu0 %v10484_v31  ;;  %8430 = vmatprep.subr.bf16.mxu1 %v10373_v41  ;;  %v10564_v31 = vcombine.low %v5448_v22, %v5452_v23  ;;  %v10453_v41 = vcombine.high %v5336_v49, %v5340_v24  ;;  %v5432_v13 = vld [vmem:[#allocation10 + $0xa48] sm:$0xff] }
 0x436   :  { %8477 = vmatprep.subr.bf16.mxu0 %v10477_v32  ;;  %v10557_v32 = vcombine.high %v5440_v30, %v5444_v4  ;;  %v5436_v60 = vld [vmem:[#allocation10 + $0xa68] sm:$0xff] }
 0x437   :  { %v5320_v3 = vld [vmem:[#allocation10 + $0x6c8] sm:$0xff] }
 0x438   :  { %8431 = vmatpush1.bf16.msra.mxu1 %v10372_v0  ;;  %v10452_v0 = vcombine.low %v5336_v49, %v5340_v24  ;;  %v5324_v50 = vld [vmem:[#allocation10 + $0x6e8] sm:$0xff] }
 0x439   :  { %8478 = vmatpush1.bf16.msra.mxu0 %v10476_v44  ;;  %8432 = vmatprep.subr.bf16.mxu1 %v10365_v38  ;;  %v10556_v44 = vcombine.low %v5440_v30, %v5444_v4  ;;  %v10445_v38 = vcombine.high %v5328_v14, %v5332_v62  ;;  %v5424_v8 = vld [vmem:[#allocation10 + $0xa08] sm:$0xff] }
 0x43a   :  { %8479 = vmatprep.subr.bf16.mxu0 %v10597_v45  ;;  %v10549_v45 = vcombine.high %v5432_v13, %v5436_v60  ;;  %v5428_v40 = vld [vmem:[#allocation10 + $0xa28] sm:$0xff] }
 0x43b   :  { %v5312_v48 = vld [vmem:[#allocation10 + $0x688] sm:$0xff] }
 0x43c   :  { %8433 = vmatpush1.bf16.msra.mxu1 %v10364_v46  ;;  %v10444_v46 = vcombine.low %v5328_v14, %v5332_v62  ;;  %v5316_v51 = vld [vmem:[#allocation10 + $0x6a8] sm:$0xff] }
 0x43d   :  { %8480 = vmatpush2.bf16.msra.mxu0 %v10596_v43  ;;  %8434 = vmatprep.subr.bf16.mxu1 %v10357_v47  ;;  %v10548_v43 = vcombine.low %v5432_v13, %v5436_v60  ;;  %v10437_v47 = vcombine.high %v5320_v3, %v5324_v50  ;;  %v5304_v28 = vld [vmem:[#allocation10 + $0x648] sm:$0xff]  ;;  %v5137_v60 = vld [vmem:[#allocation10 + $0x110] sm:$0xff] }
 0x43e   :  { %8481 = vmatprep.subr.bf16.mxu0 %v10589_v27  ;;  %v10541_v27 = vcombine.high %v5424_v8, %v5428_v40  ;;  %v5308_v10 = vld [vmem:[#allocation10 + $0x668] sm:$0xff] }
 0x43f   :  { %v10421_v21 = vcombine.high %v5304_v28, %v5308_v10  ;;  %v5296_v23 = vld [vmem:[#allocation10 + $0x608] sm:$0xff]  ;;  %v10420_v30 = vcombine.low %v5304_v28, %v5308_v10 }
 0x440   :  { %8435 = vmatpush1.bf16.msra.mxu1 %v10356_v59  ;;  %v10436_v59 = vcombine.low %v5320_v3, %v5324_v50  ;;  %v5544_v14 = vld [vmem:[#allocation10 + $0xdc8] sm:$0xff] }
 0x441   :  { %8482 = vmatpush2.bf16.msra.mxu0 %v10588_v5  ;;  %8436 = vmatprep.subr.bf16.mxu1 %v10349_v19  ;;  %v10540_v5 = vcombine.low %v5424_v8, %v5428_v40  ;;  %v10429_v19 = vcombine.high %v5312_v48, %v5316_v51  ;;  %v5548_v62 = vld [vmem:[#allocation10 + $0xde8] sm:$0xff] }
 0x442   :  { %8483 = vmatprep.subr.bf16.mxu0 %v10581_v25  ;;  %v5615_v25 = vld [vmem:[#allocation12] sm:$0xff]  ;;  %v10661_v8 = vcombine.high %v5544_v14, %v5548_v62 }
 0x443   :  { %v5624_v52 = vrot.slane %v5615_v25, %v11328_v16 }
 0x444   :  { %8437 = vmatpush1.bf16.msra.mxu1 %v10348_v17  ;;  %v5157_v17 = vld [vmem:[#allocation10 + $0x1b0] sm:$0xff] }
 0x445   :  { %8484 = vmatpush2.bf16.msra.mxu0 %v10580_v11  ;;  %8438 = vmatprep.subr.bf16.mxu1 %v10469_v18  ;;  %v10428_v11 = vcombine.low %v5312_v48, %v5316_v51  ;;  %v5620_v18 = vrot.slane %v5615_v25, %v11320_v33  ;;  %v10271_v22 = vcombine.high %v5153_v15, %v5157_v17  ;;  %v5133_v48 = vld [vmem:[#allocation10 + $0xf0] sm:$0xff] }
 0x446   :  { %8485 = vmatprep.subr.bf16.mxu0 %v10573_v20  ;;  %v10278_v20 = vcombine.low %v5161_v56, %v5165_v58  ;;  %v10270_v4 = vcombine.low %v5153_v15, %v5157_v17  ;;  %v10660_v51 = vcombine.low %v5544_v14, %v5548_v62  ;;  %v5121_v25 = vld [vmem:[#allocation10 + $0x90] sm:$0xff] }
 0x448   :  { %8439 = vmatpush2.bf16.msra.mxu1 %v10468_v42  ;;  %v5300_v42 = vld [vmem:[#allocation10 + $0x628] sm:$0xff] }
 0x449   :  { %8486 = vmatpush2.bf16.msra.mxu0 %v10572_v55  ;;  %8440 = vmatprep.subr.bf16.mxu1 %v10461_v29  ;;  %v5145_v29 = vld [vmem:[#allocation10 + $0x150] sm:$0xff] }
 0x44a   :  { %8487 = vmatprep.subr.bf16.mxu0 %v10565_v9  ;;  %v5149_v9 = vld [vmem:[#allocation10 + $0x170] sm:$0xff] }
 0x44b   :  { %v10262_v50 = vcombine.low %v5145_v29, %v5149_v9 }
 0x44c   :  { %8441 = vmatpush2.bf16.msra.mxu1 %v10460_v39  ;;  %v10413_v39 = vcombine.high %v5296_v23, %v5300_v42 }
 0x44d   :  { %8488 = vmatpush2.bf16.msra.mxu0 %v10564_v31  ;;  %8442 = vmatprep.subr.bf16.mxu1 %v10453_v41 }
 0x44e   :  { %8489 = vmatprep.subr.bf16.mxu0 %v10557_v32  ;;  %v10263_v32 = vcombine.high %v5145_v29, %v5149_v9  ;;  %v5516_v29 = vld [vmem:[#allocation10 + $0xce8] sm:$0xff]  ;;  %v5105_v9 = vld [vmem:[#allocation10 + $0x10] sm:$0xff] }
 0x450   :  { %8443 = vmatpush2.bf16.msra.mxu1 %v10452_v0  ;;  %v5141_v0 = vld [vmem:[#allocation10 + $0x130] sm:$0xff] }
 0x451   :  { %8490 = vmatpush2.bf16.msra.mxu0 %v10556_v44  ;;  %8444 = vmatprep.subr.bf16.mxu1 %v10445_v38  ;;  %v10254_v56 = vcombine.low %v5137_v60, %v5141_v0 }
 0x452   :  { %8491 = vmatprep.subr.bf16.mxu0 %v10549_v45  ;;  %v10412_v45 = vcombine.low %v5296_v23, %v5300_v42 }
 0x454   :  { %8445 = vmatpush2.bf16.msra.mxu1 %v10444_v46  ;;  %v10255_v46 = vcombine.high %v5137_v60, %v5141_v0  ;;  %v5496_v0 = vld [vmem:[#allocation10 + $0xc48] sm:$0xff] }
 0x455   :  { %8492 = vmatpush2.bf16.msra.mxu0 %v10548_v43  ;;  %8446 = vmatprep.subr.bf16.mxu1 %v10437_v47  ;;  %v5536_v43 = vld [vmem:[#allocation10 + $0xd88] sm:$0xff] }
 0x456   :  { %8493 = vmatprep.subr.bf16.mxu0 %v10541_v27  ;;  %v5540_v47 = vld [vmem:[#allocation10 + $0xda8] sm:$0xff]  ;;  %v5129_v27 = vld [vmem:[#allocation10 + $0xd0] sm:$0xff] }
 0x457   :  { %v10653_v58 = vcombine.high %v5536_v43, %v5540_v47  ;;  %v10652_v28 = vcombine.low %v5536_v43, %v5540_v47  ;;  %v10246_v10 = vcombine.low %v5129_v27, %v5133_v48  ;;  %v5488_v43 = vld [vmem:[#allocation10 + $0xc08] sm:$0xff] }
 0x458   :  { %8447 = vmatpush2.bf16.msra.mxu1 %v10436_v59  ;;  %v10247_v59 = vcombine.high %v5129_v27, %v5133_v48  ;;  %v5492_v47 = vld [vmem:[#allocation10 + $0xc28] sm:$0xff]  ;;  %v5209_v27 = vld [vmem:[#allocation10 + $0x350] sm:$0xff] }
 0x459   :  { %8494 = vmatpush2.bf16.msra.mxu0 %v10540_v5  ;;  %8448 = vmatprep.subr.bf16.mxu1 %v10429_v19  ;;  %v5528_v5 = vld [vmem:[#allocation10 + $0xd48] sm:$0xff]  ;;  %v5213_v48 = vld [vmem:[#allocation10 + $0x370] sm:$0xff] }
 0x45a   :  { %8545 = vmatprep.subr.bf16.mxu0 %v10279_v6  ;;  %v5532_v19 = vld [vmem:[#allocation10 + $0xd68] sm:$0xff]  ;;  %v5125_v6 = vld [vmem:[#allocation10 + $0xb0] sm:$0xff] }
 0x45b   :  { %v8251_v55 = vpop.f32.mrf.mxu0  ;;  %v10645_v15 = vcombine.high %v5528_v5, %v5532_v19  ;;  %v10239_v17 = vcombine.high %v5121_v25, %v5125_v6 }
 0x45c   :  { %v8252_v49 = vadd.f32 %v8251_v55, %v5620_v18  ;;  %v8292_v24 = vpop.f32.mrf.mxu1  ;;  %8449 = vmatpush2.bf16.msra.mxu1 %v10428_v11  ;;  %8496 = vmatmul.mubr.bf16.vlgmr.msra.gmra.mxu0 %v11506_v37  ;;  %v5520_v11 = vld [vmem:[#allocation10 + $0xd08] sm:$0xff] }
 0x45d   :  { %8546 = vmatpush1.bf16.msra.mxu0 %v10278_v20  ;;  %8577 = vmatprep.mubr.bf16.mxu0 %v11462_v12  ;;  %v8253_v33 = vpop.f32.mrf.mxu0  ;;  %v5524_v18 = vld [vmem:[#allocation10 + $0xd28] sm:$0xff]  ;;  %v5113_v20 = vld [vmem:[#allocation10 + $0x50] sm:$0xff] }
 0x45e   :  { %v11540_v16 = vadd.f32 %v8292_v24, %v8252_v49  ;;  %v8254_v31 = vadd.f32 %v8253_v33, %v5624_v52  ;;  %v8294_v41 = vpop.f32.mrf.mxu1  ;;  %8450 = vmatprep.subr.bf16.mxu1 %v10421_v21  ;;  %8547 = vmatprep.subr.bf16.mxu0 %v10271_v22  ;;  %v5117_v52 = vld [vmem:[#allocation10 + $0x70] sm:$0xff]  ;;  %v10644_v21 = vcombine.low %v5528_v5, %v5532_v19  ;;  %v5512_v55 = vld [vmem:[#allocation10 + $0xcc8] sm:$0xff] }
 0x45f   :  { %v8255_v13 = vpop.f32.mrf.mxu0  ;;  %v10238_v22 = vcombine.low %v5121_v25, %v5125_v6  ;;  %v10637_v23 = vcombine.high %v5520_v11, %v5524_v18  ;;  %v10231_v42 = vcombine.high %v5113_v20, %v5117_v52  ;;  %v5109_v49 = vld [vmem:[#allocation10 + $0x30] sm:$0xff]  ;;  %v10636_v24 = vcombine.low %v5520_v11, %v5524_v18  ;;  %v5608_v5 = vld [vmem:[#allocation10 + $0xfc8] sm:$0xff] }
 0x460   :  { %v11542_v44 = vadd.f32 %v8294_v41, %v8254_v31  ;;  %v8296_v38 = vpop.f32.mrf.mxu1  ;;  %8451 = vmatpush2.bf16.msra.mxu1 %v10420_v30  ;;  %v10230_v30 = vcombine.low %v5113_v20, %v5117_v52  ;;  %v10629_v33 = vcombine.high %v5512_v55, %v5516_v29  ;;  %v5508_v31 = vld [vmem:[#allocation10 + $0xca8] sm:$0xff]  ;;  %v5225_v41 = vld [vmem:[#allocation10 + $0x3d0] sm:$0xff]  ;;  %v10628_v14 = vcombine.low %v5512_v55, %v5516_v29 }
 0x461   :  { %8548 = vmatpush1.bf16.msra.mxu0 %v10270_v4  ;;  %v8256_v3 = vpop.f32.mrf.mxu0  ;;  %8452 = vmatprep.subr.bf16.mxu1 %v10413_v39  ;;  %v10223_v4 = vcombine.high %v5105_v9, %v5109_v49  ;;  %v5504_v39 = vld [vmem:[#allocation10 + $0xc88] sm:$0xff]  ;;  %v10222_v62 = vcombine.low %v5105_v9, %v5109_v49  ;;  %v5201_v25 = vld [vmem:[#allocation10 + $0x310] sm:$0xff] }
 0x462   :  { %v8297_v40 = vpop.f32.mrf.mxu1  ;;  %8549 = vmatprep.subr.bf16.mxu0 %v10263_v32  ;;  %v5229_v32 = vld [vmem:[#allocation10 + $0x3f0] sm:$0xff]  ;;  %v10621_v13 = vcombine.high %v5504_v39, %v5508_v31  ;;  %v5500_v38 = vld [vmem:[#allocation10 + $0xc68] sm:$0xff] }
 0x463   :  { %v10343_v60 = vcombine.high %v5225_v41, %v5229_v32  ;;  %v5221_v3 = vld [vmem:[#allocation10 + $0x3b0] sm:$0xff]  ;;  %v10613_v40 = vcombine.high %v5496_v0, %v5500_v38  ;;  %v5612_v19 = vld [vmem:[#allocation10 + $0xfe8] sm:$0xff] }
 0x464   :  { %8453 = vmatpush2.bf16.msra.mxu1 %v10412_v45  ;;  %v5217_v45 = vld [vmem:[#allocation10 + $0x390] sm:$0xff]  ;;  %v5600_v11 = vld [vmem:[#allocation10 + $0xf88] sm:$0xff] }
 0x465   :  { %8550 = vmatpush1.bf16.msra.mxu0 %v10262_v50  ;;  %8504 = vmatprep.subr.bf16.mxu1 %v10661_v8  ;;  %v10620_v50 = vcombine.low %v5504_v39, %v5508_v31  ;;  %v10342_v8 = vcombine.low %v5225_v41, %v5229_v32  ;;  %v5205_v6 = vld [vmem:[#allocation10 + $0x330] sm:$0xff]  ;;  %v5604_v18 = vld [vmem:[#allocation10 + $0xfa8] sm:$0xff] }
 0x466   :  { %8551 = vmatprep.subr.bf16.mxu0 %v10255_v46  ;;  %v10335_v46 = vcombine.high %v5217_v45, %v5221_v3  ;;  %v5193_v20 = vld [vmem:[#allocation10 + $0x2d0] sm:$0xff]  ;;  %v5592_v55 = vld [vmem:[#allocation10 + $0xf48] sm:$0xff] }
 0x467   :  { %8455 = vmatmul.mubr.bf16.vlgmr.msra.gmra.mxu1 %v11483_v26  ;;  %v5197_v52 = vld [vmem:[#allocation10 + $0x2f0] sm:$0xff]  ;;  %v5596_v29 = vld [vmem:[#allocation10 + $0xf68] sm:$0xff] }
 0x468   :  { %8505 = vmatpush1.bf16.msra.mxu1 %v10660_v51  ;;  %8536 = vmatprep.mubr.bf16.mxu1 %v11526_v1  ;;  %v10612_v51 = vcombine.low %v5496_v0, %v5500_v38  ;;  %v5185_v9 = vld [vmem:[#allocation10 + $0x290] sm:$0xff]  ;;  %v5584_v39 = vld [vmem:[#allocation10 + $0xf08] sm:$0xff] }
 0x469   :  { %8552 = vmatpush1.bf16.msra.mxu0 %v10254_v56  ;;  %8506 = vmatprep.subr.bf16.mxu1 %v10653_v58  ;;  %v10334_v56 = vcombine.low %v5217_v45, %v5221_v3  ;;  %v10605_v58 = vcombine.high %v5488_v43, %v5492_v47  ;;  %v5189_v49 = vld [vmem:[#allocation10 + $0x2b0] sm:$0xff]  ;;  %v5588_v31 = vld [vmem:[#allocation10 + $0xf28] sm:$0xff] }
 0x46a   :  { %8553 = vmatprep.subr.bf16.mxu0 %v10247_v59  ;;  %v10327_v59 = vcombine.high %v5209_v27, %v5213_v48  ;;  %v5177_v41 = vld [vmem:[#allocation10 + $0x250] sm:$0xff]  ;;  %v5576_v0 = vld [vmem:[#allocation10 + $0xec8] sm:$0xff] }
 0x46b   :  { %v5181_v32 = vld [vmem:[#allocation10 + $0x270] sm:$0xff]  ;;  %v5580_v38 = vld [vmem:[#allocation10 + $0xee8] sm:$0xff] }
 0x46c   :  { %8507 = vmatpush1.bf16.msra.mxu1 %v10652_v28  ;;  %v10604_v28 = vcombine.low %v5488_v43, %v5492_v47  ;;  %v5169_v45 = vld [vmem:[#allocation10 + $0x210] sm:$0xff]  ;;  %v5568_v43 = vld [vmem:[#allocation10 + $0xe88] sm:$0xff] }
 0x46d   :  { %8554 = vmatpush1.bf16.msra.mxu0 %v10246_v10  ;;  %8508 = vmatprep.subr.bf16.mxu1 %v10645_v15  ;;  %v10326_v10 = vcombine.low %v5209_v27, %v5213_v48  ;;  %v10725_v15 = vcombine.high %v5608_v5, %v5612_v19  ;;  %v5173_v3 = vld [vmem:[#allocation10 + $0x230] sm:$0xff]  ;;  %v5572_v47 = vld [vmem:[#allocation10 + $0xea8] sm:$0xff] }
 0x46e   :  { %8555 = vmatprep.subr.bf16.mxu0 %v10239_v17  ;;  %v10319_v17 = vcombine.high %v5201_v25, %v5205_v6  ;;  %v5417_v27 = vld [vmem:[#allocation10 + $0x9d0] sm:$0xff] }
 0x46f   :  { %v5421_v48 = vld [vmem:[#allocation10 + $0x9f0] sm:$0xff] }
 0x470   :  { %8509 = vmatpush1.bf16.msra.mxu1 %v10644_v21  ;;  %v10724_v21 = vcombine.low %v5608_v5, %v5612_v19  ;;  %v5560_v5 = vld [vmem:[#allocation10 + $0xe48] sm:$0xff] }
 0x471   :  { %8556 = vmatpush1.bf16.msra.mxu0 %v10238_v22  ;;  %8510 = vmatprep.subr.bf16.mxu1 %v10637_v23  ;;  %v10318_v22 = vcombine.low %v5201_v25, %v5205_v6  ;;  %v10717_v23 = vcombine.high %v5600_v11, %v5604_v18  ;;  %v5564_v19 = vld [vmem:[#allocation10 + $0xe68] sm:$0xff]  ;;  %v5409_v25 = vld [vmem:[#allocation10 + $0x990] sm:$0xff] }
 0x472   :  { %8557 = vmatprep.subr.bf16.mxu0 %v10231_v42  ;;  %v10311_v42 = vcombine.high %v5193_v20, %v5197_v52  ;;  %v5413_v6 = vld [vmem:[#allocation10 + $0x9b0] sm:$0xff] }
 0x474   :  { %8511 = vmatpush1.bf16.msra.mxu1 %v10636_v24  ;;  %v10716_v24 = vcombine.low %v5600_v11, %v5604_v18  ;;  %v5552_v11 = vld [vmem:[#allocation10 + $0xe08] sm:$0xff] }
 0x475   :  { %8558 = vmatpush1.bf16.msra.mxu0 %v10230_v30  ;;  %8512 = vmatprep.subr.bf16.mxu1 %v10629_v33  ;;  %v10310_v30 = vcombine.low %v5193_v20, %v5197_v52  ;;  %v10709_v33 = vcombine.high %v5592_v55, %v5596_v29  ;;  %v5556_v18 = vld [vmem:[#allocation10 + $0xe28] sm:$0xff]  ;;  %v5401_v52 = vld [vmem:[#allocation10 + $0x950] sm:$0xff] }
 0x476   :  { %8559 = vmatprep.subr.bf16.mxu0 %v10223_v4  ;;  %v10303_v4 = vcombine.high %v5185_v9, %v5189_v49 }
 0x478   :  { %8513 = vmatpush1.bf16.msra.mxu1 %v10628_v14  ;;  %v10708_v14 = vcombine.low %v5592_v55, %v5596_v29  ;;  %v10526_v55 = vcombine.low %v5409_v25, %v5413_v6  ;;  %v10669_v29 = vcombine.high %v5552_v11, %v5556_v18 }
 0x479   :  { %8560 = vmatpush1.bf16.msra.mxu0 %v10222_v62  ;;  %8514 = vmatprep.subr.bf16.mxu1 %v10621_v13  ;;  %v10302_v62 = vcombine.low %v5185_v9, %v5189_v49  ;;  %v10701_v13 = vcombine.high %v5584_v39, %v5588_v31 }
 0x47a   :  { %8561 = vmatprep.subr.bf16.mxu0 %v10343_v60  ;;  %v10295_v60 = vcombine.high %v5177_v41, %v5181_v32 }
 0x47c   :  { %8515 = vmatpush1.bf16.msra.mxu1 %v10620_v50  ;;  %v10700_v50 = vcombine.low %v5584_v39, %v5588_v31  ;;  %v10668_v39 = vcombine.low %v5552_v11, %v5556_v18 }
 0x47d   :  { %8562 = vmatpush2.bf16.msra.mxu0 %v10342_v8  ;;  %8516 = vmatprep.subr.bf16.mxu1 %v10613_v40  ;;  %v10294_v8 = vcombine.low %v5177_v41, %v5181_v32  ;;  %v10693_v40 = vcombine.high %v5576_v0, %v5580_v38 }
 0x47e   :  { %8563 = vmatprep.subr.bf16.mxu0 %v10335_v46  ;;  %v10287_v46 = vcombine.high %v5169_v45, %v5173_v3 }
 0x480   :  { %8517 = vmatpush1.bf16.msra.mxu1 %v10612_v51  ;;  %v10692_v51 = vcombine.low %v5576_v0, %v5580_v38 }
 0x481   :  { %8564 = vmatpush2.bf16.msra.mxu0 %v10334_v56  ;;  %8518 = vmatprep.subr.bf16.mxu1 %v10605_v58  ;;  %v10286_v56 = vcombine.low %v5169_v45, %v5173_v3  ;;  %v10685_v58 = vcombine.high %v5568_v43, %v5572_v47 }
 0x482   :  { %8565 = vmatprep.subr.bf16.mxu0 %v10327_v59  ;;  %v10535_v59 = vcombine.high %v5417_v27, %v5421_v48 }
 0x484   :  { %8519 = vmatpush1.bf16.msra.mxu1 %v10604_v28  ;;  %v10684_v28 = vcombine.low %v5568_v43, %v5572_v47 }
 0x485   :  { %8566 = vmatpush2.bf16.msra.mxu0 %v10326_v10  ;;  %8520 = vmatprep.subr.bf16.mxu1 %v10725_v15  ;;  %v10534_v10 = vcombine.low %v5417_v27, %v5421_v48  ;;  %v10677_v15 = vcombine.high %v5560_v5, %v5564_v19 }
 0x486   :  { %8567 = vmatprep.subr.bf16.mxu0 %v10319_v17  ;;  %v10527_v17 = vcombine.high %v5409_v25, %v5413_v6 }
 0x488   :  { %8521 = vmatpush2.bf16.msra.mxu1 %v10724_v21  ;;  %v5405_v21 = vld [vmem:[#allocation10 + $0x970] sm:$0xff] }
 0x489   :  { %8568 = vmatpush2.bf16.msra.mxu0 %v10318_v22  ;;  %8522 = vmatprep.subr.bf16.mxu1 %v10717_v23  ;;  %v10676_v23 = vcombine.low %v5560_v5, %v5564_v19  ;;  %v10519_v49 = vcombine.high %v5401_v52, %v5405_v21  ;;  %v10518_v41 = vcombine.low %v5401_v52, %v5405_v21  ;;  %v5249_v21 = vld [vmem:[#allocation10 + $0x490] sm:$0xff] }
 0x48a   :  { %8569 = vmatprep.subr.bf16.mxu0 %v10311_v42 }
 0x48c   :  { %8523 = vmatpush2.bf16.msra.mxu1 %v10716_v24  ;;  %v5289_v24 = vld [vmem:[#allocation10 + $0x5d0] sm:$0xff] }
 0x48d   :  { %8570 = vmatpush2.bf16.msra.mxu0 %v10310_v30  ;;  %8524 = vmatprep.subr.bf16.mxu1 %v10709_v33  ;;  %v5293_v30 = vld [vmem:[#allocation10 + $0x5f0] sm:$0xff] }
 0x48e   :  { %8571 = vmatprep.subr.bf16.mxu0 %v10303_v4  ;;  %v5393_v33 = vld [vmem:[#allocation10 + $0x910] sm:$0xff]  ;;  %v10407_v32 = vcombine.high %v5289_v24, %v5293_v30  ;;  %v10406_v0 = vcombine.low %v5289_v24, %v5293_v30 }
 0x48f   :  { %v5397_v4 = vld [vmem:[#allocation10 + $0x930] sm:$0xff] }
 0x490   :  { %8525 = vmatpush2.bf16.msra.mxu1 %v10708_v14  ;;  %v10511_v14 = vcombine.high %v5393_v33, %v5397_v4  ;;  %v10510_v38 = vcombine.low %v5393_v33, %v5397_v4  ;;  %v5245_v33 = vld [vmem:[#allocation10 + $0x470] sm:$0xff] }
 0x491   :  { %8572 = vmatpush2.bf16.msra.mxu0 %v10302_v62  ;;  %8526 = vmatprep.subr.bf16.mxu1 %v10701_v13  ;;  %v5281_v62 = vld [vmem:[#allocation10 + $0x590] sm:$0xff] }
 0x492   :  { %8573 = vmatprep.subr.bf16.mxu0 %v10295_v60  ;;  %v5385_v13 = vld [vmem:[#allocation10 + $0x8d0] sm:$0xff] }
 0x493   :  { %v5389_v60 = vld [vmem:[#allocation10 + $0x8f0] sm:$0xff] }
 0x494   :  { %8527 = vmatpush2.bf16.msra.mxu1 %v10700_v50  ;;  %v10503_v3 = vcombine.high %v5385_v13, %v5389_v60  ;;  %v5273_v50 = vld [vmem:[#allocation10 + $0x550] sm:$0xff]  ;;  %v10502_v47 = vcombine.low %v5385_v13, %v5389_v60 }
 0x495   :  { %8574 = vmatpush2.bf16.msra.mxu0 %v10294_v8  ;;  %8528 = vmatprep.subr.bf16.mxu1 %v10693_v40  ;;  %v5277_v8 = vld [vmem:[#allocation10 + $0x570] sm:$0xff] }
 0x496   :  { %8575 = vmatprep.subr.bf16.mxu0 %v10287_v46  ;;  %v5377_v40 = vld [vmem:[#allocation10 + $0x890] sm:$0xff]  ;;  %v10391_v27 = vcombine.high %v5273_v50, %v5277_v8  ;;  %v10390_v5 = vcombine.low %v5273_v50, %v5277_v8 }
 0x497   :  { %v5381_v46 = vld [vmem:[#allocation10 + $0x8b0] sm:$0xff] }
 0x498   :  { %8529 = vmatpush2.bf16.msra.mxu1 %v10692_v51  ;;  %v10495_v48 = vcombine.high %v5377_v40, %v5381_v46  ;;  %v5265_v51 = vld [vmem:[#allocation10 + $0x510] sm:$0xff]  ;;  %v10494_v19 = vcombine.low %v5377_v40, %v5381_v46 }
 0x499   :  { %8576 = vmatpush2.bf16.msra.mxu0 %v10286_v56  ;;  %8530 = vmatprep.subr.bf16.mxu1 %v10685_v58  ;;  %v5269_v56 = vld [vmem:[#allocation10 + $0x530] sm:$0xff] }
 0x49a   :  { %8627 = vmatprep.subr.bf16.mxu0 %v10535_v59  ;;  %v5369_v58 = vld [vmem:[#allocation10 + $0x850] sm:$0xff]  ;;  %v10383_v25 = vcombine.high %v5265_v51, %v5269_v56  ;;  %v10382_v11 = vcombine.low %v5265_v51, %v5269_v56 }
 0x49b   :  { %v8333_v20 = vpop.f32.mrf.mxu0  ;;  %v5373_v59 = vld [vmem:[#allocation10 + $0x870] sm:$0xff] }
 0x49c   :  { %v11547_v22 = vadd.f32 %v8333_v20, %v11540_v16  ;;  %8531 = vmatpush2.bf16.msra.mxu1 %v10684_v28  ;;  %8578 = vmatmul.mubr.bf16.vlgmr.msra.gmra.mxu0 %v11481_v34  ;;  %v10487_v6 = vcombine.high %v5369_v58, %v5373_v59  ;;  %v5257_v28 = vld [vmem:[#allocation10 + $0x4d0] sm:$0xff]  ;;  %v10486_v18 = vcombine.low %v5369_v58, %v5373_v59 }
 0x49d   :  { %8628 = vmatpush1.bf16.msra.mxu0 %v10534_v10  ;;  %8659 = vmatprep.mubr.bf16.mxu0 %v11492_v7  ;;  %v8335_v42 = vpop.f32.mrf.mxu0  ;;  %v5261_v10 = vld [vmem:[#allocation10 + $0x4f0] sm:$0xff] }
 0x49e   :  { %v11552_v9 = vadd.f32 %v8335_v42, %v11542_v44  ;;  %8532 = vmatprep.subr.bf16.mxu1 %v10677_v15  ;;  %8629 = vmatprep.subr.bf16.mxu0 %v10527_v17  ;;  %v5285_v44 = vld [vmem:[#allocation10 + $0x5b0] sm:$0xff]  ;;  %v10375_v20 = vcombine.high %v5257_v28, %v5261_v10 }
 0x49f   :  { %v8337_v16 = vpop.f32.mrf.mxu0  ;;  %v10399_v45 = vcombine.high %v5281_v62, %v5285_v44  ;;  %v10398_v43 = vcombine.low %v5281_v62, %v5285_v44  ;;  %v5361_v15 = vld [vmem:[#allocation10 + $0x810] sm:$0xff] }
 0x4a0   :  { %8533 = vmatpush2.bf16.msra.mxu1 %v10676_v23  ;;  %v5365_v17 = vld [vmem:[#allocation10 + $0x830] sm:$0xff] }
 0x4a1   :  { %8630 = vmatpush1.bf16.msra.mxu0 %v10526_v55  ;;  %v8338_v31 = vpop.f32.mrf.mxu0  ;;  %8534 = vmatprep.subr.bf16.mxu1 %v10669_v29  ;;  %v10479_v52 = vcombine.high %v5361_v15, %v5365_v17  ;;  %v5253_v23 = vld [vmem:[#allocation10 + $0x4b0] sm:$0xff]  ;;  %v10374_v29 = vcombine.low %v5257_v28, %v5261_v10 }
 0x4a2   :  { %8631 = vmatprep.subr.bf16.mxu0 %v10519_v49  ;;  %v5481_v42 = vld [vmem:[#allocation10 + $0xbd0] sm:$0xff]  ;;  %v10478_v49 = vcombine.low %v5361_v15, %v5365_v17  ;;  %v10367_v24 = vcombine.high %v5249_v21, %v5253_v23  ;;  %v10366_v31 = vcombine.low %v5249_v21, %v5253_v23 }
 0x4a3   :  { %v5485_v55 = vld [vmem:[#allocation10 + $0xbf0] sm:$0xff] }
 0x4a4   :  { %8535 = vmatpush2.bf16.msra.mxu1 %v10668_v39  ;;  %v10599_v30 = vcombine.high %v5481_v42, %v5485_v55  ;;  %v5241_v16 = vld [vmem:[#allocation10 + $0x450] sm:$0xff] }
 0x4a5   :  { %8632 = vmatpush1.bf16.msra.mxu0 %v10518_v41  ;;  %8586 = vmatprep.subr.bf16.mxu1 %v10407_v32  ;;  %v5473_v4 = vld [vmem:[#allocation10 + $0xb90] sm:$0xff]  ;;  %v10598_v41 = vcombine.low %v5481_v42, %v5485_v55  ;;  %v10359_v32 = vcombine.high %v5241_v16, %v5245_v33 }
 0x4a6   :  { %8633 = vmatprep.subr.bf16.mxu0 %v10511_v14  ;;  %v5477_v39 = vld [vmem:[#allocation10 + $0xbb0] sm:$0xff] }
 0x4a7   :  { %8537 = vmatmul.mubr.bf16.vlgmr.msra.gmra.mxu1 %v11528_v2  ;;  %v10591_v14 = vcombine.high %v5473_v4, %v5477_v39  ;;  %v5233_v62 = vld [vmem:[#allocation10 + $0x410] sm:$0xff] }
 0x4a8   :  { %8587 = vmatpush1.bf16.msra.mxu1 %v10406_v0  ;;  %8618 = vmatprep.mubr.bf16.mxu1 %v11465_v53  ;;  %v5237_v44 = vld [vmem:[#allocation10 + $0x430] sm:$0xff]  ;;  %v10358_v0 = vcombine.low %v5241_v16, %v5245_v33 }
 0x4a9   :  { %8634 = vmatpush1.bf16.msra.mxu0 %v10510_v38  ;;  %8588 = vmatprep.subr.bf16.mxu1 %v10399_v45  ;;  %v5465_v13 = vld [vmem:[#allocation10 + $0xb50] sm:$0xff]  ;;  %v10590_v38 = vcombine.low %v5473_v4, %v5477_v39  ;;  %v10351_v45 = vcombine.high %v5233_v62, %v5237_v44 }
 0x4aa   :  { %8635 = vmatprep.subr.bf16.mxu0 %v10503_v3  ;;  %v5469_v60 = vld [vmem:[#allocation10 + $0xb70] sm:$0xff] }
 0x4ab   :  { %v10583_v3 = vcombine.high %v5465_v13, %v5469_v60  ;;  %v5353_v50 = vld [vmem:[#allocation10 + $0x7d0] sm:$0xff] }
 0x4ac   :  { %8589 = vmatpush1.bf16.msra.mxu1 %v10398_v43  ;;  %v5357_v8 = vld [vmem:[#allocation10 + $0x7f0] sm:$0xff]  ;;  %v10350_v43 = vcombine.low %v5233_v62, %v5237_v44 }
 0x4ad   :  { %8636 = vmatpush1.bf16.msra.mxu0 %v10502_v47  ;;  %8590 = vmatprep.subr.bf16.mxu1 %v10391_v27  ;;  %v5457_v40 = vld [vmem:[#allocation10 + $0xb10] sm:$0xff]  ;;  %v10582_v47 = vcombine.low %v5465_v13, %v5469_v60  ;;  %v10471_v27 = vcombine.high %v5353_v50, %v5357_v8  ;;  %v5162_v13 = vld [vmem:[#allocation10 + $0x1d8] sm:$0xff] }
 0x4ae   :  { %8637 = vmatprep.subr.bf16.mxu0 %v10495_v48  ;;  %v5461_v46 = vld [vmem:[#allocation10 + $0xb30] sm:$0xff]  ;;  %v5166_v60 = vld [vmem:[#allocation10 + $0x1f8] sm:$0xff] }
 0x4af   :  { %v10575_v48 = vcombine.high %v5457_v40, %v5461_v46  ;;  %v5345_v51 = vld [vmem:[#allocation10 + $0x790] sm:$0xff] }
 0x4b0   :  { %8591 = vmatpush1.bf16.msra.mxu1 %v10390_v5  ;;  %v5349_v56 = vld [vmem:[#allocation10 + $0x7b0] sm:$0xff]  ;;  %v10470_v5 = vcombine.low %v5353_v50, %v5357_v8 }
 0x4b1   :  { %8638 = vmatpush1.bf16.msra.mxu0 %v10494_v19  ;;  %8592 = vmatprep.subr.bf16.mxu1 %v10383_v25  ;;  %v5449_v58 = vld [vmem:[#allocation10 + $0xad0] sm:$0xff]  ;;  %v10574_v19 = vcombine.low %v5457_v40, %v5461_v46  ;;  %v10463_v25 = vcombine.high %v5345_v51, %v5349_v56  ;;  %v5154_v40 = vld [vmem:[#allocation10 + $0x198] sm:$0xff] }
 0x4b2   :  { %8639 = vmatprep.subr.bf16.mxu0 %v10487_v6  ;;  %v5453_v59 = vld [vmem:[#allocation10 + $0xaf0] sm:$0xff]  ;;  %v5158_v46 = vld [vmem:[#allocation10 + $0x1b8] sm:$0xff] }
 0x4b3   :  { %v10567_v6 = vcombine.high %v5449_v58, %v5453_v59  ;;  %v5337_v28 = vld [vmem:[#allocation10 + $0x750] sm:$0xff] }
 0x4b4   :  { %8593 = vmatpush1.bf16.msra.mxu1 %v10382_v11  ;;  %v5341_v10 = vld [vmem:[#allocation10 + $0x770] sm:$0xff]  ;;  %v10462_v11 = vcombine.low %v5345_v51, %v5349_v56 }
 0x4b5   :  { %8640 = vmatpush1.bf16.msra.mxu0 %v10486_v18  ;;  %8594 = vmatprep.subr.bf16.mxu1 %v10375_v20  ;;  %v5441_v15 = vld [vmem:[#allocation10 + $0xa90] sm:$0xff]  ;;  %v10566_v18 = vcombine.low %v5449_v58, %v5453_v59  ;;  %v10455_v20 = vcombine.high %v5337_v28, %v5341_v10  ;;  %v5146_v59 = vld [vmem:[#allocation10 + $0x158] sm:$0xff] }
 0x4b6   :  { %8641 = vmatprep.subr.bf16.mxu0 %v10479_v52  ;;  %v5445_v17 = vld [vmem:[#allocation10 + $0xab0] sm:$0xff] }
 0x4b7   :  { %v10559_v52 = vcombine.high %v5441_v15, %v5445_v17  ;;  %v5329_v21 = vld [vmem:[#allocation10 + $0x710] sm:$0xff] }
 0x4b8   :  { %8595 = vmatpush1.bf16.msra.mxu1 %v10374_v29  ;;  %v5333_v23 = vld [vmem:[#allocation10 + $0x730] sm:$0xff]  ;;  %v10454_v29 = vcombine.low %v5337_v28, %v5341_v10 }
 0x4b9   :  { %8642 = vmatpush1.bf16.msra.mxu0 %v10478_v49  ;;  %8596 = vmatprep.subr.bf16.mxu1 %v10367_v24  ;;  %v5433_v42 = vld [vmem:[#allocation10 + $0xa50] sm:$0xff]  ;;  %v10558_v49 = vcombine.low %v5441_v15, %v5445_v17  ;;  %v10447_v24 = vcombine.high %v5329_v21, %v5333_v23 }
 0x4ba   :  { %8643 = vmatprep.subr.bf16.mxu0 %v10599_v30  ;;  %v5437_v55 = vld [vmem:[#allocation10 + $0xa70] sm:$0xff] }
 0x4bb   :  { %v10551_v30 = vcombine.high %v5433_v42, %v5437_v55  ;;  %v5321_v16 = vld [vmem:[#allocation10 + $0x6d0] sm:$0xff] }
 0x4bc   :  { %8597 = vmatpush1.bf16.msra.mxu1 %v10366_v31  ;;  %v5325_v33 = vld [vmem:[#allocation10 + $0x6f0] sm:$0xff]  ;;  %v10446_v31 = vcombine.low %v5329_v21, %v5333_v23 }
 0x4bd   :  { %8644 = vmatpush2.bf16.msra.mxu0 %v10598_v41  ;;  %8598 = vmatprep.subr.bf16.mxu1 %v10359_v32  ;;  %v5425_v4 = vld [vmem:[#allocation10 + $0xa10] sm:$0xff]  ;;  %v10550_v41 = vcombine.low %v5433_v42, %v5437_v55  ;;  %v10439_v32 = vcombine.high %v5321_v16, %v5325_v33 }
 0x4be   :  { %8645 = vmatprep.subr.bf16.mxu0 %v10591_v14  ;;  %v5429_v39 = vld [vmem:[#allocation10 + $0xa30] sm:$0xff] }
 0x4bf   :  { %v10543_v14 = vcombine.high %v5425_v4, %v5429_v39  ;;  %v5313_v62 = vld [vmem:[#allocation10 + $0x690] sm:$0xff] }
 0x4c0   :  { %8599 = vmatpush1.bf16.msra.mxu1 %v10358_v0  ;;  %v5317_v44 = vld [vmem:[#allocation10 + $0x6b0] sm:$0xff]  ;;  %v10438_v0 = vcombine.low %v5321_v16, %v5325_v33 }
 0x4c1   :  { %8646 = vmatpush2.bf16.msra.mxu0 %v10590_v38  ;;  %8600 = vmatprep.subr.bf16.mxu1 %v10351_v45  ;;  %v10542_v38 = vcombine.low %v5425_v4, %v5429_v39  ;;  %v10431_v45 = vcombine.high %v5313_v62, %v5317_v44  ;;  %v5305_v50 = vld [vmem:[#allocation10 + $0x650] sm:$0xff] }
 0x4c2   :  { %8647 = vmatprep.subr.bf16.mxu0 %v10583_v3  ;;  %v10281_v3 = vcombine.high %v5162_v13, %v5166_v60  ;;  %v5309_v8 = vld [vmem:[#allocation10 + $0x670] sm:$0xff] }
 0x4c3   :  { %v5297_v51 = vld [vmem:[#allocation10 + $0x610] sm:$0xff] }
 0x4c4   :  { %8601 = vmatpush1.bf16.msra.mxu1 %v10350_v43  ;;  %v10430_v43 = vcombine.low %v5313_v62, %v5317_v44  ;;  %v5301_v56 = vld [vmem:[#allocation10 + $0x630] sm:$0xff] }
 0x4c5   :  { %8648 = vmatpush2.bf16.msra.mxu0 %v10582_v47  ;;  %8602 = vmatprep.subr.bf16.mxu1 %v10471_v27  ;;  %v10280_v47 = vcombine.low %v5162_v13, %v5166_v60  ;;  %v10423_v27 = vcombine.high %v5305_v50, %v5309_v8  ;;  %v10415_v28 = vcombine.high %v5297_v51, %v5301_v56  ;;  %v5545_v15 = vld [vmem:[#allocation10 + $0xdd0] sm:$0xff] }
 0x4c6   :  { %8649 = vmatprep.subr.bf16.mxu0 %v10575_v48  ;;  %v10273_v48 = vcombine.high %v5154_v40, %v5158_v46  ;;  %v5549_v17 = vld [vmem:[#allocation10 + $0xdf0] sm:$0xff] }
 0x4c7   :  { %v10663_v42 = vcombine.high %v5545_v15, %v5549_v17  ;;  %v5537_v55 = vld [vmem:[#allocation10 + $0xd90] sm:$0xff] }
 0x4c8   :  { %8603 = vmatpush2.bf16.msra.mxu1 %v10470_v5  ;;  %v5150_v5 = vld [vmem:[#allocation10 + $0x178] sm:$0xff]  ;;  %v5529_v39 = vld [vmem:[#allocation10 + $0xd50] sm:$0xff] }
 0x4c9   :  { %8650 = vmatpush2.bf16.msra.mxu0 %v10574_v19  ;;  %8604 = vmatprep.subr.bf16.mxu1 %v10463_v25  ;;  %v10422_v19 = vcombine.low %v5305_v50, %v5309_v8  ;;  %v10265_v10 = vcombine.high %v5146_v59, %v5150_v5  ;;  %v10264_v23 = vcombine.low %v5146_v59, %v5150_v5  ;;  %v5525_v50 = vld [vmem:[#allocation10 + $0xd30] sm:$0xff]  ;;  %v5110_v59 = vld [vmem:[#allocation10 + $0x38] sm:$0xff] }
 0x4ca   :  { %8651 = vmatprep.subr.bf16.mxu0 %v10567_v6  ;;  %v10272_v6 = vcombine.low %v5154_v40, %v5158_v46  ;;  %v5114_v40 = vld [vmem:[#allocation10 + $0x58] sm:$0xff] }
 0x4cc   :  { %8605 = vmatpush2.bf16.msra.mxu1 %v10462_v11 }
 0x4cd   :  { %8652 = vmatpush2.bf16.msra.mxu0 %v10566_v18  ;;  %8606 = vmatprep.subr.bf16.mxu1 %v10455_v20  ;;  %v5138_v18 = vld [vmem:[#allocation10 + $0x118] sm:$0xff] }
 0x4ce   :  { %8653 = vmatprep.subr.bf16.mxu0 %v10559_v52  ;;  %v5142_v20 = vld [vmem:[#allocation10 + $0x138] sm:$0xff]  ;;  %v10414_v52 = vcombine.low %v5297_v51, %v5301_v56  ;;  %v5513_v51 = vld [vmem:[#allocation10 + $0xcd0] sm:$0xff] }
 0x4cf   :  { %v10256_v16 = vcombine.low %v5138_v18, %v5142_v20  ;;  %v5517_v56 = vld [vmem:[#allocation10 + $0xcf0] sm:$0xff] }
 0x4d0   :  { %8607 = vmatpush2.bf16.msra.mxu1 %v10454_v29  ;;  %v5541_v29 = vld [vmem:[#allocation10 + $0xdb0] sm:$0xff] }
 0x4d1   :  { %8654 = vmatpush2.bf16.msra.mxu0 %v10558_v49  ;;  %8608 = vmatprep.subr.bf16.mxu1 %v10447_v24  ;;  %v5130_v49 = vld [vmem:[#allocation10 + $0xd8] sm:$0xff]  ;;  %v10655_v33 = vcombine.high %v5537_v55, %v5541_v29  ;;  %v10654_v44 = vcombine.low %v5537_v55, %v5541_v29 }
 0x4d2   :  { %8655 = vmatprep.subr.bf16.mxu0 %v10551_v30  ;;  %v5134_v24 = vld [vmem:[#allocation10 + $0xf8] sm:$0xff]  ;;  %v10662_v30 = vcombine.low %v5545_v15, %v5549_v17  ;;  %v5509_v15 = vld [vmem:[#allocation10 + $0xcb0] sm:$0xff] }
 0x4d3   :  { %v10249_v4 = vcombine.high %v5130_v49, %v5134_v24  ;;  %v10248_v60 = vcombine.low %v5130_v49, %v5134_v24  ;;  %v5226_v17 = vld [vmem:[#allocation10 + $0x3d8] sm:$0xff] }
 0x4d4   :  { %8609 = vmatpush2.bf16.msra.mxu1 %v10446_v31  ;;  %v5533_v31 = vld [vmem:[#allocation10 + $0xd70] sm:$0xff]  ;;  %v5222_v55 = vld [vmem:[#allocation10 + $0x3b8] sm:$0xff] }
 0x4d5   :  { %8656 = vmatpush2.bf16.msra.mxu0 %v10550_v41  ;;  %8610 = vmatprep.subr.bf16.mxu1 %v10439_v32  ;;  %v5122_v32 = vld [vmem:[#allocation10 + $0x98] sm:$0xff]  ;;  %v10646_v46 = vcombine.low %v5529_v39, %v5533_v31 }
 0x4d6   :  { %8657 = vmatprep.subr.bf16.mxu0 %v10543_v14  ;;  %v5126_v14 = vld [vmem:[#allocation10 + $0xb8] sm:$0xff] }
 0x4d8   :  { %8611 = vmatpush2.bf16.msra.mxu1 %v10438_v0  ;;  %v10647_v0 = vcombine.high %v5529_v39, %v5533_v31  ;;  %v5214_v39 = vld [vmem:[#allocation10 + $0x378] sm:$0xff] }
 0x4d9   :  { %8658 = vmatpush2.bf16.msra.mxu0 %v10542_v38  ;;  %8612 = vmatprep.subr.bf16.mxu1 %v10431_v45  ;;  %v10241_v45 = vcombine.high %v5122_v32, %v5126_v14 }
 0x4da   :  { %8709 = vmatprep.subr.bf16.mxu0 %v10281_v3  ;;  %v5521_v3 = vld [vmem:[#allocation10 + $0xd10] sm:$0xff] }
 0x4db   :  { %v11556_v58 = vpop.f32.mrf.mxu0  ;;  %v10638_v5 = vcombine.low %v5521_v3, %v5525_v50 }
 0x4dc   :  { %8613 = vmatpush2.bf16.msra.mxu1 %v10430_v43  ;;  %8660 = vmatmul.mubr.bf16.vlgmr.msra.gmra.mxu0 %v11506_v37 }
 0x4dd   :  { %8710 = vmatpush1.bf16.msra.mxu0 %v10280_v47  ;;  %8741 = vmatprep.mubr.bf16.mxu0 %v11462_v12  ;;  %v11560_v25 = vpop.f32.mrf.mxu0  ;;  %v10257_v12 = vcombine.high %v5138_v18, %v5142_v20  ;;  %v10240_v47 = vcombine.low %v5122_v32, %v5126_v14  ;;  %v10630_v18 = vcombine.low %v5513_v51, %v5517_v56 }
 0x4de   :  { %8614 = vmatprep.subr.bf16.mxu1 %v10423_v27  ;;  %8711 = vmatprep.subr.bf16.mxu0 %v10273_v48  ;;  %v10639_v27 = vcombine.high %v5521_v3, %v5525_v50 }
 0x4df   :  { %v8419_v11 = vpop.f32.mrf.mxu0 }
 0x4e0   :  { %8615 = vmatpush2.bf16.msra.mxu1 %v10422_v19  ;;  %v5230_v11 = vld [vmem:[#allocation10 + $0x3f8] sm:$0xff] }
 0x4e1   :  { %8712 = vmatpush1.bf16.msra.mxu0 %v10272_v6  ;;  %v8420_v21 = vpop.f32.mrf.mxu0  ;;  %8616 = vmatprep.subr.bf16.mxu1 %v10415_v28  ;;  %v10631_v6 = vcombine.high %v5513_v51, %v5517_v56  ;;  %v10344_v49 = vcombine.low %v5226_v17, %v5230_v11  ;;  %v5593_v56 = vld [vmem:[#allocation10 + $0xf50] sm:$0xff] }
 0x4e2   :  { %8713 = vmatprep.subr.bf16.mxu0 %v10265_v10  ;;  %v5505_v10 = vld [vmem:[#allocation10 + $0xc90] sm:$0xff]  ;;  %v10345_v21 = vcombine.high %v5226_v17, %v5230_v11  ;;  %v5178_v11 = vld [vmem:[#allocation10 + $0x258] sm:$0xff] }
 0x4e3   :  { %v10622_v29 = vcombine.low %v5505_v10, %v5509_v15  ;;  %v5589_v17 = vld [vmem:[#allocation10 + $0xf30] sm:$0xff] }
 0x4e4   :  { %8617 = vmatpush2.bf16.msra.mxu1 %v10414_v52  ;;  %v10623_v52 = vcombine.high %v5505_v10, %v5509_v15  ;;  %v5585_v15 = vld [vmem:[#allocation10 + $0xf10] sm:$0xff] }
 0x4e5   :  { %8714 = vmatpush1.bf16.msra.mxu0 %v10264_v23  ;;  %8668 = vmatprep.subr.bf16.mxu1 %v10663_v42  ;;  %v5497_v23 = vld [vmem:[#allocation10 + $0xc50] sm:$0xff] }
 0x4e6   :  { %8715 = vmatprep.subr.bf16.mxu0 %v10257_v12  ;;  %v5501_v42 = vld [vmem:[#allocation10 + $0xc70] sm:$0xff]  ;;  %v5218_v12 = vld [vmem:[#allocation10 + $0x398] sm:$0xff] }
 0x4e7   :  { %8619 = vmatmul.mubr.bf16.vlgmr.msra.gmra.mxu1 %v11483_v26  ;;  %v8374_v41 = vpop.f32.mrf.mxu1  ;;  %v10615_v24 = vcombine.high %v5497_v23, %v5501_v42  ;;  %v10614_v31 = vcombine.low %v5497_v23, %v5501_v42  ;;  %v5577_v42 = vld [vmem:[#allocation10 + $0xed0] sm:$0xff] }
 0x4e8   :  { %v11564_v62 = vadd.f32 %v8374_v41, %v11547_v22  ;;  %8669 = vmatpush1.bf16.msra.mxu1 %v10662_v30  ;;  %8700 = vmatprep.mubr.bf16.mxu1 %v11526_v1  ;;  %v5118_v22 = vld [vmem:[#allocation10 + $0x78] sm:$0xff]  ;;  %v10337_v30 = vcombine.high %v5218_v12, %v5222_v55  ;;  %v10336_v41 = vcombine.low %v5218_v12, %v5222_v55  ;;  %v5581_v12 = vld [vmem:[#allocation10 + $0xef0] sm:$0xff] }
 0x4e9   :  { %8716 = vmatpush1.bf16.msra.mxu0 %v10256_v16  ;;  %v8376_v13 = vpop.f32.mrf.mxu1  ;;  %8670 = vmatprep.subr.bf16.mxu1 %v10655_v33  ;;  %v10233_v48 = vcombine.high %v5114_v40, %v5118_v22  ;;  %v10232_v19 = vcombine.low %v5114_v40, %v5118_v22  ;;  %v5489_v16 = vld [vmem:[#allocation10 + $0xc10] sm:$0xff]  ;;  %v5170_v55 = vld [vmem:[#allocation10 + $0x218] sm:$0xff] }
 0x4ea   :  { %v11568_v38 = vadd.f32 %v8376_v13, %v11552_v9  ;;  %8717 = vmatprep.subr.bf16.mxu0 %v10249_v4  ;;  %v5106_v9 = vld [vmem:[#allocation10 + $0x18] sm:$0xff]  ;;  %v5493_v33 = vld [vmem:[#allocation10 + $0xc30] sm:$0xff] }
 0x4eb   :  { %v8378_v8 = vpop.f32.mrf.mxu1  ;;  %v10225_v28 = vcombine.high %v5106_v9, %v5110_v59  ;;  %v10224_v20 = vcombine.low %v5106_v9, %v5110_v59  ;;  %v5210_v4 = vld [vmem:[#allocation10 + $0x358] sm:$0xff]  ;;  %v10607_v32 = vcombine.high %v5489_v16, %v5493_v33  ;;  %v5613_v13 = vld [vmem:[#allocation10 + $0xff0] sm:$0xff] }
 0x4ec   :  { %8671 = vmatpush1.bf16.msra.mxu1 %v10654_v44  ;;  %v10329_v14 = vcombine.high %v5210_v4, %v5214_v39  ;;  %v5609_v44 = vld [vmem:[#allocation10 + $0xfd0] sm:$0xff]  ;;  %v10328_v3 = vcombine.low %v5210_v4, %v5214_v39  ;;  %v5186_v59 = vld [vmem:[#allocation10 + $0x298] sm:$0xff] }
 0x4ed   :  { %8718 = vmatpush1.bf16.msra.mxu0 %v10248_v60  ;;  %v8379_v43 = vpop.f32.mrf.mxu1  ;;  %8672 = vmatprep.subr.bf16.mxu1 %v10647_v0  ;;  %v5202_v60 = vld [vmem:[#allocation10 + $0x318] sm:$0xff]  ;;  %v10727_v50 = vcombine.high %v5609_v44, %v5613_v13  ;;  %v5601_v40 = vld [vmem:[#allocation10 + $0xf90] sm:$0xff] }
 0x4ee   :  { %8719 = vmatprep.subr.bf16.mxu0 %v10241_v45  ;;  %v5206_v0 = vld [vmem:[#allocation10 + $0x338] sm:$0xff]  ;;  %v10606_v45 = vcombine.low %v5489_v16, %v5493_v33  ;;  %v5605_v22 = vld [vmem:[#allocation10 + $0xfb0] sm:$0xff] }
 0x4ef   :  { %v10321_v8 = vcombine.high %v5202_v60, %v5206_v0  ;;  %v5198_v43 = vld [vmem:[#allocation10 + $0x2f8] sm:$0xff]  ;;  %v5597_v9 = vld [vmem:[#allocation10 + $0xf70] sm:$0xff] }
 0x4f0   :  { %8673 = vmatpush1.bf16.msra.mxu1 %v10646_v46  ;;  %v5194_v46 = vld [vmem:[#allocation10 + $0x2d8] sm:$0xff]  ;;  %v5569_v33 = vld [vmem:[#allocation10 + $0xe90] sm:$0xff] }
 0x4f1   :  { %8720 = vmatpush1.bf16.msra.mxu0 %v10240_v47  ;;  %8674 = vmatprep.subr.bf16.mxu1 %v10639_v27  ;;  %v10726_v47 = vcombine.low %v5609_v44, %v5613_v13  ;;  %v10320_v27 = vcombine.low %v5202_v60, %v5206_v0  ;;  %v10313_v51 = vcombine.high %v5194_v46, %v5198_v43  ;;  %v5573_v4 = vld [vmem:[#allocation10 + $0xeb0] sm:$0xff]  ;;  %v5418_v39 = vld [vmem:[#allocation10 + $0x9d8] sm:$0xff] }
 0x4f2   :  { %8721 = vmatprep.subr.bf16.mxu0 %v10233_v48  ;;  %v10719_v48 = vcombine.high %v5601_v40, %v5605_v22  ;;  %v5561_v13 = vld [vmem:[#allocation10 + $0xe50] sm:$0xff]  ;;  %v5410_v0 = vld [vmem:[#allocation10 + $0x998] sm:$0xff] }
 0x4f3   :  { %v5565_v60 = vld [vmem:[#allocation10 + $0xe70] sm:$0xff] }
 0x4f4   :  { %8675 = vmatpush1.bf16.msra.mxu1 %v10638_v5  ;;  %v5190_v5 = vld [vmem:[#allocation10 + $0x2b8] sm:$0xff] }
 0x4f5   :  { %8722 = vmatpush1.bf16.msra.mxu0 %v10232_v19  ;;  %8676 = vmatprep.subr.bf16.mxu1 %v10631_v6  ;;  %v10718_v19 = vcombine.low %v5601_v40, %v5605_v22  ;;  %v10312_v6 = vcombine.low %v5194_v46, %v5198_v43  ;;  %v10305_v10 = vcombine.high %v5186_v59, %v5190_v5  ;;  %v5553_v22 = vld [vmem:[#allocation10 + $0xe10] sm:$0xff]  ;;  %v5402_v43 = vld [vmem:[#allocation10 + $0x958] sm:$0xff] }
 0x4f6   :  { %8723 = vmatprep.subr.bf16.mxu0 %v10225_v28  ;;  %v10711_v28 = vcombine.high %v5593_v56, %v5597_v9  ;;  %v5557_v46 = vld [vmem:[#allocation10 + $0xe30] sm:$0xff] }
 0x4f8   :  { %8677 = vmatpush1.bf16.msra.mxu1 %v10630_v18  ;;  %v5182_v18 = vld [vmem:[#allocation10 + $0x278] sm:$0xff] }
 0x4f9   :  { %8724 = vmatpush1.bf16.msra.mxu0 %v10224_v20  ;;  %8678 = vmatprep.subr.bf16.mxu1 %v10623_v52  ;;  %v10710_v20 = vcombine.low %v5593_v56, %v5597_v9  ;;  %v10304_v52 = vcombine.low %v5186_v59, %v5190_v5  ;;  %v10297_v23 = vcombine.high %v5178_v11, %v5182_v18  ;;  %v5290_v5 = vld [vmem:[#allocation10 + $0x5d8] sm:$0xff] }
 0x4fa   :  { %8725 = vmatprep.subr.bf16.mxu0 %v10345_v21  ;;  %v10703_v21 = vcombine.high %v5585_v15, %v5589_v17  ;;  %v10671_v56 = vcombine.high %v5553_v22, %v5557_v46 }
 0x4fc   :  { %8679 = vmatpush1.bf16.msra.mxu1 %v10622_v29  ;;  %v5174_v29 = vld [vmem:[#allocation10 + $0x238] sm:$0xff] }
 0x4fd   :  { %8726 = vmatpush2.bf16.msra.mxu0 %v10344_v49  ;;  %8680 = vmatprep.subr.bf16.mxu1 %v10615_v24  ;;  %v10702_v49 = vcombine.low %v5585_v15, %v5589_v17  ;;  %v10296_v24 = vcombine.low %v5178_v11, %v5182_v18  ;;  %v10289_v16 = vcombine.high %v5170_v55, %v5174_v29  ;;  %v11574_v11 = vld [vmem:[#allocation12] sm:$0xff] }
 0x4fe   :  { %8727 = vmatprep.subr.bf16.mxu0 %v10337_v30  ;;  %v10695_v30 = vcombine.high %v5577_v42, %v5581_v12  ;;  %v10670_v15 = vcombine.low %v5553_v22, %v5557_v46 }
 0x500   :  { %8681 = vmatpush1.bf16.msra.mxu1 %v10614_v31  ;;  %v5422_v31 = vld [vmem:[#allocation10 + $0x9f8] sm:$0xff] }
 0x501   :  { %8728 = vmatpush2.bf16.msra.mxu0 %v10336_v41  ;;  %8682 = vmatprep.subr.bf16.mxu1 %v10607_v32  ;;  %v10694_v41 = vcombine.low %v5577_v42, %v5581_v12  ;;  %v10288_v32 = vcombine.low %v5170_v55, %v5174_v29  ;;  %v10537_v44 = vcombine.high %v5418_v39, %v5422_v31  ;;  %v5390_v42 = vld [vmem:[#allocation10 + $0x8f8] sm:$0xff] }
 0x502   :  { %8729 = vmatprep.subr.bf16.mxu0 %v10329_v14  ;;  %v10687_v14 = vcombine.high %v5569_v33, %v5573_v4  ;;  %v5632_v12 = vrot.slane %v11574_v11, %v11331_v36 }
 0x504   :  { %8683 = vmatpush1.bf16.msra.mxu1 %v10606_v45  ;;  %v5414_v45 = vld [vmem:[#allocation10 + $0x9b8] sm:$0xff] }
 0x505   :  { %8730 = vmatpush2.bf16.msra.mxu0 %v10328_v3  ;;  %8684 = vmatprep.subr.bf16.mxu1 %v10727_v50  ;;  %v10686_v3 = vcombine.low %v5569_v33, %v5573_v4  ;;  %v10536_v50 = vcombine.low %v5418_v39, %v5422_v31  ;;  %v10529_v40 = vcombine.high %v5410_v0, %v5414_v45  ;;  %v5378_v4 = vld [vmem:[#allocation10 + $0x898] sm:$0xff] }
 0x506   :  { %8731 = vmatprep.subr.bf16.mxu0 %v10321_v8  ;;  %v10679_v8 = vcombine.high %v5561_v13, %v5565_v60  ;;  %v5382_v39 = vld [vmem:[#allocation10 + $0x8b8] sm:$0xff]  ;;  %v8418_v31 = vadd.f32 %v11560_v25, %v5632_v12 }
 0x507   :  { %v5370_v25 = vld [vmem:[#allocation10 + $0x858] sm:$0xff]  ;;  %v10496_v22 = vcombine.low %v5378_v4, %v5382_v39 }
 0x508   :  { %8685 = vmatpush2.bf16.msra.mxu1 %v10726_v47  ;;  %v5406_v47 = vld [vmem:[#allocation10 + $0x978] sm:$0xff] }
 0x509   :  { %8732 = vmatpush2.bf16.msra.mxu0 %v10320_v27  ;;  %8686 = vmatprep.subr.bf16.mxu1 %v10719_v48  ;;  %v10678_v48 = vcombine.low %v5561_v13, %v5565_v60  ;;  %v10521_v59 = vcombine.high %v5402_v43, %v5406_v47  ;;  %v10497_v13 = vcombine.high %v5378_v4, %v5382_v39  ;;  %v5266_v60 = vld [vmem:[#allocation10 + $0x518] sm:$0xff] }
 0x50a   :  { %8733 = vmatprep.subr.bf16.mxu0 %v10313_v51  ;;  %v10528_v51 = vcombine.low %v5410_v0, %v5414_v45  ;;  %v5270_v0 = vld [vmem:[#allocation10 + $0x538] sm:$0xff] }
 0x50b   :  { %v10385_v46 = vcombine.high %v5266_v60, %v5270_v0  ;;  %v5354_v39 = vld [vmem:[#allocation10 + $0x7d8] sm:$0xff] }
 0x50c   :  { %8687 = vmatpush2.bf16.msra.mxu1 %v10718_v19  ;;  %v5294_v19 = vld [vmem:[#allocation10 + $0x5f8] sm:$0xff] }
 0x50d   :  { %8734 = vmatpush2.bf16.msra.mxu0 %v10312_v6  ;;  %8688 = vmatprep.subr.bf16.mxu1 %v10711_v28  ;;  %v5394_v6 = vld [vmem:[#allocation10 + $0x918] sm:$0xff]  ;;  %v10409_v17 = vcombine.high %v5290_v5, %v5294_v19  ;;  %v10408_v55 = vcombine.low %v5290_v5, %v5294_v19 }
 0x50e   :  { %8735 = vmatprep.subr.bf16.mxu0 %v10305_v10  ;;  %v5398_v28 = vld [vmem:[#allocation10 + $0x938] sm:$0xff] }
 0x50f   :  { %v10512_v29 = vcombine.low %v5394_v6, %v5398_v28  ;;  %v5250_v19 = vld [vmem:[#allocation10 + $0x498] sm:$0xff] }
 0x510   :  { %8689 = vmatpush2.bf16.msra.mxu1 %v10710_v20  ;;  %v10513_v20 = vcombine.high %v5394_v6, %v5398_v28  ;;  %v5254_v6 = vld [vmem:[#allocation10 + $0x4b8] sm:$0xff] }
 0x511   :  { %8736 = vmatpush2.bf16.msra.mxu0 %v10304_v52  ;;  %8690 = vmatprep.subr.bf16.mxu1 %v10703_v21  ;;  %v5282_v52 = vld [vmem:[#allocation10 + $0x598] sm:$0xff] }
 0x512   :  { %8737 = vmatprep.subr.bf16.mxu0 %v10297_v23  ;;  %v5286_v21 = vld [vmem:[#allocation10 + $0x5b8] sm:$0xff] }
 0x513   :  { %v5386_v23 = vld [vmem:[#allocation10 + $0x8d8] sm:$0xff] }
 0x514   :  { %8691 = vmatpush2.bf16.msra.mxu1 %v10702_v49  ;;  %v10401_v49 = vcombine.high %v5282_v52, %v5286_v21  ;;  %v5482_v28 = vld [vmem:[#allocation10 + $0xbd8] sm:$0xff] }
 0x515   :  { %8738 = vmatpush2.bf16.msra.mxu0 %v10296_v24  ;;  %8692 = vmatprep.subr.bf16.mxu1 %v10695_v30  ;;  %v5274_v30 = vld [vmem:[#allocation10 + $0x558] sm:$0xff] }
 0x516   :  { %8739 = vmatprep.subr.bf16.mxu0 %v10289_v16  ;;  %v5278_v16 = vld [vmem:[#allocation10 + $0x578] sm:$0xff] }
 0x518   :  { %8693 = vmatpush2.bf16.msra.mxu1 %v10694_v41  ;;  %v10400_v41 = vcombine.low %v5282_v52, %v5286_v21  ;;  %v5474_v52 = vld [vmem:[#allocation10 + $0xb98] sm:$0xff] }
 0x519   :  { %8740 = vmatpush2.bf16.msra.mxu0 %v10288_v32  ;;  %8694 = vmatprep.subr.bf16.mxu1 %v10687_v14  ;;  %v10393_v14 = vcombine.high %v5274_v30, %v5278_v16  ;;  %v5478_v21 = vld [vmem:[#allocation10 + $0xbb8] sm:$0xff] }
 0x51a   :  { %8791 = vmatprep.subr.bf16.mxu0 %v10537_v44 }
 0x51c   :  { %v11570_v27 = vpop.f32.mrf.mxu0  ;;  %8695 = vmatpush2.bf16.msra.mxu1 %v10686_v3  ;;  %8742 = vmatmul.mubr.bf16.vlgmr.msra.gmra.mxu0 %v11481_v34  ;;  %v10520_v34 = vcombine.low %v5402_v43, %v5406_v47  ;;  %v5258_v47 = vld [vmem:[#allocation10 + $0x4d8] sm:$0xff] }
 0x51d   :  { %8792 = vmatpush1.bf16.msra.mxu0 %v10536_v50  ;;  %8823 = vmatprep.mubr.bf16.mxu0 %v11492_v7  ;;  %v5628_v7 = vrot.slane %v11574_v11, %v11325_v35  ;;  %v10505_v35 = vcombine.high %v5386_v23, %v5390_v42  ;;  %v5374_v50 = vld [vmem:[#allocation10 + $0x878] sm:$0xff] }
 0x51e   :  { %v8499_v9 = vpop.f32.mrf.mxu0  ;;  %8696 = vmatprep.subr.bf16.mxu1 %v10679_v8  ;;  %8793 = vmatprep.subr.bf16.mxu0 %v10529_v40  ;;  %v10392_v8 = vcombine.low %v5274_v30, %v5278_v16  ;;  %v10489_v43 = vcombine.high %v5370_v25, %v5374_v50  ;;  %v10592_v16 = vcombine.low %v5474_v52, %v5478_v21 }
 0x51f   :  { %v8416_v24 = vadd.f32 %v11556_v58, %v5628_v7  ;;  %v10504_v58 = vcombine.low %v5386_v23, %v5390_v42  ;;  %v10368_v23 = vcombine.low %v5250_v19, %v5254_v6 }
 0x520   :  { %v8501_v10 = vpop.f32.mrf.mxu0  ;;  %8697 = vmatpush2.bf16.msra.mxu1 %v10678_v48  ;;  %v5262_v48 = vld [vmem:[#allocation10 + $0x4f8] sm:$0xff] }
 0x521   :  { %8794 = vmatpush1.bf16.msra.mxu0 %v10528_v51  ;;  %8698 = vmatprep.subr.bf16.mxu1 %v10671_v56  ;;  %v5362_v51 = vld [vmem:[#allocation10 + $0x818] sm:$0xff]  ;;  %v10377_v5 = vcombine.high %v5258_v47, %v5262_v48 }
 0x522   :  { %v8502_v18 = vpop.f32.mrf.mxu0  ;;  %8795 = vmatprep.subr.bf16.mxu0 %v10521_v59  ;;  %v5366_v56 = vld [vmem:[#allocation10 + $0x838] sm:$0xff]  ;;  %v10488_v59 = vcombine.low %v5370_v25, %v5374_v50 }
 0x523   :  { %v5486_v10 = vld [vmem:[#allocation10 + $0xbf8] sm:$0xff] }
 0x524   :  { %8699 = vmatpush2.bf16.msra.mxu1 %v10670_v15  ;;  %v10376_v15 = vcombine.low %v5258_v47, %v5262_v48  ;;  %v10601_v7 = vcombine.high %v5482_v28, %v5486_v10  ;;  %v5242_v18 = vld [vmem:[#allocation10 + $0x458] sm:$0xff]  ;;  %v10600_v42 = vcombine.low %v5482_v28, %v5486_v10 }
 0x525   :  { %8796 = vmatpush1.bf16.msra.mxu0 %v10520_v34  ;;  %8750 = vmatprep.subr.bf16.mxu1 %v10409_v17  ;;  %v10480_v34 = vcombine.low %v5362_v51, %v5366_v56  ;;  %v10369_v17 = vcombine.high %v5250_v19, %v5254_v6  ;;  %v5446_v47 = vld [vmem:[#allocation10 + $0xab8] sm:$0xff] }
 0x526   :  { %8797 = vmatprep.subr.bf16.mxu0 %v10513_v20  ;;  %v5246_v20 = vld [vmem:[#allocation10 + $0x478] sm:$0xff] }
 0x527   :  { %v8456_v33 = vpop.f32.mrf.mxu1  ;;  %8701 = vmatmul.mubr.bf16.vlgmr.msra.gmra.mxu1 %v11528_v2  ;;  %v10361_v12 = vcombine.high %v5242_v18, %v5246_v20  ;;  %v10360_v30 = vcombine.low %v5242_v18, %v5246_v20  ;;  %v5438_v19 = vld [vmem:[#allocation10 + $0xa78] sm:$0xff] }
 0x528   :  { %v8457_v36 = vadd.f32 %v8456_v33, %v8416_v24  ;;  %8751 = vmatpush1.bf16.msra.mxu1 %v10408_v55  ;;  %8782 = vmatprep.mubr.bf16.mxu1 %v11465_v53  ;;  %v10593_v55 = vcombine.high %v5474_v52, %v5478_v21  ;;  %v5466_v24 = vld [vmem:[#allocation10 + $0xb58] sm:$0xff] }
 0x529   :  { %v8458_v32 = vpop.f32.mrf.mxu1  ;;  %8798 = vmatpush1.bf16.msra.mxu0 %v10512_v29  ;;  %8752 = vmatprep.subr.bf16.mxu1 %v10401_v49  ;;  %v5234_v29 = vld [vmem:[#allocation10 + $0x418] sm:$0xff] }
 0x52a   :  { %v8459_v44 = vadd.f32 %v8458_v32, %v8418_v31  ;;  %8799 = vmatprep.subr.bf16.mxu0 %v10505_v35  ;;  %v11585_v45 = vadd.f32 %v11570_v27, %v8457_v36  ;;  %v10384_v27 = vcombine.low %v5266_v60, %v5270_v0  ;;  %v5238_v49 = vld [vmem:[#allocation10 + $0x438] sm:$0xff] }
 0x52b   :  { %v8460_v3 = vpop.f32.mrf.mxu1  ;;  %v5470_v35 = vld [vmem:[#allocation10 + $0xb78] sm:$0xff]  ;;  %v10353_v33 = vcombine.high %v5234_v29, %v5238_v49  ;;  %v10352_v32 = vcombine.low %v5234_v29, %v5238_v49 }
 0x52c   :  { %8753 = vmatpush1.bf16.msra.mxu1 %v10400_v41  ;;  %v11587_v53 = vadd.f32 %v8499_v9, %v8459_v44  ;;  %v10481_v9 = vcombine.high %v5362_v51, %v5366_v56  ;;  %v10585_v4 = vcombine.high %v5466_v24, %v5470_v35  ;;  %v5358_v31 = vld [vmem:[#allocation10 + $0x7f8] sm:$0xff] }
 0x52d   :  { %v8461_v40 = vpop.f32.mrf.mxu1  ;;  %8800 = vmatpush1.bf16.msra.mxu0 %v10504_v58  ;;  %8754 = vmatprep.subr.bf16.mxu1 %v10393_v14  ;;  %v5458_v36 = vld [vmem:[#allocation10 + $0xb18] sm:$0xff]  ;;  %v10584_v58 = vcombine.low %v5466_v24, %v5470_v35  ;;  %v10473_v14 = vcombine.high %v5354_v39, %v5358_v31  ;;  %v10472_v25 = vcombine.low %v5354_v39, %v5358_v31  ;;  %v10897_v24 = vld [vmem:[#allocation13 + $0x78] sm:$0xff]   ;;  %v8874_v35 = vmax.f32 %v11568_v38, 0.0 }
 0x52e   :  { %8801 = vmatprep.subr.bf16.mxu0 %v10497_v13  ;;  %v5462_v41 = vld [vmem:[#allocation10 + $0xb38] sm:$0xff] }
 0x52f   :  { %v10577_v44 = vcombine.high %v5458_v36, %v5462_v41  ;;  %v5346_v13 = vld [vmem:[#allocation10 + $0x798] sm:$0xff]  ;;  %v10576_v50 = vcombine.low %v5458_v36, %v5462_v41 }
 0x530   :  { %8755 = vmatpush1.bf16.msra.mxu1 %v10392_v8  ;;  %v5350_v60 = vld [vmem:[#allocation10 + $0x7b8] sm:$0xff] }
 0x531   :  { %8802 = vmatpush1.bf16.msra.mxu0 %v10496_v22  ;;  %8756 = vmatprep.subr.bf16.mxu1 %v10385_v46  ;;  %v5450_v0 = vld [vmem:[#allocation10 + $0xad8] sm:$0xff]  ;;  %v10465_v8 = vcombine.high %v5346_v13, %v5350_v60  ;;  %v10464_v48 = vcombine.low %v5346_v13, %v5350_v60  ;;  %v10901_v60 = vld [vmem:[#allocation13 + $0x68] sm:$0xff]  }
 0x532   :  { %8803 = vmatprep.subr.bf16.mxu0 %v10489_v43  ;;  %v5454_v3 = vld [vmem:[#allocation10 + $0xaf8] sm:$0xff] }
 0x533   :  { %v10569_v40 = vcombine.high %v5450_v0, %v5454_v3  ;;  %v5338_v22 = vld [vmem:[#allocation10 + $0x758] sm:$0xff]  ;;  %v10568_v51 = vcombine.low %v5450_v0, %v5454_v3 }
 0x534   :  { %8757 = vmatpush1.bf16.msra.mxu1 %v10384_v27  ;;  %v5342_v46 = vld [vmem:[#allocation10 + $0x778] sm:$0xff] }
 0x535   :  { %8804 = vmatpush1.bf16.msra.mxu0 %v10488_v59  ;;  %8758 = vmatprep.subr.bf16.mxu1 %v10377_v5  ;;  %v5442_v43 = vld [vmem:[#allocation10 + $0xa98] sm:$0xff]  ;;  %v10457_v56 = vcombine.high %v5338_v22, %v5342_v46  ;;  %v10456_v6 = vcombine.low %v5338_v22, %v5342_v46  ;;  %v10903_v22 = vld [vmem:[#allocation13 + $0x60] sm:$0xff]  }
 0x536   :  { %8805 = vmatprep.subr.bf16.mxu0 %v10481_v9  ;;  %v10561_v27 = vcombine.high %v5442_v43, %v5446_v47  ;;  %v5330_v59 = vld [vmem:[#allocation10 + $0x718] sm:$0xff]  ;;  %v10560_v28 = vcombine.low %v5442_v43, %v5446_v47 }
 0x537   :  { %v5334_v5 = vld [vmem:[#allocation10 + $0x738] sm:$0xff] }
 0x538   :  { %8759 = vmatpush1.bf16.msra.mxu1 %v10376_v15  ;;  %v5434_v9 = vld [vmem:[#allocation10 + $0xa58] sm:$0xff]  ;;  %v10449_v10 = vcombine.high %v5330_v59, %v5334_v5  ;;  %v10448_v20 = vcombine.low %v5330_v59, %v5334_v5 }
 0x539   :  { %8806 = vmatpush1.bf16.msra.mxu0 %v10480_v34  ;;  %8760 = vmatprep.subr.bf16.mxu1 %v10369_v17  ;;  %v10553_v15 = vcombine.high %v5434_v9, %v5438_v19  ;;  %v5322_v34 = vld [vmem:[#allocation10 + $0x6d8] sm:$0xff]  ;;  %v10552_v52 = vcombine.low %v5434_v9, %v5438_v19 }
 0x53a   :  { %8807 = vmatprep.subr.bf16.mxu0 %v10601_v7  ;;  %v5326_v17 = vld [vmem:[#allocation10 + $0x6f8] sm:$0xff] }
 0x53b   :  { %v5426_v7 = vld [vmem:[#allocation10 + $0xa18] sm:$0xff]  ;;  %v10441_v21 = vcombine.high %v5322_v34, %v5326_v17 }
 0x53c   :  { %8761 = vmatpush1.bf16.msra.mxu1 %v10368_v23  ;;  %v5430_v18 = vld [vmem:[#allocation10 + $0xa38] sm:$0xff] }
 0x53d   :  { %8808 = vmatpush2.bf16.msra.mxu0 %v10600_v42  ;;  %8762 = vmatprep.subr.bf16.mxu1 %v10361_v12  ;;  %v10545_v23 = vcombine.high %v5426_v7, %v5430_v18  ;;  %v5314_v42 = vld [vmem:[#allocation10 + $0x698] sm:$0xff]  ;;  %v10544_v29 = vcombine.low %v5426_v7, %v5430_v18 }
 0x53e   :  { %8809 = vmatprep.subr.bf16.mxu0 %v10593_v55  ;;  %v5318_v12 = vld [vmem:[#allocation10 + $0x6b8] sm:$0xff]  ;;  %v10440_v55 = vcombine.low %v5322_v34, %v5326_v17 }
 0x53f   :  { %v10433_v49 = vcombine.high %v5314_v42, %v5318_v12  ;;  %v10899_v31 = vld [vmem:[#allocation13 + $0x70] sm:$0xff]  }
 0x540   :  { %8763 = vmatpush1.bf16.msra.mxu1 %v10360_v30  ;;  %v5306_v30 = vld [vmem:[#allocation10 + $0x658] sm:$0xff] }
 0x541   :  { %8810 = vmatpush2.bf16.msra.mxu0 %v10592_v16  ;;  %8764 = vmatprep.subr.bf16.mxu1 %v10353_v33  ;;  %v5310_v16 = vld [vmem:[#allocation10 + $0x678] sm:$0xff]  ;;  %v10432_v33 = vcombine.low %v5314_v42, %v5318_v12  ;;  %v10910_v42 = vld [vmem:[#allocation13 + $0x8] sm:$0xff]  }
 0x542   :  { %8811 = vmatprep.subr.bf16.mxu0 %v10585_v4  ;;  %v10898_v4 = vld [vmem:[#allocation13 + $0x38] sm:$0xff]   ;;  %v10425_v39 = vcombine.high %v5306_v30, %v5310_v16  ;;  %v5298_v36 = vld [vmem:[#allocation10 + $0x618] sm:$0xff] }
 0x543   :  { %v5302_v41 = vld [vmem:[#allocation10 + $0x638] sm:$0xff] }
 0x544   :  { %8765 = vmatpush1.bf16.msra.mxu1 %v10352_v32  ;;  %v8882_v32 = vpack.c.bf16 %v8874_v35, %v8874_v35  ;;  %v10900_v38 = vld [vmem:[#allocation13 + $0x30] sm:$0xff]   ;;  %v10912_v35 = vld [vmem:[#allocation13] sm:$0xff]  }
 0x545   :  { %8812 = vmatpush2.bf16.msra.mxu0 %v10584_v58  ;;  %8766 = vmatprep.subr.bf16.mxu1 %v10473_v14  ;;  %v10424_v14 = vcombine.low %v5306_v30, %v5310_v16  ;;  %v5546_v0 = vld [vmem:[#allocation10 + $0xdd8] sm:$0xff]  ;;  %v8873_v16 = vmax.f32 %v11564_v62, 0.0 }
 0x546   :  { %8813 = vmatprep.subr.bf16.mxu0 %v10577_v44  ;;  %v10417_v44 = vcombine.high %v5298_v36, %v5302_v41  ;;  %v5550_v3 = vld [vmem:[#allocation10 + $0xdf8] sm:$0xff] }
 0x547   :  { %v5538_v46 = vld [vmem:[#allocation10 + $0xd98] sm:$0xff]  ;;  %v10664_v47 = vcombine.low %v5546_v0, %v5550_v3 }
 0x548   :  { %8767 = vmatpush2.bf16.msra.mxu1 %v10472_v25  ;;  %v5542_v43 = vld [vmem:[#allocation10 + $0xdb8] sm:$0xff] }
 0x549   :  { %8814 = vmatpush2.bf16.msra.mxu0 %v10576_v50  ;;  %8768 = vmatprep.subr.bf16.mxu1 %v10465_v8  ;;  %v10416_v50 = vcombine.low %v5298_v36, %v5302_v41  ;;  %v10902_v8 = vld [vmem:[#allocation13 + $0x28] sm:$0xff]   ;;  %v5534_v59 = vld [vmem:[#allocation10 + $0xd78] sm:$0xff]  ;;  %v10656_v19 = vcombine.low %v5538_v46, %v5542_v43  ;;  %v10930_v41 = vld [vmem:[#allocation13 + $0x138] sm:$0xff]  }
 0x54a   :  { %8815 = vmatprep.subr.bf16.mxu0 %v10569_v40  ;;  %v10665_v40 = vcombine.high %v5546_v0, %v5550_v3  ;;  %v5522_v34 = vld [vmem:[#allocation10 + $0xd18] sm:$0xff] }
 0x54b   :  { %v5526_v17 = vld [vmem:[#allocation10 + $0xd38] sm:$0xff] }
 0x54c   :  { %8769 = vmatpush2.bf16.msra.mxu1 %v10464_v48  ;;  %v10904_v48 = vld [vmem:[#allocation13 + $0x20] sm:$0xff]   ;;  %v10932_v0 = vld [vmem:[#allocation13 + $0x130] sm:$0xff]  }
 0x54d   :  { %8816 = vmatpush2.bf16.msra.mxu0 %v10568_v51  ;;  %8770 = vmatprep.subr.bf16.mxu1 %v10457_v56  ;;  %v10657_v51 = vcombine.high %v5538_v46, %v5542_v43  ;;  %v10905_v56 = vld [vmem:[#allocation13 + $0x58] sm:$0xff]   ;;  %v5610_v3 = vld [vmem:[#allocation10 + $0xfd8] sm:$0xff]  ;;  %v10935_v43 = vld [vmem:[#allocation13 + $0x160] sm:$0xff]  }
 0x54e   :  { %8817 = vmatprep.subr.bf16.mxu0 %v10561_v27  ;;  %v5530_v27 = vld [vmem:[#allocation10 + $0xd58] sm:$0xff] }
 0x54f   :  { %v5606_v46 = vld [vmem:[#allocation10 + $0xfb8] sm:$0xff] }
 0x550   :  { %8771 = vmatpush2.bf16.msra.mxu1 %v10456_v6 }
 0x551   :  { %8818 = vmatpush2.bf16.msra.mxu0 %v10560_v28  ;;  %8772 = vmatprep.subr.bf16.mxu1 %v10449_v10  ;;  %v10906_v28 = vld [vmem:[#allocation13 + $0x18] sm:$0xff]   ;;  %v10649_v10 = vcombine.high %v5530_v27, %v5534_v59 }
 0x552   :  { %8819 = vmatprep.subr.bf16.mxu0 %v10553_v15  ;;  %v10907_v15 = vld [vmem:[#allocation13 + $0x50] sm:$0xff]  }
 0x554   :  { %8773 = vmatpush2.bf16.msra.mxu1 %v10448_v20  ;;  %v10641_v20 = vcombine.high %v5522_v34, %v5526_v17 }
 0x555   :  { %8820 = vmatpush2.bf16.msra.mxu0 %v10552_v52  ;;  %8774 = vmatprep.subr.bf16.mxu1 %v10441_v21  ;;  %v5514_v52 = vld [vmem:[#allocation10 + $0xcd8] sm:$0xff] }
 0x556   :  { %8821 = vmatprep.subr.bf16.mxu0 %v10545_v23  ;;  %v5518_v21 = vld [vmem:[#allocation10 + $0xcf8] sm:$0xff]  ;;  %v10640_v23 = vcombine.low %v5522_v34, %v5526_v17 }
 0x557   :  { %v10633_v12 = vcombine.high %v5514_v52, %v5518_v21  ;;  %v10939_v34 = vld [vmem:[#allocation13 + $0x150] sm:$0xff]  }
 0x558   :  { %8775 = vmatpush2.bf16.msra.mxu1 %v10440_v55  ;;  %v10911_v55 = vld [vmem:[#allocation13 + $0x40] sm:$0xff]  }
 0x559   :  { %8822 = vmatpush2.bf16.msra.mxu0 %v10544_v29  ;;  %8776 = vmatprep.subr.bf16.mxu1 %v10433_v49  ;;  %v5506_v29 = vld [vmem:[#allocation10 + $0xc98] sm:$0xff] }
 0x55a   :  { %10795 = vmatprep.subr.bf16.mxu0 %v10897_v24  ;;  %v5510_v49 = vld [vmem:[#allocation10 + $0xcb8] sm:$0xff]  ;;  %v10632_v24 = vcombine.low %v5514_v52, %v5518_v21  ;;  %v10942_v21 = vld [vmem:[#allocation13 + $0x108] sm:$0xff]  }
 0x55b   :  { %v10625_v30 = vcombine.high %v5506_v29, %v5510_v49 }
 0x55c   :  { %v11590_v58 = vpop.f32.mrf.mxu0  ;;  %8777 = vmatpush2.bf16.msra.mxu1 %v10432_v33  ;;  %8824 = vmatmul.mubr.bf16.vlgmr.msra.gmra.mxu0 %v11506_v37  ;;  %v5498_v33 = vld [vmem:[#allocation10 + $0xc58] sm:$0xff] }
 0x55d   :  { %10796 = vmatpush3.bf16.msra.mxu0 %v10898_v4  ;;  %9440 = vmatprep.mubr.bf16.mxu0 %v8882_v32  ;;  %v5502_v4 = vld [vmem:[#allocation10 + $0xc78] sm:$0xff]  ;;  %v8881_v32 = vpack.c.bf16 %v8873_v16, %v8873_v16 }
 0x55e   :  { %v11593_v13 = vpop.f32.mrf.mxu0  ;;  %8778 = vmatprep.subr.bf16.mxu1 %v10425_v39  ;;  %10797 = vmatprep.subr.bf16.mxu0 %v10899_v31  ;;  %v10929_v39 = vld [vmem:[#allocation13 + $0x178] sm:$0xff]   ;;  %v10624_v31 = vcombine.low %v5506_v29, %v5510_v49  ;;  %v10617_v36 = vcombine.high %v5498_v33, %v5502_v4  ;;  %v10944_v49 = vld [vmem:[#allocation13 + $0x100] sm:$0xff]  }
 0x560   :  { %v8583_v25 = vpop.f32.mrf.mxu0  ;;  %8779 = vmatpush2.bf16.msra.mxu1 %v10424_v14  ;;  %v5490_v14 = vld [vmem:[#allocation10 + $0xc18] sm:$0xff] }
 0x561   :  { %10798 = vmatpush3.bf16.msra.mxu0 %v10900_v38  ;;  %8780 = vmatprep.subr.bf16.mxu1 %v10417_v44  ;;  %v5494_v38 = vld [vmem:[#allocation10 + $0xc38] sm:$0xff] }
 0x562   :  { %v8584_v37 = vpop.f32.mrf.mxu0  ;;  %10799 = vmatprep.subr.bf16.mxu0 %v10901_v60  ;;  %v10931_v44 = vld [vmem:[#allocation13 + $0x170] sm:$0xff]   ;;  %v10616_v60 = vcombine.low %v5498_v33, %v5502_v4  ;;  %v10609_v62 = vcombine.high %v5490_v14, %v5494_v38 }
 0x563   :  { %v5614_v25 = vld [vmem:[#allocation10 + $0xff8] sm:$0xff]  ;;  %v10934_v37 = vld [vmem:[#allocation13 + $0x128] sm:$0xff]  }
 0x564   :  { %8781 = vmatpush2.bf16.msra.mxu1 %v10416_v50  ;;  %v10933_v50 = vld [vmem:[#allocation13 + $0x168] sm:$0xff]   ;;  %v5554_v33 = vld [vmem:[#allocation10 + $0xe18] sm:$0xff] }
 0x565   :  { %10800 = vmatpush3.bf16.msra.mxu0 %v10902_v8  ;;  %8832 = vmatprep.subr.bf16.mxu1 %v10665_v40  ;;  %v10608_v8 = vcombine.low %v5490_v14, %v5494_v38  ;;  %v10729_v40 = vcombine.high %v5610_v3, %v5614_v25  ;;  %v5558_v4 = vld [vmem:[#allocation10 + $0xe38] sm:$0xff] }
 0x566   :  { %10801 = vmatprep.subr.bf16.mxu0 %v10903_v22  ;;  %v5602_v22 = vld [vmem:[#allocation10 + $0xf98] sm:$0xff]  ;;  %v10672_v38 = vcombine.low %v5554_v33, %v5558_v4 }
 0x567   :  { %v8538_v5 = vpop.f32.mrf.mxu1  ;;  %8783 = vmatmul.mubr.bf16.vlgmr.msra.gmra.mxu1 %v11483_v26  ;;  %v10648_v26 = vcombine.low %v5530_v27, %v5534_v59  ;;  %v5598_v27 = vld [vmem:[#allocation10 + $0xf78] sm:$0xff]  ;;  %v10937_v59 = vld [vmem:[#allocation13 + $0x158] sm:$0xff]  }
 0x568   :  { %v11597_v9 = vadd.f32 %v8538_v5, %v11585_v45  ;;  %8833 = vmatpush1.bf16.msra.mxu1 %v10664_v47  ;;  %8864 = vmatprep.mubr.bf16.mxu1 %v11526_v1  ;;  %v10908_v45 = vld [vmem:[#allocation13 + $0x10] sm:$0xff]   ;;  %v10909_v1 = vld [vmem:[#allocation13 + $0x48] sm:$0xff]   ;;  %v10728_v47 = vcombine.low %v5610_v3, %v5614_v25  ;;  %v10720_v5 = vcombine.low %v5602_v22, %v5606_v46  ;;  %v10914_v25 = vld [vmem:[#allocation13 + $0xb8] sm:$0xff]  }
 0x569   :  { %v11600_v6 = vpop.f32.mrf.mxu1  ;;  %10802 = vmatpush3.bf16.msra.mxu0 %v10904_v48  ;;  %8834 = vmatprep.subr.bf16.mxu1 %v10657_v51  ;;  %v10721_v48 = vcombine.high %v5602_v22, %v5606_v46  ;;  %v10936_v51 = vld [vmem:[#allocation13 + $0x120] sm:$0xff]   ;;  %v5640_v3 = vrot.slane %v11574_v11, %v11366_v61  ;;  %v10917_v46 = vld [vmem:[#allocation13 + $0xe8] sm:$0xff]  }
 0x56a   :  { %10803 = vmatprep.subr.bf16.mxu0 %v10905_v56  ;;  %v5594_v56 = vld [vmem:[#allocation10 + $0xf58] sm:$0xff] }
 0x56b   :  { %v8542_v7 = vpop.f32.mrf.mxu1  ;;  %v10712_v17 = vcombine.low %v5594_v56, %v5598_v27 }
 0x56c   :  { %8835 = vmatpush1.bf16.msra.mxu1 %v10656_v19  ;;  %v10713_v19 = vcombine.high %v5594_v56, %v5598_v27  ;;  %v10919_v56 = vld [vmem:[#allocation13 + $0xe0] sm:$0xff]   ;;  %v10922_v27 = vld [vmem:[#allocation13 + $0x98] sm:$0xff]  }
 0x56d   :  { %v8543_v18 = vpop.f32.mrf.mxu1  ;;  %10804 = vmatpush3.bf16.msra.mxu0 %v10906_v28  ;;  %8836 = vmatprep.subr.bf16.mxu1 %v10649_v10  ;;  %v10938_v28 = vld [vmem:[#allocation13 + $0x118] sm:$0xff]   ;;  %v5586_v10 = vld [vmem:[#allocation10 + $0xf18] sm:$0xff] }
 0x56e   :  { %10805 = vmatprep.subr.bf16.mxu0 %v10907_v15  ;;  %v5590_v15 = vld [vmem:[#allocation10 + $0xf38] sm:$0xff] }
 0x56f   :  { %v10705_v7 = vcombine.high %v5586_v10, %v5590_v15  ;;  %v5578_v18 = vld [vmem:[#allocation10 + $0xed8] sm:$0xff] }
 0x570   :  { %8837 = vmatpush1.bf16.msra.mxu1 %v10648_v26  ;;  %v10940_v26 = vld [vmem:[#allocation13 + $0x110] sm:$0xff]  }
 0x571   :  { %10806 = vmatpush3.bf16.msra.mxu0 %v10908_v45  ;;  %8838 = vmatprep.subr.bf16.mxu1 %v10641_v20  ;;  %v5582_v45 = vld [vmem:[#allocation10 + $0xef8] sm:$0xff]  ;;  %v10941_v20 = vld [vmem:[#allocation13 + $0x148] sm:$0xff]  }
 0x572   :  { %10807 = vmatprep.subr.bf16.mxu0 %v10909_v1  ;;  %v10704_v1 = vcombine.low %v5586_v10, %v5590_v15  ;;  %v10697_v52 = vcombine.high %v5578_v18, %v5582_v45  ;;  %v10927_v10 = vld [vmem:[#allocation13 + $0xc0] sm:$0xff]  }
 0x573   :  { %v10928_v15 = vld [vmem:[#allocation13 + $0x80] sm:$0xff]  }
 0x574   :  { %8839 = vmatpush1.bf16.msra.mxu1 %v10640_v23  ;;  %v5570_v23 = vld [vmem:[#allocation10 + $0xe98] sm:$0xff] }
 0x575   :  { %10808 = vmatpush3.bf16.msra.mxu0 %v10910_v42  ;;  %8840 = vmatprep.subr.bf16.mxu1 %v10633_v12  ;;  %v5574_v42 = vld [vmem:[#allocation10 + $0xeb8] sm:$0xff]  ;;  %v10943_v12 = vld [vmem:[#allocation13 + $0x140] sm:$0xff]  }
 0x576   :  { %10809 = vmatprep.subr.bf16.mxu0 %v10911_v55  ;;  %v10696_v55 = vcombine.low %v5578_v18, %v5582_v45  ;;  %v10689_v29 = vcombine.high %v5570_v23, %v5574_v42  ;;  %v10947_v18 = vld [vmem:[#allocation13 + $0x1f0] sm:$0xff]  }
 0x577   :  { %v10948_v45 = vld [vmem:[#allocation13 + $0x1b0] sm:$0xff]  }
 0x578   :  { %8841 = vmatpush1.bf16.msra.mxu1 %v10632_v24  ;;  %v5562_v24 = vld [vmem:[#allocation10 + $0xe58] sm:$0xff] }
 0x579   :  { %10810 = vmatpush3.bf16.msra.mxu0 %v10912_v35  ;;  %8842 = vmatprep.subr.bf16.mxu1 %v10625_v30  ;;  %v5566_v35 = vld [vmem:[#allocation10 + $0xe78] sm:$0xff]  ;;  %v10688_v30 = vcombine.low %v5570_v23, %v5574_v42  ;;  %v10954_v23 = vld [vmem:[#allocation13 + $0x198] sm:$0xff]  }
 0x57a   :  { %10839 = vmatprep.subr.bf16.mxu0 %v10929_v39  ;;  %v10681_v16 = vcombine.high %v5562_v24, %v5566_v35  ;;  %v10955_v42 = vld [vmem:[#allocation13 + $0x1d0] sm:$0xff]  }
 0x57c   :  { %8843 = vmatpush1.bf16.msra.mxu1 %v10624_v31  ;;  %9441 = vmatmul.mubr.bf16.vlgmr.msra.gmra.mxu0 %v8881_v32  ;;  %v10680_v31 = vcombine.low %v5562_v24, %v5566_v35 }
 0x57d   :  { %8844 = vmatprep.subr.bf16.mxu1 %v10617_v36  ;;  %10840 = vmatpush3.bf16.msra.mxu0 %v10930_v41  ;;  %v10673_v36 = vcombine.high %v5554_v33, %v5558_v4  ;;  %v8541_v41 = vadd.f32 %v11600_v6, %v11587_v53  ;;  %v10958_v4 = vld [vmem:[#allocation13 + $0x188] sm:$0xff]  }
 0x57e   :  { %10841 = vmatprep.subr.bf16.mxu0 %v10931_v44  ;;  %v10913_v44 = vld [vmem:[#allocation13 + $0xf8] sm:$0xff]  }
 0x580   :  { %8845 = vmatpush1.bf16.msra.mxu1 %v10616_v60  ;;  %v5636_v60 = vrot.slane %v11574_v11, %v11360_v54  ;;  %v10916_v54 = vld [vmem:[#allocation13 + $0xb0] sm:$0xff]  }
 0x581   :  { %8846 = vmatprep.subr.bf16.mxu1 %v10609_v62  ;;  %10842 = vmatpush3.bf16.msra.mxu0 %v10932_v0  ;;  %v8876_v62 = vmax.f32 %v8541_v41, 0.0 }
 0x582   :  { %10843 = vmatprep.subr.bf16.mxu0 %v10933_v50  ;;  %v10915_v50 = vld [vmem:[#allocation13 + $0xf0] sm:$0xff]   ;;  %v8580_v53 = vadd.f32 %v11590_v58, %v5636_v60 }
 0x583   :  { %v8884_v6 = vpack.c.bf16 %v8876_v62, %v8876_v62 }
 0x584   :  { %8847 = vmatpush1.bf16.msra.mxu1 %v10608_v8 }
 0x585   :  { %8848 = vmatprep.subr.bf16.mxu1 %v10729_v40  ;;  %10844 = vmatpush3.bf16.msra.mxu0 %v10934_v37  ;;  %v8582_v40 = vadd.f32 %v11593_v13, %v5640_v3  ;;  %v10921_v13 = vld [vmem:[#allocation13 + $0xd8] sm:$0xff]  }
 0x586   :  { %10845 = vmatprep.subr.bf16.mxu0 %v10935_v43 }
 0x588   :  { %8849 = vmatpush2.bf16.msra.mxu1 %v10728_v47 }
 0x589   :  { %8850 = vmatprep.subr.bf16.mxu1 %v10721_v48  ;;  %10846 = vmatpush3.bf16.msra.mxu0 %v10936_v51  ;;  %v10918_v48 = vld [vmem:[#allocation13 + $0xa8] sm:$0xff]  }
 0x58a   :  { %10847 = vmatprep.subr.bf16.mxu0 %v10937_v59  ;;  %v10923_v59 = vld [vmem:[#allocation13 + $0xd0] sm:$0xff]  }
 0x58c   :  { %8851 = vmatpush2.bf16.msra.mxu1 %v10720_v5  ;;  %v10924_v5 = vld [vmem:[#allocation13 + $0x90] sm:$0xff]  }
 0x58d   :  { %8852 = vmatprep.subr.bf16.mxu1 %v10713_v19  ;;  %10848 = vmatpush3.bf16.msra.mxu0 %v10938_v28  ;;  %v10925_v19 = vld [vmem:[#allocation13 + $0xc8] sm:$0xff]  }
 0x58e   :  { %10849 = vmatprep.subr.bf16.mxu0 %v10939_v34  ;;  %v10926_v28 = vld [vmem:[#allocation13 + $0x88] sm:$0xff]   ;;  %v8875_v34 = vmax.f32 %v11597_v9, 0.0  ;;  %v10953_v9 = vld [vmem:[#allocation13 + $0x1d8] sm:$0xff]  }
 0x590   :  { %8853 = vmatpush2.bf16.msra.mxu1 %v10712_v17  ;;  %v10945_v17 = vld [vmem:[#allocation13 + $0x1f8] sm:$0xff]  }
 0x591   :  { %8854 = vmatprep.subr.bf16.mxu1 %v10705_v7  ;;  %10850 = vmatpush3.bf16.msra.mxu0 %v10940_v26  ;;  %v10946_v7 = vld [vmem:[#allocation13 + $0x1b8] sm:$0xff]   ;;  %v8883_v26 = vpack.c.bf16 %v8875_v34, %v8875_v34 }
 0x592   :  { %10851 = vmatprep.subr.bf16.mxu0 %v10941_v20  ;;  %v10949_v20 = vld [vmem:[#allocation13 + $0x1e8] sm:$0xff]  }
 0x594   :  { %8855 = vmatpush2.bf16.msra.mxu1 %v10704_v1  ;;  %v10950_v1 = vld [vmem:[#allocation13 + $0x1a8] sm:$0xff]  }
 0x595   :  { %8856 = vmatprep.subr.bf16.mxu1 %v10697_v52  ;;  %10852 = vmatpush3.bf16.msra.mxu0 %v10942_v21  ;;  %v10951_v52 = vld [vmem:[#allocation13 + $0x1e0] sm:$0xff]  }
 0x596   :  { %10853 = vmatprep.subr.bf16.mxu0 %v10943_v12  ;;  %v10952_v21 = vld [vmem:[#allocation13 + $0x1a0] sm:$0xff]   ;;  %v10956_v12 = vld [vmem:[#allocation13 + $0x190] sm:$0xff]  }
 0x598   :  { %8857 = vmatpush2.bf16.msra.mxu1 %v10696_v55 }
 0x599   :  { %8858 = vmatprep.subr.bf16.mxu1 %v10689_v29  ;;  %10854 = vmatpush3.bf16.msra.mxu0 %v10944_v49 }
 0x59c   :  { %v8661_v39 = vpop.f32.mrf.mxu0  ;;  %8859 = vmatpush2.bf16.msra.mxu1 %v10688_v30 }
 0x59d   :  { %8860 = vmatprep.subr.bf16.mxu1 %v10681_v16  ;;  %v10957_v16 = vld [vmem:[#allocation13 + $0x1c8] sm:$0xff]  }
 0x59e   :  { %v8663_v32 = vpop.f32.mrf.mxu0 }
 0x5a0   :  { %v8665_v14 = vpop.f32.mrf.mxu0  ;;  %8861 = vmatpush2.bf16.msra.mxu1 %v10680_v31 }
 0x5a1   :  { %8862 = vmatprep.subr.bf16.mxu1 %v10673_v36 }
 0x5a2   :  { %v8666_v0 = vpop.f32.mrf.mxu0 }
 0x5a4   :  { %8863 = vmatpush2.bf16.msra.mxu1 %v10672_v38  ;;  %v10960_v38 = vld [vmem:[#allocation13 + $0x180] sm:$0xff]  }
 0x5a5   :  { %10817 = vmatprep.subr.bf16.mxu1 %v10913_v44 }
 0x5a7   :  { %v8620_v8 = vpop.f32.mrf.mxu1  ;;  %8865 = vmatmul.mubr.bf16.vlgmr.msra.gmra.mxu1 %v11528_v2  ;;  %v10920_v2 = vld [vmem:[#allocation13 + $0xa0] sm:$0xff]  }
 0x5a8   :  { %v8621_v37 = vadd.f32 %v8620_v8, %v8580_v53  ;;  %10818 = vmatpush3.bf16.msra.mxu1 %v10914_v25  ;;  %9480 = vmatprep.mubr.bf16.mxu1 %v8884_v6  ;;  %v5644_v25 = vrot.slane %v11574_v11, %v11363_v57  ;;  %v5648_v53 = vrot.slane %v11574_v11, %v11369_v63 }
 0x5a9   :  { %v8622_v22 = vpop.f32.mrf.mxu1  ;;  %10819 = vmatprep.subr.bf16.mxu1 %v10915_v50 }
 0x5aa   :  { %v8623_v61 = vadd.f32 %v8622_v22, %v8582_v40  ;;  %v8662_v43 = vadd.f32 %v8661_v39, %v8621_v37 }
 0x5ab   :  { %v8624_v47 = vpop.f32.mrf.mxu1 }
 0x5ac   :  { %10820 = vmatpush3.bf16.msra.mxu1 %v10916_v54  ;;  %v8664_v51 = vadd.f32 %v8663_v32, %v8623_v61  ;;  %v10959_v32 = vld [vmem:[#allocation13 + $0x1c0] sm:$0xff]  }
 0x5ad   :  { %v8625_v58 = vpop.f32.mrf.mxu1  ;;  %10821 = vmatprep.subr.bf16.mxu1 %v10917_v46 }
 0x5b0   :  { %10822 = vmatpush3.bf16.msra.mxu1 %v10918_v48 }
 0x5b1   :  { %10823 = vmatprep.subr.bf16.mxu1 %v10919_v56 }
 0x5b4   :  { %10824 = vmatpush3.bf16.msra.mxu1 %v10920_v2 }
 0x5b5   :  { %10825 = vmatprep.subr.bf16.mxu1 %v10921_v13 }
 0x5b8   :  { %10826 = vmatpush3.bf16.msra.mxu1 %v10922_v27 }
 0x5b9   :  { %10827 = vmatprep.subr.bf16.mxu1 %v10923_v59 }
 0x5bc   :  { %10828 = vmatpush3.bf16.msra.mxu1 %v10924_v5 }
 0x5bd   :  { %10829 = vmatprep.subr.bf16.mxu1 %v10925_v19 }
 0x5c0   :  { %10830 = vmatpush3.bf16.msra.mxu1 %v10926_v28 }
 0x5c1   :  { %10831 = vmatprep.subr.bf16.mxu1 %v10927_v10 }
 0x5c4   :  { %10832 = vmatpush3.bf16.msra.mxu1 %v10928_v15  ;;  %v10730_v15 = vld [vmem:[#allocation15] ss:$0 sm:$0xff] }
 0x5c5   :  { %10861 = vmatprep.subr.bf16.mxu1 %v10945_v17 }
 0x5c7   :  { %9481 = vmatmul.mubr.bf16.vlgmr.msra.gmra.mxu1 %v8883_v26 }
 0x5c8   :  { %10862 = vmatpush3.bf16.msra.mxu1 %v10946_v7 }
 0x5c9   :  { %10863 = vmatprep.subr.bf16.mxu1 %v10947_v18 }
 0x5cc   :  { %10864 = vmatpush3.bf16.msra.mxu1 %v10948_v45 }
 0x5cd   :  { %10865 = vmatprep.subr.bf16.mxu1 %v10949_v20 }
 0x5d0   :  { %10866 = vmatpush3.bf16.msra.mxu1 %v10950_v1 }
 0x5d1   :  { %10867 = vmatprep.subr.bf16.mxu1 %v10951_v52 }
 0x5d4   :  { %10868 = vmatpush3.bf16.msra.mxu1 %v10952_v21 }
 0x5d5   :  { %10869 = vmatprep.subr.bf16.mxu1 %v10953_v9 }
 0x5d8   :  { %10870 = vmatpush3.bf16.msra.mxu1 %v10954_v23 }
 0x5d9   :  { %10871 = vmatprep.subr.bf16.mxu1 %v10955_v42 }
 0x5dc   :  { %v8743_v55 = vpop.f32.mrf.mxu0  ;;  %10872 = vmatpush3.bf16.msra.mxu1 %v10956_v12 }
 0x5dd   :  { %10873 = vmatprep.subr.bf16.mxu1 %v10957_v16  ;;  %v8744_v6 = vadd.f32 %v8743_v55, %v5644_v25 }
 0x5de   :  { %v8745_v29 = vpop.f32.mrf.mxu0 }
 0x5df   :  { %v8746_v40 = vadd.f32 %v8745_v29, %v5648_v53 }
 0x5e0   :  { %v8747_v49 = vpop.f32.mrf.mxu0  ;;  %10874 = vmatpush3.bf16.msra.mxu1 %v10958_v4 }
 0x5e1   :  { %10875 = vmatprep.subr.bf16.mxu1 %v10959_v32 }
 0x5e2   :  { %v8748_v24 = vpop.f32.mrf.mxu0 }
 0x5e4   :  { %10876 = vmatpush3.bf16.msra.mxu1 %v10960_v38 }
 0x5e7   :  { %v8702_v35 = vpop.f32.mrf.mxu1 }
 0x5e8   :  { %v8703_v30 = vadd.f32 %v8702_v35, %v8662_v43 }
 0x5e9   :  { %v8704_v33 = vpop.f32.mrf.mxu1 }
 0x5ea   :  { %v8705_v39 = vadd.f32 %v8704_v33, %v8664_v51  ;;  %v8877_v31 = vmax.f32 %v8703_v30, 0.0 }
 0x5eb   :  { %v8706_v36 = vpop.f32.mrf.mxu1 }
 0x5ec   :  { %v8878_v41 = vmax.f32 %v8705_v39, 0.0  ;;  %v8885_v60 = vpack.c.bf16 %v8877_v31, %v8877_v31 }
 0x5ed   :  { %v8707_v14 = vpop.f32.mrf.mxu1 }
 0x5ee   :  { %v8886_v44 = vpack.c.bf16 %v8878_v41, %v8878_v41 }
 0x5f0   :  { %9520 = vmatprep.mubr.bf16.mxu0 %v8886_v44 }
 0x5f1   :  { %9521 = vmatmul.mubr.bf16.vlgmr.msra.gmra.mxu0 %v8885_v60 }
 0x61c   :  { %v8825_v62 = vpop.f32.mrf.mxu0 }
 0x61e   :  { %v8827_v0 = vpop.f32.mrf.mxu0 }
 0x620   :  { %v8829_v3 = vpop.f32.mrf.mxu0 }
 0x622   :  { %v8830_v50 = vpop.f32.mrf.mxu0 }
 0x627   :  { %v8784_v8 = vpop.f32.mrf.mxu1 }
 0x628   :  { %v8785_v37 = vadd.f32 %v8784_v8, %v8744_v6 }
 0x629   :  { %v8786_v54 = vpop.f32.mrf.mxu1 }
 0x62a   :  { %v8787_v22 = vadd.f32 %v8786_v54, %v8746_v40  ;;  %v8826_v46 = vadd.f32 %v8825_v62, %v8785_v37 }
 0x62b   :  { %v8788_v61 = vpop.f32.mrf.mxu1 }
 0x62c   :  { %v8828_v43 = vadd.f32 %v8827_v0, %v8787_v22 }
 0x62d   :  { %v8789_v47 = vpop.f32.mrf.mxu1 }
 0x63c   :  { %v10811_v48 = vpop.f32.mrf.mxu0 }
 0x63e   :  { %v10812_v51 = vpop.f32.mrf.mxu0 }
 0x63f   :  { %v10813_v58 = vadd.f32 %v10812_v51, %v10811_v48 }
 0x640   :  { %v10814_v56 = vpop.f32.mrf.mxu0 }
 0x641   :  { %v9443_v7 = vadd.f32 %v10813_v58, %v10730_v15 }
 0x642   :  { %v10815_v2 = vpop.f32.mrf.mxu0 }
 0x667   :  { %v8866_v57 = vpop.f32.mrf.mxu1 }
 0x668   :  { %v8867_v13 = vadd.f32 %v8866_v57, %v8826_v46 }
 0x669   :  { %v8868_v27 = vpop.f32.mrf.mxu1 }
 0x66a   :  { %v8869_v59 = vadd.f32 %v8868_v27, %v8828_v43  ;;  %v8879_v63 = vmax.f32 %v8867_v13, 0.0 }
 0x66b   :  { %v8870_v11 = vpop.f32.mrf.mxu1 }
 0x66c   :  { %v8880_v5 = vmax.f32 %v8869_v59, 0.0  ;;  %v8887_v10 = vpack.c.bf16 %v8879_v63, %v8879_v63 }
 0x66d   :  { %v8871_v19 = vpop.f32.mrf.mxu1 }
 0x66e   :  { %v8888_v28 = vpack.c.bf16 %v8880_v5, %v8880_v5 }
 0x670   :  { %9560 = vmatprep.mubr.bf16.mxu1 %v8888_v28 }
 0x671   :  { %9561 = vmatmul.mubr.bf16.vlgmr.msra.gmra.mxu1 %v8887_v10 }
 0x687   :  { %v10833_v34 = vpop.f32.mrf.mxu1 }
 0x689   :  { %v10834_v17 = vpop.f32.mrf.mxu1 }
 0x68a   :  { %v10835_v26 = vadd.f32 %v10834_v17, %v10833_v34 }
 0x68b   :  { %v10836_v18 = vpop.f32.mrf.mxu1 }
 0x68c   :  { %v9483_v45 = vadd.f32 %v10835_v26, %v9443_v7 }
 0x68d   :  { %v10837_v20 = vpop.f32.mrf.mxu1 }
 0x6b1   :  { %v10855_v1 = vpop.f32.mrf.mxu0 }
 0x6b3   :  { %v10856_v52 = vpop.f32.mrf.mxu0 }
 0x6b4   :  { %v10857_v21 = vadd.f32 %v10856_v52, %v10855_v1 }
 0x6b5   :  { %v10858_v9 = vpop.f32.mrf.mxu0 }
 0x6b6   :  { %v9523_v23 = vadd.f32 %v10857_v21, %v9483_v45 }
 0x6b7   :  { %v10859_v42 = vpop.f32.mrf.mxu0 }
 0x731   :  { %v10877_v12 = vpop.f32.mrf.mxu1 }
 0x733   :  { %v10878_v55 = vpop.f32.mrf.mxu1 }
 0x734   :  { %v10879_v29 = vadd.f32 %v10878_v55, %v10877_v12 }
 0x735   :  { %v10880_v49 = vpop.f32.mrf.mxu1 }
 0x736   :  { %v9563_v24 = vadd.f32 %v10879_v29, %v9523_v23 }
 0x737   :  { %v10881_v35 = vpop.f32.mrf.mxu1 }
 0x738   :  { %9568 = vst [vmem:[%s11631_s11] sm:$0xff] %v9563_v24 }
 0x739   :  { %9573 = vsyncpa [#allocation3], 1 }
 0x73a   :  { %9574 = vsyncpa [#allocation5], 1 }
 0x73b   :  { %9575 = vsyncpa [#allocation8], 1 }
 0x73c   :  { %9576 = vsyncpa [#allocation11], 1 }
 0x73d   :  { %9577 = vsyncpa [#allocation14], 1 }

</bundles_post_ra>
